<compile_context>
chip_gen: v7x
topology: tpu7x:2x2x1
jax: 0.10.0
libtpu: 0.0.40
codegen_flags: <defaults>
</compile_context>

<pallas_src>
import functools

import jax
import jax.numpy as jnp
from jax import lax
from jax.experimental import pallas as pl
from jax.experimental.pallas import tpu as pltpu


_VMEM_LIMIT = 32 * 1024 * 1024    # explicit scoped-VMEM budget (>= default on v5e/v6e/v7x)
_PATCH_BUDGET = 8 * 1024 * 1024   # cap on the per-step in-kernel im2col value
_BN_EPS = 1e-5
_LRELU_SLOPE = 0.2


def _round_up(x, m):
    return ((x + m - 1) // m) * m


# ----------------------------------------------------------------------------
# Optional single-buffering of grid-invariant operands (probed once).
# ----------------------------------------------------------------------------
_BUFFERED1_OK = None


def _probe_buffered1():
    """Check once whether pipeline_mode=pl.Buffered(1) compiles and runs."""
    global _BUFFERED1_OK
    if _BUFFERED1_OK is not None:
        return _BUFFERED1_OK
    try:
        def _k(a_ref, c_ref, o_ref):
            o_ref[...] = a_ref[...] + c_ref[...]

        x = jnp.zeros((8, 128), jnp.float32)
        out = pl.pallas_call(
            _k,
            out_shape=jax.ShapeDtypeStruct((8, 128), jnp.float32),
            grid=(2,),
            in_specs=[
                pl.BlockSpec((8, 128), lambda i: (0, 0)),
                pl.BlockSpec((8, 128), lambda i: (0, 0),
                             pipeline_mode=pl.Buffered(1)),
            ],
            out_specs=pl.BlockSpec((8, 128), lambda i: (0, 0)),
        )(x, x)
        jax.block_until_ready(out)
        _BUFFERED1_OK = True
    except Exception:
        _BUFFERED1_OK = False
    return _BUFFERED1_OK


def _resident_spec(shape):
    """BlockSpec for a grid-invariant operand; single-buffered when supported
    (default 2-deep pipelining only doubles its VMEM footprint)."""
    idx = lambda *_: (0,) * len(shape)
    if _probe_buffered1():
        return pl.BlockSpec(shape, idx, pipeline_mode=pl.Buffered(1))
    return pl.BlockSpec(shape, idx)


# ----------------------------------------------------------------------------
# Fused Conv2d(4,2,1) + BatchNorm2d(train) + LeakyReLU(0.2): one pallas_call.
# Grid = (phase, batch_tile).  Phase 0: in-kernel im2col + GEMM + stats into
# VMEM scratch.  Phase 1: BN folded to one FMA + LeakyReLU, bf16 store.
# ----------------------------------------------------------------------------
def _conv_bn_lrelu_kernel(x_ref, w_ref, g_ref, b_ref, o_ref,
                          acc_scr, sum_scr, sq_scr,
                          *, ho, wo, cin_pad, cpad, rows_tile, n_tiles, inv_m):
    p = pl.program_id(0)          # phase: 0 = conv + stats, 1 = BN + LeakyReLU
    i = pl.program_id(1)          # batch tile

    row_idx = slice(None) if n_tiles == 1 else pl.ds(i * rows_tile, rows_tile)

    @pl.when((p == 0) & (i == 0))
    def _init_stats():
        sum_scr[...] = jnp.zeros_like(sum_scr)
        sq_scr[...] = jnp.zeros_like(sq_scr)

    @pl.when(p == 0)
    def _conv_phase():
        # x: (tn, ho+1, 2, wo+1, 2*cin_pad) bf16 (spatially padded, parity-split)
        x = x_ref[...]
        slabs = []
        for kh in range(4):
            a, r = divmod(kh, 2)
            for kw in range(4):
                b, s = divmod(kw, 2)
                slabs.append(
                    x[:, a:a + ho, r, b:b + wo, s * cin_pad:(s + 1) * cin_pad])
        # in-VMEM im2col: (tn, ho, wo, 16*cin_pad) -> one MXU GEMM, f32 accumulate
        patches = jnp.concatenate(slabs, axis=-1)
        patches = patches.reshape(rows_tile, 16 * cin_pad)
        acc = jnp.dot(patches, w_ref[...], preferred_element_type=jnp.float32)
        acc_scr[row_idx, :] = acc

        # per-sublane partial channel sums (VALU adds that co-issue with MXU)
        rows8 = _round_up(rows_tile, 8)
        if rows8 != rows_tile:
            acc = jnp.pad(acc, ((0, rows8 - rows_tile), (0, 0)))
        a3 = acc.reshape(rows8 // 8, 8, cpad)
        sum_scr[...] += jnp.sum(a3, axis=0)
        sq_scr[...] += jnp.sum(a3 * a3, axis=0)

    @pl.when(p == 1)
    def _bn_phase():
        # finalize training-mode BatchNorm stats in-kernel (rsqrt -> EUP slot)
        s1 = jnp.sum(sum_scr[...], axis=0, keepdims=True)      # (1, cpad)
        s2 = jnp.sum(sq_scr[...], axis=0, keepdims=True)
        mean = s1 * inv_m
        var = jnp.maximum(s2 * inv_m - mean * mean, 0.0)
        scale = g_ref[...] * lax.rsqrt(var + _BN_EPS)
        shift = b_ref[...] - mean * scale
        z = acc_scr[row_idx, :]
        y = z * scale + shift
        y = jnp.where(y >= 0.0, y, _LRELU_SLOPE * y)
        o_ref[...] = y.astype(o_ref.dtype)


def _pick_batch_tile(n, ho, wo, cin_pad):
    """Largest divisor of n whose per-step im2col value fits the VMEM budget."""
    divisors = [t for t in range(n, 0, -1)
                if n % t == 0 and (t == n or (t * ho * wo) % 8 == 0)]
    for t in divisors:
        if t * ho * wo * 16 * cin_pad * 2 <= _PATCH_BUDGET:
            return t, n // t
    t = divisors[-1]
    return t, n // t


def _conv_bn_lrelu_layer(x_nhwc, layer):
    """x_nhwc (N, H, W, C) -> (N, H/2, W/2, Cpad) bf16."""
    n, h, w, c = x_nhwc.shape
    ho, wo = h // 2, w // 2
    w_mat, gamma, beta = layer["w_mat"], layer["gamma"], layer["beta"]
    cin_pad = w_mat.shape[0] // 16
    cpad = w_mat.shape[1]

    # Spatial zero-pad (PyTorch padding=1), channel pad to the weight's lane
    # width, then a FREE parity-split reshape so every conv tap is a contiguous
    # slice inside the kernel (no strided loads, no 16x im2col blowup in HBM).
    xp = jnp.pad(x_nhwc, ((0, 0), (1, 1), (1, 1), (0, cin_pad - c)))
    xp = xp.astype(jnp.bfloat16)
    xr = xp.reshape(n, ho + 1, 2, wo + 1, 2 * cin_pad)

    m = n * ho * wo
    tn, n_tiles = _pick_batch_tile(n, ho, wo, cin_pad)
    rows_tile = tn * ho * wo

    kernel = functools.partial(
        _conv_bn_lrelu_kernel,
        ho=ho, wo=wo, cin_pad=cin_pad, cpad=cpad,
        rows_tile=rows_tile, n_tiles=n_tiles, inv_m=1.0 / m)

    out = pl.pallas_call(
        kernel,
        out_shape=jax.ShapeDtypeStruct((m, cpad), jnp.bfloat16),
        grid=(2, n_tiles),    # (phase, batch tile)
        in_specs=[
            # fetched per tile in phase 0; index frozen in phase 1 (no refetch)
            pl.BlockSpec(
                (tn, ho + 1, 2, wo + 1, 2 * cin_pad),
                lambda p, i: (i * (1 - p) + (n_tiles - 1) * p, 0, 0, 0, 0)),
            _resident_spec((16 * cin_pad, cpad)),    # conv weights (pre-permuted)
            _resident_spec((1, cpad)),               # BN gamma (padded)
            _resident_spec((1, cpad)),               # BN beta (padded)
        ],
        # output blocks are only written in phase 1; during phase 0 the map is
        # pinned to block 0 so nothing is flushed before it holds real data.
        out_specs=pl.BlockSpec((rows_tile, cpad), lambda p, i: (p * i, 0)),
        scratch_shapes=[
            pltpu.VMEM((m, cpad), jnp.float32),      # pre-BN conv out (never hits HBM)
            pltpu.VMEM((8, cpad), jnp.float32),      # per-sublane channel sums
            pltpu.VMEM((8, cpad), jnp.float32),      # per-sublane channel sum-of-squares
        ],
        compiler_params=pltpu.CompilerParams(
            dimension_semantics=("arbitrary", "arbitrary"),
            vmem_limit_bytes=_VMEM_LIMIT),
    )(xr, w_mat, gamma, beta)

    return out.reshape(n, ho, wo, cpad)


# ----------------------------------------------------------------------------
# Fused mu/logvar head: K-tiled GEMM with a resident f32 accumulator.
# ----------------------------------------------------------------------------
def _fc_kernel(x_ref, w_ref, b_ref, o_ref, acc_ref):
    k = pl.program_id(0)

    @pl.when(k == 0)
    def _init():
        acc_ref[...] = jnp.zeros_like(acc_ref)

    acc_ref[...] += jnp.dot(x_ref[...], w_ref[...],
                            preferred_element_type=jnp.float32)

    @pl.when(k == pl.num_programs(0) - 1)
    def _finalize():
        o_ref[...] = acc_ref[...] + b_ref[...]


def _pick_k_tile(f):
    for kt in (2048, 1024, 512, 256, 128):
        if f % kt == 0:
            return kt
    return f


def _fc_heads(x2d, w_fc, b_fc):
    mp, f = x2d.shape
    lpad = w_fc.shape[1]
    kt = _pick_k_tile(f)
    return pl.pallas_call(
        _fc_kernel,
        out_shape=jax.ShapeDtypeStruct((mp, lpad), jnp.float32),
        grid=(f // kt,),                             # stream the weight over K
        in_specs=[
            pl.BlockSpec((mp, kt), lambda k: (0, k)),
            pl.BlockSpec((kt, lpad), lambda k: (k, 0)),
            _resident_spec((1, lpad)),               # bias
        ],
        out_specs=pl.BlockSpec((mp, lpad), lambda k: (0, 0)),
        scratch_shapes=[pltpu.VMEM((mp, lpad), jnp.float32)],
        compiler_params=pltpu.CompilerParams(
            dimension_semantics=("arbitrary",),
            vmem_limit_bytes=_VMEM_LIMIT),
    )(x2d, w_fc, b_fc)


# ----------------------------------------------------------------------------
# Parameter init (PyTorch layout) + one-time kernel-ready preparation.
# ----------------------------------------------------------------------------
def init_encoder_params(key, input_dim, hidden_dim, latent_dim, h, w):
    """Deterministic parameters in the PyTorch module's native layout.
    (The module builds fc_mu/fc_logvar lazily on the first forward; we resolve
    the flatten size here from (h, w) once.)"""
    ks = jax.random.split(key, 16)
    flatten = hidden_dim * 4 * (h // 8) * (w // 8)
    dims = [(hidden_dim, input_dim),
            (hidden_dim * 2, hidden_dim),
            (hidden_dim * 4, hidden_dim * 2)]
    p = {}
    for i, (co, ci) in enumerate(dims):
        j = i + 1
        p[f"conv{j}_w"] = 0.05 * jax.random.normal(ks[4 * i + 0], (co, ci, 4, 4), jnp.float32)
        p[f"conv{j}_b"] = 0.01 * jax.random.normal(ks[4 * i + 1], (co,), jnp.float32)
        p[f"bn{j}_g"] = 1.0 + 0.01 * jax.random.normal(ks[4 * i + 2], (co,), jnp.float32)
        p[f"bn{j}_b"] = 0.01 * jax.random.normal(ks[4 * i + 3], (co,), jnp.float32)
    p["fc_mu_w"] = 0.05 * jax.random.normal(ks[12], (latent_dim, flatten), jnp.float32)
    p["fc_mu_b"] = 0.01 * jax.random.normal(ks[13], (latent_dim,), jnp.float32)
    p["fc_lv_w"] = 0.05 * jax.random.normal(ks[14], (latent_dim, flatten), jnp.float32)
    p["fc_lv_b"] = 0.01 * jax.random.normal(ks[15], (latent_dim,), jnp.float32)
    return p


def prepare_encoder_params(p, input_dim, hidden_dim, latent_dim, h, w):
    """One-time weight permutation / 128-lane padding / bf16 cast."""
    _probe_buffered1()   # decide single-buffering support outside jit
    cins = [input_dim, hidden_dim, hidden_dim * 2]
    couts = [hidden_dim, hidden_dim * 2, hidden_dim * 4]
    convs = []
    cin_pad = _round_up(input_dim, 128)
    for i in range(3):
        cin, cout = cins[i], couts[i]
        cpad = _round_up(cout, 128)
        w_oihw = p[f"conv{i + 1}_w"]                        # (Cout, Cin, 4, 4)
        w_t = jnp.transpose(w_oihw, (2, 3, 1, 0))           # (kh, kw, Cin, Cout)
        w_t = jnp.pad(w_t, ((0, 0), (0, 0), (0, cin_pad - cin), (0, cpad - cout)))
        w_mat = w_t.reshape(16 * cin_pad, cpad).astype(jnp.bfloat16)
        gamma = jnp.pad(p[f"bn{i + 1}_g"], (0, cpad - cout)).reshape(1, cpad).astype(jnp.float32)
        beta = jnp.pad(p[f"bn{i + 1}_b"], (0, cpad - cout)).reshape(1, cpad).astype(jnp.float32)
        convs.append({"w_mat": w_mat, "gamma": gamma, "beta": beta})
        # conv{i}_b intentionally dropped: cancelled by training-mode BN mean subtraction.
        cin_pad = cpad           # next layer consumes this layer's padded activation

    # Fused FC heads, columns permuted once to the NHWC(+channel-pad) flatten order.
    c3 = hidden_dim * 4
    cpad3 = _round_up(c3, 128)
    h3, w3 = h // 8, w // 8
    f = h3 * w3 * cpad3
    lpad = _round_up(2 * latent_dim, 128)
    w_cat = jnp.concatenate([p["fc_mu_w"], p["fc_lv_w"]], axis=0)          # (2L, c3*h3*w3)
    w_cat = w_cat.reshape(2 * latent_dim, c3, h3, w3).transpose(0, 2, 3, 1)
    w_cat = jnp.pad(w_cat, ((0, 0), (0, 0), (0, 0), (0, cpad3 - c3)))
    w_cat = w_cat.reshape(2 * latent_dim, f).T                              # (F, 2L)
    fc_w = jnp.pad(w_cat, ((0, 0), (0, lpad - 2 * latent_dim))).astype(jnp.bfloat16)
    b_cat = jnp.concatenate([p["fc_mu_b"], p["fc_lv_b"]])
    fc_b = jnp.pad(b_cat, (0, lpad - 2 * latent_dim)).reshape(1, lpad).astype(jnp.float32)
    return {"convs": convs, "fc_w": fc_w, "fc_b": fc_b}


# ----------------------------------------------------------------------------
# Forward
# ----------------------------------------------------------------------------
@functools.partial(jax.jit, static_argnames=("latent_dim",))
def encoder_forward(prep, x_nchw, *, latent_dim):
    # NCHW (PyTorch) -> NHWC; activations run in bf16 (MXU-native).
    act = jnp.transpose(x_nchw, (0, 2, 3, 1))
    n = act.shape[0]
    for layer in prep["convs"]:
        act = _conv_bn_lrelu_layer(act, layer)

    # FC weights were permuted at init to NHWC(+pad) flatten order -> direct flatten.
    x2d = act.reshape(n, -1)
    mp = _round_up(n, 16)                    # bf16 packs 16 rows per vreg
    x2d = jnp.pad(x2d, ((0, mp - n), (0, 0))).astype(jnp.bfloat16)
    out = _fc_heads(x2d, prep["fc_w"], prep["fc_b"])
    mu = out[:n, :latent_dim]
    logvar = out[:n, latent_dim:2 * latent_dim]
    return mu, logvar


# ----------------------------------------------------------------------------
# Pure-JAX f32 reference (PyTorch training-mode semantics) for a tolerance check.
# ----------------------------------------------------------------------------
def encoder_reference(p, x_nchw, latent_dim):
    x = x_nchw
    for i in range(1, 4):
        w = p[f"conv{i}_w"]
        b = p[f"conv{i}_b"]
        x = lax.conv_general_dilated(
            x, w, window_strides=(2, 2), padding=((1, 1), (1, 1)),
            dimension_numbers=("NCHW", "OIHW", "NCHW"))
        x = x + b[None, :, None, None]
        mean = jnp.mean(x, axis=(0, 2, 3), keepdims=True)
        var = jnp.var(x, axis=(0, 2, 3), keepdims=True)       # biased (training BN)
        xh = (x - mean) * lax.rsqrt(var + _BN_EPS)
        x = p[f"bn{i}_g"][None, :, None, None] * xh + p[f"bn{i}_b"][None, :, None, None]
        x = jnp.where(x >= 0, x, _LRELU_SLOPE * x)
    xf = x.reshape(x.shape[0], -1)
    mu = xf @ p["fc_mu_w"].T + p["fc_mu_b"]
    logvar = xf @ p["fc_lv_w"].T + p["fc_lv_b"]
    return mu, logvar


if __name__ == "__main__":
    # Small shapes consistent with the module: 3 stride-2 convs need H, W
    # divisible by 8.  batch=2, input_dim=4, spatial=16x16, hidden=8, latent=16.
    N, C_IN, H, W = 2, 4, 16, 16
    HIDDEN, LATENT = 8, 16

    key = jax.random.PRNGKey(0)
    k_param, k_x = jax.random.split(key)
    params = init_encoder_params(k_param, C_IN, HIDDEN, LATENT, H, W)
    prep = prepare_encoder_params(params, C_IN, HIDDEN, LATENT, H, W)
    x = jax.random.normal(k_x, (N, C_IN, H, W), jnp.float32)

    mu, logvar = encoder_forward(prep, x, latent_dim=LATENT)
    jax.block_until_ready((mu, logvar))

    assert mu.shape == (N, LATENT) and logvar.shape == (N, LATENT)
    assert bool(jnp.all(jnp.isfinite(mu))) and bool(jnp.all(jnp.isfinite(logvar)))

    # Tolerance check vs a pure-JAX f32 reference (kernel path is bf16).
    mu_ref, lv_ref = encoder_reference(params, x, LATENT)
    err = max(float(jnp.max(jnp.abs(mu - mu_ref))),
              float(jnp.max(jnp.abs(logvar - lv_ref))))
    assert err < 0.15, f"kernel vs reference max abs error too large: {err}"
    print("KERNEL_OK")
</pallas_src>

<mosaic_0001>
module attributes {stable_mosaic.version = 11 : i64} {
  func.func @_k(%arg0: i32, %arg1: memref<8x128xf32, #tpu.memory_space<vmem>>, %arg2: memref<8x128xf32, #tpu.memory_space<vmem>>, %arg3: memref<8x128xf32, #tpu.memory_space<vmem>>) attributes {dimension_semantics = [#tpu.dimension_semantics<arbitrary>], iteration_bounds = array<i64: 2>, scalar_prefetch = 0 : i64, scratch_operands = 0 : i64, tpu.core_type = #tpu.core_type<tc>, window_params = [{pipeline_mode = #tpu.pipeline_mode<synchronous>, transform_indices = @transform_0, window_bounds = array<i64: 8, 128>}, {pipeline_mode = #tpu.pipeline_mode<synchronous>, transform_indices = @transform_1, window_bounds = array<i64: 8, 128>}, {pipeline_mode = #tpu.pipeline_mode<synchronous>, transform_indices = @transform_2, window_bounds = array<i64: 8, 128>}]} {
    %c0 = arith.constant 0 : index
    %c0_0 = arith.constant 0 : index
    %0 = vector.load %arg1[%c0, %c0_0] : memref<8x128xf32, #tpu.memory_space<vmem>>, vector<8x128xf32>
    %c0_1 = arith.constant 0 : index
    %c0_2 = arith.constant 0 : index
    %1 = vector.load %arg2[%c0_1, %c0_2] : memref<8x128xf32, #tpu.memory_space<vmem>>, vector<8x128xf32>
    %2 = arith.addf %0, %1 : vector<8x128xf32>
    %c0_3 = arith.constant 0 : index
    %c0_4 = arith.constant 0 : index
    %3 = vector.load %arg3[%c0_3, %c0_4] : memref<8x128xf32, #tpu.memory_space<vmem>>, vector<8x128xf32>
    tpu.vector_store %arg3[%c0_3, %c0_4], %2 {strides = array<i32>} : memref<8x128xf32, #tpu.memory_space<vmem>>, vector<8x128xf32>,
    return
  }
  func.func @transform_0(%arg0: i32) -> (i32, i32) {
    %c0_i32 = arith.constant 0 : i32
    %c0_i32_0 = arith.constant 0 : i32
    %c0_i32_1 = arith.constant 0 : i32
    return %c0_i32, %c0_i32_0 : i32, i32
  }
  func.func @transform_1(%arg0: i32) -> (i32, i32) {
    %c0_i32 = arith.constant 0 : i32
    %c0_i32_0 = arith.constant 0 : i32
    %c0_i32_1 = arith.constant 0 : i32
    return %c0_i32, %c0_i32_0 : i32, i32
  }
  func.func @transform_2(%arg0: i32) -> (i32, i32) {
    %c0_i32 = arith.constant 0 : i32
    %c0_i32_0 = arith.constant 0 : i32
    %c0_i32_1 = arith.constant 0 : i32
    return %c0_i32, %c0_i32_0 : i32, i32
  }
}

module attributes {stable_mosaic.version = 11 : i64} {
  func.func @_conv_bn_lrelu_kernel(%arg0: i32, %arg1: i32, %arg2: memref<2x9x2x9x256xbf16, #tpu.memory_space<vmem>>, %arg3: memref<2048x128xbf16, #tpu.memory_space<vmem>>, %arg4: memref<1x128xf32, #tpu.memory_space<vmem>>, %arg5: memref<1x128xf32, #tpu.memory_space<vmem>>, %arg6: memref<128x128xbf16, #tpu.memory_space<vmem>>, %arg7: memref<128x128xf32, #tpu.memory_space<vmem>>, %arg8: memref<8x128xf32, #tpu.memory_space<vmem>>, %arg9: memref<8x128xf32, #tpu.memory_space<vmem>>) attributes {dimension_semantics = [#tpu.dimension_semantics<arbitrary>, #tpu.dimension_semantics<arbitrary>], iteration_bounds = array<i64: 2, 1>, scalar_prefetch = 0 : i64, scratch_operands = 3 : i64, tpu.core_type = #tpu.core_type<tc>, window_params = [{transform_indices = @transform_0, window_bounds = array<i64: 2, 9, 2, 9, 256>}, {pipeline_mode = #tpu.pipeline_mode<synchronous>, transform_indices = @transform_1, window_bounds = array<i64: 2048, 128>}, {pipeline_mode = #tpu.pipeline_mode<synchronous>, transform_indices = @transform_2, window_bounds = array<i64: 1, 128>}, {pipeline_mode = #tpu.pipeline_mode<synchronous>, transform_indices = @transform_3, window_bounds = array<i64: 1, 128>}, {transform_indices = @transform_4, window_bounds = array<i64: 128, 128>}]} {
    %c0_i32 = arith.constant 0 : i32
    %0 = arith.cmpi eq, %arg0, %c0_i32 : i32
    %c0_i32_0 = arith.constant 0 : i32
    %1 = arith.cmpi eq, %arg1, %c0_i32_0 : i32
    %2 = arith.andi %0, %1 : i1
    %3 = arith.extui %2 : i1 to i32
    %c0_i32_1 = arith.constant 0 : i32
    %4 = arith.cmpi ne, %3, %c0_i32_1 : i32
    scf.if %4 {
      %cst = arith.constant 0.000000e+00 : f32
      %11 = vector.broadcast %cst : f32 to vector<8x128xf32>
      %c0 = arith.constant 0 : index
      %c0_5 = arith.constant 0 : index
      %12 = vector.load %arg8[%c0, %c0_5] : memref<8x128xf32, #tpu.memory_space<vmem>>, vector<8x128xf32>
      tpu.vector_store %arg8[%c0, %c0_5], %11 {strides = array<i32>} : memref<8x128xf32, #tpu.memory_space<vmem>>, vector<8x128xf32>,
      %cst_6 = arith.constant 0.000000e+00 : f32
      %13 = vector.broadcast %cst_6 : f32 to vector<8x128xf32>
      %c0_7 = arith.constant 0 : index
      %c0_8 = arith.constant 0 : index
      %14 = vector.load %arg9[%c0_7, %c0_8] : memref<8x128xf32, #tpu.memory_space<vmem>>, vector<8x128xf32>
      tpu.vector_store %arg9[%c0_7, %c0_8], %13 {strides = array<i32>} : memref<8x128xf32, #tpu.memory_space<vmem>>, vector<8x128xf32>,
    } else {
    }
    %c0_i32_2 = arith.constant 0 : i32
    %5 = arith.cmpi eq, %arg0, %c0_i32_2 : i32
    %6 = arith.extui %5 : i1 to i32
    %c0_i32_3 = arith.constant 0 : i32
    %7 = arith.cmpi ne, %6, %c0_i32_3 : i32
    scf.if %7 {
      %c0 = arith.constant 0 : index
      %c0_5 = arith.constant 0 : index
      %c0_6 = arith.constant 0 : index
      %c0_7 = arith.constant 0 : index
      %c0_8 = arith.constant 0 : index
      %11 = vector.load %arg2[%c0, %c0_5, %c0_6, %c0_7, %c0_8] : memref<2x9x2x9x256xbf16, #tpu.memory_space<vmem>>, vector<2x9x2x9x256xbf16>
      %12 = vector.extract_strided_slice %11 {offsets = [0, 0, 0, 0, 0], sizes = [2, 8, 1, 8, 128], strides = [1, 1, 1, 1, 1]} : vector<2x9x2x9x256xbf16> to vector<2x8x1x8x128xbf16>
      %13 = vector.shape_cast %12 : vector<2x8x1x8x128xbf16> to vector<2x8x8x128xbf16>
      %14 = vector.extract_strided_slice %11 {offsets = [0, 0, 0, 0, 128], sizes = [2, 8, 1, 8, 128], strides = [1, 1, 1, 1, 1]} : vector<2x9x2x9x256xbf16> to vector<2x8x1x8x128xbf16>
      %15 = vector.shape_cast %14 : vector<2x8x1x8x128xbf16> to vector<2x8x8x128xbf16>
      %16 = vector.extract_strided_slice %11 {offsets = [0, 0, 0, 1, 0], sizes = [2, 8, 1, 8, 128], strides = [1, 1, 1, 1, 1]} : vector<2x9x2x9x256xbf16> to vector<2x8x1x8x128xbf16>
      %17 = vector.shape_cast %16 : vector<2x8x1x8x128xbf16> to vector<2x8x8x128xbf16>
      %18 = vector.extract_strided_slice %11 {offsets = [0, 0, 0, 1, 128], sizes = [2, 8, 1, 8, 128], strides = [1, 1, 1, 1, 1]} : vector<2x9x2x9x256xbf16> to vector<2x8x1x8x128xbf16>
      %19 = vector.shape_cast %18 : vector<2x8x1x8x128xbf16> to vector<2x8x8x128xbf16>
      %20 = vector.extract_strided_slice %11 {offsets = [0, 0, 1, 0, 0], sizes = [2, 8, 1, 8, 128], strides = [1, 1, 1, 1, 1]} : vector<2x9x2x9x256xbf16> to vector<2x8x1x8x128xbf16>
      %21 = vector.shape_cast %20 : vector<2x8x1x8x128xbf16> to vector<2x8x8x128xbf16>
      %22 = vector.extract_strided_slice %11 {offsets = [0, 0, 1, 0, 128], sizes = [2, 8, 1, 8, 128], strides = [1, 1, 1, 1, 1]} : vector<2x9x2x9x256xbf16> to vector<2x8x1x8x128xbf16>
      %23 = vector.shape_cast %22 : vector<2x8x1x8x128xbf16> to vector<2x8x8x128xbf16>
      %24 = vector.extract_strided_slice %11 {offsets = [0, 0, 1, 1, 0], sizes = [2, 8, 1, 8, 128], strides = [1, 1, 1, 1, 1]} : vector<2x9x2x9x256xbf16> to vector<2x8x1x8x128xbf16>
      %25 = vector.shape_cast %24 : vector<2x8x1x8x128xbf16> to vector<2x8x8x128xbf16>
      %26 = vector.extract_strided_slice %11 {offsets = [0, 0, 1, 1, 128], sizes = [2, 8, 1, 8, 128], strides = [1, 1, 1, 1, 1]} : vector<2x9x2x9x256xbf16> to vector<2x8x1x8x128xbf16>
      %27 = vector.shape_cast %26 : vector<2x8x1x8x128xbf16> to vector<2x8x8x128xbf16>
      %28 = vector.extract_strided_slice %11 {offsets = [0, 1, 0, 0, 0], sizes = [2, 8, 1, 8, 128], strides = [1, 1, 1, 1, 1]} : vector<2x9x2x9x256xbf16> to vector<2x8x1x8x128xbf16>
      %29 = vector.shape_cast %28 : vector<2x8x1x8x128xbf16> to vector<2x8x8x128xbf16>
      %30 = vector.extract_strided_slice %11 {offsets = [0, 1, 0, 0, 128], sizes = [2, 8, 1, 8, 128], strides = [1, 1, 1, 1, 1]} : vector<2x9x2x9x256xbf16> to vector<2x8x1x8x128xbf16>
      %31 = vector.shape_cast %30 : vector<2x8x1x8x128xbf16> to vector<2x8x8x128xbf16>
      %32 = vector.extract_strided_slice %11 {offsets = [0, 1, 0, 1, 0], sizes = [2, 8, 1, 8, 128], strides = [1, 1, 1, 1, 1]} : vector<2x9x2x9x256xbf16> to vector<2x8x1x8x128xbf16>
      %33 = vector.shape_cast %32 : vector<2x8x1x8x128xbf16> to vector<2x8x8x128xbf16>
      %34 = vector.extract_strided_slice %11 {offsets = [0, 1, 0, 1, 128], sizes = [2, 8, 1, 8, 128], strides = [1, 1, 1, 1, 1]} : vector<2x9x2x9x256xbf16> to vector<2x8x1x8x128xbf16>
      %35 = vector.shape_cast %34 : vector<2x8x1x8x128xbf16> to vector<2x8x8x128xbf16>
      %36 = vector.extract_strided_slice %11 {offsets = [0, 1, 1, 0, 0], sizes = [2, 8, 1, 8, 128], strides = [1, 1, 1, 1, 1]} : vector<2x9x2x9x256xbf16> to vector<2x8x1x8x128xbf16>
      %37 = vector.shape_cast %36 : vector<2x8x1x8x128xbf16> to vector<2x8x8x128xbf16>
      %38 = vector.extract_strided_slice %11 {offsets = [0, 1, 1, 0, 128], sizes = [2, 8, 1, 8, 128], strides = [1, 1, 1, 1, 1]} : vector<2x9x2x9x256xbf16> to vector<2x8x1x8x128xbf16>
      %39 = vector.shape_cast %38 : vector<2x8x1x8x128xbf16> to vector<2x8x8x128xbf16>
      %40 = vector.extract_strided_slice %11 {offsets = [0, 1, 1, 1, 0], sizes = [2, 8, 1, 8, 128], strides = [1, 1, 1, 1, 1]} : vector<2x9x2x9x256xbf16> to vector<2x8x1x8x128xbf16>
      %41 = vector.shape_cast %40 : vector<2x8x1x8x128xbf16> to vector<2x8x8x128xbf16>
      %42 = vector.extract_strided_slice %11 {offsets = [0, 1, 1, 1, 128], sizes = [2, 8, 1, 8, 128], strides = [1, 1, 1, 1, 1]} : vector<2x9x2x9x256xbf16> to vector<2x8x1x8x128xbf16>
      %43 = vector.shape_cast %42 : vector<2x8x1x8x128xbf16> to vector<2x8x8x128xbf16>
      %44 = tpu.concatenate %13, %15, %17, %19, %21, %23, %25, %27, %29, %31, %33, %35, %37, %39, %41, %43 in 3 : vector<2x8x8x128xbf16>, vector<2x8x8x128xbf16>, vector<2x8x8x128xbf16>, vector<2x8x8x128xbf16>, vector<2x8x8x128xbf16>, vector<2x8x8x128xbf16>, vector<2x8x8x128xbf16>, vector<2x8x8x128xbf16>, vector<2x8x8x128xbf16>, vector<2x8x8x128xbf16>, vector<2x8x8x128xbf16>, vector<2x8x8x128xbf16>, vector<2x8x8x128xbf16>, vector<2x8x8x128xbf16>, vector<2x8x8x128xbf16>, vector<2x8x8x128xbf16> -> vector<2x8x8x2048xbf16>
      %45 = vector.shape_cast %44 : vector<2x8x8x2048xbf16> to vector<128x2048xbf16>
      %c0_9 = arith.constant 0 : index
      %c0_10 = arith.constant 0 : index
      %46 = vector.load %arg3[%c0_9, %c0_10] : memref<2048x128xbf16, #tpu.memory_space<vmem>>, vector<2048x128xbf16>
      %cst = arith.constant dense<0.000000e+00> : vector<128x128xf32>
      %47 = tpu.matmul %45, %46, %cst {dimension_numbers = #tpu.dot_dimension_numbers<[1], [0], [0], [1], [0, 0, 1, 1], [], []>} : vector<128x2048xbf16>, vector<2048x128xbf16>, vector<128x128xf32> -> vector<128x128xf32>
      %c0_11 = arith.constant 0 : index
      %c0_12 = arith.constant 0 : index
      %48 = vector.load %arg7[%c0_11, %c0_12] : memref<128x128xf32, #tpu.memory_space<vmem>>, vector<128x128xf32>
      tpu.vector_store %arg7[%c0_11, %c0_12], %47 {strides = array<i32>} : memref<128x128xf32, #tpu.memory_space<vmem>>, vector<128x128xf32>,
      %49 = vector.shape_cast %47 : vector<128x128xf32> to vector<16x8x128xf32>
      %c0_13 = arith.constant 0 : index
      %c0_14 = arith.constant 0 : index
      %50 = vector.load %arg8[%c0_13, %c0_14] : memref<8x128xf32, #tpu.memory_space<vmem>>, vector<8x128xf32>
      %cst_15 = arith.constant dense<0.000000e+00> : vector<8x128xf32>
      %51 = vector.multi_reduction <add>, %49, %cst_15 [0] : vector<16x8x128xf32> to vector<8x128xf32>
      %52 = arith.addf %50, %51 : vector<8x128xf32>
      %c0_16 = arith.constant 0 : index
      %c0_17 = arith.constant 0 : index
      %53 = vector.load %arg8[%c0_16, %c0_17] : memref<8x128xf32, #tpu.memory_space<vmem>>, vector<8x128xf32>
      tpu.vector_store %arg8[%c0_16, %c0_17], %52 {strides = array<i32>} : memref<8x128xf32, #tpu.memory_space<vmem>>, vector<8x128xf32>,
      %c0_18 = arith.constant 0 : index
      %c0_19 = arith.constant 0 : index
      %54 = vector.load %arg9[%c0_18, %c0_19] : memref<8x128xf32, #tpu.memory_space<vmem>>, vector<8x128xf32>
      %55 = arith.mulf %49, %49 : vector<16x8x128xf32>
      %cst_20 = arith.constant dense<0.000000e+00> : vector<8x128xf32>
      %56 = vector.multi_reduction <add>, %55, %cst_20 [0] : vector<16x8x128xf32> to vector<8x128xf32>
      %57 = arith.addf %54, %56 : vector<8x128xf32>
      %c0_21 = arith.constant 0 : index
      %c0_22 = arith.constant 0 : index
      %58 = vector.load %arg9[%c0_21, %c0_22] : memref<8x128xf32, #tpu.memory_space<vmem>>, vector<8x128xf32>
      tpu.vector_store %arg9[%c0_21, %c0_22], %57 {strides = array<i32>} : memref<8x128xf32, #tpu.memory_space<vmem>>, vector<8x128xf32>,
    } else {
    }
    %c1_i32 = arith.constant 1 : i32
    %8 = arith.cmpi eq, %arg0, %c1_i32 : i32
    %9 = arith.extui %8 : i1 to i32
    %c0_i32_4 = arith.constant 0 : i32
    %10 = arith.cmpi ne, %9, %c0_i32_4 : i32
    scf.if %10 {
      %c0 = arith.constant 0 : index
      %c0_5 = arith.constant 0 : index
      %11 = vector.load %arg8[%c0, %c0_5] : memref<8x128xf32, #tpu.memory_space<vmem>>, vector<8x128xf32>
      %cst = arith.constant dense<0.000000e+00> : vector<128xf32>
      %12 = vector.multi_reduction <add>, %11, %cst [0] : vector<8x128xf32> to vector<128xf32>
      %13 = vector.shape_cast %12 : vector<128xf32> to vector<1x128xf32>
      %c0_6 = arith.constant 0 : index
      %c0_7 = arith.constant 0 : index
      %14 = vector.load %arg9[%c0_6, %c0_7] : memref<8x128xf32, #tpu.memory_space<vmem>>, vector<8x128xf32>
      %cst_8 = arith.constant dense<0.000000e+00> : vector<128xf32>
      %15 = vector.multi_reduction <add>, %14, %cst_8 [0] : vector<8x128xf32> to vector<128xf32>
      %16 = vector.shape_cast %15 : vector<128xf32> to vector<1x128xf32>
      %cst_9 = arith.constant 7.812500e-03 : f32
      %17 = vector.broadcast %cst_9 : f32 to vector<1x128xf32>
      %18 = arith.mulf %13, %17 : vector<1x128xf32>
      %cst_10 = arith.constant 7.812500e-03 : f32
      %19 = vector.broadcast %cst_10 : f32 to vector<1x128xf32>
      %20 = arith.mulf %16, %19 : vector<1x128xf32>
      %21 = arith.mulf %18, %18 : vector<1x128xf32>
      %22 = arith.subf %20, %21 : vector<1x128xf32>
      %cst_11 = arith.constant 0.000000e+00 : f32
      %23 = vector.broadcast %cst_11 : f32 to vector<1x128xf32>
      %24 = arith.maximumf %22, %23 : vector<1x128xf32>
      %c0_12 = arith.constant 0 : index
      %c0_13 = arith.constant 0 : index
      %25 = vector.load %arg4[%c0_12, %c0_13] : memref<1x128xf32, #tpu.memory_space<vmem>>, vector<1x128xf32>
      %cst_14 = arith.constant 9.99999974E-6 : f32
      %26 = vector.broadcast %cst_14 : f32 to vector<1x128xf32>
      %27 = arith.addf %24, %26 : vector<1x128xf32>
      %28 = math.rsqrt %27 : vector<1x128xf32>
      %29 = arith.mulf %25, %28 : vector<1x128xf32>
      %c0_15 = arith.constant 0 : index
      %c0_16 = arith.constant 0 : index
      %30 = vector.load %arg5[%c0_15, %c0_16] : memref<1x128xf32, #tpu.memory_space<vmem>>, vector<1x128xf32>
      %31 = arith.mulf %18, %29 : vector<1x128xf32>
      %32 = arith.subf %30, %31 : vector<1x128xf32>
      %c0_17 = arith.constant 0 : index
      %c0_18 = arith.constant 0 : index
      %33 = vector.load %arg7[%c0_17, %c0_18] : memref<128x128xf32, #tpu.memory_space<vmem>>, vector<128x128xf32>
      %34 = vector.broadcast %29 : vector<1x128xf32> to vector<128x128xf32>
      %35 = arith.mulf %33, %34 : vector<128x128xf32>
      %36 = vector.broadcast %32 : vector<1x128xf32> to vector<128x128xf32>
      %37 = arith.addf %35, %36 : vector<128x128xf32>
      %cst_19 = arith.constant 0.000000e+00 : f32
      %38 = vector.broadcast %cst_19 : f32 to vector<128x128xf32>
      %39 = arith.cmpf oge, %37, %38 : vector<128x128xf32>
      %cst_20 = arith.constant 2.000000e-01 : f32
      %40 = vector.broadcast %cst_20 : f32 to vector<128x128xf32>
      %41 = arith.mulf %40, %37 : vector<128x128xf32>
      %42 = arith.select %39, %37, %41 : vector<128x128xi1>, vector<128x128xf32>
      %43 = arith.truncf %42 : vector<128x128xf32> to vector<128x128xbf16>
      %c0_21 = arith.constant 0 : index
      %c0_22 = arith.constant 0 : index
      %44 = vector.load %arg6[%c0_21, %c0_22] : memref<128x128xbf16, #tpu.memory_space<vmem>>, vector<128x128xbf16>
      tpu.vector_store %arg6[%c0_21, %c0_22], %43 {strides = array<i32>} : memref<128x128xbf16, #tpu.memory_space<vmem>>, vector<128x128xbf16>,
    } else {
    }
    return
  }
  func.func @transform_0(%arg0: i32, %arg1: i32) -> (i32, i32, i32, i32, i32) {
    %c1_i32 = arith.constant 1 : i32
    %0 = arith.subi %c1_i32, %arg0 : i32
    %1 = arith.muli %arg1, %0 : i32
    %c0_i32 = arith.constant 0 : i32
    %2 = arith.muli %c0_i32, %arg0 : i32
    %3 = arith.addi %1, %2 : i32
    %c0_i32_0 = arith.constant 0 : i32
    %c0_i32_1 = arith.constant 0 : i32
    %c0_i32_2 = arith.constant 0 : i32
    %c0_i32_3 = arith.constant 0 : i32
    %c0_i32_4 = arith.constant 0 : i32
    return %3, %c0_i32_0, %c0_i32_1, %c0_i32_2, %c0_i32_3 : i32, i32, i32, i32, i32
  }
  func.func @transform_1(%arg0: i32, %arg1: i32) -> (i32, i32) {
    %c0_i32 = arith.constant 0 : i32
    %c0_i32_0 = arith.constant 0 : i32
    %c0_i32_1 = arith.constant 0 : i32
    return %c0_i32, %c0_i32_0 : i32, i32
  }
  func.func @transform_2(%arg0: i32, %arg1: i32) -> (i32, i32) {
    %c0_i32 = arith.constant 0 : i32
    %c0_i32_0 = arith.constant 0 : i32
    %c0_i32_1 = arith.constant 0 : i32
    return %c0_i32, %c0_i32_0 : i32, i32
  }
  func.func @transform_3(%arg0: i32, %arg1: i32) -> (i32, i32) {
    %c0_i32 = arith.constant 0 : i32
    %c0_i32_0 = arith.constant 0 : i32
    %c0_i32_1 = arith.constant 0 : i32
    return %c0_i32, %c0_i32_0 : i32, i32
  }
  func.func @transform_4(%arg0: i32, %arg1: i32) -> (i32, i32) {
    %0 = arith.muli %arg0, %arg1 : i32
    %c0_i32 = arith.constant 0 : i32
    %c0_i32_0 = arith.constant 0 : i32
    return %0, %c0_i32 : i32, i32
  }
}

module attributes {stable_mosaic.version = 11 : i64} {
  func.func @_conv_bn_lrelu_kernel(%arg0: i32, %arg1: i32, %arg2: memref<2x5x2x5x256xbf16, #tpu.memory_space<vmem>>, %arg3: memref<2048x128xbf16, #tpu.memory_space<vmem>>, %arg4: memref<1x128xf32, #tpu.memory_space<vmem>>, %arg5: memref<1x128xf32, #tpu.memory_space<vmem>>, %arg6: memref<32x128xbf16, #tpu.memory_space<vmem>>, %arg7: memref<32x128xf32, #tpu.memory_space<vmem>>, %arg8: memref<8x128xf32, #tpu.memory_space<vmem>>, %arg9: memref<8x128xf32, #tpu.memory_space<vmem>>) attributes {dimension_semantics = [#tpu.dimension_semantics<arbitrary>, #tpu.dimension_semantics<arbitrary>], iteration_bounds = array<i64: 2, 1>, scalar_prefetch = 0 : i64, scratch_operands = 3 : i64, tpu.core_type = #tpu.core_type<tc>, window_params = [{transform_indices = @transform_0, window_bounds = array<i64: 2, 5, 2, 5, 256>}, {pipeline_mode = #tpu.pipeline_mode<synchronous>, transform_indices = @transform_1, window_bounds = array<i64: 2048, 128>}, {pipeline_mode = #tpu.pipeline_mode<synchronous>, transform_indices = @transform_2, window_bounds = array<i64: 1, 128>}, {pipeline_mode = #tpu.pipeline_mode<synchronous>, transform_indices = @transform_3, window_bounds = array<i64: 1, 128>}, {transform_indices = @transform_4, window_bounds = array<i64: 32, 128>}]} {
    %c0_i32 = arith.constant 0 : i32
    %0 = arith.cmpi eq, %arg0, %c0_i32 : i32
    %c0_i32_0 = arith.constant 0 : i32
    %1 = arith.cmpi eq, %arg1, %c0_i32_0 : i32
    %2 = arith.andi %0, %1 : i1
    %3 = arith.extui %2 : i1 to i32
    %c0_i32_1 = arith.constant 0 : i32
    %4 = arith.cmpi ne, %3, %c0_i32_1 : i32
    scf.if %4 {
      %cst = arith.constant 0.000000e+00 : f32
      %11 = vector.broadcast %cst : f32 to vector<8x128xf32>
      %c0 = arith.constant 0 : index
      %c0_5 = arith.constant 0 : index
      %12 = vector.load %arg8[%c0, %c0_5] : memref<8x128xf32, #tpu.memory_space<vmem>>, vector<8x128xf32>
      tpu.vector_store %arg8[%c0, %c0_5], %11 {strides = array<i32>} : memref<8x128xf32, #tpu.memory_space<vmem>>, vector<8x128xf32>,
      %cst_6 = arith.constant 0.000000e+00 : f32
      %13 = vector.broadcast %cst_6 : f32 to vector<8x128xf32>
      %c0_7 = arith.constant 0 : index
      %c0_8 = arith.constant 0 : index
      %14 = vector.load %arg9[%c0_7, %c0_8] : memref<8x128xf32, #tpu.memory_space<vmem>>, vector<8x128xf32>
      tpu.vector_store %arg9[%c0_7, %c0_8], %13 {strides = array<i32>} : memref<8x128xf32, #tpu.memory_space<vmem>>, vector<8x128xf32>,
    } else {
    }
    %c0_i32_2 = arith.constant 0 : i32
    %5 = arith.cmpi eq, %arg0, %c0_i32_2 : i32
    %6 = arith.extui %5 : i1 to i32
    %c0_i32_3 = arith.constant 0 : i32
    %7 = arith.cmpi ne, %6, %c0_i32_3 : i32
    scf.if %7 {
      %c0 = arith.constant 0 : index
      %c0_5 = arith.constant 0 : index
      %c0_6 = arith.constant 0 : index
      %c0_7 = arith.constant 0 : index
      %c0_8 = arith.constant 0 : index
      %11 = vector.load %arg2[%c0, %c0_5, %c0_6, %c0_7, %c0_8] : memref<2x5x2x5x256xbf16, #tpu.memory_space<vmem>>, vector<2x5x2x5x256xbf16>
      %12 = vector.extract_strided_slice %11 {offsets = [0, 0, 0, 0, 0], sizes = [2, 4, 1, 4, 128], strides = [1, 1, 1, 1, 1]} : vector<2x5x2x5x256xbf16> to vector<2x4x1x4x128xbf16>
      %13 = vector.shape_cast %12 : vector<2x4x1x4x128xbf16> to vector<2x4x4x128xbf16>
      %14 = vector.extract_strided_slice %11 {offsets = [0, 0, 0, 0, 128], sizes = [2, 4, 1, 4, 128], strides = [1, 1, 1, 1, 1]} : vector<2x5x2x5x256xbf16> to vector<2x4x1x4x128xbf16>
      %15 = vector.shape_cast %14 : vector<2x4x1x4x128xbf16> to vector<2x4x4x128xbf16>
      %16 = vector.extract_strided_slice %11 {offsets = [0, 0, 0, 1, 0], sizes = [2, 4, 1, 4, 128], strides = [1, 1, 1, 1, 1]} : vector<2x5x2x5x256xbf16> to vector<2x4x1x4x128xbf16>
      %17 = vector.shape_cast %16 : vector<2x4x1x4x128xbf16> to vector<2x4x4x128xbf16>
      %18 = vector.extract_strided_slice %11 {offsets = [0, 0, 0, 1, 128], sizes = [2, 4, 1, 4, 128], strides = [1, 1, 1, 1, 1]} : vector<2x5x2x5x256xbf16> to vector<2x4x1x4x128xbf16>
      %19 = vector.shape_cast %18 : vector<2x4x1x4x128xbf16> to vector<2x4x4x128xbf16>
      %20 = vector.extract_strided_slice %11 {offsets = [0, 0, 1, 0, 0], sizes = [2, 4, 1, 4, 128], strides = [1, 1, 1, 1, 1]} : vector<2x5x2x5x256xbf16> to vector<2x4x1x4x128xbf16>
      %21 = vector.shape_cast %20 : vector<2x4x1x4x128xbf16> to vector<2x4x4x128xbf16>
      %22 = vector.extract_strided_slice %11 {offsets = [0, 0, 1, 0, 128], sizes = [2, 4, 1, 4, 128], strides = [1, 1, 1, 1, 1]} : vector<2x5x2x5x256xbf16> to vector<2x4x1x4x128xbf16>
      %23 = vector.shape_cast %22 : vector<2x4x1x4x128xbf16> to vector<2x4x4x128xbf16>
      %24 = vector.extract_strided_slice %11 {offsets = [0, 0, 1, 1, 0], sizes = [2, 4, 1, 4, 128], strides = [1, 1, 1, 1, 1]} : vector<2x5x2x5x256xbf16> to vector<2x4x1x4x128xbf16>
      %25 = vector.shape_cast %24 : vector<2x4x1x4x128xbf16> to vector<2x4x4x128xbf16>
      %26 = vector.extract_strided_slice %11 {offsets = [0, 0, 1, 1, 128], sizes = [2, 4, 1, 4, 128], strides = [1, 1, 1, 1, 1]} : vector<2x5x2x5x256xbf16> to vector<2x4x1x4x128xbf16>
      %27 = vector.shape_cast %26 : vector<2x4x1x4x128xbf16> to vector<2x4x4x128xbf16>
      %28 = vector.extract_strided_slice %11 {offsets = [0, 1, 0, 0, 0], sizes = [2, 4, 1, 4, 128], strides = [1, 1, 1, 1, 1]} : vector<2x5x2x5x256xbf16> to vector<2x4x1x4x128xbf16>
      %29 = vector.shape_cast %28 : vector<2x4x1x4x128xbf16> to vector<2x4x4x128xbf16>
      %30 = vector.extract_strided_slice %11 {offsets = [0, 1, 0, 0, 128], sizes = [2, 4, 1, 4, 128], strides = [1, 1, 1, 1, 1]} : vector<2x5x2x5x256xbf16> to vector<2x4x1x4x128xbf16>
      %31 = vector.shape_cast %30 : vector<2x4x1x4x128xbf16> to vector<2x4x4x128xbf16>
      %32 = vector.extract_strided_slice %11 {offsets = [0, 1, 0, 1, 0], sizes = [2, 4, 1, 4, 128], strides = [1, 1, 1, 1, 1]} : vector<2x5x2x5x256xbf16> to vector<2x4x1x4x128xbf16>
      %33 = vector.shape_cast %32 : vector<2x4x1x4x128xbf16> to vector<2x4x4x128xbf16>
      %34 = vector.extract_strided_slice %11 {offsets = [0, 1, 0, 1, 128], sizes = [2, 4, 1, 4, 128], strides = [1, 1, 1, 1, 1]} : vector<2x5x2x5x256xbf16> to vector<2x4x1x4x128xbf16>
      %35 = vector.shape_cast %34 : vector<2x4x1x4x128xbf16> to vector<2x4x4x128xbf16>
      %36 = vector.extract_strided_slice %11 {offsets = [0, 1, 1, 0, 0], sizes = [2, 4, 1, 4, 128], strides = [1, 1, 1, 1, 1]} : vector<2x5x2x5x256xbf16> to vector<2x4x1x4x128xbf16>
      %37 = vector.shape_cast %36 : vector<2x4x1x4x128xbf16> to vector<2x4x4x128xbf16>
      %38 = vector.extract_strided_slice %11 {offsets = [0, 1, 1, 0, 128], sizes = [2, 4, 1, 4, 128], strides = [1, 1, 1, 1, 1]} : vector<2x5x2x5x256xbf16> to vector<2x4x1x4x128xbf16>
      %39 = vector.shape_cast %38 : vector<2x4x1x4x128xbf16> to vector<2x4x4x128xbf16>
      %40 = vector.extract_strided_slice %11 {offsets = [0, 1, 1, 1, 0], sizes = [2, 4, 1, 4, 128], strides = [1, 1, 1, 1, 1]} : vector<2x5x2x5x256xbf16> to vector<2x4x1x4x128xbf16>
      %41 = vector.shape_cast %40 : vector<2x4x1x4x128xbf16> to vector<2x4x4x128xbf16>
      %42 = vector.extract_strided_slice %11 {offsets = [0, 1, 1, 1, 128], sizes = [2, 4, 1, 4, 128], strides = [1, 1, 1, 1, 1]} : vector<2x5x2x5x256xbf16> to vector<2x4x1x4x128xbf16>
      %43 = vector.shape_cast %42 : vector<2x4x1x4x128xbf16> to vector<2x4x4x128xbf16>
      %44 = tpu.concatenate %13, %15, %17, %19, %21, %23, %25, %27, %29, %31, %33, %35, %37, %39, %41, %43 in 3 : vector<2x4x4x128xbf16>, vector<2x4x4x128xbf16>, vector<2x4x4x128xbf16>, vector<2x4x4x128xbf16>, vector<2x4x4x128xbf16>, vector<2x4x4x128xbf16>, vector<2x4x4x128xbf16>, vector<2x4x4x128xbf16>, vector<2x4x4x128xbf16>, vector<2x4x4x128xbf16>, vector<2x4x4x128xbf16>, vector<2x4x4x128xbf16>, vector<2x4x4x128xbf16>, vector<2x4x4x128xbf16>, vector<2x4x4x128xbf16>, vector<2x4x4x128xbf16> -> vector<2x4x4x2048xbf16>
      %45 = vector.shape_cast %44 : vector<2x4x4x2048xbf16> to vector<32x2048xbf16>
      %c0_9 = arith.constant 0 : index
      %c0_10 = arith.constant 0 : index
      %46 = vector.load %arg3[%c0_9, %c0_10] : memref<2048x128xbf16, #tpu.memory_space<vmem>>, vector<2048x128xbf16>
      %cst = arith.constant dense<0.000000e+00> : vector<32x128xf32>
      %47 = tpu.matmul %45, %46, %cst {dimension_numbers = #tpu.dot_dimension_numbers<[1], [0], [0], [1], [0, 0, 1, 1], [], []>} : vector<32x2048xbf16>, vector<2048x128xbf16>, vector<32x128xf32> -> vector<32x128xf32>
      %c0_11 = arith.constant 0 : index
      %c0_12 = arith.constant 0 : index
      %48 = vector.load %arg7[%c0_11, %c0_12] : memref<32x128xf32, #tpu.memory_space<vmem>>, vector<32x128xf32>
      tpu.vector_store %arg7[%c0_11, %c0_12], %47 {strides = array<i32>} : memref<32x128xf32, #tpu.memory_space<vmem>>, vector<32x128xf32>,
      %49 = vector.shape_cast %47 : vector<32x128xf32> to vector<4x8x128xf32>
      %c0_13 = arith.constant 0 : index
      %c0_14 = arith.constant 0 : index
      %50 = vector.load %arg8[%c0_13, %c0_14] : memref<8x128xf32, #tpu.memory_space<vmem>>, vector<8x128xf32>
      %cst_15 = arith.constant dense<0.000000e+00> : vector<8x128xf32>
      %51 = vector.multi_reduction <add>, %49, %cst_15 [0] : vector<4x8x128xf32> to vector<8x128xf32>
      %52 = arith.addf %50, %51 : vector<8x128xf32>
      %c0_16 = arith.constant 0 : index
      %c0_17 = arith.constant 0 : index
      %53 = vector.load %arg8[%c0_16, %c0_17] : memref<8x128xf32, #tpu.memory_space<vmem>>, vector<8x128xf32>
      tpu.vector_store %arg8[%c0_16, %c0_17], %52 {strides = array<i32>} : memref<8x128xf32, #tpu.memory_space<vmem>>, vector<8x128xf32>,
      %c0_18 = arith.constant 0 : index
      %c0_19 = arith.constant 0 : index
      %54 = vector.load %arg9[%c0_18, %c0_19] : memref<8x128xf32, #tpu.memory_space<vmem>>, vector<8x128xf32>
      %55 = arith.mulf %49, %49 : vector<4x8x128xf32>
      %cst_20 = arith.constant dense<0.000000e+00> : vector<8x128xf32>
      %56 = vector.multi_reduction <add>, %55, %cst_20 [0] : vector<4x8x128xf32> to vector<8x128xf32>
      %57 = arith.addf %54, %56 : vector<8x128xf32>
      %c0_21 = arith.constant 0 : index
      %c0_22 = arith.constant 0 : index
      %58 = vector.load %arg9[%c0_21, %c0_22] : memref<8x128xf32, #tpu.memory_space<vmem>>, vector<8x128xf32>
      tpu.vector_store %arg9[%c0_21, %c0_22], %57 {strides = array<i32>} : memref<8x128xf32, #tpu.memory_space<vmem>>, vector<8x128xf32>,
    } else {
    }
    %c1_i32 = arith.constant 1 : i32
    %8 = arith.cmpi eq, %arg0, %c1_i32 : i32
    %9 = arith.extui %8 : i1 to i32
    %c0_i32_4 = arith.constant 0 : i32
    %10 = arith.cmpi ne, %9, %c0_i32_4 : i32
    scf.if %10 {
      %c0 = arith.constant 0 : index
      %c0_5 = arith.constant 0 : index
      %11 = vector.load %arg8[%c0, %c0_5] : memref<8x128xf32, #tpu.memory_space<vmem>>, vector<8x128xf32>
      %cst = arith.constant dense<0.000000e+00> : vector<128xf32>
      %12 = vector.multi_reduction <add>, %11, %cst [0] : vector<8x128xf32> to vector<128xf32>
      %13 = vector.shape_cast %12 : vector<128xf32> to vector<1x128xf32>
      %c0_6 = arith.constant 0 : index
      %c0_7 = arith.constant 0 : index
      %14 = vector.load %arg9[%c0_6, %c0_7] : memref<8x128xf32, #tpu.memory_space<vmem>>, vector<8x128xf32>
      %cst_8 = arith.constant dense<0.000000e+00> : vector<128xf32>
      %15 = vector.multi_reduction <add>, %14, %cst_8 [0] : vector<8x128xf32> to vector<128xf32>
      %16 = vector.shape_cast %15 : vector<128xf32> to vector<1x128xf32>
      %cst_9 = arith.constant 3.125000e-02 : f32
      %17 = vector.broadcast %cst_9 : f32 to vector<1x128xf32>
      %18 = arith.mulf %13, %17 : vector<1x128xf32>
      %cst_10 = arith.constant 3.125000e-02 : f32
      %19 = vector.broadcast %cst_10 : f32 to vector<1x128xf32>
      %20 = arith.mulf %16, %19 : vector<1x128xf32>
      %21 = arith.mulf %18, %18 : vector<1x128xf32>
      %22 = arith.subf %20, %21 : vector<1x128xf32>
      %cst_11 = arith.constant 0.000000e+00 : f32
      %23 = vector.broadcast %cst_11 : f32 to vector<1x128xf32>
      %24 = arith.maximumf %22, %23 : vector<1x128xf32>
      %c0_12 = arith.constant 0 : index
      %c0_13 = arith.constant 0 : index
      %25 = vector.load %arg4[%c0_12, %c0_13] : memref<1x128xf32, #tpu.memory_space<vmem>>, vector<1x128xf32>
      %cst_14 = arith.constant 9.99999974E-6 : f32
      %26 = vector.broadcast %cst_14 : f32 to vector<1x128xf32>
      %27 = arith.addf %24, %26 : vector<1x128xf32>
      %28 = math.rsqrt %27 : vector<1x128xf32>
      %29 = arith.mulf %25, %28 : vector<1x128xf32>
      %c0_15 = arith.constant 0 : index
      %c0_16 = arith.constant 0 : index
      %30 = vector.load %arg5[%c0_15, %c0_16] : memref<1x128xf32, #tpu.memory_space<vmem>>, vector<1x128xf32>
      %31 = arith.mulf %18, %29 : vector<1x128xf32>
      %32 = arith.subf %30, %31 : vector<1x128xf32>
      %c0_17 = arith.constant 0 : index
      %c0_18 = arith.constant 0 : index
      %33 = vector.load %arg7[%c0_17, %c0_18] : memref<32x128xf32, #tpu.memory_space<vmem>>, vector<32x128xf32>
      %34 = vector.broadcast %29 : vector<1x128xf32> to vector<32x128xf32>
      %35 = arith.mulf %33, %34 : vector<32x128xf32>
      %36 = vector.broadcast %32 : vector<1x128xf32> to vector<32x128xf32>
      %37 = arith.addf %35, %36 : vector<32x128xf32>
      %cst_19 = arith.constant 0.000000e+00 : f32
      %38 = vector.broadcast %cst_19 : f32 to vector<32x128xf32>
      %39 = arith.cmpf oge, %37, %38 : vector<32x128xf32>
      %cst_20 = arith.constant 2.000000e-01 : f32
      %40 = vector.broadcast %cst_20 : f32 to vector<32x128xf32>
      %41 = arith.mulf %40, %37 : vector<32x128xf32>
      %42 = arith.select %39, %37, %41 : vector<32x128xi1>, vector<32x128xf32>
      %43 = arith.truncf %42 : vector<32x128xf32> to vector<32x128xbf16>
      %c0_21 = arith.constant 0 : index
      %c0_22 = arith.constant 0 : index
      %44 = vector.load %arg6[%c0_21, %c0_22] : memref<32x128xbf16, #tpu.memory_space<vmem>>, vector<32x128xbf16>
      tpu.vector_store %arg6[%c0_21, %c0_22], %43 {strides = array<i32>} : memref<32x128xbf16, #tpu.memory_space<vmem>>, vector<32x128xbf16>,
    } else {
    }
    return
  }
  func.func @transform_0(%arg0: i32, %arg1: i32) -> (i32, i32, i32, i32, i32) {
    %c1_i32 = arith.constant 1 : i32
    %0 = arith.subi %c1_i32, %arg0 : i32
    %1 = arith.muli %arg1, %0 : i32
    %c0_i32 = arith.constant 0 : i32
    %2 = arith.muli %c0_i32, %arg0 : i32
    %3 = arith.addi %1, %2 : i32
    %c0_i32_0 = arith.constant 0 : i32
    %c0_i32_1 = arith.constant 0 : i32
    %c0_i32_2 = arith.constant 0 : i32
    %c0_i32_3 = arith.constant 0 : i32
    %c0_i32_4 = arith.constant 0 : i32
    return %3, %c0_i32_0, %c0_i32_1, %c0_i32_2, %c0_i32_3 : i32, i32, i32, i32, i32
  }
  func.func @transform_1(%arg0: i32, %arg1: i32) -> (i32, i32) {
    %c0_i32 = arith.constant 0 : i32
    %c0_i32_0 = arith.constant 0 : i32
    %c0_i32_1 = arith.constant 0 : i32
    return %c0_i32, %c0_i32_0 : i32, i32
  }
  func.func @transform_2(%arg0: i32, %arg1: i32) -> (i32, i32) {
    %c0_i32 = arith.constant 0 : i32
    %c0_i32_0 = arith.constant 0 : i32
    %c0_i32_1 = arith.constant 0 : i32
    return %c0_i32, %c0_i32_0 : i32, i32
  }
  func.func @transform_3(%arg0: i32, %arg1: i32) -> (i32, i32) {
    %c0_i32 = arith.constant 0 : i32
    %c0_i32_0 = arith.constant 0 : i32
    %c0_i32_1 = arith.constant 0 : i32
    return %c0_i32, %c0_i32_0 : i32, i32
  }
  func.func @transform_4(%arg0: i32, %arg1: i32) -> (i32, i32) {
    %0 = arith.muli %arg0, %arg1 : i32
    %c0_i32 = arith.constant 0 : i32
    %c0_i32_0 = arith.constant 0 : i32
    return %0, %c0_i32 : i32, i32
  }
}

module attributes {stable_mosaic.version = 11 : i64} {
  func.func @_conv_bn_lrelu_kernel(%arg0: i32, %arg1: i32, %arg2: memref<2x3x2x3x256xbf16, #tpu.memory_space<vmem>>, %arg3: memref<2048x128xbf16, #tpu.memory_space<vmem>>, %arg4: memref<1x128xf32, #tpu.memory_space<vmem>>, %arg5: memref<1x128xf32, #tpu.memory_space<vmem>>, %arg6: memref<8x128xbf16, #tpu.memory_space<vmem>>, %arg7: memref<8x128xf32, #tpu.memory_space<vmem>>, %arg8: memref<8x128xf32, #tpu.memory_space<vmem>>, %arg9: memref<8x128xf32, #tpu.memory_space<vmem>>) attributes {dimension_semantics = [#tpu.dimension_semantics<arbitrary>, #tpu.dimension_semantics<arbitrary>], iteration_bounds = array<i64: 2, 1>, scalar_prefetch = 0 : i64, scratch_operands = 3 : i64, tpu.core_type = #tpu.core_type<tc>, window_params = [{transform_indices = @transform_0, window_bounds = array<i64: 2, 3, 2, 3, 256>}, {pipeline_mode = #tpu.pipeline_mode<synchronous>, transform_indices = @transform_1, window_bounds = array<i64: 2048, 128>}, {pipeline_mode = #tpu.pipeline_mode<synchronous>, transform_indices = @transform_2, window_bounds = array<i64: 1, 128>}, {pipeline_mode = #tpu.pipeline_mode<synchronous>, transform_indices = @transform_3, window_bounds = array<i64: 1, 128>}, {transform_indices = @transform_4, window_bounds = array<i64: 8, 128>}]} {
    %c0_i32 = arith.constant 0 : i32
    %0 = arith.cmpi eq, %arg0, %c0_i32 : i32
    %c0_i32_0 = arith.constant 0 : i32
    %1 = arith.cmpi eq, %arg1, %c0_i32_0 : i32
    %2 = arith.andi %0, %1 : i1
    %3 = arith.extui %2 : i1 to i32
    %c0_i32_1 = arith.constant 0 : i32
    %4 = arith.cmpi ne, %3, %c0_i32_1 : i32
    scf.if %4 {
      %cst = arith.constant 0.000000e+00 : f32
      %11 = vector.broadcast %cst : f32 to vector<8x128xf32>
      %c0 = arith.constant 0 : index
      %c0_5 = arith.constant 0 : index
      %12 = vector.load %arg8[%c0, %c0_5] : memref<8x128xf32, #tpu.memory_space<vmem>>, vector<8x128xf32>
      tpu.vector_store %arg8[%c0, %c0_5], %11 {strides = array<i32>} : memref<8x128xf32, #tpu.memory_space<vmem>>, vector<8x128xf32>,
      %cst_6 = arith.constant 0.000000e+00 : f32
      %13 = vector.broadcast %cst_6 : f32 to vector<8x128xf32>
      %c0_7 = arith.constant 0 : index
      %c0_8 = arith.constant 0 : index
      %14 = vector.load %arg9[%c0_7, %c0_8] : memref<8x128xf32, #tpu.memory_space<vmem>>, vector<8x128xf32>
      tpu.vector_store %arg9[%c0_7, %c0_8], %13 {strides = array<i32>} : memref<8x128xf32, #tpu.memory_space<vmem>>, vector<8x128xf32>,
    } else {
    }
    %c0_i32_2 = arith.constant 0 : i32
    %5 = arith.cmpi eq, %arg0, %c0_i32_2 : i32
    %6 = arith.extui %5 : i1 to i32
    %c0_i32_3 = arith.constant 0 : i32
    %7 = arith.cmpi ne, %6, %c0_i32_3 : i32
    scf.if %7 {
      %c0 = arith.constant 0 : index
      %c0_5 = arith.constant 0 : index
      %c0_6 = arith.constant 0 : index
      %c0_7 = arith.constant 0 : index
      %c0_8 = arith.constant 0 : index
      %11 = vector.load %arg2[%c0, %c0_5, %c0_6, %c0_7, %c0_8] : memref<2x3x2x3x256xbf16, #tpu.memory_space<vmem>>, vector<2x3x2x3x256xbf16>
      %12 = vector.extract_strided_slice %11 {offsets = [0, 0, 0, 0, 0], sizes = [2, 2, 1, 2, 128], strides = [1, 1, 1, 1, 1]} : vector<2x3x2x3x256xbf16> to vector<2x2x1x2x128xbf16>
      %13 = vector.shape_cast %12 : vector<2x2x1x2x128xbf16> to vector<2x2x2x128xbf16>
      %14 = vector.extract_strided_slice %11 {offsets = [0, 0, 0, 0, 128], sizes = [2, 2, 1, 2, 128], strides = [1, 1, 1, 1, 1]} : vector<2x3x2x3x256xbf16> to vector<2x2x1x2x128xbf16>
      %15 = vector.shape_cast %14 : vector<2x2x1x2x128xbf16> to vector<2x2x2x128xbf16>
      %16 = vector.extract_strided_slice %11 {offsets = [0, 0, 0, 1, 0], sizes = [2, 2, 1, 2, 128], strides = [1, 1, 1, 1, 1]} : vector<2x3x2x3x256xbf16> to vector<2x2x1x2x128xbf16>
      %17 = vector.shape_cast %16 : vector<2x2x1x2x128xbf16> to vector<2x2x2x128xbf16>
      %18 = vector.extract_strided_slice %11 {offsets = [0, 0, 0, 1, 128], sizes = [2, 2, 1, 2, 128], strides = [1, 1, 1, 1, 1]} : vector<2x3x2x3x256xbf16> to vector<2x2x1x2x128xbf16>
      %19 = vector.shape_cast %18 : vector<2x2x1x2x128xbf16> to vector<2x2x2x128xbf16>
      %20 = vector.extract_strided_slice %11 {offsets = [0, 0, 1, 0, 0], sizes = [2, 2, 1, 2, 128], strides = [1, 1, 1, 1, 1]} : vector<2x3x2x3x256xbf16> to vector<2x2x1x2x128xbf16>
      %21 = vector.shape_cast %20 : vector<2x2x1x2x128xbf16> to vector<2x2x2x128xbf16>
      %22 = vector.extract_strided_slice %11 {offsets = [0, 0, 1, 0, 128], sizes = [2, 2, 1, 2, 128], strides = [1, 1, 1, 1, 1]} : vector<2x3x2x3x256xbf16> to vector<2x2x1x2x128xbf16>
      %23 = vector.shape_cast %22 : vector<2x2x1x2x128xbf16> to vector<2x2x2x128xbf16>
      %24 = vector.extract_strided_slice %11 {offsets = [0, 0, 1, 1, 0], sizes = [2, 2, 1, 2, 128], strides = [1, 1, 1, 1, 1]} : vector<2x3x2x3x256xbf16> to vector<2x2x1x2x128xbf16>
      %25 = vector.shape_cast %24 : vector<2x2x1x2x128xbf16> to vector<2x2x2x128xbf16>
      %26 = vector.extract_strided_slice %11 {offsets = [0, 0, 1, 1, 128], sizes = [2, 2, 1, 2, 128], strides = [1, 1, 1, 1, 1]} : vector<2x3x2x3x256xbf16> to vector<2x2x1x2x128xbf16>
      %27 = vector.shape_cast %26 : vector<2x2x1x2x128xbf16> to vector<2x2x2x128xbf16>
      %28 = vector.extract_strided_slice %11 {offsets = [0, 1, 0, 0, 0], sizes = [2, 2, 1, 2, 128], strides = [1, 1, 1, 1, 1]} : vector<2x3x2x3x256xbf16> to vector<2x2x1x2x128xbf16>
      %29 = vector.shape_cast %28 : vector<2x2x1x2x128xbf16> to vector<2x2x2x128xbf16>
      %30 = vector.extract_strided_slice %11 {offsets = [0, 1, 0, 0, 128], sizes = [2, 2, 1, 2, 128], strides = [1, 1, 1, 1, 1]} : vector<2x3x2x3x256xbf16> to vector<2x2x1x2x128xbf16>
      %31 = vector.shape_cast %30 : vector<2x2x1x2x128xbf16> to vector<2x2x2x128xbf16>
      %32 = vector.extract_strided_slice %11 {offsets = [0, 1, 0, 1, 0], sizes = [2, 2, 1, 2, 128], strides = [1, 1, 1, 1, 1]} : vector<2x3x2x3x256xbf16> to vector<2x2x1x2x128xbf16>
      %33 = vector.shape_cast %32 : vector<2x2x1x2x128xbf16> to vector<2x2x2x128xbf16>
      %34 = vector.extract_strided_slice %11 {offsets = [0, 1, 0, 1, 128], sizes = [2, 2, 1, 2, 128], strides = [1, 1, 1, 1, 1]} : vector<2x3x2x3x256xbf16> to vector<2x2x1x2x128xbf16>
      %35 = vector.shape_cast %34 : vector<2x2x1x2x128xbf16> to vector<2x2x2x128xbf16>
      %36 = vector.extract_strided_slice %11 {offsets = [0, 1, 1, 0, 0], sizes = [2, 2, 1, 2, 128], strides = [1, 1, 1, 1, 1]} : vector<2x3x2x3x256xbf16> to vector<2x2x1x2x128xbf16>
      %37 = vector.shape_cast %36 : vector<2x2x1x2x128xbf16> to vector<2x2x2x128xbf16>
      %38 = vector.extract_strided_slice %11 {offsets = [0, 1, 1, 0, 128], sizes = [2, 2, 1, 2, 128], strides = [1, 1, 1, 1, 1]} : vector<2x3x2x3x256xbf16> to vector<2x2x1x2x128xbf16>
      %39 = vector.shape_cast %38 : vector<2x2x1x2x128xbf16> to vector<2x2x2x128xbf16>
      %40 = vector.extract_strided_slice %11 {offsets = [0, 1, 1, 1, 0], sizes = [2, 2, 1, 2, 128], strides = [1, 1, 1, 1, 1]} : vector<2x3x2x3x256xbf16> to vector<2x2x1x2x128xbf16>
      %41 = vector.shape_cast %40 : vector<2x2x1x2x128xbf16> to vector<2x2x2x128xbf16>
      %42 = vector.extract_strided_slice %11 {offsets = [0, 1, 1, 1, 128], sizes = [2, 2, 1, 2, 128], strides = [1, 1, 1, 1, 1]} : vector<2x3x2x3x256xbf16> to vector<2x2x1x2x128xbf16>
      %43 = vector.shape_cast %42 : vector<2x2x1x2x128xbf16> to vector<2x2x2x128xbf16>
      %44 = tpu.concatenate %13, %15, %17, %19, %21, %23, %25, %27, %29, %31, %33, %35, %37, %39, %41, %43 in 3 : vector<2x2x2x128xbf16>, vector<2x2x2x128xbf16>, vector<2x2x2x128xbf16>, vector<2x2x2x128xbf16>, vector<2x2x2x128xbf16>, vector<2x2x2x128xbf16>, vector<2x2x2x128xbf16>, vector<2x2x2x128xbf16>, vector<2x2x2x128xbf16>, vector<2x2x2x128xbf16>, vector<2x2x2x128xbf16>, vector<2x2x2x128xbf16>, vector<2x2x2x128xbf16>, vector<2x2x2x128xbf16>, vector<2x2x2x128xbf16>, vector<2x2x2x128xbf16> -> vector<2x2x2x2048xbf16>
      %45 = vector.shape_cast %44 : vector<2x2x2x2048xbf16> to vector<8x2048xbf16>
      %c0_9 = arith.constant 0 : index
      %c0_10 = arith.constant 0 : index
      %46 = vector.load %arg3[%c0_9, %c0_10] : memref<2048x128xbf16, #tpu.memory_space<vmem>>, vector<2048x128xbf16>
      %cst = arith.constant dense<0.000000e+00> : vector<8x128xf32>
      %47 = tpu.matmul %45, %46, %cst {dimension_numbers = #tpu.dot_dimension_numbers<[1], [0], [0], [1], [0, 0, 1, 1], [], []>} : vector<8x2048xbf16>, vector<2048x128xbf16>, vector<8x128xf32> -> vector<8x128xf32>
      %c0_11 = arith.constant 0 : index
      %c0_12 = arith.constant 0 : index
      %48 = vector.load %arg7[%c0_11, %c0_12] : memref<8x128xf32, #tpu.memory_space<vmem>>, vector<8x128xf32>
      tpu.vector_store %arg7[%c0_11, %c0_12], %47 {strides = array<i32>} : memref<8x128xf32, #tpu.memory_space<vmem>>, vector<8x128xf32>,
      %49 = vector.shape_cast %47 : vector<8x128xf32> to vector<1x8x128xf32>
      %c0_13 = arith.constant 0 : index
      %c0_14 = arith.constant 0 : index
      %50 = vector.load %arg8[%c0_13, %c0_14] : memref<8x128xf32, #tpu.memory_space<vmem>>, vector<8x128xf32>
      %cst_15 = arith.constant dense<0.000000e+00> : vector<8x128xf32>
      %51 = vector.multi_reduction <add>, %49, %cst_15 [0] : vector<1x8x128xf32> to vector<8x128xf32>
      %52 = arith.addf %50, %51 : vector<8x128xf32>
      %c0_16 = arith.constant 0 : index
      %c0_17 = arith.constant 0 : index
      %53 = vector.load %arg8[%c0_16, %c0_17] : memref<8x128xf32, #tpu.memory_space<vmem>>, vector<8x128xf32>
      tpu.vector_store %arg8[%c0_16, %c0_17], %52 {strides = array<i32>} : memref<8x128xf32, #tpu.memory_space<vmem>>, vector<8x128xf32>,
      %c0_18 = arith.constant 0 : index
      %c0_19 = arith.constant 0 : index
      %54 = vector.load %arg9[%c0_18, %c0_19] : memref<8x128xf32, #tpu.memory_space<vmem>>, vector<8x128xf32>
      %55 = arith.mulf %49, %49 : vector<1x8x128xf32>
      %cst_20 = arith.constant dense<0.000000e+00> : vector<8x128xf32>
      %56 = vector.multi_reduction <add>, %55, %cst_20 [0] : vector<1x8x128xf32> to vector<8x128xf32>
      %57 = arith.addf %54, %56 : vector<8x128xf32>
      %c0_21 = arith.constant 0 : index
      %c0_22 = arith.constant 0 : index
      %58 = vector.load %arg9[%c0_21, %c0_22] : memref<8x128xf32, #tpu.memory_space<vmem>>, vector<8x128xf32>
      tpu.vector_store %arg9[%c0_21, %c0_22], %57 {strides = array<i32>} : memref<8x128xf32, #tpu.memory_space<vmem>>, vector<8x128xf32>,
    } else {
    }
    %c1_i32 = arith.constant 1 : i32
    %8 = arith.cmpi eq, %arg0, %c1_i32 : i32
    %9 = arith.extui %8 : i1 to i32
    %c0_i32_4 = arith.constant 0 : i32
    %10 = arith.cmpi ne, %9, %c0_i32_4 : i32
    scf.if %10 {
      %c0 = arith.constant 0 : index
      %c0_5 = arith.constant 0 : index
      %11 = vector.load %arg8[%c0, %c0_5] : memref<8x128xf32, #tpu.memory_space<vmem>>, vector<8x128xf32>
      %cst = arith.constant dense<0.000000e+00> : vector<128xf32>
      %12 = vector.multi_reduction <add>, %11, %cst [0] : vector<8x128xf32> to vector<128xf32>
      %13 = vector.shape_cast %12 : vector<128xf32> to vector<1x128xf32>
      %c0_6 = arith.constant 0 : index
      %c0_7 = arith.constant 0 : index
      %14 = vector.load %arg9[%c0_6, %c0_7] : memref<8x128xf32, #tpu.memory_space<vmem>>, vector<8x128xf32>
      %cst_8 = arith.constant dense<0.000000e+00> : vector<128xf32>
      %15 = vector.multi_reduction <add>, %14, %cst_8 [0] : vector<8x128xf32> to vector<128xf32>
      %16 = vector.shape_cast %15 : vector<128xf32> to vector<1x128xf32>
      %cst_9 = arith.constant 1.250000e-01 : f32
      %17 = vector.broadcast %cst_9 : f32 to vector<1x128xf32>
      %18 = arith.mulf %13, %17 : vector<1x128xf32>
      %cst_10 = arith.constant 1.250000e-01 : f32
      %19 = vector.broadcast %cst_10 : f32 to vector<1x128xf32>
      %20 = arith.mulf %16, %19 : vector<1x128xf32>
      %21 = arith.mulf %18, %18 : vector<1x128xf32>
      %22 = arith.subf %20, %21 : vector<1x128xf32>
      %cst_11 = arith.constant 0.000000e+00 : f32
      %23 = vector.broadcast %cst_11 : f32 to vector<1x128xf32>
      %24 = arith.maximumf %22, %23 : vector<1x128xf32>
      %c0_12 = arith.constant 0 : index
      %c0_13 = arith.constant 0 : index
      %25 = vector.load %arg4[%c0_12, %c0_13] : memref<1x128xf32, #tpu.memory_space<vmem>>, vector<1x128xf32>
      %cst_14 = arith.constant 9.99999974E-6 : f32
      %26 = vector.broadcast %cst_14 : f32 to vector<1x128xf32>
      %27 = arith.addf %24, %26 : vector<1x128xf32>
      %28 = math.rsqrt %27 : vector<1x128xf32>
      %29 = arith.mulf %25, %28 : vector<1x128xf32>
      %c0_15 = arith.constant 0 : index
      %c0_16 = arith.constant 0 : index
      %30 = vector.load %arg5[%c0_15, %c0_16] : memref<1x128xf32, #tpu.memory_space<vmem>>, vector<1x128xf32>
      %31 = arith.mulf %18, %29 : vector<1x128xf32>
      %32 = arith.subf %30, %31 : vector<1x128xf32>
      %c0_17 = arith.constant 0 : index
      %c0_18 = arith.constant 0 : index
      %33 = vector.load %arg7[%c0_17, %c0_18] : memref<8x128xf32, #tpu.memory_space<vmem>>, vector<8x128xf32>
      %34 = vector.broadcast %29 : vector<1x128xf32> to vector<8x128xf32>
      %35 = arith.mulf %33, %34 : vector<8x128xf32>
      %36 = vector.broadcast %32 : vector<1x128xf32> to vector<8x128xf32>
      %37 = arith.addf %35, %36 : vector<8x128xf32>
      %cst_19 = arith.constant 0.000000e+00 : f32
      %38 = vector.broadcast %cst_19 : f32 to vector<8x128xf32>
      %39 = arith.cmpf oge, %37, %38 : vector<8x128xf32>
      %cst_20 = arith.constant 2.000000e-01 : f32
      %40 = vector.broadcast %cst_20 : f32 to vector<8x128xf32>
      %41 = arith.mulf %40, %37 : vector<8x128xf32>
      %42 = arith.select %39, %37, %41 : vector<8x128xi1>, vector<8x128xf32>
      %43 = arith.truncf %42 : vector<8x128xf32> to vector<8x128xbf16>
      %c0_21 = arith.constant 0 : index
      %c0_22 = arith.constant 0 : index
      %44 = vector.load %arg6[%c0_21, %c0_22] : memref<8x128xbf16, #tpu.memory_space<vmem>>, vector<8x128xbf16>
      tpu.vector_store %arg6[%c0_21, %c0_22], %43 {strides = array<i32>} : memref<8x128xbf16, #tpu.memory_space<vmem>>, vector<8x128xbf16>,
    } else {
    }
    return
  }
  func.func @transform_0(%arg0: i32, %arg1: i32) -> (i32, i32, i32, i32, i32) {
    %c1_i32 = arith.constant 1 : i32
    %0 = arith.subi %c1_i32, %arg0 : i32
    %1 = arith.muli %arg1, %0 : i32
    %c0_i32 = arith.constant 0 : i32
    %2 = arith.muli %c0_i32, %arg0 : i32
    %3 = arith.addi %1, %2 : i32
    %c0_i32_0 = arith.constant 0 : i32
    %c0_i32_1 = arith.constant 0 : i32
    %c0_i32_2 = arith.constant 0 : i32
    %c0_i32_3 = arith.constant 0 : i32
    %c0_i32_4 = arith.constant 0 : i32
    return %3, %c0_i32_0, %c0_i32_1, %c0_i32_2, %c0_i32_3 : i32, i32, i32, i32, i32
  }
  func.func @transform_1(%arg0: i32, %arg1: i32) -> (i32, i32) {
    %c0_i32 = arith.constant 0 : i32
    %c0_i32_0 = arith.constant 0 : i32
    %c0_i32_1 = arith.constant 0 : i32
    return %c0_i32, %c0_i32_0 : i32, i32
  }
  func.func @transform_2(%arg0: i32, %arg1: i32) -> (i32, i32) {
    %c0_i32 = arith.constant 0 : i32
    %c0_i32_0 = arith.constant 0 : i32
    %c0_i32_1 = arith.constant 0 : i32
    return %c0_i32, %c0_i32_0 : i32, i32
  }
  func.func @transform_3(%arg0: i32, %arg1: i32) -> (i32, i32) {
    %c0_i32 = arith.constant 0 : i32
    %c0_i32_0 = arith.constant 0 : i32
    %c0_i32_1 = arith.constant 0 : i32
    return %c0_i32, %c0_i32_0 : i32, i32
  }
  func.func @transform_4(%arg0: i32, %arg1: i32) -> (i32, i32) {
    %0 = arith.muli %arg0, %arg1 : i32
    %c0_i32 = arith.constant 0 : i32
    %c0_i32_0 = arith.constant 0 : i32
    return %0, %c0_i32 : i32, i32
  }
}

module attributes {stable_mosaic.version = 11 : i64} {
  func.func @_fc_kernel(%arg0: i32, %arg1: memref<16x512xbf16, #tpu.memory_space<vmem>>, %arg2: memref<512x128xbf16, #tpu.memory_space<vmem>>, %arg3: memref<1x128xf32, #tpu.memory_space<vmem>>, %arg4: memref<16x128xf32, #tpu.memory_space<vmem>>, %arg5: memref<16x128xf32, #tpu.memory_space<vmem>>) attributes {dimension_semantics = [#tpu.dimension_semantics<arbitrary>], iteration_bounds = array<i64: 1>, scalar_prefetch = 0 : i64, scratch_operands = 1 : i64, tpu.core_type = #tpu.core_type<tc>, window_params = [{transform_indices = @transform_0, window_bounds = array<i64: 16, 512>}, {transform_indices = @transform_1, window_bounds = array<i64: 512, 128>}, {pipeline_mode = #tpu.pipeline_mode<synchronous>, transform_indices = @transform_2, window_bounds = array<i64: 1, 128>}, {pipeline_mode = #tpu.pipeline_mode<synchronous>, transform_indices = @transform_3, window_bounds = array<i64: 16, 128>}]} {
    %c0_i32 = arith.constant 0 : i32
    %0 = arith.cmpi eq, %arg0, %c0_i32 : i32
    %1 = arith.extui %0 : i1 to i32
    %c0_i32_0 = arith.constant 0 : i32
    %2 = arith.cmpi ne, %1, %c0_i32_0 : i32
    scf.if %2 {
      %cst_10 = arith.constant 0.000000e+00 : f32
      %12 = vector.broadcast %cst_10 : f32 to vector<16x128xf32>
      %c0_11 = arith.constant 0 : index
      %c0_12 = arith.constant 0 : index
      %13 = vector.load %arg5[%c0_11, %c0_12] : memref<16x128xf32, #tpu.memory_space<vmem>>, vector<16x128xf32>
      tpu.vector_store %arg5[%c0_11, %c0_12], %12 {strides = array<i32>} : memref<16x128xf32, #tpu.memory_space<vmem>>, vector<16x128xf32>,
    } else {
    }
    %c0 = arith.constant 0 : index
    %c0_1 = arith.constant 0 : index
    %3 = vector.load %arg5[%c0, %c0_1] : memref<16x128xf32, #tpu.memory_space<vmem>>, vector<16x128xf32>
    %c0_2 = arith.constant 0 : index
    %c0_3 = arith.constant 0 : index
    %4 = vector.load %arg1[%c0_2, %c0_3] : memref<16x512xbf16, #tpu.memory_space<vmem>>, vector<16x512xbf16>
    %c0_4 = arith.constant 0 : index
    %c0_5 = arith.constant 0 : index
    %5 = vector.load %arg2[%c0_4, %c0_5] : memref<512x128xbf16, #tpu.memory_space<vmem>>, vector<512x128xbf16>
    %cst = arith.constant dense<0.000000e+00> : vector<16x128xf32>
    %6 = tpu.matmul %4, %5, %cst {dimension_numbers = #tpu.dot_dimension_numbers<[1], [0], [0], [1], [0, 0, 1, 1], [], []>} : vector<16x512xbf16>, vector<512x128xbf16>, vector<16x128xf32> -> vector<16x128xf32>
    %7 = arith.addf %3, %6 : vector<16x128xf32>
    %c0_6 = arith.constant 0 : index
    %c0_7 = arith.constant 0 : index
    %8 = vector.load %arg5[%c0_6, %c0_7] : memref<16x128xf32, #tpu.memory_space<vmem>>, vector<16x128xf32>
    tpu.vector_store %arg5[%c0_6, %c0_7], %7 {strides = array<i32>} : memref<16x128xf32, #tpu.memory_space<vmem>>, vector<16x128xf32>,
    %c0_i32_8 = arith.constant 0 : i32
    %9 = arith.cmpi eq, %arg0, %c0_i32_8 : i32
    %10 = arith.extui %9 : i1 to i32
    %c0_i32_9 = arith.constant 0 : i32
    %11 = arith.cmpi ne, %10, %c0_i32_9 : i32
    scf.if %11 {
      %c0_10 = arith.constant 0 : index
      %c0_11 = arith.constant 0 : index
      %12 = vector.load %arg5[%c0_10, %c0_11] : memref<16x128xf32, #tpu.memory_space<vmem>>, vector<16x128xf32>
      %c0_12 = arith.constant 0 : index
      %c0_13 = arith.constant 0 : index
      %13 = vector.load %arg3[%c0_12, %c0_13] : memref<1x128xf32, #tpu.memory_space<vmem>>, vector<1x128xf32>
      %14 = vector.broadcast %13 : vector<1x128xf32> to vector<16x128xf32>
      %15 = arith.addf %12, %14 : vector<16x128xf32>
      %c0_14 = arith.constant 0 : index
      %c0_15 = arith.constant 0 : index
      %16 = vector.load %arg4[%c0_14, %c0_15] : memref<16x128xf32, #tpu.memory_space<vmem>>, vector<16x128xf32>
      tpu.vector_store %arg4[%c0_14, %c0_15], %15 {strides = array<i32>} : memref<16x128xf32, #tpu.memory_space<vmem>>, vector<16x128xf32>,
    } else {
    }
    return
  }
  func.func @transform_0(%arg0: i32) -> (i32, i32) {
    %c0_i32 = arith.constant 0 : i32
    %c0_i32_0 = arith.constant 0 : i32
    return %c0_i32, %arg0 : i32, i32
  }
  func.func @transform_1(%arg0: i32) -> (i32, i32) {
    %c0_i32 = arith.constant 0 : i32
    %c0_i32_0 = arith.constant 0 : i32
    return %arg0, %c0_i32 : i32, i32
  }
  func.func @transform_2(%arg0: i32) -> (i32, i32) {
    %c0_i32 = arith.constant 0 : i32
    %c0_i32_0 = arith.constant 0 : i32
    %c0_i32_1 = arith.constant 0 : i32
    return %c0_i32, %c0_i32_0 : i32, i32
  }
  func.func @transform_3(%arg0: i32) -> (i32, i32) {
    %c0_i32 = arith.constant 0 : i32
    %c0_i32_0 = arith.constant 0 : i32
    %c0_i32_1 = arith.constant 0 : i32
    return %c0_i32, %c0_i32_0 : i32, i32
  }
}

</mosaic_0001>

<bundles_post_ra>
// kernel: tpu_custom_call.1
= control target key start
LH: loop header
LB: loop body
LE: loop exit
PB: predicated region body
PF: predicated region fallthrough
CT: control target
= control target key end

     0   :  { %7 = vsyncpa [#allocation3], 0  ;;  %s479_s0 = inlined_call_operand.hbm [shape: f32[8,128], index: 0, kind: input, shape index: {}]   ;;  %s480_s1 = inlined_call_operand.hbm [shape: f32[8,128], index: 1, kind: input, shape index: {}]   ;;  %s481_s2 = inlined_call_operand.hbm [shape: f32[8,128], index: 2, kind: output, shape index: {}]  }
   0x1   :  { %8 = vsyncpa [#allocation6], 0 }
   0x2   :  { %9 = vsyncpa [#allocation4], 0  ;;  %s363_s9 = smov 0  }
   0x3 LB: > { %s196_s10 = sadd.s32 4294967295, %s343_s9   ;;  %p197_p0 = scmp.ge.s32.totalorder %s343_s9, 1  ;;  %s343_s9 = sphi %s363_s9, %s15_s9  }
   0x4   : > { %p83_p1 = scmp.lt.s32.totalorder %s343_s9, 3  ;;  %p373_p2 = scmp.eq.s32.totalorder %s196_s10, 0 }
   0x5   : > { %s345_s13 = smov [#allocation2]   ;;  %s346_s15 = smov [#allocation5]  }
   0x6   : > { %s485_s11 = scalar_select %p373_p2, 1, 0 }
   0x7   : > { %p377_p3 = pnand %p197_p0, %p83_p1  ;;  %s96_s14 = sshll.u32 %s345_s13, 4  ;;  %s97_s14 = int_to_ptr.vmem [resolvable:$true] %s96_s14 }
   0x8   : > { %s107_s16 = sshll.u32 %s346_s15, 4  ;;  %s243_s20 = scalar_lea.hbm %s479_s0, 128  ;;  %s389_s16 = int_to_ptr.vmem [resolvable:$true] %s107_s16 }
   0x9   : > { %s486_s12 = scalar_select %p377_p3, 1, 0 }
   0xa   : > { %p219_p4 = pneg %p377_p3  ;;  %p244_p6 = scmp.ne.s32.totalorder %s479_s0, %s243_s20 }
   0xb   : > { %p250_p10 = scmp.lt.u32.totalorder %s243_s20, %s479_s0 }
   0xc   : > { %p385_p5 = pnand %p373_p2, %p219_p4 }
   0xe   : > { %p245_p7 = pneg %p385_p5 }
  0x10   : > { %p246_p8 = pnand %p245_p7, %p244_p6 }
  0x12   : > { %p247_p9 = pneg %p246_p8 }
  0x14   : > { %p252_p11 = pnand %p250_p10, %p247_p9 }
  0x16   : > { %255 = shalt.err (!%p252_p11)
}
  0x17   : > { %s256_s25 = scalar_lea.vmem %s97_s14, 128  ;;  %p264_p1 = scmp.lt.s32.totalorder %s97_s14, %s97_s14 }
  0x18   : > { %p257_p12 = scmp.ne.s32.totalorder %s97_s14, %s256_s25  ;;  %p265_p4 = scmp.lt.s32.totalorder %s256_s25, %s256_s25 }
  0x1a   : > { %p259_p13 = pnand %p257_p12, %p245_p7  ;;  %p266_p2 = por %p265_p4, %p264_p1 }
  0x1c   : > { %p260_p0 = pneg %p259_p13 }
  0x1e   : > { %p267_p3 = pnand %p266_p2, %p260_p0 }
  0x20   : > { %270 = shalt.err (!%p267_p3)
}
  0x21   : > { %222 = dma.hbm_to_vmem [thread:$0]  (!%p385_p5), %s479_s0, 128, %s97_s14, [#allocation3]  }
  0x22   : > { %s271_s30 = scalar_lea.hbm %s480_s1, 128 }
  0x23   : > { %p272_p6 = scmp.ne.s32.totalorder %s480_s1, %s271_s30  ;;  %p278_p3 = scmp.lt.u32.totalorder %s271_s30, %s480_s1 }
  0x25   : > { %p274_p8 = pnand %p272_p6, %p245_p7 }
  0x27   : > { %p275_p2 = pneg %p274_p8 }
  0x29   : > { %p280_p9 = pnand %p278_p3, %p275_p2 }
  0x2b   : > { %283 = shalt.err (!%p280_p9)
}
  0x2c   : > { %s284_s7 = scalar_lea.vmem %s389_s16, 128  ;;  %p292_p13 = scmp.lt.s32.totalorder %s389_s16, %s389_s16 }
  0x2d   : > { %p285_p10 = scmp.ne.s32.totalorder %s389_s16, %s284_s7  ;;  %p293_p0 = scmp.lt.s32.totalorder %s284_s7, %s284_s7 }
  0x2f   : > { %p287_p11 = pnand %p285_p10, %p245_p7  ;;  %p294_p1 = por %p293_p0, %p292_p13 }
  0x31   : > { %p288_p12 = pneg %p287_p11 }
  0x33   : > { %p295_p4 = pnand %p294_p1, %p288_p12 }
  0x35   : > { %298 = shalt.err (!%p295_p4)
}
  0x36   : > { %225 = dma.hbm_to_vmem [thread:$0]  (!%p385_p5), %s480_s1, 128, %s389_s16, [#allocation6]  }
  0x37   : > { %p488_p6 = scmp.ne.s32.totalorder %s486_s12, 0 }
  0x38   : > { %p489_p8 = scmp.ne.s32.totalorder (!%p488_p6), %s485_s11, 0 }
  0x39   : > { %120 = sbr.rel (%p488_p6) target bundleno = 92 (0x5c), region = 28 }
  0x40   : > { %330 = dma.done.wait (%p489_p8), [#allocation3], 128  }
  0x41   : > { %332 = vsyncadd (%p489_p8), [#allocation3], 4294967168 }
  0x42   : > { %334 = dma.done.wait (%p489_p8), [#allocation6], 128  }
  0x43   : > { %336 = vsyncadd (%p489_p8), [#allocation6], 4294967168  ;;  %s347_s14 = smov [#allocation7]   ;;  %v136_v0 = vld [vmem:[#allocation2] sm:$0xff]  ;;  %v137_v1 = vld [vmem:[#allocation5] sm:$0xff]  ;;  %p450_p5 = scmp.eq.s32.totalorder %s196_s10, 1 }
  0x44   : > { %s147_s15 = sshll.u32 %s347_s14, 4  ;;  %v138_v2 = vadd.f32 %v137_v1, %v136_v0  ;;  %s148_s15 = int_to_ptr.vmem [resolvable:$true] %s147_s15 }
  0x45   : > { %s299_s16 = scalar_lea.vmem %s148_s15, 128  ;;  %p306_p9 = scmp.lt.s32.totalorder %s148_s15, %s148_s15 }
  0x46   : > { %139 = vst [vmem:[#allocation7] sm:$0xff] %v138_v2  ;;  %p300_p7 = scmp.ne.s32.totalorder %s148_s15, %s299_s16  ;;  %p307_p10 = scmp.lt.s32.totalorder %s299_s16, %s299_s16 }
  0x48   : > { %p301_p2 = pnand %p300_p7, %p450_p5  ;;  %p308_p11 = por %p307_p10, %p306_p9 }
  0x4a   : > { %p302_p3 = pneg %p301_p2 }
  0x4c   : > { %p309_p12 = pnand %p308_p11, %p302_p3 }
  0x4e   : > { %312 = shalt.err (!%p309_p12)
}
  0x4f   : > { %s313_s10 = scalar_lea.hbm %s481_s2, 128 }
  0x50   : > { %p314_p13 = scmp.ne.s32.totalorder %s481_s2, %s313_s10  ;;  %p319_p4 = scmp.lt.u32.totalorder %s313_s10, %s481_s2 }
  0x52   : > { %p315_p0 = pnand %p314_p13, %p450_p5 }
  0x54   : > { %p316_p1 = pneg %p315_p0 }
  0x56   : > { %p321_p6 = pnand %p319_p4, %p316_p1 }
  0x58   : > { %324 = shalt.err (!%p321_p6)
}
  0x59   : > { %216 = dma.vmem_to_hbm [thread:$0]  (%p450_p5), %s148_s15, 128, %s481_s2, [#allocation4]  }
  0x5a   : > { %338 = dma.done.wait (%p450_p5), [#allocation4], 128  }
  0x5b   : > { %340 = vsyncadd (%p450_p5), [#allocation4], 4294967168 }
  0x5c PF: > { %s15_s9 = sadd.s32 1, %s343_s9  }
  0x5d   : > { %p12_p8 = scmp.ge.s32.totalorder %s15_s9, 4  }
  0x5f   :  { %14 = sbr.rel (!%p12_p8) target bundleno = 3 (0x3), region = 61 }
  0x66   :  { %160 = vsyncpa [#allocation3], 1 }
  0x67   :  { %162 = vsyncpa [#allocation3 + $0x1], 1 }
  0x68   :  { %163 = vsyncpa [#allocation6], 1 }
  0x69   :  { %164 = vsyncpa [#allocation4], 1 }
  0x6a   :  { %166 = vsyncpa [#allocation4 + $0x1], 1 }

// kernel: encoder_forward.7
= control target key start
LH: loop header
LB: loop body
LE: loop exit
PB: predicated region body
PF: predicated region fallthrough
CT: control target
= control target key end

     0   :  { %s665_s1 = inlined_call_operand.vmem [shape: bf16[512,128], index: 1, kind: input, shape index: {}]   ;;  %s666_s0 = inlined_call_operand.vmem [shape: bf16[16,512], index: 0, kind: input, shape index: {}]   ;;  %s667_s2 = inlined_call_operand.vmem [shape: f32[1,128], index: 2, kind: input, shape index: {}]   ;;  %s668_s3 = inlined_call_operand.vmem [shape: f32[16,128], index: 3, kind: output, shape index: {}]  }
   0x1   :  { %v490_v0 = vld [vmem:[%s665_s1 + $0x40] sm:$0xff]   ;;  %v494_v4 = vld [vmem:[%s665_s1 + $0x48] sm:$0xff]   ;;  %v498_v8 = vld [vmem:[%s665_s1 + $0x50] sm:$0xff]  }
   0x2   :  { %v491_v1 = vld [vmem:[%s665_s1 + $0xc0] sm:$0xff]   ;;  %446 = vmatprep.subr.bf16.mxu0 %v490_v0  ;;  %v495_v5 = vld [vmem:[%s665_s1 + $0xc8] sm:$0xff]   ;;  %v499_v9 = vld [vmem:[%s665_s1 + $0xd0] sm:$0xff]  }
   0x3   :  { %v492_v2 = vld [vmem:[%s665_s1] sm:$0xff]   ;;  %468 = vmatprep.subr.bf16.mxu1 %v491_v1  ;;  %v496_v6 = vld [vmem:[%s665_s1 + $0x8] sm:$0xff]   ;;  %v500_v10 = vld [vmem:[%s665_s1 + $0x10] sm:$0xff]  }
   0x4   :  { %v493_v3 = vld [vmem:[%s665_s1 + $0x80] sm:$0xff]   ;;  %447 = vmatpush3.bf16.msra.mxu0 %v492_v2  ;;  %v497_v7 = vld [vmem:[%s665_s1 + $0x88] sm:$0xff]   ;;  %v501_v11 = vld [vmem:[%s665_s1 + $0x90] sm:$0xff]  }
   0x5   :  { %469 = vmatpush3.bf16.msra.mxu1 %v493_v3  ;;  %448 = vmatprep.subr.bf16.mxu0 %v494_v4  ;;  %v502_v12 = vld [vmem:[%s665_s1 + $0x58] sm:$0xff]   ;;  %v506_v16 = vld [vmem:[%s665_s1 + $0x60] sm:$0xff]   ;;  %v510_v20 = vld [vmem:[%s665_s1 + $0x68] sm:$0xff]  }
   0x6   :  { %470 = vmatprep.subr.bf16.mxu1 %v495_v5  ;;  %v503_v13 = vld [vmem:[%s665_s1 + $0xd8] sm:$0xff]   ;;  %v507_v17 = vld [vmem:[%s665_s1 + $0xe0] sm:$0xff]   ;;  %v511_v21 = vld [vmem:[%s665_s1 + $0xe8] sm:$0xff]  }
   0x7   :  { %v504_v14 = vld [vmem:[%s665_s1 + $0x18] sm:$0xff]   ;;  %v508_v18 = vld [vmem:[%s665_s1 + $0x20] sm:$0xff]   ;;  %v512_v22 = vld [vmem:[%s665_s1 + $0x28] sm:$0xff]  }
   0x8   :  { %449 = vmatpush3.bf16.msra.mxu0 %v496_v6  ;;  %v505_v15 = vld [vmem:[%s665_s1 + $0x98] sm:$0xff]   ;;  %v509_v19 = vld [vmem:[%s665_s1 + $0xa0] sm:$0xff]   ;;  %v513_v23 = vld [vmem:[%s665_s1 + $0xa8] sm:$0xff]  }
   0x9   :  { %471 = vmatpush3.bf16.msra.mxu1 %v497_v7  ;;  %450 = vmatprep.subr.bf16.mxu0 %v498_v8  ;;  %v514_v24 = vld [vmem:[%s665_s1 + $0x70] sm:$0xff]   ;;  %v518_v28 = vld [vmem:[%s665_s1 + $0x78] sm:$0xff]   ;;  %v445_v45 = vld [vmem:[%s667_s2] ss:$0 sm:$0xff] }
   0xa   :  { %472 = vmatprep.subr.bf16.mxu1 %v499_v9  ;;  %v515_v25 = vld [vmem:[%s665_s1 + $0xf0] sm:$0xff]   ;;  %v519_v29 = vld [vmem:[%s665_s1 + $0xf8] sm:$0xff]  }
   0xb   :  { %v516_v26 = vld [vmem:[%s665_s1 + $0x30] sm:$0xff]   ;;  %v520_v30 = vld [vmem:[%s665_s1 + $0x38] sm:$0xff]  }
   0xc   :  { %451 = vmatpush3.bf16.msra.mxu0 %v500_v10  ;;  %v517_v27 = vld [vmem:[%s665_s1 + $0xb0] sm:$0xff]   ;;  %v521_v31 = vld [vmem:[%s665_s1 + $0xb8] sm:$0xff]  }
   0xd   :  { %473 = vmatpush3.bf16.msra.mxu1 %v501_v11  ;;  %452 = vmatprep.subr.bf16.mxu0 %v502_v12  ;;  %v522_v32 = vld [vmem:[%s666_s0] ss:$16 sps:$4 sm:$0xff]   ;;  %v524_v33 = vld [vmem:[%s666_s0 + $0x4] ss:$16 sps:$4 sm:$0xff]   ;;  %v525_v34 = vld [vmem:[%s666_s0 + $0x8] ss:$16 sps:$4 sm:$0xff]  }
   0xe   :  { %474 = vmatprep.subr.bf16.mxu1 %v503_v13  ;;  %v527_v35 = vld [vmem:[%s666_s0 + $0xc] ss:$16 sps:$4 sm:$0xff]   ;;  %335 = vmatprep.mubr.bf16.mxu0 %v524_v33 }
   0xf   :  { %376 = vmatprep.mubr.bf16.mxu1 %v527_v35 }
  0x10   :  { %453 = vmatpush3.bf16.msra.mxu0 %v504_v14 }
  0x11   :  { %475 = vmatpush3.bf16.msra.mxu1 %v505_v15  ;;  %454 = vmatprep.subr.bf16.mxu0 %v506_v16 }
  0x12   :  { %476 = vmatprep.subr.bf16.mxu1 %v507_v17 }
  0x14   :  { %455 = vmatpush3.bf16.msra.mxu0 %v508_v18 }
  0x15   :  { %477 = vmatpush3.bf16.msra.mxu1 %v509_v19  ;;  %456 = vmatprep.subr.bf16.mxu0 %v510_v20 }
  0x16   :  { %478 = vmatprep.subr.bf16.mxu1 %v511_v21 }
  0x18   :  { %457 = vmatpush3.bf16.msra.mxu0 %v512_v22 }
  0x19   :  { %479 = vmatpush3.bf16.msra.mxu1 %v513_v23  ;;  %458 = vmatprep.subr.bf16.mxu0 %v514_v24 }
  0x1a   :  { %480 = vmatprep.subr.bf16.mxu1 %v515_v25 }
  0x1c   :  { %459 = vmatpush3.bf16.msra.mxu0 %v516_v26 }
  0x1d   :  { %481 = vmatpush3.bf16.msra.mxu1 %v517_v27  ;;  %460 = vmatprep.subr.bf16.mxu0 %v518_v28 }
  0x1e   :  { %482 = vmatprep.subr.bf16.mxu1 %v519_v29 }
  0x20   :  { %461 = vmatpush3.bf16.msra.mxu0 %v520_v30 }
  0x21   :  { %483 = vmatpush3.bf16.msra.mxu1 %v521_v31 }
  0x23   :  { %336 = vmatmul.mubr.bf16.vlgmr.msra.gmra.mrb[0].mxu0 %v522_v32 }
  0x24   :  { %377 = vmatmul.mubr.bf16.vlgmr.msra.gmra.mrb[0].mxu1 %v525_v34 }
  0xf6   :  { %v462_v36 = vpop.f32.mrb[0].mxu0 }
  0xf7   :  { %v484_v37 = vpop.f32.mrb[0].mxu1  ;;  %v463_v38 = vpop.f32.mrb[1].mxu0 }
  0xf8   :  { %v464_v39 = vadd.f32 %v463_v38, %v462_v36  ;;  %v485_v40 = vpop.f32.mrb[1].mxu1  ;;  %v465_v41 = vpop.f32.mrb[2].mxu0 }
  0xf9   :  { %v486_v42 = vadd.f32 %v485_v40, %v484_v37  ;;  %v487_v43 = vpop.f32.mrb[2].mxu1  ;;  %v466_v44 = vpop.f32.mrb[3].mxu0 }
  0xfa   :  { %v467_v46 = vadd.f32 %v466_v44, %v465_v41  ;;  %v488_v47 = vpop.f32.mrb[3].mxu1 }
  0xfb   :  { %v379_v48 = vadd.f32 %v486_v42, %v464_v39  ;;  %v489_v49 = vadd.f32 %v488_v47, %v487_v43 }
  0xfd   :  { %v401_v50 = vadd.f32 %v445_v45, %v379_v48  ;;  %v382_v51 = vadd.f32 %v489_v49, %v467_v46 }
  0xff   :  { %403 = vst [vmem:[%s668_s3] sm:$0xff] %v401_v50  ;;  %v402_v52 = vadd.f32 %v445_v45, %v382_v51 }
 0x101   :  { %404 = vst [vmem:[%s668_s3 + $0x8] sm:$0xff] %v402_v52 }

// kernel: encoder_forward.6
= control target key start
LH: loop header
LB: loop body
LE: loop exit
PB: predicated region body
PF: predicated region fallthrough
CT: control target
= control target key end

     0   :  { %s3066_s15 = smov 0   ;;  %s3068_s16 = smov 0   ;;  %s3659_s0 = inlined_call_operand.vmem [shape: bf16[2,3,2,3,256], index: 0, kind: input, shape index: {}]   ;;  %s3660_s1 = inlined_call_operand.vmem [shape: bf16[2048,128], index: 1, kind: input, shape index: {}]   ;;  %s3661_s2 = inlined_call_operand.vmem [shape: f32[1,128], index: 2, kind: input, shape index: {}]   ;;  %s3662_s3 = inlined_call_operand.vmem [shape: f32[1,128], index: 3, kind: input, shape index: {}]   ;;  %s3663_s4 = inlined_call_operand.vmem [shape: bf16[8,128], index: 4, kind: output, shape index: {}]  }
   0x1   :  { %s3070_s17 = smov 0  }
   0x2 LB: > { %s26_s18 = sadd.s32 1, %s3032_s16  ;;  %p2536_p0 = scmp.ge.s32.totalorder %s3036_s17, 1  ;;  %s3036_s17 = sphi %s3070_s17, %s14_s17   ;;  %s3032_s16 = sphi %s3068_s16, %s3665_s16   ;;  %s3028_s15 = sphi %s3066_s15, %s3664_s15  }
   0x3   : > { %p28_p1 = scmp.ge.s32.totalorder %s26_s18, 2  ;;  %p186_p2 = scmp.lt.s32.totalorder %s3036_s17, 3 }
   0x5   : > { %s3667_s18 = smov (%p28_p1, %s26_s18), 0  ;;  %p187_p3 = pnand %p2536_p0, %p186_p2 }
   0x6   : > { %p233_p4 = scmp.eq.s32.totalorder (!%p187_p3), %s3028_s15, 0 }
   0x7   : > { %190 = sbr.rel (%p187_p3) target bundleno = 447 (0x1bf), region = 36 }
   0xe   : > { %238 = sbr.rel (!%p233_p4) target bundleno = 21 (0x15), region = 40  ;;  %v3038_v0 = vmov (%p233_p4), 0.0  }
   0xf   : > { %239 = vst [vmem:[#allocation3] sm:$0xff] (%p233_p4), %v3038_v0  ;;  %240 = vst [vmem:[#allocation4] sm:$0xff] (%p233_p4), %v3038_v0 }
  0x15 PF: > { %p2538_p5 = scmp.ne.s32.totalorder %s3028_s15, 0 }
  0x16   : > { %v2884_v1 = vld [vmem:[%s3660_s1 + $0x40] sm:$0xff] (!%p2538_p5)   ;;  %v2888_v5 = vld [vmem:[%s3660_s1 + $0x48] sm:$0xff] (!%p2538_p5)   ;;  %v2892_v9 = vld [vmem:[%s3660_s1 + $0x50] sm:$0xff] (!%p2538_p5)   ;;  %v283_v32 = vlaneseq (!%p2538_p5)  ;;  %v3039_v41 = vmov (!%p2538_p5), 1983009808  }
  0x17   : > { %243 = sbr.rel (%p2538_p5) target bundleno = 393 (0x189), region = 44  ;;  %v2885_v2 = vld [vmem:[%s3660_s1 + $0xc0] sm:$0xff] (!%p2538_p5)   ;;  %2681 = vmatprep.subr.bf16.mxu0 (!%p2538_p5), %v2884_v1  ;;  %v2889_v6 = vld [vmem:[%s3660_s1 + $0xc8] sm:$0xff] (!%p2538_p5)   ;;  %v2893_v10 = vld [vmem:[%s3660_s1 + $0xd0] sm:$0xff] (!%p2538_p5)   ;;  %v281_v42 = vunpack.c.l.s4 (!%p2538_p5), %v3039_v41  ;;  %v3040_v43 = vmov (!%p2538_p5), 1966171168  }
  0x18   : > { %v2886_v3 = vld [vmem:[%s3660_s1] sm:$0xff] (!%p2538_p5)   ;;  %2703 = vmatprep.subr.bf16.mxu1 (!%p2538_p5), %v2885_v2  ;;  %v2890_v7 = vld [vmem:[%s3660_s1 + $0x8] sm:$0xff] (!%p2538_p5)   ;;  %v2894_v11 = vld [vmem:[%s3660_s1 + $0x10] sm:$0xff] (!%p2538_p5)   ;;  %v284_v39 = vshrl.u32 (!%p2538_p5), %v283_v32, 7  ;;  %v621_v44 = vunpack.c.l.s4 (!%p2538_p5), %v3040_v43 }
  0x19   : > { %v2887_v4 = vld [vmem:[%s3660_s1 + $0x80] sm:$0xff] (!%p2538_p5)   ;;  %2682 = vmatpush3.bf16.msra.mxu0 (!%p2538_p5), %v2886_v3  ;;  %v2891_v8 = vld [vmem:[%s3660_s1 + $0x88] sm:$0xff] (!%p2538_p5)   ;;  %v2895_v12 = vld [vmem:[%s3660_s1 + $0x90] sm:$0xff] (!%p2538_p5)   ;;  %v282_v46 = vunpack.c.0.s8 (!%p2538_p5), %v281_v42 }
  0x1a   : > { %2704 = vmatpush3.bf16.msra.mxu1 (!%p2538_p5), %v2887_v4  ;;  %2683 = vmatprep.subr.bf16.mxu0 (!%p2538_p5), %v2888_v5  ;;  %v2896_v13 = vld [vmem:[%s3660_s1 + $0x58] sm:$0xff] (!%p2538_p5)   ;;  %v2900_v17 = vld [vmem:[%s3660_s1 + $0x60] sm:$0xff] (!%p2538_p5)   ;;  %v2904_v21 = vld [vmem:[%s3660_s1 + $0x68] sm:$0xff] (!%p2538_p5)   ;;  %v622_v49 = vunpack.c.0.s8 (!%p2538_p5), %v621_v44 }
  0x1b   : > { %2705 = vmatprep.subr.bf16.mxu1 (!%p2538_p5), %v2889_v6  ;;  %v2897_v14 = vld [vmem:[%s3660_s1 + $0xd8] sm:$0xff] (!%p2538_p5)   ;;  %v2901_v18 = vld [vmem:[%s3660_s1 + $0xe0] sm:$0xff] (!%p2538_p5)   ;;  %v2905_v22 = vld [vmem:[%s3660_s1 + $0xe8] sm:$0xff] (!%p2538_p5)   ;;  %v3202_v51 = vsub.s32 (!%p2538_p5), %v282_v46, %v284_v39 }
  0x1c   : > { %v2898_v15 = vld [vmem:[%s3660_s1 + $0x18] sm:$0xff] (!%p2538_p5)   ;;  %v2902_v19 = vld [vmem:[%s3660_s1 + $0x20] sm:$0xff] (!%p2538_p5)   ;;  %v2906_v23 = vld [vmem:[%s3660_s1 + $0x28] sm:$0xff] (!%p2538_p5)   ;;  %v3211_v60 = vsub.s32 (!%p2538_p5), %v622_v49, %v284_v39 }
  0x1d   : > { %2684 = vmatpush3.bf16.msra.mxu0 (!%p2538_p5), %v2890_v7  ;;  %v2899_v16 = vld [vmem:[%s3660_s1 + $0x98] sm:$0xff] (!%p2538_p5)   ;;  %v2903_v20 = vld [vmem:[%s3660_s1 + $0xa0] sm:$0xff] (!%p2538_p5)   ;;  %v2907_v24 = vld [vmem:[%s3660_s1 + $0xa8] sm:$0xff] (!%p2538_p5)  }
  0x1e   : > { %2706 = vmatpush3.bf16.msra.mxu1 %v2891_v8  ;;  %2685 = vmatprep.subr.bf16.mxu0 %v2892_v9  ;;  %v2908_v25 = vld [vmem:[%s3660_s1 + $0x70] sm:$0xff]   ;;  %v2912_v29 = vld [vmem:[%s3660_s1 + $0x78] sm:$0xff]   ;;  %v244_v34 = vld [vmem:[%s3659_s0] sm:$0xf] }
  0x1f   : > { %2707 = vmatprep.subr.bf16.mxu1 %v2893_v10  ;;  %v2909_v26 = vld [vmem:[%s3660_s1 + $0xf0] sm:$0xff]   ;;  %v2913_v30 = vld [vmem:[%s3660_s1 + $0xf8] sm:$0xff]   ;;  %v246_v35 = vld [vmem:[%s3659_s0 + $0x8] sm:$0xf]  ;;  %v260_v45 = vrot.slane %v244_v34, 2  ;;  %v286_v53 = vrot.slane %v244_v34, %v3202_v51 }
  0x20   : > { %v2910_v27 = vld [vmem:[%s3660_s1 + $0x30] sm:$0xff]   ;;  %v2914_v31 = vld [vmem:[%s3660_s1 + $0x38] sm:$0xff]   ;;  %v2916_v37 = vld [vmem:[%s3660_s1 + $0x140] sm:$0xff]   ;;  %v261_v47 = vrot.slane %v246_v35, 2  ;;  %v293_v54 = vrot.slane %v246_v35, %v3202_v51 }
  0x21   : > { %2686 = vmatpush3.bf16.msra.mxu0 %v2894_v11  ;;  %v2911_v28 = vld [vmem:[%s3660_s1 + $0xb0] sm:$0xff]   ;;  %v2915_v33 = vld [vmem:[%s3660_s1 + $0xb8] sm:$0xff]   ;;  %v252_v38 = vld [vmem:[%s3659_s0 + $0x20] sm:$0xf]  ;;  %v616_v52 = vcombine.low %v244_v34, %v260_v45  ;;  %v342_v57 = vrot.slane %v260_v45, %v3202_v51  ;;  %v309_v61 = vshrl.u32 %v286_v53, 16  ;;  %v311_v62 = vshll.u32 %v286_v53, 16 }
  0x22   : > { %2708 = vmatpush3.bf16.msra.mxu1 %v2895_v12  ;;  %2687 = vmatprep.subr.bf16.mxu0 %v2896_v13  ;;  %v250_v36 = vld [vmem:[%s3659_s0 + $0x18] sm:$0xf]  ;;  %v2917_v40 = vld [vmem:[%s3660_s1 + $0x1c0] sm:$0xff]   ;;  %v263_v50 = vrot.slane %v252_v38, 2  ;;  %v307_v56 = vrot.slane %v252_v38, %v3202_v51  ;;  %v349_v58 = vrot.slane %v261_v47, %v3202_v51  ;;  %v318_v63 = vshll.u32 %v293_v54, 16 }
  0x23   : > { %2709 = vmatprep.subr.bf16.mxu1 %v2897_v14  ;;  %v262_v48 = vrot.slane %v250_v36, 2  ;;  %v300_v55 = vrot.slane %v250_v36, %v3202_v51  ;;  %v316_v1 = vshrl.u32 %v293_v54, 16  ;;  %v313_v5 = vrot.slane %v311_v62, 1 }
  0x24   : > { %v363_v0 = vrot.slane %v263_v50, %v3202_v51  ;;  %v332_v4 = vshll.u32 %v307_v56, 16  ;;  %v320_v6 = vrot.slane %v318_v63, 1  ;;  %v365_v7 = vshrl.u32 %v342_v57, 16 }
  0x25   : > { %2688 = vmatpush3.bf16.msra.mxu0 %v2898_v15  ;;  %v356_v59 = vrot.slane %v262_v48, %v3202_v51  ;;  %v323_v2 = vshrl.u32 %v300_v55, 16  ;;  %v325_v3 = vshll.u32 %v300_v55, 16  ;;  %v367_v8 = vshll.u32 %v342_v57, 16 }
  0x26   : > { %2710 = vmatpush3.bf16.msra.mxu1 %v2899_v16  ;;  %2689 = vmatprep.subr.bf16.mxu0 %v2900_v17  ;;  %v330_v10 = vshrl.u32 %v307_v56, 16  ;;  %v372_v11 = vshrl.u32 %v349_v58, 16  ;;  %v374_v12 = vshll.u32 %v349_v58, 16  ;;  %v314_v13 = vor.u32 %v313_v5, %v309_v61  ;;  %v2918_v61 = vld [vmem:[%s3660_s1 + $0x100] sm:$0xff]   ;;  %v3261_v5 = vld [vmem:[%s3659_s0 + $0x1c] sm:$0xf] }
  0x27   : > { %2711 = vmatprep.subr.bf16.mxu1 %v2901_v18  ;;  %v327_v9 = vrot.slane %v325_v3, 1  ;;  %v334_v14 = vrot.slane %v332_v4, 1  ;;  %v369_v15 = vrot.slane %v367_v8, 1  ;;  %v379_v16 = vshrl.u32 %v356_v59, 16  ;;  %v3253_v3 = vld [vmem:[%s3659_s0 + $0xc] sm:$0xf] }
  0x28   : > { %v321_v17 = vor.u32 %v320_v6, %v316_v1  ;;  %v376_v18 = vrot.slane %v374_v12, 1  ;;  %v626_v32 = vrot.slane %v616_v52, %v3211_v60  ;;  %v2920_v1 = vld [vmem:[%s3660_s1 + $0x148] sm:$0xff]   ;;  %v3266_v6 = vld [vmem:[%s3659_s0 + $0x24] sm:$0xf]  ;;  %v269_v8 = vrot.slane %v3253_v3, 2 }
  0x29   : > { %2690 = vmatpush3.bf16.msra.mxu0 %v2902_v19  ;;  %v381_v19 = vshll.u32 %v356_v59, 16  ;;  %v2921_v4 = vld [vmem:[%s3660_s1 + $0x1c8] sm:$0xff]  }
  0x2a   : > { %2712 = vmatpush3.bf16.msra.mxu1 %v2903_v20  ;;  %2691 = vmatprep.subr.bf16.mxu0 %v2904_v21  ;;  %v665_v20 = vcombine.low %v246_v35, %v261_v47  ;;  %v370_v21 = vor.u32 %v369_v15, %v365_v7  ;;  %v2922_v15 = vld [vmem:[%s3660_s1 + $0x108] sm:$0xff]  }
  0x2b   : > { %2713 = vmatprep.subr.bf16.mxu1 %v2905_v22  ;;  %v386_v22 = vshrl.u32 %v363_v0, 16 }
  0x2d   : > { %2692 = vmatpush3.bf16.msra.mxu0 %v2906_v23  ;;  %v388_v23 = vshll.u32 %v363_v0, 16  ;;  %v2919_v0 = vld [vmem:[%s3660_s1 + $0x180] sm:$0xff]  }
  0x2e   : > { %2714 = vmatpush3.bf16.msra.mxu1 %v2907_v24  ;;  %2693 = vmatprep.subr.bf16.mxu0 %v2908_v25  ;;  %v763_v24 = vcombine.low %v250_v36, %v262_v48  ;;  %v328_v25 = vor.u32 %v327_v9, %v323_v2  ;;  %v3248_v2 = vld [vmem:[%s3659_s0 + $0x4] sm:$0xf] }
  0x2f   : > { %2715 = vmatprep.subr.bf16.mxu1 %v2909_v26  ;;  %v377_v26 = vor.u32 %v376_v18, %v372_v11  ;;  %v268_v7 = vrot.slane %v3248_v2, 2  ;;  %v398_v9 = vrot.slane %v3248_v2, %v3202_v51  ;;  %v419_v18 = vrot.slane %v3266_v6, %v3202_v51 }
  0x30   : > { %v773_v36 = vrot.slane %v763_v24, %v3211_v60  ;;  %v461_v24 = vrot.slane %v269_v8, %v3202_v51 }
  0x31   : > { %2694 = vmatpush3.bf16.msra.mxu0 %v2910_v27  ;;  %v383_v27 = vrot.slane %v381_v19, 1  ;;  %v666_v34 = vcombine.low %v321_v17, %v377_v26  ;;  %v412_v17 = vrot.slane %v3261_v5, %v3202_v51  ;;  %v421_v19 = vshrl.u32 %v398_v9, 16 }
  0x32   : > { %2716 = vmatpush3.bf16.msra.mxu1 %v2911_v28  ;;  %2695 = vmatprep.subr.bf16.mxu0 %v2912_v29  ;;  %v812_v28 = vcombine.low %v252_v38, %v263_v50  ;;  %v335_v29 = vor.u32 %v334_v14, %v330_v10  ;;  %v405_v10 = vrot.slane %v3253_v3, %v3202_v51  ;;  %v271_v14 = vrot.slane %v3266_v6, 2 }
  0x33   : > { %2717 = vmatprep.subr.bf16.mxu1 %v2913_v30  ;;  %v390_v30 = vrot.slane %v388_v23, 1  ;;  %v454_v23 = vrot.slane %v268_v7, %v3202_v51  ;;  %v435_v26 = vshrl.u32 %v412_v17, 16 }
  0x34   : > { %v822_v38 = vrot.slane %v812_v28, %v3211_v60  ;;  %v442_v28 = vshrl.u32 %v419_v18, 16 }
  0x35   : > { %2696 = vmatpush3.bf16.msra.mxu0 %v2914_v31  ;;  %v617_v31 = vcombine.low %v314_v13, %v370_v21  ;;  %v391_v39 = vor.u32 %v390_v30, %v386_v22  ;;  %v270_v13 = vrot.slane %v3261_v5, 2  ;;  %v428_v21 = vshrl.u32 %v405_v10, 16  ;;  %v2925_v30 = vld [vmem:[%s3660_s1 + $0x1d0] sm:$0xff]  }
  0x36   : > { %2718 = vmatpush3.bf16.msra.mxu1 %v2915_v33  ;;  %2725 = vmatprep.subr.bf16.mxu0 %v2916_v37  ;;  %v384_v33 = vor.u32 %v383_v27, %v379_v16  ;;  %v675_v37 = vrot.slane %v665_v20, %v3211_v60  ;;  %v2924_v16 = vld [vmem:[%s3660_s1 + $0x150] sm:$0xff]   ;;  %v423_v20 = vshll.u32 %v398_v9, 16  ;;  %v430_v22 = vshll.u32 %v405_v10, 16 }
  0x37   : > { %2747 = vmatprep.subr.bf16.mxu1 %v2917_v40  ;;  %v633_v35 = vrot.slane %v617_v31, %v3211_v60  ;;  %v682_v40 = vrot.slane %v666_v34, %v3211_v60  ;;  %v813_v43 = vcombine.low %v335_v29, %v391_v39  ;;  %v437_v27 = vshll.u32 %v412_v17, 16  ;;  %v2923_v29 = vld [vmem:[%s3660_s1 + $0x188] sm:$0xff]   ;;  %v2935_v17 = vld [vmem:[%s3660_s1 + $0x1a0] sm:$0xff]  }
  0x38   : > { %v764_v41 = vcombine.low %v328_v25, %v384_v33  ;;  %v425_v25 = vrot.slane %v423_v20, 1  ;;  %v432_v31 = vrot.slane %v430_v22, 1  ;;  %v468_v33 = vrot.slane %v270_v13, %v3202_v51 }
  0x39   : > { %v648_v42 = vcombine.low %v626_v32, %v633_v35  ;;  %v697_v44 = vcombine.low %v675_v37, %v682_v40  ;;  %v829_v47 = vrot.slane %v813_v43, %v3211_v60  ;;  %v444_v32 = vshll.u32 %v419_v18, 16  ;;  %v2926_v37 = vld [vmem:[%s3660_s1 + $0x110] sm:$0xff]  }
  0x3a   : > { %v780_v45 = vrot.slane %v764_v41, %v3211_v60  ;;  %v475_v34 = vrot.slane %v271_v14, %v3202_v51  ;;  %v426_v39 = vor.u32 %v425_v25, %v421_v19  ;;  %v439_v35 = vrot.slane %v437_v27, 1  ;;  %v2938_v27 = vld [vmem:[%s3660_s1 + $0x128] sm:$0xff]  }
  0x3b   : > { %v656_v46 = vrot.slane %v648_v42, %v3211_v60  ;;  %v3224_v48 = vrot.slane %v697_v44, %v3211_v60  ;;  %v844_v50 = vcombine.low %v822_v38, %v829_v47  ;;  %v477_v40 = vshrl.u32 %v454_v23, 16 }
  0x3c   : > { %v795_v49 = vcombine.low %v773_v36, %v780_v45  ;;  %v479_v41 = vshll.u32 %v454_v23, 16  ;;  %v2927_v36 = vld [vmem:[%s3660_s1 + $0x190] sm:$0xff]   ;;  %v433_v42 = vor.u32 %v432_v31, %v428_v21  ;;  %v446_v43 = vrot.slane %v444_v32, 1  ;;  %v2928_v45 = vld [vmem:[%s3660_s1 + $0x158] sm:$0xff]   ;;  %v2936_v21 = vld [vmem:[%s3660_s1 + $0x168] sm:$0xff]  }
  0x3d   : > { %v2539_v53 = vcombine.low %v656_v46, %v3224_v48  ;;  %v3229_v54 = vrot.slane %v844_v50, %v3211_v60  ;;  %v484_v38 = vshrl.u32 %v461_v24, 16  ;;  %v486_v44 = vshll.u32 %v461_v24, 16  ;;  %v2937_v24 = vld [vmem:[%s3660_s1 + $0x1e8] sm:$0xff]  }
  0x3e   : > { %v803_v52 = vrot.slane %v795_v49, %v3211_v60  ;;  %v440_v46 = vor.u32 %v439_v35, %v435_v26  ;;  %v481_v47 = vrot.slane %v479_v41, 1  ;;  %v491_v49 = vshrl.u32 %v468_v33, 16  ;;  %v2943_v41 = vld [vmem:[%s3660_s1 + $0x1b0] sm:$0xff]  }
  0x3f   : > { %v1176_v56 = vrot.slane %v2539_v53, %v3211_v60  ;;  %v493_v50 = vshll.u32 %v468_v33, 16  ;;  %v447_v53 = vor.u32 %v446_v43, %v442_v28  ;;  %v765_v10 = vcombine.low %v3261_v5, %v270_v13  ;;  %v2934_v5 = vld [vmem:[%s3660_s1 + $0x120] sm:$0xff]   ;;  %v2940_v33 = vld [vmem:[%s3660_s1 + $0x170] sm:$0xff]   ;;  %v2944_v43 = vld [vmem:[%s3660_s1 + $0x178] sm:$0xff]  }
  0x40   : > { %v2541_v55 = vcombine.low %v803_v52, %v3229_v54  ;;  %v2929_v52 = vld [vmem:[%s3660_s1 + $0x1d8] sm:$0xff]  }
  0x42   : > { %v1190_v57 = vrot.slane %v2541_v55, %v3211_v60  ;;  %v488_v55 = vrot.slane %v486_v44, 1 }
  0x44   : > { %v1199_v58 = vcombine.high %v1176_v56, %v1190_v57  ;;  %v1198_v59 = vcombine.low %v1176_v56, %v1190_v57  ;;  %v498_v56 = vshrl.u32 %v475_v34, 16  ;;  %v500_v57 = vshll.u32 %v475_v34, 16 }
  0x46   : > { %v1222_v62 = vrot.slane %v1199_v58, %v3211_v60  ;;  %v1208_v63 = vrot.slane %v1198_v59, %v3211_v60  ;;  %v2930_v58 = vld [vmem:[%s3660_s1 + $0x118] sm:$0xff]   ;;  %v482_v59 = vor.u32 %v481_v47, %v477_v40  ;;  %v502_v9 = vrot.slane %v500_v57, 1  ;;  %v2942_v40 = vld [vmem:[%s3660_s1 + $0x130] sm:$0xff]  }
  0x48   : > { %2118 = vmatprep.mubr.bf16.mxu0 %v1222_v62  ;;  %v1232_v11 = vcombine.high %v1222_v62, %v1222_v62  ;;  %v1230_v12 = vcombine.high %v1208_v63, %v1208_v63  ;;  %v618_v62 = vcombine.low %v3248_v2, %v268_v7  ;;  %v814_v2 = vcombine.low %v3266_v6, %v271_v14 }
  0x49   : > { %2119 = vmatmul.mubr.bf16.vlgmr.msra.gmra.mrb[0].mxu0 %v1208_v63  ;;  %v667_v63 = vcombine.low %v3253_v3, %v269_v8  ;;  %v2933_v3 = vld [vmem:[%s3660_s1 + $0x1e0] sm:$0xff]   ;;  %v619_v8 = vcombine.low %v426_v39, %v482_v59  ;;  %v787_v14 = vrot.slane %v765_v10, %v3211_v60 }
  0x4a   : > { %2158 = vmatprep.mubr.bf16.mxu1 %v1232_v11  ;;  %2726 = vmatpush3.bf16.msra.mxu0 %v2918_v61  ;;  %v495_v61 = vrot.slane %v493_v50, 1  ;;  %v640_v11 = vrot.slane %v618_v62, %v3211_v60  ;;  %v836_v20 = vrot.slane %v814_v2, %v3211_v60  ;;  %v2948_v50 = vld [vmem:[%s3660_s1 + $0x240] sm:$0xff]   ;;  %v2953_v62 = vld [vmem:[%s3660_s1 + $0x2c8] sm:$0xff]  }
  0x4b   : > { %2159 = vmatmul.mubr.bf16.vlgmr.msra.gmra.mrb[0].mxu1 %v1230_v12  ;;  %2727 = vmatprep.subr.bf16.mxu0 %v2920_v1  ;;  %v2932_v1 = vld [vmem:[%s3660_s1 + $0x160] sm:$0xff]   ;;  %v503_v12 = vor.u32 %v502_v9, %v498_v56  ;;  %v647_v6 = vrot.slane %v619_v8, %v3211_v60  ;;  %v254_v9 = vld [vmem:[%s3659_s0 + $0x28] sm:$0xf] }
  0x4c   : > { %2748 = vmatpush3.bf16.msra.mxu1 %v2919_v0  ;;  %v2931_v0 = vld [vmem:[%s3660_s1 + $0x198] sm:$0xff]   ;;  %v496_v7 = vor.u32 %v495_v61, %v491_v49  ;;  %v2950_v56 = vld [vmem:[%s3660_s1 + $0x200] sm:$0xff]   ;;  %v2952_v61 = vld [vmem:[%s3660_s1 + $0x248] sm:$0xff]   ;;  %v517_v8 = vrot.slane %v254_v9, %v3202_v51 }
  0x4d   : > { %2749 = vmatprep.subr.bf16.mxu1 %v2921_v4  ;;  %v489_v4 = vor.u32 %v488_v55, %v484_v38  ;;  %v815_v19 = vcombine.low %v447_v53, %v503_v12  ;;  %v649_v22 = vcombine.low %v640_v11, %v647_v6  ;;  %v2945_v38 = vld [vmem:[%s3660_s1 + $0x1f8] sm:$0xff]   ;;  %v2949_v55 = vld [vmem:[%s3660_s1 + $0x2c0] sm:$0xff]  }
  0x4e   : > { %2728 = vmatpush3.bf16.msra.mxu0 %v2922_v15  ;;  %v766_v13 = vcombine.low %v440_v46, %v496_v7  ;;  %v2947_v46 = vld [vmem:[%s3660_s1 + $0x1b8] sm:$0xff]   ;;  %v275_v7 = vrot.slane %v254_v9, 2  ;;  %v526_v6 = vshrl.u32 %v517_v8, 16 }
  0x4f   : > { %2729 = vmatprep.subr.bf16.mxu0 %v2924_v16  ;;  %v668_v15 = vcombine.low %v433_v42, %v489_v4  ;;  %v689_v16 = vrot.slane %v667_v63, %v3211_v60  ;;  %v843_v26 = vrot.slane %v815_v19, %v3211_v60  ;;  %v663_v28 = vrot.slane %v649_v22, %v3211_v60  ;;  %v2954_v63 = vld [vmem:[%s3660_s1 + $0x208] sm:$0xff]   ;;  %v2956_v4 = vld [vmem:[%s3660_s1 + $0x250] sm:$0xff]  }
  0x50   : > { %2750 = vmatpush3.bf16.msra.mxu1 %v2923_v29  ;;  %v794_v23 = vrot.slane %v766_v13, %v3211_v60  ;;  %v528_v13 = vshll.u32 %v517_v8, 16 }
  0x51   : > { %2751 = vmatprep.subr.bf16.mxu1 %v2925_v30  ;;  %v696_v18 = vrot.slane %v668_v15, %v3211_v60  ;;  %v2939_v30 = vld [vmem:[%s3660_s1 + $0x1a8] sm:$0xff]   ;;  %v845_v32 = vcombine.low %v836_v20, %v843_v26 }
  0x52   : > { %2730 = vmatpush3.bf16.msra.mxu0 %v2926_v37  ;;  %v796_v29 = vcombine.low %v787_v14, %v794_v23  ;;  %v2941_v37 = vld [vmem:[%s3660_s1 + $0x1f0] sm:$0xff]   ;;  %v545_v14 = vrot.slane %v275_v7, %v3202_v51  ;;  %v530_v22 = vrot.slane %v528_v13, 1  ;;  %v2983_v13 = vld [vmem:[%s3660_s1 + $0x380] sm:$0xff]  }
  0x53   : > { %2731 = vmatprep.subr.bf16.mxu0 %v2928_v45  ;;  %v698_v25 = vcombine.low %v689_v16, %v696_v18  ;;  %v3378_v39 = vrot.slane %v845_v32, %v3211_v60  ;;  %v2946_v45 = vld [vmem:[%s3660_s1 + $0x138] sm:$0xff]   ;;  %v2958_v16 = vld [vmem:[%s3660_s1 + $0x210] sm:$0xff]  }
  0x54   : > { %2752 = vmatpush3.bf16.msra.mxu1 %v2927_v36  ;;  %v810_v34 = vrot.slane %v796_v29, %v3211_v60  ;;  %v554_v23 = vshrl.u32 %v545_v14, 16  ;;  %v2963_v29 = vld [vmem:[%s3660_s1 + $0x298] sm:$0xff]   ;;  %v531_v32 = vor.u32 %v530_v22, %v526_v6  ;;  %v2984_v6 = vld [vmem:[%s3660_s1 + $0x348] sm:$0xff]   ;;  %v2989_v22 = vld [vmem:[%s3660_s1 + $0x3d0] sm:$0xff]  }
  0x55   : > { %2753 = vmatprep.subr.bf16.mxu1 %v2929_v52  ;;  %v3368_v31 = vrot.slane %v698_v25, %v3211_v60  ;;  %v2962_v25 = vld [vmem:[%s3660_s1 + $0x218] sm:$0xff]  }
  0x56   : > { %2732 = vmatpush3.bf16.msra.mxu0 %v2930_v58  ;;  %v2542_v36 = vcombine.low %v810_v34, %v3378_v39  ;;  %v2951_v58 = vld [vmem:[%s3660_s1 + $0x280] sm:$0xff]   ;;  %v861_v34 = vcombine.low %v254_v9, %v275_v7  ;;  %v2977_v9 = vld [vmem:[%s3660_s1 + $0x2f8] sm:$0xff]  }
  0x57   : > { %2733 = vmatprep.subr.bf16.mxu0 %v2932_v1  ;;  %v2540_v35 = vcombine.low %v663_v28, %v3368_v31  ;;  %v248_v1 = vld [vmem:[%s3659_s0 + $0x10] sm:$0xf]  ;;  %v2979_v7 = vld [vmem:[%s3660_s1 + $0x2b8] sm:$0xff]  }
  0x58   : > { %2754 = vmatpush3.bf16.msra.mxu1 %v2931_v0  ;;  %v1197_v44 = vrot.slane %v2542_v36, %v3211_v60  ;;  %v2955_v0 = vld [vmem:[%s3660_s1 + $0x288] sm:$0xff]   ;;  %v274_v10 = vrot.slane %v248_v1, 2  ;;  %v510_v2 = vrot.slane %v248_v1, %v3202_v51 }
  0x59   : > { %2755 = vmatprep.subr.bf16.mxu1 %v2933_v3  ;;  %v1183_v42 = vrot.slane %v2540_v35, %v3211_v60  ;;  %v2957_v3 = vld [vmem:[%s3660_s1 + $0x2d0] sm:$0xff]  }
  0x5a   : > { %2734 = vmatpush3.bf16.msra.mxu0 %v2934_v5  ;;  %v519_v11 = vshrl.u32 %v510_v2, 16  ;;  %v521_v12 = vshll.u32 %v510_v2, 16  ;;  %v538_v15 = vrot.slane %v274_v10, %v3202_v51  ;;  %v2959_v5 = vld [vmem:[%s3660_s1 + $0x290] sm:$0xff]   ;;  %v714_v28 = vcombine.low %v248_v1, %v274_v10 }
  0x5b   : > { %2735 = vmatprep.subr.bf16.mxu0 %v2936_v21  ;;  %v1201_v47 = vcombine.high %v1183_v42, %v1197_v44  ;;  %v1200_v49 = vcombine.low %v1183_v42, %v1197_v44  ;;  %v2961_v21 = vld [vmem:[%s3660_s1 + $0x2d8] sm:$0xff]   ;;  %v2966_v42 = vld [vmem:[%s3660_s1 + $0x220] sm:$0xff]   ;;  %v2968_v44 = vld [vmem:[%s3660_s1 + $0x268] sm:$0xff]  }
  0x5c   : > { %2756 = vmatpush3.bf16.msra.mxu1 %v2935_v17  ;;  %v2960_v17 = vld [vmem:[%s3660_s1 + $0x258] sm:$0xff]   ;;  %v523_v18 = vrot.slane %v521_v12, 1  ;;  %v547_v19 = vshrl.u32 %v538_v15, 16  ;;  %v549_v20 = vshll.u32 %v538_v15, 16  ;;  %v724_v36 = vrot.slane %v714_v28, %v3211_v60  ;;  %v2981_v12 = vld [vmem:[%s3660_s1 + $0x3c0] sm:$0xff]  }
  0x5d   : > { %2757 = vmatprep.subr.bf16.mxu1 %v2937_v24  ;;  %v1229_v52 = vrot.slane %v1201_v47, %v3211_v60  ;;  %v1215_v53 = vrot.slane %v1200_v49, %v3211_v60  ;;  %v556_v24 = vshll.u32 %v545_v14, 16  ;;  %v2969_v49 = vld [vmem:[%s3660_s1 + $0x2e8] sm:$0xff]   ;;  %v2992_v28 = vld [vmem:[%s3660_s1 + $0x358] sm:$0xff]  }
  0x5e   : > { %2736 = vmatpush3.bf16.msra.mxu0 %v2938_v27  ;;  %v524_v26 = vor.u32 %v523_v18, %v519_v11  ;;  %v551_v27 = vrot.slane %v549_v20, 1  ;;  %v2985_v14 = vld [vmem:[%s3660_s1 + $0x3c8] sm:$0xff]   ;;  %v2988_v18 = vld [vmem:[%s3660_s1 + $0x350] sm:$0xff]  }
  0x5f   : > { %2737 = vmatprep.subr.bf16.mxu0 %v2940_v33  ;;  %2198 = vmatprep.mubr.bf16.mxu0 %v1229_v52  ;;  %v1233_v57 = vcombine.high %v1229_v52, %v1229_v52  ;;  %v1231_v59 = vcombine.high %v1215_v53, %v1215_v53  ;;  %v558_v33 = vrot.slane %v556_v24, 1  ;;  %v2970_v52 = vld [vmem:[%s3660_s1 + $0x228] sm:$0xff]   ;;  %v249_v20 = vld [vmem:[%s3659_s0 + $0x14] sm:$0xf] }
  0x60   : > { %2758 = vmatpush3.bf16.msra.mxu1 %v2939_v30  ;;  %v2964_v30 = vld [vmem:[%s3660_s1 + $0x260] sm:$0xff]  }
  0x61   : > { %2759 = vmatprep.subr.bf16.mxu1 %v2941_v37  ;;  %2238 = vmatprep.mubr.bf16.mxu1 %v1233_v57  ;;  %v552_v37 = vor.u32 %v551_v27, %v547_v19  ;;  %v559_v35 = vor.u32 %v558_v33, %v554_v23  ;;  %v2971_v57 = vld [vmem:[%s3660_s1 + $0x2a8] sm:$0xff]   ;;  %v278_v23 = vrot.slane %v249_v20, 2  ;;  %v2990_v27 = vld [vmem:[%s3660_s1 + $0x310] sm:$0xff]  }
  0x62   : > { %2738 = vmatpush3.bf16.msra.mxu0 %v2942_v40  ;;  %v2965_v40 = vld [vmem:[%s3660_s1 + $0x2e0] sm:$0xff]   ;;  %v2987_v19 = vld [vmem:[%s3660_s1 + $0x388] sm:$0xff]  }
  0x63   : > { %2739 = vmatprep.subr.bf16.mxu0 %v2944_v43  ;;  %v862_v43 = vcombine.low %v531_v32, %v559_v35  ;;  %v2991_v32 = vld [vmem:[%s3660_s1 + $0x390] sm:$0xff]  }
  0x64   : > { %2760 = vmatpush3.bf16.msra.mxu1 %v2943_v41  ;;  %v715_v41 = vcombine.low %v524_v26, %v552_v37  ;;  %v594_v37 = vrot.slane %v278_v23, %v3202_v51 }
  0x65   : > { %2761 = vmatprep.subr.bf16.mxu1 %v2945_v38  ;;  %v871_v38 = vrot.slane %v861_v34, %v3211_v60  ;;  %v878_v47 = vrot.slane %v862_v43, %v3211_v60 }
  0x66   : > { %2740 = vmatpush3.bf16.msra.mxu0 %v2946_v45  ;;  %v731_v45 = vrot.slane %v715_v41, %v3211_v60  ;;  %v603_v43 = vshrl.u32 %v594_v37, 16 }
  0x67   : > { %2769 = vmatprep.subr.bf16.mxu0 %v2948_v50 }
  0x68   : > { %2762 = vmatpush3.bf16.msra.mxu1 %v2947_v46  ;;  %v2967_v46 = vld [vmem:[%s3660_s1 + $0x2a0] sm:$0xff]   ;;  %v746_v50 = vcombine.low %v724_v36, %v731_v45 }
  0x69   : > { %2199 = vmatmul.mubr.bf16.vlgmr.msra.gmra.mrb[4].mxu0 %v1215_v53  ;;  %2791 = vmatprep.subr.bf16.mxu1 %v2949_v55  ;;  %v893_v53 = vcombine.low %v871_v38, %v878_v47  ;;  %v2972_v55 = vld [vmem:[%s3660_s1 + $0x270] sm:$0xff]   ;;  %v605_v38 = vshll.u32 %v594_v37, 16 }
  0x6a   : > { %2770 = vmatpush3.bf16.msra.mxu0 %v2950_v56  ;;  %v754_v56 = vrot.slane %v746_v50, %v3211_v60 }
  0x6b   : > { %2239 = vmatmul.mubr.bf16.vlgmr.msra.gmra.mrb[4].mxu1 %v1231_v59  ;;  %2771 = vmatprep.subr.bf16.mxu0 %v2952_v61  ;;  %v2973_v59 = vld [vmem:[%s3660_s1 + $0x2f0] sm:$0xff]  }
  0x6c   : > { %2792 = vmatpush3.bf16.msra.mxu1 %v2951_v58  ;;  %v901_v58 = vrot.slane %v893_v53, %v3211_v60  ;;  %v2543_v61 = vcombine.low %v3224_v48, %v754_v56  ;;  %v607_v53 = vrot.slane %v605_v38, 1  ;;  %v2997_v56 = vld [vmem:[%s3660_s1 + $0x3e0] sm:$0xff]  }
  0x6d   : > { %2793 = vmatprep.subr.bf16.mxu1 %v2953_v62  ;;  %v2974_v62 = vld [vmem:[%s3660_s1 + $0x230] sm:$0xff]  }
  0x6e   : > { %2772 = vmatpush3.bf16.msra.mxu0 %v2954_v63  ;;  %v2545_v63 = vcombine.low %v3229_v54, %v901_v58  ;;  %v1244_v1 = vrot.slane %v2543_v61, %v3211_v60  ;;  %v2978_v54 = vld [vmem:[%s3660_s1 + $0x238] sm:$0xff]   ;;  %v608_v58 = vor.u32 %v607_v53, %v603_v43  ;;  %v3000_v61 = vld [vmem:[%s3660_s1 + $0x368] sm:$0xff]  }
  0x6f   : > { %2773 = vmatprep.subr.bf16.mxu0 %v2956_v4  ;;  %v2975_v4 = vld [vmem:[%s3660_s1 + $0x2b0] sm:$0xff]  }
  0x70   : > { %2794 = vmatpush3.bf16.msra.mxu1 %v2955_v0  ;;  %v2976_v0 = vld [vmem:[%s3660_s1 + $0x278] sm:$0xff]   ;;  %v1258_v48 = vrot.slane %v2545_v63, %v3211_v60 }
  0x71   : > { %2795 = vmatprep.subr.bf16.mxu1 %v2957_v3  ;;  %v2980_v3 = vld [vmem:[%s3660_s1 + $0x340] sm:$0xff]  }
  0x72   : > { %2774 = vmatpush3.bf16.msra.mxu0 %v2958_v16  ;;  %v1267_v10 = vcombine.high %v1244_v1, %v1258_v48  ;;  %v1266_v2 = vcombine.low %v1244_v1, %v1258_v48  ;;  %v2982_v16 = vld [vmem:[%s3660_s1 + $0x300] sm:$0xff]   ;;  %v3001_v48 = vld [vmem:[%s3660_s1 + $0x3e8] sm:$0xff]  }
  0x73   : > { %2775 = vmatprep.subr.bf16.mxu0 %v2960_v17  ;;  %v2986_v17 = vld [vmem:[%s3660_s1 + $0x308] sm:$0xff]  }
  0x74   : > { %2796 = vmatpush3.bf16.msra.mxu1 %v2959_v5  ;;  %v1290_v8 = vrot.slane %v1267_v10, %v3211_v60  ;;  %v1276_v11 = vrot.slane %v1266_v2, %v3211_v60  ;;  %v3004_v2 = vld [vmem:[%s3660_s1 + $0x370] sm:$0xff]  }
  0x75   : > { %2797 = vmatprep.subr.bf16.mxu1 %v2961_v21  ;;  %v255_v21 = vld [vmem:[%s3659_s0 + $0x2c] sm:$0xf] }
  0x76   : > { %2776 = vmatpush3.bf16.msra.mxu0 %v2962_v25  ;;  %2278 = vmatprep.mubr.bf16.mxu0 %v1290_v8  ;;  %v1300_v15 = vcombine.high %v1290_v8, %v1290_v8  ;;  %v1298_v5 = vcombine.high %v1276_v11, %v1276_v11  ;;  %v279_v24 = vrot.slane %v255_v21, 2  ;;  %v566_v25 = vrot.slane %v249_v20, %v3202_v51 }
  0x77   : > { %2777 = vmatprep.subr.bf16.mxu0 %v2964_v30  ;;  %v573_v26 = vrot.slane %v255_v21, %v3202_v51 }
  0x78   : > { %2798 = vmatpush3.bf16.msra.mxu1 %v2963_v29  ;;  %2318 = vmatprep.mubr.bf16.mxu1 %v1300_v15  ;;  %v577_v29 = vshll.u32 %v566_v25, 16  ;;  %v575_v33 = vshrl.u32 %v566_v25, 16  ;;  %v601_v35 = vrot.slane %v279_v24, %v3202_v51  ;;  %v2996_v51 = vld [vmem:[%s3660_s1 + $0x360] sm:$0xff]   ;;  %v863_v47 = vcombine.low %v255_v21, %v279_v24 }
  0x79   : > { %2799 = vmatprep.subr.bf16.mxu1 %v2965_v40  ;;  %v584_v30 = vshll.u32 %v573_v26, 16  ;;  %v582_v34 = vshrl.u32 %v573_v26, 16  ;;  %v2993_v40 = vld [vmem:[%s3660_s1 + $0x3d8] sm:$0xff]  }
  0x7a   : > { %2778 = vmatpush3.bf16.msra.mxu0 %v2966_v42  ;;  %v579_v41 = vrot.slane %v577_v29, 1  ;;  %v2994_v42 = vld [vmem:[%s3660_s1 + $0x318] sm:$0xff]   ;;  %v612_v45 = vshll.u32 %v601_v35, 16 }
  0x7b   : > { %2779 = vmatprep.subr.bf16.mxu0 %v2968_v44  ;;  %v586_v36 = vrot.slane %v584_v30, 1  ;;  %v610_v44 = vshrl.u32 %v601_v35, 16 }
  0x7c   : > { %2800 = vmatpush3.bf16.msra.mxu1 %v2967_v46  ;;  %v716_v46 = vcombine.low %v249_v20, %v278_v23  ;;  %v580_v50 = vor.u32 %v579_v41, %v575_v33 }
  0x7d   : > { %2801 = vmatprep.subr.bf16.mxu1 %v2969_v49  ;;  %v2995_v49 = vld [vmem:[%s3660_s1 + $0x398] sm:$0xff]  }
  0x7e   : > { %2780 = vmatpush3.bf16.msra.mxu0 %v2970_v52  ;;  %v587_v52 = vor.u32 %v586_v36, %v582_v34  ;;  %v717_v63 = vcombine.low %v580_v50, %v608_v58 }
  0x7f   : > { %2781 = vmatprep.subr.bf16.mxu0 %v2972_v55  ;;  %v614_v55 = vrot.slane %v612_v45, 1 }
  0x80   : > { %2802 = vmatpush3.bf16.msra.mxu1 %v2971_v57  ;;  %v2998_v57 = vld [vmem:[%s3660_s1 + $0x320] sm:$0xff]  }
  0x81   : > { %2803 = vmatprep.subr.bf16.mxu1 %v2973_v59  ;;  %v615_v59 = vor.u32 %v614_v55, %v610_v44 }
  0x82   : > { %2782 = vmatpush3.bf16.msra.mxu0 %v2974_v62  ;;  %v2999_v62 = vld [vmem:[%s3660_s1 + $0x3a0] sm:$0xff]  }
  0x83   : > { %2783 = vmatprep.subr.bf16.mxu0 %v2976_v0  ;;  %v738_v0 = vrot.slane %v716_v46, %v3211_v60  ;;  %v864_v1 = vcombine.low %v587_v52, %v615_v59 }
  0x84   : > { %2804 = vmatpush3.bf16.msra.mxu1 %v2975_v4  ;;  %v885_v4 = vrot.slane %v863_v47, %v3211_v60 }
  0x85   : > { %2805 = vmatprep.subr.bf16.mxu1 %v2977_v9  ;;  %v3002_v9 = vld [vmem:[%s3660_s1 + $0x328] sm:$0xff]   ;;  %v892_v10 = vrot.slane %v864_v1, %v3211_v60 }
  0x86   : > { %2784 = vmatpush3.bf16.msra.mxu0 %v2978_v54  ;;  %v745_v54 = vrot.slane %v717_v63, %v3211_v60 }
  0x87   : > { %2813 = vmatprep.subr.bf16.mxu0 %v2980_v3  ;;  %v3003_v3 = vld [vmem:[%s3660_s1 + $0x3a8] sm:$0xff]   ;;  %v894_v8 = vcombine.low %v885_v4, %v892_v10 }
  0x88   : > { %2806 = vmatpush3.bf16.msra.mxu1 %v2979_v7  ;;  %v747_v7 = vcombine.low %v738_v0, %v745_v54 }
  0x89   : > { %2279 = vmatmul.mubr.bf16.vlgmr.msra.gmra.mrb[8].mxu0 %v1276_v11  ;;  %2835 = vmatprep.subr.bf16.mxu1 %v2981_v12  ;;  %v3005_v11 = vld [vmem:[%s3660_s1 + $0x3f0] sm:$0xff]  }
  0x8a   : > { %2814 = vmatpush3.bf16.msra.mxu0 %v2982_v16  ;;  %v3006_v12 = vld [vmem:[%s3660_s1 + $0x330] sm:$0xff]   ;;  %v761_v15 = vrot.slane %v747_v7, %v3211_v60  ;;  %v908_v16 = vrot.slane %v894_v8, %v3211_v60 }
  0x8b   : > { %2319 = vmatmul.mubr.bf16.vlgmr.msra.gmra.mrb[8].mxu1 %v1298_v5  ;;  %2815 = vmatprep.subr.bf16.mxu0 %v2984_v6  ;;  %v3008_v5 = vld [vmem:[%s3660_s1 + $0x378] sm:$0xff]   ;;  %v3007_v6 = vld [vmem:[%s3660_s1 + $0x3b0] sm:$0xff]  }
  0x8c   : > { %2836 = vmatpush3.bf16.msra.mxu1 %v2983_v13  ;;  %v2544_v13 = vcombine.low %v3368_v31, %v761_v15  ;;  %v3011_v31 = vld [vmem:[%s3660_s1 + $0x3b8] sm:$0xff]  }
  0x8d   : > { %2837 = vmatprep.subr.bf16.mxu1 %v2985_v14  ;;  %v2546_v14 = vcombine.low %v3378_v39, %v908_v16  ;;  %v2411_v16 = vld [vmem:[#allocation4] sm:$0xff] }
  0x8e   : > { %2816 = vmatpush3.bf16.msra.mxu0 %v2986_v17  ;;  %v3009_v17 = vld [vmem:[%s3660_s1 + $0x3f8] sm:$0xff]  }
  0x8f   : > { %2817 = vmatprep.subr.bf16.mxu0 %v2988_v18  ;;  %v3010_v18 = vld [vmem:[%s3660_s1 + $0x338] sm:$0xff]   ;;  %v1265_v20 = vrot.slane %v2546_v14, %v3211_v60 }
  0x90   : > { %2838 = vmatpush3.bf16.msra.mxu1 %v2987_v19  ;;  %v1251_v19 = vrot.slane %v2544_v13, %v3211_v60 }
  0x91   : > { %2839 = vmatprep.subr.bf16.mxu1 %v2989_v22 }
  0x92   : > { %2818 = vmatpush3.bf16.msra.mxu0 %v2990_v27  ;;  %v1269_v39 = vcombine.high %v1251_v19, %v1265_v20  ;;  %v1268_v21 = vcombine.low %v1251_v19, %v1265_v20 }
  0x93   : > { %2819 = vmatprep.subr.bf16.mxu0 %v2992_v28 }
  0x94   : > { %2840 = vmatpush3.bf16.msra.mxu1 %v2991_v32  ;;  %v1297_v22 = vrot.slane %v1269_v39, %v3211_v60  ;;  %v1283_v23 = vrot.slane %v1268_v21, %v3211_v60 }
  0x95   : > { %2841 = vmatprep.subr.bf16.mxu1 %v2993_v40 }
  0x96   : > { %2820 = vmatpush3.bf16.msra.mxu0 %v2994_v42  ;;  %2358 = vmatprep.mubr.bf16.mxu0 %v1297_v22  ;;  %v1301_v24 = vcombine.high %v1297_v22, %v1297_v22  ;;  %v1299_v25 = vcombine.high %v1283_v23, %v1283_v23 }
  0x97   : > { %2821 = vmatprep.subr.bf16.mxu0 %v2996_v51 }
  0x98   : > { %2842 = vmatpush3.bf16.msra.mxu1 %v2995_v49  ;;  %2398 = vmatprep.mubr.bf16.mxu1 %v1301_v24 }
  0x99   : > { %2843 = vmatprep.subr.bf16.mxu1 %v2997_v56 }
  0x9a   : > { %2822 = vmatpush3.bf16.msra.mxu0 %v2998_v57 }
  0x9b   : > { %2823 = vmatprep.subr.bf16.mxu0 %v3000_v61 }
  0x9c   : > { %2844 = vmatpush3.bf16.msra.mxu1 %v2999_v62 }
  0x9d   : > { %2845 = vmatprep.subr.bf16.mxu1 %v3001_v48 }
  0x9e   : > { %2824 = vmatpush3.bf16.msra.mxu0 %v3002_v9 }
  0x9f   : > { %2825 = vmatprep.subr.bf16.mxu0 %v3004_v2 }
  0xa0   : > { %2846 = vmatpush3.bf16.msra.mxu1 %v3003_v3 }
  0xa1   : > { %2847 = vmatprep.subr.bf16.mxu1 %v3005_v11  ;;  %v2407_v11 = vld [vmem:[#allocation3] sm:$0xff] }
  0xa2   : > { %2826 = vmatpush3.bf16.msra.mxu0 %v3006_v12 }
  0xa3   : > { %2827 = vmatprep.subr.bf16.mxu0 %v3008_v5 }
  0xa4   : > { %2848 = vmatpush3.bf16.msra.mxu1 %v3007_v6 }
  0xa5   : > { %2849 = vmatprep.subr.bf16.mxu1 %v3009_v17 }
  0xa6   : > { %2828 = vmatpush3.bf16.msra.mxu0 %v3010_v18 }
  0xa8   : > { %2850 = vmatpush3.bf16.msra.mxu1 %v3011_v31 }
  0xa9   : > { %2359 = vmatmul.mubr.bf16.vlgmr.msra.gmra.mrb[12].mxu0 %v1283_v23 }
  0xab   : > { %2399 = vmatmul.mubr.bf16.vlgmr.msra.gmra.mrb[12].mxu1 %v1299_v25 }
 0x11c   : > { %v2697_v26 = vpop.f32.mrb[0].mxu0 }
 0x11d   : > { %v2698_v27 = vpop.f32.mrb[1].mxu0 }
 0x11e   : > { %v2719_v28 = vpop.f32.mrb[0].mxu1  ;;  %v2699_v29 = vadd.f32 %v2698_v27, %v2697_v26  ;;  %v2700_v30 = vpop.f32.mrb[2].mxu0 }
 0x11f   : > { %v2720_v32 = vpop.f32.mrb[1].mxu1  ;;  %v2701_v33 = vpop.f32.mrb[3].mxu0 }
 0x120   : > { %v2721_v34 = vadd.f32 %v2720_v32, %v2719_v28  ;;  %v2722_v37 = vpop.f32.mrb[2].mxu1 }
 0x121   : > { %v2723_v35 = vpop.f32.mrb[3].mxu1 }
 0x122   : > { %v2161_v40 = vadd.f32 %v2721_v34, %v2699_v29 }
 0x13c   : > { %v2741_v41 = vpop.f32.mrb[4].mxu0 }
 0x13d   : > { %v2742_v60 = vpop.f32.mrb[5].mxu0 }
 0x13e   : > { %v2763_v36 = vpop.f32.mrb[4].mxu1  ;;  %v2743_v42 = vadd.f32 %v2742_v60, %v2741_v41  ;;  %v2744_v43 = vpop.f32.mrb[6].mxu0 }
 0x13f   : > { %v2764_v38 = vpop.f32.mrb[5].mxu1  ;;  %v2745_v44 = vpop.f32.mrb[7].mxu0 }
 0x140   : > { %v2201_v45 = vadd.f32 %v2743_v42, %v2161_v40  ;;  %v2765_v51 = vadd.f32 %v2764_v38, %v2763_v36  ;;  %v2766_v46 = vpop.f32.mrb[6].mxu1 }
 0x141   : > { %v2767_v47 = vpop.f32.mrb[7].mxu1 }
 0x142   : > { %v2241_v49 = vadd.f32 %v2765_v51, %v2201_v45 }
 0x15c   : > { %v2785_v50 = vpop.f32.mrb[8].mxu0 }
 0x15d   : > { %v2786_v52 = vpop.f32.mrb[9].mxu0 }
 0x15e   : > { %v2807_v53 = vpop.f32.mrb[8].mxu1  ;;  %v2787_v55 = vadd.f32 %v2786_v52, %v2785_v50  ;;  %v2788_v56 = vpop.f32.mrb[10].mxu0 }
 0x15f   : > { %v2808_v57 = vpop.f32.mrb[9].mxu1  ;;  %v2789_v58 = vpop.f32.mrb[11].mxu0 }
 0x160   : > { %v2281_v59 = vadd.f32 %v2787_v55, %v2241_v49  ;;  %v2809_v61 = vadd.f32 %v2808_v57, %v2807_v53  ;;  %v2810_v62 = vpop.f32.mrb[10].mxu1 }
 0x161   : > { %v2811_v63 = vpop.f32.mrb[11].mxu1 }
 0x162   : > { %v2321_v0 = vadd.f32 %v2809_v61, %v2281_v59 }
 0x17c   : > { %v2829_v1 = vpop.f32.mrb[12].mxu0 }
 0x17d   : > { %v2830_v4 = vpop.f32.mrb[13].mxu0 }
 0x17e   : > { %v2851_v48 = vpop.f32.mrb[12].mxu1  ;;  %v2831_v9 = vadd.f32 %v2830_v4, %v2829_v1  ;;  %v2832_v54 = vpop.f32.mrb[14].mxu0 }
 0x17f   : > { %v2852_v10 = vpop.f32.mrb[13].mxu1  ;;  %v2833_v2 = vpop.f32.mrb[15].mxu0 }
 0x180   : > { %v2361_v3 = vadd.f32 %v2831_v9, %v2321_v0  ;;  %v2853_v7 = vadd.f32 %v2852_v10, %v2851_v48  ;;  %v2854_v8 = vpop.f32.mrb[14].mxu1 }
 0x181   : > { %v2855_v12 = vpop.f32.mrb[15].mxu1 }
 0x182   : > { %v2401_v15 = vadd.f32 %v2853_v7, %v2361_v3 }
 0x184   : > { %2406 = vst [vmem:[#allocation2] sm:$0xff] %v2401_v15  ;;  %v2409_v5 = vadd.f32 %v2407_v11, %v2401_v15  ;;  %v2412_v6 = vmul.f32 %v2401_v15, %v2401_v15 }
 0x186   : > { %2410 = vst [vmem:[#allocation3] sm:$0xff] %v2409_v5  ;;  %v2414_v13 = vadd.f32 %v2412_v6, %v2411_v16 }
 0x188   : > { %2415 = vst [vmem:[#allocation4] sm:$0xff] %v2414_v13 }
 0x189 PF: > { %p2675_p6 = scmp.ne.s32.totalorder %s3028_s15, 1 }
 0x18a   : > { %v2448_v37 = vlaneseq (!%p2675_p6)  ;;  %v2439_v40 = vld [vmem:[%s3661_s2] sm:$0x1] (!%p2675_p6) }
 0x18b   : > { %2419 = sbr.rel (%p2675_p6) target bundleno = 447 (0x1bf), region = 48  ;;  %v2443_v42 = vld [vmem:[%s3662_s3] sm:$0x1] (!%p2675_p6) }
 0x18c   : > { %v2449_v35 = vshrl.u32 (!%p2675_p6), %v2448_v37, 7  ;;  %v2446_v43 = vld [vmem:[#allocation2] sm:$0xff] (!%p2675_p6) }
 0x18d   : > { %v2420_v14 = vld [vmem:[#allocation3] sm:$0xff] (!%p2675_p6) }
 0x18e   : > { %v2421_v18 = vrot.slane (!%p2675_p6), %v2420_v14, 4  ;;  %v2450_v41 = vsub.s32 (!%p2675_p6), 0, %v2449_v35 }
 0x18f   : > { %v2427_v17 = vld [vmem:[#allocation4] sm:$0xff] (!%p2675_p6) }
 0x190   : > { %v2428_v19 = vrot.slane (!%p2675_p6), %v2427_v17, 4  ;;  %v2422_v20 = vadd.f32 (!%p2675_p6), %v2421_v18, %v2420_v14 }
 0x192   : > { %v2429_v31 = vadd.f32 %v2428_v19, %v2427_v17  ;;  %v2423_v39 = vrot.slane %v2422_v20, 2 }
 0x194   : > { %v2430_v21 = vrot.slane %v2429_v31, 2  ;;  %v2424_v22 = vadd.f32 %v2423_v39, %v2422_v20 }
 0x196   : > { %v2431_v23 = vadd.f32 %v2430_v21, %v2429_v31  ;;  %v2425_v24 = vrot.slane %v2424_v22, 1 }
 0x198   : > { %v2432_v25 = vrot.slane %v2431_v23, 1  ;;  %v2426_v26 = vadd.f32 %v2425_v24, %v2424_v22 }
 0x19a   : > { %v2433_v27 = vadd.f32 %v2432_v25, %v2431_v23  ;;  %v2434_v28 = vmul.f32 0.125, %v2426_v26 }
 0x19c   : > { %v2435_v29 = vmul.f32 0.125, %v2433_v27  ;;  %v2436_v30 = vmul.f32 %v2434_v28, %v2434_v28 }
 0x19e   : > { %v2437_v32 = vsub.f32 %v2435_v29, %v2436_v30 }
 0x1a0   : > { %v2438_v33 = vmax.f32 %v2437_v32, 0.0 }
 0x1a2   : > { %v2440_v34 = vadd.f32 1e-05, %v2438_v33 }
 0x1a4   : > { %3012 = vrsqrt.f32 %v2440_v34 }
 0x1ae   : > { %v3013_v60 = vpop.eup %3012 }
 0x1af   : > { %v2442_v36 = vmul.f32 %v3013_v60, %v2439_v40 }
 0x1b1   : > { %v2444_v38 = vmul.f32 %v2442_v36, %v2434_v28  ;;  %v2451_v44 = vrot.slane %v2442_v36, %v2450_v41 }
 0x1b3   : > { %v2445_v45 = vsub.f32 %v2443_v42, %v2444_v38  ;;  %v2453_v51 = vmul.f32 %v2451_v44, %v2446_v43 }
 0x1b5   : > { %v2458_v46 = vrot.slane %v2445_v45, %v2450_v41 }
 0x1b7   : > { %v2460_v47 = vadd.f32 %v2458_v46, %v2453_v51 }
 0x1b9   : > { %vm2461_vm0 = vcmp.ge.f32.partialorder %v2460_v47, 0.0  ;;  %v2462_v49 = vmul.f32 0.2, %v2460_v47 }
 0x1bb   : > { %v2463_v50 = vsel %vm2461_vm0, %v2460_v47, %v2462_v49 }
 0x1bc   : > { %v2464_v52 = vpack.c.bf16 %v2463_v50, %v2463_v50 }
 0x1be   : > { %2465 = vst [vmem:[%s3663_s4] sm:$0xf] %v2464_v52 }
 0x1bf PF: > { %s14_s17 = sadd.s32 1, %s3036_s17   ;;  %s3664_s15 = smov %s3032_s16 }
 0x1c0   : > { %p11_p7 = scmp.ge.s32.totalorder %s14_s17, 4   ;;  %s3665_s16 = smov %s3667_s18 }
 0x1c2   :  { %13 = sbr.rel (!%p11_p7) target bundleno = 2 (0x2), region = 78 }

// kernel: encoder_forward.5
= control target key start
LH: loop header
LB: loop body
LE: loop exit
PB: predicated region body
PF: predicated region fallthrough
CT: control target
= control target key end

     0   :  { %s3601_s15 = smov 0   ;;  %s3603_s16 = smov 0   ;;  %s4360_s0 = inlined_call_operand.vmem [shape: bf16[2,5,2,5,256], index: 0, kind: input, shape index: {}]   ;;  %s4361_s1 = inlined_call_operand.vmem [shape: bf16[2048,128], index: 1, kind: input, shape index: {}]   ;;  %s4362_s2 = inlined_call_operand.vmem [shape: f32[1,128], index: 2, kind: input, shape index: {}]   ;;  %s4363_s3 = inlined_call_operand.vmem [shape: f32[1,128], index: 3, kind: input, shape index: {}]   ;;  %s4364_s4 = inlined_call_operand.vmem [shape: bf16[32,128], index: 4, kind: output, shape index: {}]  }
   0x1   :  { %s3605_s17 = smov 0  }
   0x2 LB: > { %s26_s18 = sadd.s32 1, %s3568_s16  ;;  %p2922_p0 = scmp.ge.s32.totalorder %s3572_s17, 1  ;;  %s3572_s17 = sphi %s3605_s17, %s14_s17   ;;  %s3568_s16 = sphi %s3603_s16, %s4366_s16   ;;  %s3564_s15 = sphi %s3601_s15, %s4365_s15  }
   0x3   : > { %p28_p1 = scmp.ge.s32.totalorder %s26_s18, 2  ;;  %p186_p2 = scmp.lt.s32.totalorder %s3572_s17, 3 }
   0x5   : > { %s4368_s18 = smov (%p28_p1, %s26_s18), 0  ;;  %p187_p3 = pnand %p2922_p0, %p186_p2 }
   0x6   : > { %p236_p4 = scmp.eq.s32.totalorder (!%p187_p3), %s3564_s15, 0 }
   0x7   : > { %190 = sbr.rel (%p187_p3) target bundleno = 459 (0x1cb), region = 36 }
   0xe   : > { %241 = sbr.rel (!%p236_p4) target bundleno = 21 (0x15), region = 40  ;;  %v3574_v0 = vmov (%p236_p4), 0.0  }
   0xf   : > { %242 = vst [vmem:[#allocation3] sm:$0xff] (%p236_p4), %v3574_v0  ;;  %243 = vst [vmem:[#allocation4] sm:$0xff] (%p236_p4), %v3574_v0 }
  0x15 PF: > { %p2924_p5 = scmp.ne.s32.totalorder %s3564_s15, 0 }
  0x16   : > { %v3400_v1 = vld [vmem:[%s4361_s1 + $0x40] sm:$0xff] (!%p2924_p5)   ;;  %v3404_v5 = vld [vmem:[%s4361_s1 + $0x48] sm:$0xff] (!%p2924_p5)   ;;  %v3408_v9 = vld [vmem:[%s4361_s1 + $0x50] sm:$0xff] (!%p2924_p5)   ;;  %v672_v29 = vlaneseq (!%p2924_p5)  ;;  %v3575_v54 = vmov (!%p2924_p5), 1983009808  }
  0x17   : > { %246 = sbr.rel (%p2924_p5) target bundleno = 404 (0x194), region = 44  ;;  %v3401_v2 = vld [vmem:[%s4361_s1 + $0xc0] sm:$0xff] (!%p2924_p5)   ;;  %3150 = vmatprep.subr.bf16.mxu0 (!%p2924_p5), %v3400_v1  ;;  %v3405_v6 = vld [vmem:[%s4361_s1 + $0xc8] sm:$0xff] (!%p2924_p5)   ;;  %v3409_v10 = vld [vmem:[%s4361_s1 + $0xd0] sm:$0xff] (!%p2924_p5)   ;;  %v670_v55 = vunpack.c.l.s4 (!%p2924_p5), %v3575_v54 }
  0x18   : > { %v3402_v3 = vld [vmem:[%s4361_s1] sm:$0xff] (!%p2924_p5)   ;;  %3178 = vmatprep.subr.bf16.mxu1 (!%p2924_p5), %v3401_v2  ;;  %v3406_v7 = vld [vmem:[%s4361_s1 + $0x8] sm:$0xff] (!%p2924_p5)   ;;  %v3410_v11 = vld [vmem:[%s4361_s1 + $0x10] sm:$0xff] (!%p2924_p5)   ;;  %v673_v34 = vshrl.u32 (!%p2924_p5), %v672_v29, 7 }
  0x19   : > { %v3403_v4 = vld [vmem:[%s4361_s1 + $0x80] sm:$0xff] (!%p2924_p5)   ;;  %3151 = vmatpush3.bf16.msra.mxu0 (!%p2924_p5), %v3402_v3  ;;  %v3407_v8 = vld [vmem:[%s4361_s1 + $0x88] sm:$0xff] (!%p2924_p5)   ;;  %v3411_v12 = vld [vmem:[%s4361_s1 + $0x90] sm:$0xff] (!%p2924_p5)   ;;  %v671_v63 = vunpack.c.0.s8 (!%p2924_p5), %v670_v55 }
  0x1a   : > { %3179 = vmatpush3.bf16.msra.mxu1 (!%p2924_p5), %v3403_v4  ;;  %3152 = vmatprep.subr.bf16.mxu0 (!%p2924_p5), %v3404_v5  ;;  %v3412_v13 = vld [vmem:[%s4361_s1 + $0x58] sm:$0xff] (!%p2924_p5)   ;;  %v3416_v17 = vld [vmem:[%s4361_s1 + $0x60] sm:$0xff] (!%p2924_p5)   ;;  %v3420_v21 = vld [vmem:[%s4361_s1 + $0x68] sm:$0xff] (!%p2924_p5)  }
  0x1b   : > { %3180 = vmatprep.subr.bf16.mxu1 (!%p2924_p5), %v3405_v6  ;;  %v3413_v14 = vld [vmem:[%s4361_s1 + $0xd8] sm:$0xff] (!%p2924_p5)   ;;  %v3417_v18 = vld [vmem:[%s4361_s1 + $0xe0] sm:$0xff] (!%p2924_p5)   ;;  %v3421_v22 = vld [vmem:[%s4361_s1 + $0xe8] sm:$0xff] (!%p2924_p5)  }
  0x1c   : > { %v3414_v15 = vld [vmem:[%s4361_s1 + $0x18] sm:$0xff] (!%p2924_p5)   ;;  %v3418_v19 = vld [vmem:[%s4361_s1 + $0x20] sm:$0xff] (!%p2924_p5)   ;;  %v3422_v23 = vld [vmem:[%s4361_s1 + $0x28] sm:$0xff] (!%p2924_p5)  }
  0x1d   : > { %3153 = vmatpush3.bf16.msra.mxu0 (!%p2924_p5), %v3406_v7  ;;  %v3415_v16 = vld [vmem:[%s4361_s1 + $0x98] sm:$0xff] (!%p2924_p5)   ;;  %v3419_v20 = vld [vmem:[%s4361_s1 + $0xa0] sm:$0xff] (!%p2924_p5)   ;;  %v3423_v24 = vld [vmem:[%s4361_s1 + $0xa8] sm:$0xff] (!%p2924_p5)   ;;  %v3737_v7 = vsub.s32 (!%p2924_p5), %v671_v63, %v673_v34 }
  0x1e   : > { %3181 = vmatpush3.bf16.msra.mxu1 %v3407_v8  ;;  %3154 = vmatprep.subr.bf16.mxu0 %v3408_v9  ;;  %v3424_v25 = vld [vmem:[%s4361_s1 + $0x70] sm:$0xff]   ;;  %v3428_v30 = vld [vmem:[%s4361_s1 + $0x78] sm:$0xff]   ;;  %v247_v35 = vld [vmem:[%s4360_s0] sm:$0x77] }
  0x1f   : > { %3182 = vmatprep.subr.bf16.mxu1 %v3409_v10  ;;  %v3425_v26 = vld [vmem:[%s4361_s1 + $0xf0] sm:$0xff]   ;;  %v3429_v31 = vld [vmem:[%s4361_s1 + $0xf8] sm:$0xff]   ;;  %v251_v37 = vld [vmem:[%s4360_s0 + $0x20] sm:$0x77]  ;;  %v275_v39 = vrot.slane %v247_v35, 4  ;;  %v2925_v42 = vcombine.low %v247_v35, %v247_v35 }
  0x20   : > { %v3426_v27 = vld [vmem:[%s4361_s1 + $0x30] sm:$0xff]   ;;  %v3430_v32 = vld [vmem:[%s4361_s1 + $0x38] sm:$0xff]   ;;  %v277_v41 = vrot.slane %v251_v37, 4  ;;  %v3436_v43 = vld [vmem:[%s4361_s1 + $0x140] sm:$0xff]   ;;  %v2927_v46 = vcombine.low %v251_v37, %v251_v37 }
  0x21   : > { %3155 = vmatpush3.bf16.msra.mxu0 %v3410_v11  ;;  %v3427_v28 = vld [vmem:[%s4361_s1 + $0xb0] sm:$0xff]   ;;  %v3431_v33 = vld [vmem:[%s4361_s1 + $0xb8] sm:$0xff]   ;;  %v3437_v47 = vld [vmem:[%s4361_s1 + $0x1c0] sm:$0xff]   ;;  %v2933_v49 = vcombine.low %v275_v39, %v275_v39  ;;  %v667_v52 = vcombine.low %v247_v35, %v275_v39  ;;  %v326_v58 = vshll.u32 %v2925_v42, 16  ;;  %v324_v59 = vshrl.u32 %v2925_v42, 16 }
  0x22   : > { %3183 = vmatpush3.bf16.msra.mxu1 %v3411_v12  ;;  %3156 = vmatprep.subr.bf16.mxu0 %v3412_v13  ;;  %v249_v36 = vld [vmem:[%s4360_s0 + $0x10] sm:$0x77]  ;;  %v2935_v51 = vcombine.low %v277_v41, %v277_v41  ;;  %v735_v56 = vcombine.low %v251_v37, %v277_v41  ;;  %v340_v62 = vshll.u32 %v2927_v46, 16  ;;  %v338_v1 = vshrl.u32 %v2927_v46, 16  ;;  %v3438_v39 = vld [vmem:[%s4361_s1 + $0x100] sm:$0xff]  }
  0x23   : > { %3184 = vmatprep.subr.bf16.mxu1 %v3413_v14  ;;  %v253_v38 = vld [vmem:[%s4360_s0 + $0x30] sm:$0x77]  ;;  %v276_v40 = vrot.slane %v249_v36, 4  ;;  %v2926_v45 = vcombine.low %v249_v36, %v249_v36  ;;  %v328_v0 = vrot.slane %v326_v58, 1  ;;  %v396_v5 = vshrl.u32 %v2933_v49, 16  ;;  %v3439_v58 = vld [vmem:[%s4361_s1 + $0x180] sm:$0xff]  }
  0x24   : > { %v278_v44 = vrot.slane %v253_v38, 4  ;;  %v2928_v48 = vcombine.low %v253_v38, %v253_v38  ;;  %v398_v6 = vshll.u32 %v2933_v49, 16  ;;  %v342_v8 = vrot.slane %v340_v62, 1  ;;  %v3441_v62 = vld [vmem:[%s4361_s1 + $0x1c8] sm:$0xff]   ;;  %v261_v63 = vld [vmem:[%s4360_s0 + $0x70] sm:$0x77] }
  0x25   : > { %3157 = vmatpush3.bf16.msra.mxu0 %v3414_v15  ;;  %v2934_v50 = vcombine.low %v276_v40, %v276_v40  ;;  %v701_v53 = vcombine.low %v249_v36, %v276_v40  ;;  %v331_v60 = vshrl.u32 %v2926_v45, 16  ;;  %v333_v61 = vshll.u32 %v2926_v45, 16  ;;  %v3440_v45 = vld [vmem:[%s4361_s1 + $0x148] sm:$0xff]  }
  0x26   : > { %3185 = vmatpush3.bf16.msra.mxu1 %v3415_v16  ;;  %3158 = vmatprep.subr.bf16.mxu0 %v3416_v17  ;;  %v769_v57 = vcombine.low %v253_v38, %v278_v44  ;;  %v347_v2 = vshll.u32 %v2928_v48, 16  ;;  %v345_v4 = vshrl.u32 %v2928_v48, 16  ;;  %v2936_v11 = vcombine.low %v278_v44, %v278_v44 }
  0x27   : > { %3186 = vmatprep.subr.bf16.mxu1 %v3417_v18  ;;  %v335_v3 = vrot.slane %v333_v61, 1  ;;  %v403_v10 = vshrl.u32 %v2934_v50, 16  ;;  %v329_v12 = vor.u32 %v328_v0, %v324_v59  ;;  %v400_v13 = vrot.slane %v398_v6, 1  ;;  %v3448_v59 = vld [vmem:[%s4361_s1 + $0x158] sm:$0xff]   ;;  %v259_v61 = vld [vmem:[%s4360_s0 + $0x60] sm:$0x77] }
  0x28   : > { %v349_v9 = vrot.slane %v347_v2, 1  ;;  %v405_v14 = vshll.u32 %v2934_v50, 16  ;;  %v675_v15 = vrot.slane %v667_v52, %v3737_v7  ;;  %v3741_v16 = vrot.slane %v701_v53, %v3737_v7  ;;  %v3442_v50 = vld [vmem:[%s4361_s1 + $0x108] sm:$0xff]   ;;  %v3444_v52 = vld [vmem:[%s4361_s1 + $0x150] sm:$0xff]   ;;  %v263_v0 = vld [vmem:[%s4360_s0 + $0x80] sm:$0x77] }
  0x29   : > { %3159 = vmatpush3.bf16.msra.mxu0 %v3418_v19  ;;  %v3744_v17 = vrot.slane %v735_v56, %v3737_v7  ;;  %v3747_v18 = vrot.slane %v769_v57, %v3737_v7  ;;  %v336_v19 = vor.u32 %v335_v3, %v331_v60  ;;  %v3446_v56 = vld [vmem:[%s4361_s1 + $0x110] sm:$0xff]   ;;  %v280_v2 = vrot.slane %v259_v61, 4 }
  0x2a   : > { %3187 = vmatpush3.bf16.msra.mxu1 %v3419_v20  ;;  %3160 = vmatprep.subr.bf16.mxu0 %v3420_v21  ;;  %v401_v20 = vor.u32 %v400_v13, %v396_v5  ;;  %v407_v21 = vrot.slane %v405_v14, 1  ;;  %v350_v35 = vor.u32 %v349_v9, %v345_v4  ;;  %v257_v60 = vld [vmem:[%s4360_s0 + $0x50] sm:$0x77]  ;;  %v2930_v4 = vcombine.low %v259_v61, %v259_v61  ;;  %v3452_v14 = vld [vmem:[%s4361_s1 + $0x160] sm:$0xff]  }
  0x2b   : > { %3188 = vmatprep.subr.bf16.mxu1 %v3421_v22  ;;  %v410_v22 = vshrl.u32 %v2935_v51, 16  ;;  %v2929_v3 = vcombine.low %v257_v60, %v257_v60  ;;  %v282_v9 = vrot.slane %v263_v0, 4 }
  0x2c   : > { %v668_v29 = vcombine.low %v329_v12, %v401_v20  ;;  %v3814_v12 = vcombine.low %v263_v0, %v263_v0 }
  0x2d   : > { %3161 = vmatpush3.bf16.msra.mxu0 %v3422_v23  ;;  %v2965_v23 = vcombine.low %v675_v15, %v3741_v16  ;;  %v3821_v15 = vcombine.low %v280_v2, %v280_v2 }
  0x2e   : > { %3189 = vmatpush3.bf16.msra.mxu1 %v3423_v24  ;;  %3162 = vmatprep.subr.bf16.mxu0 %v3424_v25  ;;  %v2967_v24 = vcombine.low %v3744_v17, %v3747_v18  ;;  %v412_v25 = vshll.u32 %v2935_v51, 16  ;;  %v682_v37 = vrot.slane %v668_v29, %v3737_v7 }
  0x2f   : > { %3190 = vmatprep.subr.bf16.mxu1 %v3425_v26  ;;  %v417_v26 = vshrl.u32 %v2936_v11, 16 }
  0x30   : > { %v414_v34 = vrot.slane %v412_v25, 1  ;;  %v354_v25 = vshll.u32 %v2929_v3, 16 }
  0x31   : > { %3163 = vmatpush3.bf16.msra.mxu0 %v3426_v27  ;;  %v408_v27 = vor.u32 %v407_v21, %v403_v10  ;;  %v3450_v10 = vld [vmem:[%s4361_s1 + $0x118] sm:$0xff]   ;;  %v3443_v21 = vld [vmem:[%s4361_s1 + $0x188] sm:$0xff]  }
  0x32   : > { %3191 = vmatpush3.bf16.msra.mxu1 %v3427_v28  ;;  %3164 = vmatprep.subr.bf16.mxu0 %v3428_v30  ;;  %v419_v28 = vshll.u32 %v2936_v11, 16  ;;  %v2973_v30 = vcombine.low %v3741_v16, %v3744_v17  ;;  %v415_v41 = vor.u32 %v414_v34, %v410_v22  ;;  %v3812_v11 = vcombine.low %v261_v63, %v261_v63 }
  0x33   : > { %3192 = vmatprep.subr.bf16.mxu1 %v3429_v31  ;;  %v1273_v31 = vrot.slane %v2965_v23, %v3737_v7  ;;  %v702_v38 = vcombine.low %v336_v19, %v408_v27  ;;  %v871_v22 = vcombine.low %v259_v61, %v280_v2  ;;  %v3454_v27 = vld [vmem:[%s4361_s1 + $0x120] sm:$0xff]  }
  0x34   : > { %v421_v36 = vrot.slane %v419_v28, 1  ;;  %v3834_v28 = vcombine.low %v282_v9, %v282_v9 }
  0x35   : > { %3165 = vmatpush3.bf16.msra.mxu0 %v3430_v32  ;;  %v1287_v32 = vrot.slane %v2967_v24, %v3737_v7  ;;  %v3761_v44 = vrot.slane %v702_v38, %v3737_v7  ;;  %v939_v24 = vcombine.low %v263_v0, %v282_v9  ;;  %v3841_v34 = vrot.slane %v871_v22, %v3737_v7  ;;  %v3447_v38 = vld [vmem:[%s4361_s1 + $0x190] sm:$0xff]   ;;  %v3462_v0 = vld [vmem:[%s4361_s1 + $0x128] sm:$0xff]  }
  0x36   : > { %3193 = vmatpush3.bf16.msra.mxu1 %v3431_v33  ;;  %3206 = vmatprep.subr.bf16.mxu0 %v3436_v43  ;;  %v343_v33 = vor.u32 %v342_v8, %v338_v1  ;;  %v422_v43 = vor.u32 %v421_v36, %v417_v26  ;;  %v279_v1 = vrot.slane %v257_v60, 4  ;;  %v281_v8 = vrot.slane %v261_v63, 4  ;;  %v3445_v26 = vld [vmem:[%s4361_s1 + $0x1d0] sm:$0xff]   ;;  %v252_v22 = vld [vmem:[%s4360_s0 + $0x28] sm:$0x77] }
  0x37   : > { %3234 = vmatprep.subr.bf16.mxu1 %v3437_v47  ;;  %v1296_v40 = vcombine.high %v1273_v31, %v1287_v32  ;;  %v1295_v42 = vcombine.low %v1273_v31, %v1287_v32  ;;  %v2966_v48 = vcombine.low %v682_v37, %v3761_v44  ;;  %v352_v31 = vshrl.u32 %v2929_v3, 16 }
  0x38   : > { %v736_v46 = vcombine.low %v343_v33, %v415_v41  ;;  %v770_v47 = vcombine.low %v350_v35, %v422_v43  ;;  %v3816_v13 = vcombine.low %v279_v1, %v279_v1  ;;  %v3823_v19 = vcombine.low %v281_v8, %v281_v8  ;;  %v3456_v33 = vld [vmem:[%s4361_s1 + $0x168] sm:$0xff]  }
  0x39   : > { %2383 = vmatprep.mubr.bf16.mxu0 %v1296_v40  ;;  %v1280_v55 = vrot.slane %v2966_v48, %v3737_v7  ;;  %v837_v20 = vcombine.low %v257_v60, %v279_v1  ;;  %v905_v23 = vcombine.low %v261_v63, %v281_v8  ;;  %v361_v32 = vshll.u32 %v2930_v4, 16  ;;  %v3451_v60 = vld [vmem:[%s4361_s1 + $0x198] sm:$0xff]   ;;  %v3453_v1 = vld [vmem:[%s4361_s1 + $0x1e0] sm:$0xff]  }
  0x3a   : > { %2384 = vmatmul.mubr.bf16.vlgmr.msra.gmra.mrb[0].mxu0 %v1295_v42  ;;  %v3768_v49 = vrot.slane %v736_v46, %v3737_v7  ;;  %v3774_v51 = vrot.slane %v770_v47, %v3737_v7  ;;  %v3847_v36 = vrot.slane %v939_v24, %v3737_v7  ;;  %v359_v37 = vshrl.u32 %v2930_v4, 16 }
  0x3b   : > { %3207 = vmatpush3.bf16.msra.mxu0 %v3438_v39  ;;  %v845_v29 = vrot.slane %v837_v20, %v3737_v7  ;;  %v3844_v35 = vrot.slane %v905_v23, %v3737_v7  ;;  %v356_v39 = vrot.slane %v354_v25, 1  ;;  %v363_v40 = vrot.slane %v361_v32, 1  ;;  %v3466_v20 = vld [vmem:[%s4361_s1 + $0x130] sm:$0xff]   ;;  %v3455_v23 = vld [vmem:[%s4361_s1 + $0x1a0] sm:$0xff]  }
  0x3c   : > { %3208 = vmatprep.subr.bf16.mxu0 %v3440_v45  ;;  %v2974_v53 = vcombine.low %v3761_v44, %v3768_v49  ;;  %v2968_v54 = vcombine.low %v3768_v49, %v3774_v51  ;;  %v368_v41 = vshll.u32 %v3812_v11, 16  ;;  %v375_v42 = vshll.u32 %v3814_v12, 16  ;;  %v3511_v49 = vld [vmem:[%s4361_s1 + $0x2b8] sm:$0xff]  }
  0x3d   : > { %v2981_v43 = vcombine.low %v845_v29, %v3841_v34  ;;  %v2983_v45 = vcombine.low %v3844_v35, %v3847_v36  ;;  %v366_v46 = vshrl.u32 %v3812_v11, 16  ;;  %v373_v47 = vshrl.u32 %v3814_v12, 16  ;;  %v248_v12 = vld [vmem:[%s4360_s0 + $0x8] sm:$0x77] }
  0x3e   : > { %v1294_v57 = vrot.slane %v2968_v54, %v3737_v7  ;;  %v370_v48 = vrot.slane %v368_v41, 1  ;;  %v426_v54 = vshll.u32 %v3816_v13, 16  ;;  %v357_v61 = vor.u32 %v356_v39, %v352_v31  ;;  %v3457_v31 = vld [vmem:[%s4361_s1 + $0x1e8] sm:$0xff]  }
  0x3f   : > { %3209 = vmatpush3.bf16.msra.mxu0 %v3442_v50  ;;  %v377_v50 = vrot.slane %v375_v42, 1  ;;  %v438_v4 = vshrl.u32 %v3823_v19, 16  ;;  %v445_v9 = vshrl.u32 %v3834_v28, 16  ;;  %v3909_v41 = vcombine.low %v248_v12, %v248_v12 }
  0x40   : > { %3210 = vmatprep.subr.bf16.mxu0 %v3444_v52  ;;  %v1298_v5 = vcombine.high %v1280_v55, %v1294_v57  ;;  %v1297_v6 = vcombine.low %v1280_v55, %v1294_v57  ;;  %v424_v52 = vshrl.u32 %v3816_v13, 16  ;;  %v3449_v55 = vld [vmem:[%s4361_s1 + $0x1d8] sm:$0xff]   ;;  %v1431_v57 = vrot.slane %v2983_v45, %v3737_v7 }
  0x41   : > { %v428_v63 = vrot.slane %v426_v54, 1  ;;  %v371_v13 = vor.u32 %v370_v48, %v366_v46  ;;  %v3916_v46 = vcombine.low %v252_v22, %v252_v22  ;;  %v3463_v48 = vld [vmem:[%s4361_s1 + $0x1a8] sm:$0xff]  }
  0x42   : > { %2432 = vmatprep.mubr.bf16.mxu1 %v1298_v5  ;;  %v440_v5 = vshll.u32 %v3823_v19, 16 }
  0x43   : > { %3211 = vmatpush3.bf16.msra.mxu0 %v3446_v56  ;;  %2433 = vmatmul.mubr.bf16.vlgmr.msra.gmra.mrb[0].mxu1 %v1297_v6  ;;  %v1417_v56 = vrot.slane %v2981_v43, %v3737_v7  ;;  %v3464_v6 = vld [vmem:[%s4361_s1 + $0x170] sm:$0xff]   ;;  %v429_v8 = vor.u32 %v428_v63, %v424_v52 }
  0x44   : > { %3212 = vmatprep.subr.bf16.mxu0 %v3448_v59  ;;  %3235 = vmatpush3.bf16.msra.mxu1 %v3439_v58  ;;  %v431_v58 = vshrl.u32 %v3821_v15, 16  ;;  %v433_v59 = vshll.u32 %v3821_v15, 16  ;;  %v442_v19 = vrot.slane %v440_v5, 1  ;;  %v470_v5 = vshll.u32 %v3909_v41, 16 }
  0x45   : > { %3236 = vmatprep.subr.bf16.mxu1 %v3441_v62  ;;  %v364_v62 = vor.u32 %v363_v40, %v359_v37  ;;  %v1440_v2 = vcombine.high %v1417_v56, %v1431_v57  ;;  %v1439_v11 = vcombine.low %v1417_v56, %v1431_v57  ;;  %v838_v25 = vcombine.low %v357_v61, %v429_v8 }
  0x46   : > { %v435_v3 = vrot.slane %v433_v59, 1  ;;  %v443_v32 = vor.u32 %v442_v19, %v438_v4  ;;  %v293_v37 = vrot.slane %v252_v22, 4  ;;  %v468_v4 = vshrl.u32 %v3909_v41, 16  ;;  %v3467_v19 = vld [vmem:[%s4361_s1 + $0x1b0] sm:$0xff]  }
  0x47   : > { %3213 = vmatpush3.bf16.msra.mxu0 %v3450_v10  ;;  %v447_v10 = vshll.u32 %v3834_v28, 16  ;;  %2391 = vmatprep.mubr.bf16.mxu0 %v1440_v2  ;;  %v291_v28 = vrot.slane %v248_v12, 4  ;;  %v852_v40 = vrot.slane %v838_v25, %v3737_v7 }
  0x48   : > { %3214 = vmatprep.subr.bf16.mxu0 %v3452_v14  ;;  %3237 = vmatpush3.bf16.msra.mxu1 %v3443_v21  ;;  %v378_v14 = vor.u32 %v377_v50, %v373_v47  ;;  %v436_v15 = vor.u32 %v435_v3, %v431_v58  ;;  %v250_v21 = vld [vmem:[%s4360_s0 + $0x18] sm:$0x77]  ;;  %v906_v43 = vcombine.low %v371_v13, %v443_v32 }
  0x49   : > { %3238 = vmatprep.subr.bf16.mxu1 %v3445_v26  ;;  %v449_v24 = vrot.slane %v447_v10, 1  ;;  %v3468_v26 = vld [vmem:[%s4361_s1 + $0x178] sm:$0xff]   ;;  %v292_v29 = vrot.slane %v250_v21, 4  ;;  %2392 = vmatmul.mubr.bf16.gmra.mrb[4].mxu0 %v1439_v11  ;;  %v3914_v45 = vcombine.low %v250_v21, %v250_v21  ;;  %v3926_v54 = vcombine.low %v291_v28, %v291_v28 }
  0x4a   : > { %v3470_v50 = vld [vmem:[%s4361_s1 + $0x138] sm:$0xff]   ;;  %v3929_v56 = vrot.slane %v906_v43, %v3737_v7  ;;  %v752_v59 = vcombine.low %v252_v22, %v293_v37 }
  0x4b   : > { %3215 = vmatpush3.bf16.msra.mxu0 %v3454_v27  ;;  %v254_v27 = vld [vmem:[%s4360_s0 + $0x38] sm:$0x77]  ;;  %v450_v39 = vor.u32 %v449_v24, %v445_v9  ;;  %v718_v58 = vcombine.low %v250_v21, %v292_v29  ;;  %v3941_v63 = vcombine.low %v292_v29, %v292_v29  ;;  %v477_v10 = vshll.u32 %v3914_v45, 16 }
  0x4c   : > { %3216 = vmatprep.subr.bf16.mxu0 %v3456_v33  ;;  %3239 = vmatpush3.bf16.msra.mxu1 %v3447_v38  ;;  %v872_v33 = vcombine.low %v364_v62, %v436_v15  ;;  %v294_v38 = vrot.slane %v254_v27, 4  ;;  %v3924_v52 = vcombine.low %v254_v27, %v254_v27  ;;  %v3465_v62 = vld [vmem:[%s4361_s1 + $0x1f0] sm:$0xff]   ;;  %v3948_v3 = vrot.slane %v752_v59, %v3737_v7  ;;  %v3480_v59 = vld [vmem:[%s4361_s1 + $0x248] sm:$0xff]  }
  0x4d   : > { %3240 = vmatprep.subr.bf16.mxu1 %v3449_v55  ;;  %v940_v47 = vcombine.low %v378_v14, %v450_v39  ;;  %v684_v55 = vcombine.low %v248_v12, %v291_v28  ;;  %v3945_v2 = vrot.slane %v718_v58, %v3737_v7  ;;  %v472_v12 = vrot.slane %v470_v5, 1  ;;  %v3478_v39 = vld [vmem:[%s4361_s1 + $0x200] sm:$0xff]  }
  0x4e   : > { %v3912_v42 = vrot.slane %v872_v33, %v3737_v7  ;;  %v475_v13 = vshrl.u32 %v3914_v45, 16  ;;  %v484_v14 = vshll.u32 %v3916_v46, 16  ;;  %v479_v22 = vrot.slane %v477_v10, 1  ;;  %v3477_v45 = vld [vmem:[%s4361_s1 + $0x2c0] sm:$0xff]   ;;  %v3482_v10 = vld [vmem:[%s4361_s1 + $0x208] sm:$0xff]  }
  0x4f   : > { %3217 = vmatpush3.bf16.msra.mxu0 %v3462_v0  ;;  %v3936_v61 = vrot.slane %v940_v47, %v3737_v7  ;;  %v692_v0 = vrot.slane %v684_v55, %v3737_v7  ;;  %v2951_v24 = vcombine.low %v293_v37, %v293_v37  ;;  %v2952_v32 = vcombine.low %v294_v38, %v294_v38 }
  0x50   : > { %3218 = vmatprep.subr.bf16.mxu0 %v3464_v6  ;;  %3241 = vmatpush3.bf16.msra.mxu1 %v3451_v60  ;;  %v2982_v57 = vcombine.low %v852_v40, %v3912_v42  ;;  %v3476_v60 = vld [vmem:[%s4361_s1 + $0x240] sm:$0xff]   ;;  %v486_v37 = vrot.slane %v484_v14, 1  ;;  %v540_v41 = vshrl.u32 %v3926_v54, 16  ;;  %v542_v43 = vshll.u32 %v3926_v54, 16 }
  0x51   : > { %3242 = vmatprep.subr.bf16.mxu1 %v3453_v1  ;;  %v786_v1 = vcombine.low %v254_v27, %v294_v38  ;;  %v2984_v6 = vcombine.low %v3929_v56, %v3936_v61  ;;  %v2969_v11 = vcombine.low %v692_v0, %v3945_v2  ;;  %v491_v27 = vshll.u32 %v3924_v52, 16  ;;  %v3990_v38 = vld [vmem:[%s4360_s0 + $0x58] sm:$0x77] }
  0x52   : > { %v1424_v8 = vrot.slane %v2982_v57, %v3737_v7  ;;  %v473_v54 = vor.u32 %v472_v12, %v468_v4  ;;  %v544_v55 = vrot.slane %v542_v43, 1  ;;  %v554_v57 = vshrl.u32 %v2951_v24, 16 }
  0x53   : > { %3219 = vmatpush3.bf16.msra.mxu0 %v3466_v20  ;;  %v3956_v9 = vrot.slane %v786_v1, %v3737_v7  ;;  %v1438_v15 = vrot.slane %v2984_v6, %v3737_v7  ;;  %v3469_v20 = vld [vmem:[%s4361_s1 + $0x1f8] sm:$0xff]   ;;  %v1309_v25 = vrot.slane %v2969_v11, %v3737_v7  ;;  %v493_v40 = vrot.slane %v491_v27, 1  ;;  %v264_v11 = vld [vmem:[%s4360_s0 + $0x88] sm:$0x77] }
  0x54   : > { %3220 = vmatprep.subr.bf16.mxu0 %v3468_v26  ;;  %3243 = vmatpush3.bf16.msra.mxu1 %v3455_v23  ;;  %v482_v23 = vshrl.u32 %v3916_v46, 16  ;;  %v489_v26 = vshrl.u32 %v3924_v52, 16  ;;  %v3995_v46 = vld [vmem:[%s4360_s0 + $0x68] sm:$0x77]  ;;  %v549_v52 = vshll.u32 %v3941_v63, 16  ;;  %v556_v58 = vshll.u32 %v2951_v24, 16 }
  0x55   : > { %3244 = vmatprep.subr.bf16.mxu1 %v3457_v31  ;;  %v2971_v21 = vcombine.low %v3948_v3, %v3956_v9  ;;  %v1442_v28 = vcombine.high %v1424_v8, %v1438_v15  ;;  %v1441_v29 = vcombine.low %v1424_v8, %v1438_v15  ;;  %v3471_v31 = vld [vmem:[%s4361_s1 + $0x1b8] sm:$0xff]   ;;  %v561_v1 = vshrl.u32 %v2952_v32, 16 }
  0x56   : > { %v551_v0 = vrot.slane %v549_v52, 1  ;;  %v563_v5 = vshll.u32 %v2952_v32, 16  ;;  %v494_v6 = vor.u32 %v493_v40, %v489_v26  ;;  %v545_v8 = vor.u32 %v544_v55, %v540_v41 }
  0x57   : > { %3221 = vmatpush3.bf16.msra.mxu0 %v3470_v50  ;;  %v1323_v33 = vrot.slane %v2971_v21, %v3737_v7  ;;  %2440 = vmatprep.mubr.bf16.mxu1 %v1442_v28  ;;  %v547_v50 = vshrl.u32 %v3941_v63, 16  ;;  %v487_v63 = vor.u32 %v486_v37, %v482_v23  ;;  %v558_v4 = vrot.slane %v556_v58, 1  ;;  %v3490_v37 = vld [vmem:[%s4361_s1 + $0x210] sm:$0xff]  }
  0x58   : > { %3262 = vmatprep.subr.bf16.mxu0 %v3476_v60  ;;  %3245 = vmatpush3.bf16.msra.mxu1 %v3463_v48  ;;  %v262_v60 = vld [vmem:[%s4360_s0 + $0x78] sm:$0x77]  ;;  %v565_v14 = vrot.slane %v563_v5, 1  ;;  %v296_v15 = vrot.slane %v3995_v46, 4  ;;  %v685_v21 = vcombine.low %v473_v54, %v545_v8  ;;  %v4019_v28 = vcombine.low %v3990_v38, %v3990_v38  ;;  %v3496_v8 = vld [vmem:[%s4361_s1 + $0x260] sm:$0xff]  }
  0x59   : > { %3246 = vmatprep.subr.bf16.mxu1 %v3465_v62  ;;  %v1331_v47 = vcombine.low %v1309_v25, %v1323_v33  ;;  %v1332_v48 = vcombine.high %v1309_v25, %v1323_v33  ;;  %2441 = vmatmul.mubr.bf16.gmra.mrb[4].mxu1 %v1441_v29  ;;  %v480_v62 = vor.u32 %v479_v22, %v475_v13  ;;  %v295_v13 = vrot.slane %v3990_v38, 4 }
  0x5a   : > { %v552_v12 = vor.u32 %v551_v0, %v547_v50  ;;  %v566_v22 = vor.u32 %v565_v14, %v561_v1  ;;  %v297_v24 = vrot.slane %v262_v60, 4  ;;  %v298_v25 = vrot.slane %v264_v11, 4  ;;  %v3494_v0 = vld [vmem:[%s4361_s1 + $0x218] sm:$0xff]  }
  0x5b   : > { %2481 = vmatprep.mubr.bf16.mxu0 %v1332_v48  ;;  %v699_v26 = vrot.slane %v685_v21, %v3737_v7  ;;  %v4023_v29 = vcombine.low %v3995_v46, %v3995_v46  ;;  %v4028_v33 = vcombine.low %v262_v60, %v262_v60  ;;  %v854_v41 = vcombine.low %v3990_v38, %v295_v13 }
  0x5c   : > { %3247 = vmatpush3.bf16.msra.mxu1 %v3467_v19  ;;  %2482 = vmatmul.mubr.bf16.vlgmr.msra.gmra.mrb[8].mxu0 %v1331_v47  ;;  %v3488_v19 = vld [vmem:[%s4361_s1 + $0x250] sm:$0xff]   ;;  %v719_v23 = vcombine.low %v480_v62, %v552_v12  ;;  %v787_v32 = vcombine.low %v494_v6, %v566_v22  ;;  %v888_v43 = vcombine.low %v3995_v46, %v296_v15  ;;  %v3492_v47 = vld [vmem:[%s4361_s1 + $0x258] sm:$0xff]   ;;  %v496_v12 = vshrl.u32 %v4019_v28, 16 }
  0x5d   : > { %3248 = vmatprep.subr.bf16.mxu1 %v3469_v20  ;;  %3263 = vmatpush3.bf16.msra.mxu0 %v3478_v39  ;;  %v559_v20 = vor.u32 %v558_v4, %v554_v57  ;;  %v4030_v39 = vcombine.low %v264_v11, %v264_v11  ;;  %v4047_v52 = vcombine.low %v295_v13, %v295_v13  ;;  %v498_v57 = vshll.u32 %v4019_v28, 16  ;;  %v3481_v13 = vld [vmem:[%s4361_s1 + $0x2c8] sm:$0xff]  }
  0x5e   : > { %3264 = vmatprep.subr.bf16.mxu0 %v3480_v59  ;;  %v4044_v48 = vrot.slane %v787_v32, %v3737_v7  ;;  %v956_v54 = vcombine.low %v264_v11, %v298_v25  ;;  %v862_v55 = vrot.slane %v854_v41, %v3737_v7  ;;  %v4051_v38 = vrot.slane %v888_v43, %v3737_v7 }
  0x5f   : > { %v753_v27 = vcombine.low %v487_v63, %v559_v20  ;;  %v4068_v1 = vcombine.low %v297_v24, %v297_v24  ;;  %v4070_v5 = vcombine.low %v298_v25, %v298_v25  ;;  %v505_v6 = vshll.u32 %v4023_v29, 16 }
  0x60   : > { %3249 = vmatpush3.bf16.msra.mxu1 %v3471_v31  ;;  %v4026_v31 = vrot.slane %v719_v23, %v3737_v7  ;;  %v4063_v62 = vrot.slane %v956_v54, %v3737_v7  ;;  %v2985_v63 = vcombine.low %v862_v55, %v4051_v38  ;;  %v512_v14 = vshll.u32 %v4028_v33, 16  ;;  %v3500_v55 = vld [vmem:[%s4361_s1 + $0x268] sm:$0xff]  }
  0x61   : > { %3290 = vmatprep.subr.bf16.mxu1 %v3477_v45  ;;  %3265 = vmatpush3.bf16.msra.mxu0 %v3482_v10  ;;  %v4036_v40 = vrot.slane %v753_v27, %v3737_v7  ;;  %v922_v45 = vcombine.low %v262_v60, %v297_v24  ;;  %v4060_v60 = vcombine.low %v296_v15, %v296_v15  ;;  %v3479_v10 = vld [vmem:[%s4361_s1 + $0x280] sm:$0xff]   ;;  %v503_v20 = vshrl.u32 %v4023_v29, 16 }
  0x62   : > { %3266 = vmatprep.subr.bf16.mxu0 %v3488_v19  ;;  %v2970_v50 = vcombine.low %v699_v26, %v4026_v31  ;;  %v1453_v15 = vrot.slane %v2985_v63, %v3737_v7  ;;  %v500_v19 = vrot.slane %v498_v57, 1  ;;  %v519_v21 = vshll.u32 %v4030_v39, 16  ;;  %v3498_v26 = vld [vmem:[%s4361_s1 + $0x220] sm:$0xff]   ;;  %v3502_v63 = vld [vmem:[%s4361_s1 + $0x228] sm:$0xff]  }
  0x63   : > { %v4054_v46 = vrot.slane %v922_v45, %v3737_v7  ;;  %v2972_v58 = vcombine.low %v4036_v40, %v4044_v48  ;;  %v510_v25 = vshrl.u32 %v4028_v33, 16  ;;  %v507_v27 = vrot.slane %v505_v6, 1 }
  0x64   : > { %v1316_v59 = vrot.slane %v2970_v50, %v3737_v7  ;;  %v517_v28 = vshrl.u32 %v4030_v39, 16  ;;  %v568_v32 = vshrl.u32 %v4047_v52, 16  ;;  %v570_v29 = vshll.u32 %v4047_v52, 16 }
  0x65   : > { %3267 = vmatpush3.bf16.msra.mxu0 %v3490_v37  ;;  %v1330_v4 = vrot.slane %v2972_v58, %v3737_v7  ;;  %v2987_v11 = vcombine.low %v4054_v46, %v4063_v62  ;;  %v3483_v37 = vld [vmem:[%s4361_s1 + $0x288] sm:$0xff]   ;;  %v514_v43 = vrot.slane %v512_v14, 1  ;;  %v521_v45 = vrot.slane %v519_v21, 1  ;;  %v255_v21 = vld [vmem:[%s4360_s0 + $0x40] sm:$0x77] }
  0x66   : > { %3268 = vmatprep.subr.bf16.mxu0 %v3492_v47  ;;  %v3489_v47 = vld [vmem:[%s4361_s1 + $0x2d0] sm:$0xff]   ;;  %v501_v39 = vor.u32 %v500_v19, %v496_v12  ;;  %v572_v50 = vrot.slane %v570_v29, 1  ;;  %v575_v54 = vshrl.u32 %v4060_v60, 16  ;;  %v577_v52 = vshll.u32 %v4060_v60, 16 }
  0x67   : > { %v1333_v22 = vcombine.low %v1316_v59, %v1330_v4  ;;  %v1334_v23 = vcombine.high %v1316_v59, %v1330_v4  ;;  %v1467_v24 = vrot.slane %v2987_v11, %v3737_v7  ;;  %v582_v57 = vshrl.u32 %v4068_v1, 16  ;;  %v3504_v4 = vld [vmem:[%s4361_s1 + $0x270] sm:$0xff]  }
  0x68   : > { %v584_v58 = vshll.u32 %v4068_v1, 16  ;;  %v589_v59 = vshrl.u32 %v4070_v5, 16  ;;  %v508_v60 = vor.u32 %v507_v27, %v503_v20  ;;  %v573_v6 = vor.u32 %v572_v50, %v568_v32  ;;  %v3491_v20 = vld [vmem:[%s4361_s1 + $0x290] sm:$0xff]   ;;  %v3495_v32 = vld [vmem:[%s4361_s1 + $0x298] sm:$0xff]  }
  0x69   : > { %3269 = vmatpush3.bf16.msra.mxu0 %v3494_v0  ;;  %2530 = vmatprep.mubr.bf16.mxu1 %v1334_v23  ;;  %v1476_v41 = vcombine.high %v1453_v15, %v1467_v24  ;;  %v1475_v33 = vcombine.low %v1453_v15, %v1467_v24  ;;  %v591_v0 = vshll.u32 %v4070_v5, 16  ;;  %v2977_v1 = vcombine.low %v3945_v2, %v3948_v3  ;;  %v3493_v24 = vld [vmem:[%s4361_s1 + $0x2d8] sm:$0xff]   ;;  %v3506_v29 = vld [vmem:[%s4361_s1 + $0x230] sm:$0xff]  }
  0x6a   : > { %3270 = vmatprep.subr.bf16.mxu0 %v3496_v8  ;;  %2531 = vmatmul.mubr.bf16.vlgmr.msra.gmra.mrb[8].mxu1 %v1333_v22  ;;  %v579_v8 = vrot.slane %v577_v52, 1  ;;  %v522_v11 = vor.u32 %v521_v45, %v517_v28  ;;  %v586_v12 = vrot.slane %v584_v58, 1  ;;  %v855_v15 = vcombine.low %v501_v39, %v573_v6 }
  0x6b   : > { %3291 = vmatpush3.bf16.msra.mxu1 %v3479_v10  ;;  %2489 = vmatprep.mubr.bf16.mxu0 %v1476_v41  ;;  %v515_v10 = vor.u32 %v514_v43, %v510_v25  ;;  %v593_v5 = vrot.slane %v591_v0, 1  ;;  %v301_v25 = vrot.slane %v255_v21, 4  ;;  %v3497_v41 = vld [vmem:[%s4361_s1 + $0x2e0] sm:$0xff]   ;;  %v3510_v0 = vld [vmem:[%s4361_s1 + $0x238] sm:$0xff]  }
  0x6c   : > { %3292 = vmatprep.subr.bf16.mxu1 %v3481_v13  ;;  %2490 = vmatmul.mubr.bf16.gmra.mrb[12].mxu0 %v1475_v33  ;;  %v580_v14 = vor.u32 %v579_v8, %v575_v54  ;;  %v587_v13 = vor.u32 %v586_v12, %v582_v57  ;;  %v869_v22 = vrot.slane %v855_v15, %v3737_v7  ;;  %v3508_v33 = vld [vmem:[%s4361_s1 + $0x278] sm:$0xff]   ;;  %v3499_v12 = vld [vmem:[%s4361_s1 + $0x2a0] sm:$0xff]  }
  0x6d   : > { %3271 = vmatpush3.bf16.msra.mxu0 %v3498_v26  ;;  %v594_v19 = vor.u32 %v593_v5, %v589_v59  ;;  %v2957_v26 = vcombine.low %v255_v21, %v255_v21  ;;  %v2959_v43 = vcombine.low %v301_v25, %v301_v25  ;;  %v803_v45 = vcombine.low %v255_v21, %v301_v25  ;;  %v3505_v21 = vld [vmem:[%s4361_s1 + $0x2f0] sm:$0xff]  }
  0x6e   : > { %3272 = vmatprep.subr.bf16.mxu0 %v3500_v55  ;;  %v889_v23 = vcombine.low %v508_v60, %v580_v14  ;;  %v923_v27 = vcombine.low %v515_v10, %v587_v13  ;;  %v1345_v8 = vrot.slane %v2973_v30, %v3737_v7  ;;  %v3513_v10 = vld [vmem:[%s4361_s1 + $0x340] sm:$0xff]   ;;  %v265_v30 = vld [vmem:[%s4360_s0 + $0x90] sm:$0x77]  ;;  %v3503_v13 = vld [vmem:[%s4361_s1 + $0x2a8] sm:$0xff]   ;;  %v2989_v25 = vcombine.low %v3841_v34, %v3844_v35 }
  0x6f   : > { %3293 = vmatpush3.bf16.msra.mxu1 %v3483_v37  ;;  %v957_v28 = vcombine.low %v522_v11, %v594_v19  ;;  %v600_v50 = vshrl.u32 %v2957_v26, 16  ;;  %v602_v54 = vshll.u32 %v2957_v26, 16  ;;  %v811_v55 = vrot.slane %v803_v45, %v3737_v7  ;;  %v3515_v26 = vld [vmem:[%s4361_s1 + $0x300] sm:$0xff]  }
  0x70   : > { %3294 = vmatprep.subr.bf16.mxu1 %v3489_v47  ;;  %v4139_v37 = vrot.slane %v889_v23, %v3737_v7  ;;  %v4148_v47 = vrot.slane %v923_v27, %v3737_v7  ;;  %v618_v57 = vshrl.u32 %v2959_v43, 16  ;;  %v620_v58 = vshll.u32 %v2959_v43, 16  ;;  %v3517_v27 = vld [vmem:[%s4361_s1 + $0x348] sm:$0xff]  }
  0x71   : > { %3273 = vmatpush3.bf16.msra.mxu0 %v3502_v63  ;;  %v4151_v39 = vrot.slane %v957_v28, %v3737_v7  ;;  %v604_v63 = vrot.slane %v602_v54, 1  ;;  %v2975_v6 = vcombine.low %v3747_v18, %v811_v55  ;;  %v3501_v18 = vld [vmem:[%s4361_s1 + $0x2e8] sm:$0xff]   ;;  %v302_v19 = vrot.slane %v265_v30, 4 }
  0x72   : > { %3274 = vmatprep.subr.bf16.mxu0 %v3504_v4  ;;  %v2986_v52 = vcombine.low %v869_v22, %v4139_v37  ;;  %v622_v4 = vrot.slane %v620_v58, 1  ;;  %v3519_v55 = vld [vmem:[%s4361_s1 + $0x308] sm:$0xff]   ;;  %v1489_v58 = vrot.slane %v2989_v25, %v3737_v7  ;;  %v3527_v25 = vld [vmem:[%s4361_s1 + $0x3d8] sm:$0xff]  }
  0x73   : > { %3295 = vmatpush3.bf16.msra.mxu1 %v3491_v20  ;;  %v2988_v59 = vcombine.low %v4148_v47, %v4151_v39  ;;  %v605_v5 = vor.u32 %v604_v63, %v600_v50  ;;  %v1359_v16 = vrot.slane %v2975_v6, %v3737_v7  ;;  %v2958_v20 = vcombine.low %v265_v30, %v265_v30  ;;  %v3507_v50 = vld [vmem:[%s4361_s1 + $0x2b0] sm:$0xff]   ;;  %v3514_v6 = vld [vmem:[%s4361_s1 + $0x3c0] sm:$0xff]  }
  0x74   : > { %3296 = vmatprep.subr.bf16.mxu1 %v3493_v24  ;;  %v1460_v60 = vrot.slane %v2986_v52, %v3737_v7  ;;  %v623_v17 = vor.u32 %v622_v4, %v618_v57  ;;  %v2960_v28 = vcombine.low %v302_v19, %v302_v19  ;;  %v1352_v52 = vrot.slane %v2974_v53, %v3737_v7 }
  0x75   : > { %3275 = vmatpush3.bf16.msra.mxu0 %v3506_v29  ;;  %v1474_v11 = vrot.slane %v2988_v59, %v3737_v7  ;;  %v1367_v22 = vcombine.low %v1345_v8, %v1359_v16  ;;  %v1368_v23 = vcombine.high %v1345_v8, %v1359_v16  ;;  %v607_v29 = vshrl.u32 %v2958_v20, 16  ;;  %v3518_v16 = vld [vmem:[%s4361_s1 + $0x3c8] sm:$0xff]  }
  0x76   : > { %3276 = vmatprep.subr.bf16.mxu0 %v3508_v33  ;;  %v804_v24 = vcombine.low %v605_v5, %v623_v17  ;;  %v625_v43 = vshrl.u32 %v2960_v28, 16  ;;  %v627_v45 = vshll.u32 %v2960_v28, 16  ;;  %v2990_v8 = vcombine.low %v3912_v42, %v3929_v56  ;;  %v3526_v5 = vld [vmem:[%s4361_s1 + $0x358] sm:$0xff]   ;;  %v256_v28 = vld [vmem:[%s4360_s0 + $0x48] sm:$0x77] }
  0x77   : > { %3297 = vmatpush3.bf16.msra.mxu1 %v3495_v32  ;;  %v1478_v14 = vcombine.high %v1460_v60, %v1474_v11  ;;  %v1477_v15 = vcombine.low %v1460_v60, %v1474_v11  ;;  %v973_v32 = vcombine.low %v265_v30, %v302_v19  ;;  %2579 = vmatprep.mubr.bf16.mxu0 %v1368_v23  ;;  %v3525_v23 = vld [vmem:[%s4361_s1 + $0x390] sm:$0xff]  }
  0x78   : > { %3298 = vmatprep.subr.bf16.mxu1 %v3497_v41  ;;  %v609_v41 = vshll.u32 %v2958_v20, 16  ;;  %v818_v33 = vrot.slane %v804_v24, %v3737_v7  ;;  %v1496_v30 = vrot.slane %v2990_v8, %v3737_v7 }
  0x79   : > { %3277 = vmatpush3.bf16.msra.mxu0 %v3510_v0  ;;  %2538 = vmatprep.mubr.bf16.mxu1 %v1478_v14  ;;  %v981_v34 = vrot.slane %v973_v32, %v3737_v7  ;;  %v629_v0 = vrot.slane %v627_v45, 1  ;;  %v3528_v14 = vld [vmem:[%s4361_s1 + $0x318] sm:$0xff]   ;;  %v2993_v45 = vcombine.low %v4051_v38, %v4054_v46 }
  0x7a   : > { %3318 = vmatprep.subr.bf16.mxu0 %v3513_v10  ;;  %2539 = vmatmul.mubr.bf16.gmra.mrb[12].mxu1 %v1477_v15  ;;  %v611_v35 = vrot.slane %v609_v41, 1  ;;  %v2976_v54 = vcombine.low %v3774_v51, %v818_v33  ;;  %v3509_v51 = vld [vmem:[%s4361_s1 + $0x2f8] sm:$0xff]   ;;  %v3530_v15 = vld [vmem:[%s4361_s1 + $0x360] sm:$0xff]   ;;  %v2961_v41 = vcombine.low %v256_v28, %v256_v28 }
  0x7b   : > { %3299 = vmatpush3.bf16.msra.mxu1 %v3499_v12  ;;  %v2991_v57 = vcombine.low %v3847_v36, %v981_v34  ;;  %v3522_v36 = vld [vmem:[%s4361_s1 + $0x350] sm:$0xff]   ;;  %v630_v63 = vor.u32 %v629_v0, %v625_v43  ;;  %v266_v32 = vld [vmem:[%s4360_s0 + $0x98] sm:$0x77] }
  0x7c   : > { %3300 = vmatprep.subr.bf16.mxu1 %v3501_v18  ;;  %2580 = vmatmul.mubr.bf16.vlgmr.msra.gmra.mrb[16].mxu0 %v1367_v22  ;;  %v612_v59 = vor.u32 %v611_v35, %v607_v29  ;;  %v1366_v44 = vrot.slane %v2976_v54, %v3737_v7  ;;  %v3524_v12 = vld [vmem:[%s4361_s1 + $0x310] sm:$0xff]   ;;  %v3516_v18 = vld [vmem:[%s4361_s1 + $0x380] sm:$0xff]   ;;  %v3534_v22 = vld [vmem:[%s4361_s1 + $0x368] sm:$0xff]   ;;  %v305_v29 = vrot.slane %v256_v28, 4  ;;  %v306_v33 = vrot.slane %v266_v32, 4 }
  0x7d   : > { %3319 = vmatpush3.bf16.msra.mxu0 %v3515_v26  ;;  %v1503_v53 = vrot.slane %v2991_v57, %v3737_v7  ;;  %v3536_v26 = vld [vmem:[%s4361_s1 + $0x328] sm:$0xff]   ;;  %v2962_v34 = vcombine.low %v266_v32, %v266_v32  ;;  %v3529_v35 = vld [vmem:[%s4361_s1 + $0x398] sm:$0xff]   ;;  %v3540_v43 = vld [vmem:[%s4361_s1 + $0x330] sm:$0xff]   ;;  %v636_v57 = vshrl.u32 %v2961_v41, 16 }
  0x7e   : > { %3320 = vmatprep.subr.bf16.mxu0 %v3517_v27  ;;  %v1370_v60 = vcombine.high %v1352_v52, %v1366_v44  ;;  %v974_v11 = vcombine.low %v612_v59, %v630_v63  ;;  %v1369_v56 = vcombine.low %v1352_v52, %v1366_v44  ;;  %v3538_v27 = vld [vmem:[%s4361_s1 + $0x370] sm:$0xff]   ;;  %v3542_v54 = vld [vmem:[%s4361_s1 + $0x378] sm:$0xff]   ;;  %v2963_v52 = vcombine.low %v305_v29, %v305_v29 }
  0x7f   : > { %3301 = vmatpush3.bf16.msra.mxu1 %v3503_v13  ;;  %v1512_v4 = vcombine.high %v1489_v58, %v1503_v53  ;;  %v1511_v10 = vcombine.low %v1489_v58, %v1503_v53  ;;  %v3520_v13 = vld [vmem:[%s4361_s1 + $0x388] sm:$0xff]   ;;  %v638_v58 = vshll.u32 %v2961_v41, 16  ;;  %v2964_v59 = vcombine.low %v306_v33, %v306_v33  ;;  %v3544_v63 = vld [vmem:[%s4361_s1 + $0x338] sm:$0xff]  }
  0x80   : > { %3302 = vmatprep.subr.bf16.mxu1 %v3505_v21  ;;  %2628 = vmatprep.mubr.bf16.mxu1 %v1370_v60  ;;  %v988_v42 = vrot.slane %v974_v11, %v3737_v7  ;;  %v3532_v21 = vld [vmem:[%s4361_s1 + $0x320] sm:$0xff]   ;;  %v990_v0 = vcombine.low %v266_v32, %v306_v33  ;;  %v645_v44 = vshll.u32 %v2962_v34, 16  ;;  %v656_v53 = vshll.u32 %v2963_v52, 16 }
  0x81   : > { %3321 = vmatpush3.bf16.msra.mxu0 %v3519_v55  ;;  %2587 = vmatprep.mubr.bf16.mxu0 %v1512_v4  ;;  %v820_v55 = vcombine.low %v256_v28, %v305_v29  ;;  %v640_v46 = vrot.slane %v638_v58, 1  ;;  %v661_v8 = vshrl.u32 %v2964_v59, 16  ;;  %v663_v4 = vshll.u32 %v2964_v59, 16  ;;  %v3545_v28 = vld [vmem:[%s4361_s1 + $0x3b8] sm:$0xff]  }
  0x82   : > { %3322 = vmatprep.subr.bf16.mxu0 %v3522_v36  ;;  %v2992_v17 = vcombine.low %v3936_v61, %v988_v42  ;;  %v3523_v61 = vld [vmem:[%s4361_s1 + $0x3d0] sm:$0xff]   ;;  %v3533_v36 = vld [vmem:[%s4361_s1 + $0x3a0] sm:$0xff]   ;;  %v998_v60 = vrot.slane %v990_v0, %v3737_v7 }
  0x83   : > { %3303 = vmatpush3.bf16.msra.mxu1 %v3507_v50  ;;  %v3531_v50 = vld [vmem:[%s4361_s1 + $0x3e0] sm:$0xff]   ;;  %v828_v38 = vrot.slane %v820_v55, %v3737_v7 }
  0x84   : > { %3304 = vmatprep.subr.bf16.mxu1 %v3509_v51  ;;  %2588 = vmatmul.mubr.bf16.gmra.mrb[20].mxu0 %v1511_v10  ;;  %v1510_v19 = vrot.slane %v2992_v17, %v3737_v7  ;;  %v643_v51 = vshrl.u32 %v2962_v34, 16  ;;  %v3535_v10 = vld [vmem:[%s4361_s1 + $0x3e8] sm:$0xff]   ;;  %v2995_v42 = vcombine.low %v4063_v62, %v998_v60  ;;  %v665_v17 = vrot.slane %v663_v4, 1  ;;  %v3539_v62 = vld [vmem:[%s4361_s1 + $0x3f0] sm:$0xff]  }
  0x85   : > { %3323 = vmatpush3.bf16.msra.mxu0 %v3524_v12  ;;  %v2979_v11 = vcombine.low %v3956_v9, %v828_v38  ;;  %v1381_v12 = vrot.slane %v2977_v1, %v3737_v7  ;;  %v3537_v9 = vld [vmem:[%s4361_s1 + $0x3a8] sm:$0xff]  }
  0x86   : > { %3324 = vmatprep.subr.bf16.mxu0 %v3526_v5  ;;  %v1514_v20 = vcombine.high %v1496_v30, %v1510_v19  ;;  %v1513_v24 = vcombine.low %v1496_v30, %v1510_v19  ;;  %v641_v5 = vor.u32 %v640_v46, %v636_v57  ;;  %v1539_v2 = vrot.slane %v2995_v42, %v3737_v7 }
  0x87   : > { %3305 = vmatpush3.bf16.msra.mxu1 %v3511_v49  ;;  %v654_v49 = vshrl.u32 %v2963_v52, 16  ;;  %v1395_v30 = vrot.slane %v2979_v11, %v3737_v7  ;;  %v666_v3 = vor.u32 %v665_v17, %v661_v8  ;;  %v2978_v19 = vcombine.low %v4026_v31, %v4036_v40  ;;  %v3543_v31 = vld [vmem:[%s4361_s1 + $0x3f8] sm:$0xff]  }
  0x88   : > { %3346 = vmatprep.subr.bf16.mxu1 %v3514_v6  ;;  %v647_v6 = vrot.slane %v645_v44, 1 }
  0x89   : > { %3325 = vmatpush3.bf16.msra.mxu0 %v3528_v14  ;;  %v1403_v1 = vcombine.low %v1381_v12, %v1395_v30 }
  0x8a   : > { %2629 = vmatmul.mubr.bf16.vlgmr.msra.gmra.mrb[16].mxu1 %v1369_v56  ;;  %3326 = vmatprep.subr.bf16.mxu0 %v3530_v15  ;;  %v1525_v56 = vrot.slane %v2993_v45, %v3737_v7  ;;  %v1404_v15 = vcombine.high %v1381_v12, %v1395_v30 }
  0x8b   : > { %3347 = vmatpush3.bf16.msra.mxu1 %v3516_v18  ;;  %2636 = vmatprep.mubr.bf16.mxu1 %v1514_v20  ;;  %v658_v18 = vrot.slane %v656_v53, 1 }
  0x8c   : > { %3348 = vmatprep.subr.bf16.mxu1 %v3518_v16  ;;  %v648_v16 = vor.u32 %v647_v6, %v643_v51  ;;  %2677 = vmatprep.mubr.bf16.mxu0 %v1404_v15  ;;  %v1547_v32 = vcombine.low %v1525_v56, %v1539_v2 }
  0x8d   : > { %3327 = vmatpush3.bf16.msra.mxu0 %v3532_v21  ;;  %v659_v14 = vor.u32 %v658_v18, %v654_v49 }
  0x8e   : > { %3328 = vmatprep.subr.bf16.mxu0 %v3534_v22  ;;  %v991_v20 = vcombine.low %v648_v16, %v666_v3  ;;  %v3541_v22 = vld [vmem:[%s4361_s1 + $0x3b0] sm:$0xff]  }
  0x8f   : > { %3349 = vmatpush3.bf16.msra.mxu1 %v3520_v13  ;;  %v821_v13 = vcombine.low %v641_v5, %v659_v14 }
  0x90   : > { %3350 = vmatprep.subr.bf16.mxu1 %v3523_v61  ;;  %v1548_v61 = vcombine.high %v1525_v56, %v1539_v2 }
  0x91   : > { %3329 = vmatpush3.bf16.msra.mxu0 %v3536_v26  ;;  %v835_v21 = vrot.slane %v821_v13, %v3737_v7 }
  0x92   : > { %2637 = vmatmul.mubr.bf16.gmra.mrb[20].mxu1 %v1513_v24  ;;  %3330 = vmatprep.subr.bf16.mxu0 %v3538_v27  ;;  %v2994_v24 = vcombine.low %v4139_v37, %v4148_v47 }
  0x93   : > { %3351 = vmatpush3.bf16.msra.mxu1 %v3525_v23  ;;  %v1005_v23 = vrot.slane %v991_v20, %v3737_v7  ;;  %v2980_v40 = vcombine.low %v4044_v48, %v835_v21 }
  0x94   : > { %3352 = vmatprep.subr.bf16.mxu1 %v3527_v25  ;;  %v1388_v25 = vrot.slane %v2978_v19, %v3737_v7  ;;  %v1532_v37 = vrot.slane %v2994_v24, %v3737_v7 }
  0x95   : > { %3331 = vmatpush3.bf16.msra.mxu0 %v3540_v43  ;;  %v2996_v26 = vcombine.low %v4151_v39, %v1005_v23  ;;  %v1402_v27 = vrot.slane %v2980_v40, %v3737_v7 }
  0x96   : > { %3332 = vmatprep.subr.bf16.mxu0 %v3542_v54 }
  0x97   : > { %3353 = vmatpush3.bf16.msra.mxu1 %v3529_v35  ;;  %v1546_v47 = vrot.slane %v2996_v26, %v3737_v7  ;;  %v1406_v29 = vcombine.high %v1388_v25, %v1402_v27  ;;  %v1405_v48 = vcombine.low %v1388_v25, %v1402_v27 }
  0x98   : > { %3354 = vmatprep.subr.bf16.mxu1 %v3531_v50 }
  0x99   : > { %3333 = vmatpush3.bf16.msra.mxu0 %v3544_v63  ;;  %2726 = vmatprep.mubr.bf16.mxu1 %v1406_v29  ;;  %v1550_v41 = vcombine.high %v1532_v37, %v1546_v47  ;;  %v1549_v39 = vcombine.low %v1532_v37, %v1546_v47 }
  0x9b   : > { %3355 = vmatpush3.bf16.msra.mxu1 %v3533_v36 }
  0x9c   : > { %3356 = vmatprep.subr.bf16.mxu1 %v3535_v10  ;;  %2678 = vmatmul.mubr.bf16.vlgmr.msra.gmra.mrb[24].mxu0 %v1403_v1 }
  0x9d   : > { %2685 = vmatprep.mubr.bf16.mxu0 %v1548_v61 }
  0x9f   : > { %3357 = vmatpush3.bf16.msra.mxu1 %v3537_v9 }
  0xa0   : > { %3358 = vmatprep.subr.bf16.mxu1 %v3539_v62 }
  0xa3   : > { %3359 = vmatpush3.bf16.msra.mxu1 %v3541_v22 }
  0xa4   : > { %3360 = vmatprep.subr.bf16.mxu1 %v3543_v31  ;;  %2686 = vmatmul.mubr.bf16.gmra.mrb[28].mxu0 %v1547_v32 }
  0xa7   : > { %3361 = vmatpush3.bf16.msra.mxu1 %v3545_v28 }
  0xaa   : > { %2727 = vmatmul.mubr.bf16.vlgmr.msra.gmra.mrb[24].mxu1 %v1405_v48 }
  0xab   : > { %2734 = vmatprep.mubr.bf16.mxu1 %v1550_v41 }
  0xb2   : > { %2735 = vmatmul.mubr.bf16.gmra.mrb[28].mxu1 %v1549_v39 }
 0x10d   : > { %v3166_v33 = vpop.f32.mrb[0].mxu0 }
 0x10e   : > { %v3167_v34 = vpop.f32.mrb[1].mxu0 }
 0x10f   : > { %v3168_v35 = vadd.f32 %v3167_v34, %v3166_v33  ;;  %v3169_v43 = vpop.f32.mrb[2].mxu0 }
 0x110   : > { %v3170_v45 = vpop.f32.mrb[3].mxu0 }
 0x111   : > { %v3171_v50 = vadd.f32 %v3170_v45, %v3169_v43 }
 0x116   : > { %v3194_v54 = vpop.f32.mrb[0].mxu1 }
 0x117   : > { %v3195_v7 = vpop.f32.mrb[1].mxu1 }
 0x118   : > { %v3196_v52 = vadd.f32 %v3195_v7, %v3194_v54  ;;  %v3197_v55 = vpop.f32.mrb[2].mxu1 }
 0x119   : > { %v3198_v57 = vpop.f32.mrb[3].mxu1 }
 0x11a   : > { %v2435_v58 = vadd.f32 %v3196_v52, %v3168_v35  ;;  %v3199_v59 = vadd.f32 %v3198_v57, %v3197_v55 }
 0x11c   : > { %v2438_v0 = vadd.f32 %v3199_v59, %v3171_v50  ;;  %v3172_v51 = vpop.f32.mrb[4].mxu0 }
 0x11d   : > { %v3173_v44 = vpop.f32.mrb[5].mxu0 }
 0x11e   : > { %v3174_v38 = vadd.f32 %v3173_v44, %v3172_v51  ;;  %v3175_v46 = vpop.f32.mrb[6].mxu0 }
 0x11f   : > { %v3176_v49 = vpop.f32.mrb[7].mxu0 }
 0x120   : > { %v3177_v53 = vadd.f32 %v3176_v49, %v3175_v46 }
 0x12c   : > { %v3200_v36 = vpop.f32.mrb[4].mxu1 }
 0x12d   : > { %v3201_v63 = vpop.f32.mrb[5].mxu1 }
 0x12e   : > { %v3202_v60 = vadd.f32 %v3201_v63, %v3200_v36  ;;  %v3203_v6 = vpop.f32.mrb[6].mxu1 }
 0x12f   : > { %v3222_v8 = vpop.f32.mrb[8].mxu0  ;;  %v3204_v4 = vpop.f32.mrb[7].mxu1 }
 0x130   : > { %v3223_v10 = vpop.f32.mrb[9].mxu0  ;;  %v2443_v11 = vadd.f32 %v3202_v60, %v3174_v38  ;;  %v3205_v12 = vadd.f32 %v3204_v4, %v3203_v6 }
 0x131   : > { %v3224_v5 = vadd.f32 %v3223_v10, %v3222_v8  ;;  %v3225_v18 = vpop.f32.mrb[10].mxu0 }
 0x132   : > { %v3226_v42 = vpop.f32.mrb[11].mxu0  ;;  %v2446_v56 = vadd.f32 %v3205_v12, %v3177_v53 }
 0x133   : > { %v2484_v16 = vadd.f32 %v3224_v5, %v2435_v58  ;;  %v3227_v17 = vadd.f32 %v3226_v42, %v3225_v18 }
 0x135   : > { %v2487_v30 = vadd.f32 %v3227_v17, %v2438_v0 }
 0x13d   : > { %v3250_v14 = vpop.f32.mrb[8].mxu1 }
 0x13e   : > { %v3251_v9 = vpop.f32.mrb[9].mxu1 }
 0x13f   : > { %v3252_v2 = vadd.f32 %v3251_v9, %v3250_v14  ;;  %v3253_v3 = vpop.f32.mrb[10].mxu1  ;;  %v3228_v62 = vpop.f32.mrb[12].mxu0 }
 0x140   : > { %v3254_v1 = vpop.f32.mrb[11].mxu1  ;;  %v3229_v15 = vpop.f32.mrb[13].mxu0 }
 0x141   : > { %v2533_v13 = vadd.f32 %v3252_v2, %v2484_v16  ;;  %v3255_v19 = vadd.f32 %v3254_v1, %v3253_v3  ;;  %v3230_v61 = vadd.f32 %v3229_v15, %v3228_v62  ;;  %v3231_v20 = vpop.f32.mrb[14].mxu0 }
 0x142   : > { %v3232_v21 = vpop.f32.mrb[15].mxu0 }
 0x143   : > { %v2536_v22 = vadd.f32 %v3255_v19, %v2487_v30  ;;  %v2492_v23 = vadd.f32 %v3230_v61, %v2443_v11  ;;  %v3233_v24 = vadd.f32 %v3232_v21, %v3231_v20 }
 0x145   : > { %v2495_v31 = vadd.f32 %v3233_v24, %v2446_v56 }
 0x14d   : > { %v3256_v40 = vpop.f32.mrb[12].mxu1 }
 0x14e   : > { %v3257_v25 = vpop.f32.mrb[13].mxu1 }
 0x14f   : > { %v3258_v26 = vadd.f32 %v3257_v25, %v3256_v40  ;;  %v3259_v27 = vpop.f32.mrb[14].mxu1  ;;  %v3278_v28 = vpop.f32.mrb[16].mxu0 }
 0x150   : > { %v3260_v37 = vpop.f32.mrb[15].mxu1  ;;  %v3279_v47 = vpop.f32.mrb[17].mxu0 }
 0x151   : > { %v2541_v32 = vadd.f32 %v3258_v26, %v2492_v23  ;;  %v3261_v29 = vadd.f32 %v3260_v37, %v3259_v27  ;;  %v3280_v48 = vadd.f32 %v3279_v47, %v3278_v28  ;;  %v3281_v41 = vpop.f32.mrb[18].mxu0 }
 0x152   : > { %v3282_v39 = vpop.f32.mrb[19].mxu0 }
 0x153   : > { %v2544_v33 = vadd.f32 %v3261_v29, %v2495_v31  ;;  %v2582_v34 = vadd.f32 %v3280_v48, %v2533_v13  ;;  %v3283_v35 = vadd.f32 %v3282_v39, %v3281_v41 }
 0x155   : > { %v2585_v43 = vadd.f32 %v3283_v35, %v2536_v22  ;;  %v2747_v35 = vld [vmem:[#allocation3] sm:$0xff] }
 0x157   : > { %v3284_v45 = vpop.f32.mrb[20].mxu0 }
 0x158   : > { %v3285_v50 = vpop.f32.mrb[21].mxu0 }
 0x159   : > { %v3286_v54 = vadd.f32 %v3285_v50, %v3284_v45  ;;  %v3287_v7 = vpop.f32.mrb[22].mxu0 }
 0x15a   : > { %v3288_v52 = vpop.f32.mrb[23].mxu0 }
 0x15b   : > { %v2590_v57 = vadd.f32 %v3286_v54, %v2541_v32  ;;  %v3289_v58 = vadd.f32 %v3288_v52, %v3287_v7  ;;  %v2753_v54 = vld [vmem:[#allocation4] sm:$0xff] }
 0x15d   : > { %v3306_v55 = vpop.f32.mrb[16].mxu1  ;;  %v2593_v44 = vadd.f32 %v3289_v58, %v2544_v33 }
 0x15e   : > { %v3307_v59 = vpop.f32.mrb[17].mxu1 }
 0x15f   : > { %v3308_v0 = vadd.f32 %v3307_v59, %v3306_v55  ;;  %v3309_v51 = vpop.f32.mrb[18].mxu1 }
 0x160   : > { %v3310_v38 = vpop.f32.mrb[19].mxu1 }
 0x161   : > { %v2631_v46 = vadd.f32 %v3308_v0, %v2582_v34  ;;  %v3311_v49 = vadd.f32 %v3310_v38, %v3309_v51 }
 0x163   : > { %v2634_v53 = vadd.f32 %v3311_v49, %v2585_v43 }
 0x165   : > { %v3312_v36 = vpop.f32.mrb[20].mxu1 }
 0x166   : > { %v3313_v63 = vpop.f32.mrb[21].mxu1 }
 0x167   : > { %v3314_v60 = vadd.f32 %v3313_v63, %v3312_v36  ;;  %v3315_v6 = vpop.f32.mrb[22].mxu1 }
 0x168   : > { %v3316_v8 = vpop.f32.mrb[23].mxu1 }
 0x169   : > { %v2639_v4 = vadd.f32 %v3314_v60, %v2590_v57  ;;  %v3317_v10 = vadd.f32 %v3316_v8, %v3315_v6 }
 0x16b   : > { %v2642_v11 = vadd.f32 %v3317_v10, %v2593_v44 }
 0x16f   : > { %v3334_v12 = vpop.f32.mrb[24].mxu0 }
 0x170   : > { %v3335_v5 = vpop.f32.mrb[25].mxu0 }
 0x171   : > { %v3336_v18 = vadd.f32 %v3335_v5, %v3334_v12  ;;  %v3337_v42 = vpop.f32.mrb[26].mxu0 }
 0x172   : > { %v3338_v56 = vpop.f32.mrb[27].mxu0 }
 0x173   : > { %v2680_v16 = vadd.f32 %v3336_v18, %v2631_v46  ;;  %v3339_v17 = vadd.f32 %v3338_v56, %v3337_v42 }
 0x175   : > { %v2683_v30 = vadd.f32 %v3339_v17, %v2634_v53 }
 0x177   : > { %v3340_v14 = vpop.f32.mrb[28].mxu0 }
 0x178   : > { %v3341_v9 = vpop.f32.mrb[29].mxu0 }
 0x179   : > { %v3342_v2 = vadd.f32 %v3341_v9, %v3340_v14  ;;  %v3343_v3 = vpop.f32.mrb[30].mxu0 }
 0x17a   : > { %v3344_v1 = vpop.f32.mrb[31].mxu0 }
 0x17b   : > { %v2688_v13 = vadd.f32 %v3342_v2, %v2639_v4  ;;  %v3345_v19 = vadd.f32 %v3344_v1, %v3343_v3 }
 0x17d   : > { %v3362_v62 = vpop.f32.mrb[24].mxu1  ;;  %v2691_v22 = vadd.f32 %v3345_v19, %v2642_v11 }
 0x17e   : > { %v3363_v15 = vpop.f32.mrb[25].mxu1 }
 0x17f   : > { %v3364_v61 = vadd.f32 %v3363_v15, %v3362_v62  ;;  %v3365_v20 = vpop.f32.mrb[26].mxu1 }
 0x180   : > { %v3366_v21 = vpop.f32.mrb[27].mxu1 }
 0x181   : > { %v2729_v23 = vadd.f32 %v3364_v61, %v2680_v16  ;;  %v3367_v24 = vadd.f32 %v3366_v21, %v3365_v20 }
 0x183   : > { %2743 = vst [vmem:[#allocation2] sm:$0xff] %v2729_v23  ;;  %v2732_v31 = vadd.f32 %v3367_v24, %v2683_v30  ;;  %v2754_v40 = vmul.f32 %v2729_v23, %v2729_v23 }
 0x185   : > { %2744 = vst [vmem:[#allocation2 + $0x8] sm:$0xff] %v2732_v31  ;;  %v2748_v25 = vadd.f32 %v2732_v31, %v2729_v23  ;;  %v2755_v26 = vmul.f32 %v2732_v31, %v2732_v31  ;;  %v3368_v27 = vpop.f32.mrb[28].mxu1 }
 0x186   : > { %v3369_v28 = vpop.f32.mrb[29].mxu1 }
 0x187   : > { %v2758_v37 = vadd.f32 %v2755_v26, %v2754_v40  ;;  %v3370_v47 = vadd.f32 %v3369_v28, %v3368_v27  ;;  %v3371_v32 = vpop.f32.mrb[30].mxu1 }
 0x188   : > { %v3372_v29 = vpop.f32.mrb[31].mxu1 }
 0x189   : > { %v2737_v48 = vadd.f32 %v3370_v47, %v2688_v13  ;;  %v3373_v41 = vadd.f32 %v3372_v29, %v3371_v32 }
 0x18b   : > { %2745 = vst [vmem:[#allocation2 + $0x10] sm:$0xff] %v2737_v48  ;;  %v2749_v39 = vadd.f32 %v2748_v25, %v2737_v48  ;;  %v2756_v33 = vmul.f32 %v2737_v48, %v2737_v48  ;;  %v2740_v34 = vadd.f32 %v3373_v41, %v2691_v22 }
 0x18d   : > { %v2759_v43 = vadd.f32 %v2758_v37, %v2756_v33  ;;  %2746 = vst [vmem:[#allocation2 + $0x18] sm:$0xff] %v2740_v34  ;;  %v2750_v45 = vadd.f32 %v2749_v39, %v2740_v34  ;;  %v2757_v50 = vmul.f32 %v2740_v34, %v2740_v34 }
 0x18f   : > { %v2751_v7 = vadd.f32 %v2750_v45, %v2747_v35  ;;  %v2760_v52 = vadd.f32 %v2759_v43, %v2757_v50 }
 0x191   : > { %2752 = vst [vmem:[#allocation3] sm:$0xff] %v2751_v7  ;;  %v2761_v55 = vadd.f32 %v2760_v52, %v2753_v54 }
 0x193   : > { %2762 = vst [vmem:[#allocation4] sm:$0xff] %v2761_v55 }
 0x194 PF: > { %p3125_p6 = scmp.ne.s32.totalorder %s3564_s15, 1 }
 0x195   : > { %v2798_v18 = vlaneseq (!%p3125_p6)  ;;  %v2786_v56 = vld [vmem:[%s4362_s2] sm:$0x1] (!%p3125_p6)  ;;  %v2794_v2 = vld [vmem:[#allocation2 + $0x8] sm:$0xff] (!%p3125_p6)  ;;  %v2795_v3 = vld [vmem:[#allocation2 + $0x10] sm:$0xff] (!%p3125_p6) }
 0x196   : > { %2766 = sbr.rel (%p3125_p6) target bundleno = 459 (0x1cb), region = 48  ;;  %v2790_v14 = vld [vmem:[%s4363_s3] sm:$0x1] (!%p3125_p6)  ;;  %v2796_v15 = vld [vmem:[#allocation2 + $0x18] sm:$0xff] (!%p3125_p6) }
 0x197   : > { %v2799_v42 = vshrl.u32 (!%p3125_p6), %v2798_v18, 7  ;;  %v2793_v9 = vld [vmem:[#allocation2] sm:$0xff] (!%p3125_p6) }
 0x198   : > { %v2767_v57 = vld [vmem:[#allocation3] sm:$0xff] (!%p3125_p6) }
 0x199   : > { %v2768_v59 = vrot.slane (!%p3125_p6), %v2767_v57, 4  ;;  %v2800_v16 = vsub.s32 (!%p3125_p6), 0, %v2799_v42 }
 0x19a   : > { %v2774_v58 = vld [vmem:[#allocation4] sm:$0xff] (!%p3125_p6) }
 0x19b   : > { %v2775_v0 = vrot.slane (!%p3125_p6), %v2774_v58, 4  ;;  %v2769_v51 = vadd.f32 (!%p3125_p6), %v2768_v59, %v2767_v57 }
 0x19d   : > { %v2776_v44 = vadd.f32 %v2775_v0, %v2774_v58  ;;  %v2770_v38 = vrot.slane %v2769_v51, 2 }
 0x19f   : > { %v2777_v46 = vrot.slane %v2776_v44, 2  ;;  %v2771_v49 = vadd.f32 %v2770_v38, %v2769_v51 }
 0x1a1   : > { %v2778_v53 = vadd.f32 %v2777_v46, %v2776_v44  ;;  %v2772_v36 = vrot.slane %v2771_v49, 1 }
 0x1a3   : > { %v2779_v63 = vrot.slane %v2778_v53, 1  ;;  %v2773_v60 = vadd.f32 %v2772_v36, %v2771_v49 }
 0x1a5   : > { %v2780_v6 = vadd.f32 %v2779_v63, %v2778_v53  ;;  %v2781_v8 = vmul.f32 0.03125, %v2773_v60 }
 0x1a7   : > { %v2782_v4 = vmul.f32 0.03125, %v2780_v6  ;;  %v2783_v10 = vmul.f32 %v2781_v8, %v2781_v8 }
 0x1a9   : > { %v2784_v11 = vsub.f32 %v2782_v4, %v2783_v10 }
 0x1ab   : > { %v2785_v12 = vmax.f32 %v2784_v11, 0.0 }
 0x1ad   : > { %v2787_v5 = vadd.f32 1e-05, %v2785_v12 }
 0x1af   : > { %3548 = vrsqrt.f32 %v2787_v5 }
 0x1b9   : > { %v3549_v17 = vpop.eup %3548 }
 0x1ba   : > { %v2789_v30 = vmul.f32 %v3549_v17, %v2786_v56 }
 0x1bc   : > { %v2791_v62 = vmul.f32 %v2789_v30, %v2781_v8  ;;  %v2801_v1 = vrot.slane %v2789_v30, %v2800_v16 }
 0x1be   : > { %v2792_v13 = vsub.f32 %v2790_v14, %v2791_v62  ;;  %v2803_v19 = vmul.f32 %v2801_v1, %v2793_v9  ;;  %v2804_v61 = vmul.f32 %v2801_v1, %v2794_v2  ;;  %v2805_v20 = vmul.f32 %v2801_v1, %v2795_v3 }
 0x1bf   : > { %v2806_v21 = vmul.f32 %v2801_v1, %v2796_v15 }
 0x1c0   : > { %v2811_v22 = vrot.slane %v2792_v13, %v2800_v16 }
 0x1c2   : > { %v2813_v23 = vadd.f32 %v2811_v22, %v2803_v19  ;;  %v2814_v24 = vadd.f32 %v2811_v22, %v2804_v61  ;;  %v2815_v31 = vadd.f32 %v2811_v22, %v2805_v20  ;;  %v2816_v40 = vadd.f32 %v2811_v22, %v2806_v21 }
 0x1c4   : > { %vm2817_vm0 = vcmp.ge.f32.partialorder %v2813_v23, 0.0  ;;  %vm2818_vm1 = vcmp.ge.f32.partialorder %v2814_v24, 0.0  ;;  %v2821_v25 = vmul.f32 0.2, %v2813_v23  ;;  %v2822_v26 = vmul.f32 0.2, %v2814_v24 }
 0x1c5   : > { %vm2819_vm2 = vcmp.ge.f32.partialorder %v2815_v31, 0.0  ;;  %vm2820_vm3 = vcmp.ge.f32.partialorder %v2816_v40, 0.0  ;;  %v2823_v27 = vmul.f32 0.2, %v2815_v31  ;;  %v2824_v28 = vmul.f32 0.2, %v2816_v40 }
 0x1c6   : > { %v2825_v37 = vsel %vm2817_vm0, %v2813_v23, %v2821_v25  ;;  %v2826_v47 = vsel %vm2818_vm1, %v2814_v24, %v2822_v26 }
 0x1c7   : > { %v3142_v32 = vpack.c.bf16 %v2826_v47, %v2825_v37  ;;  %v2827_v29 = vsel %vm2819_vm2, %v2815_v31, %v2823_v27  ;;  %v2828_v48 = vsel %vm2820_vm3, %v2816_v40, %v2824_v28 }
 0x1c8   : > { %v3147_v41 = vpack.c.bf16 %v2828_v48, %v2827_v29 }
 0x1c9   : > { %3143 = vst [vmem:[%s4364_s4] sm:$0xff] %v3142_v32  }
 0x1ca   : > { %3149 = vst [vmem:[%s4364_s4 + $0x8] sm:$0xff] %v3147_v41  }
 0x1cb PF: > { %s14_s17 = sadd.s32 1, %s3572_s17   ;;  %s4365_s15 = smov %s3568_s16 }
 0x1cc   : > { %p11_p7 = scmp.ge.s32.totalorder %s14_s17, 4   ;;  %s4366_s16 = smov %s4368_s18 }
 0x1ce   :  { %13 = sbr.rel (!%p11_p7) target bundleno = 2 (0x2), region = 78 }

// kernel: encoder_forward.4
= control target key start
LH: loop header
LB: loop body
LE: loop exit
PB: predicated region body
PF: predicated region fallthrough
CT: control target
= control target key end

     0   :  { %s4850_s15 = smov 0   ;;  %s4852_s16 = smov 0   ;;  %s6361_s0 = inlined_call_operand.vmem [shape: bf16[2,9,2,9,256], index: 0, kind: input, shape index: {}]   ;;  %s6362_s1 = inlined_call_operand.vmem [shape: bf16[2048,128], index: 1, kind: input, shape index: {}]   ;;  %s6363_s2 = inlined_call_operand.vmem [shape: f32[1,128], index: 2, kind: input, shape index: {}]   ;;  %s6364_s3 = inlined_call_operand.vmem [shape: f32[1,128], index: 3, kind: input, shape index: {}]   ;;  %s6365_s4 = inlined_call_operand.vmem [shape: bf16[128,128], index: 4, kind: output, shape index: {}]  }
   0x1   :  { %s4854_s17 = smov 0  }
   0x2 LB: > { %s26_s18 = sadd.s32 1, %s4818_s16  ;;  %p3670_p0 = scmp.ge.s32.totalorder %s4822_s17, 1  ;;  %s4822_s17 = sphi %s4854_s17, %s14_s17   ;;  %s4818_s16 = sphi %s4852_s16, %s6600_s16   ;;  %s4814_s15 = sphi %s4850_s15, %s6599_s15  }
   0x3   : > { %p28_p1 = scmp.ge.s32.totalorder %s26_s18, 2  ;;  %p186_p2 = scmp.lt.s32.totalorder %s4822_s17, 3 }
   0x5   : > { %s6602_s18 = smov (%p28_p1, %s26_s18), 0  ;;  %p187_p3 = pnand %p3670_p0, %p186_p2 }
   0x6   : > { %p236_p4 = scmp.eq.s32.totalorder (!%p187_p3), %s4814_s15, 0 }
   0x7   : > { %190 = sbr.rel (%p187_p3) target bundleno = 616 (0x268), region = 36 }
   0xe   : > { %241 = sbr.rel (!%p236_p4) target bundleno = 21 (0x15), region = 40  ;;  %v4824_v0 = vmov (%p236_p4), 0.0  }
   0xf   : > { %242 = vst [vmem:[#allocation3] sm:$0xff] (%p236_p4), %v4824_v0  ;;  %243 = vst [vmem:[#allocation4] sm:$0xff] (%p236_p4), %v4824_v0 }
  0x15 PF: > { %p3672_p5 = scmp.ne.s32.totalorder %s4814_s15, 0 }
  0x17   : > { %246 = sbr.rel (%p3672_p5) target bundleno = 545 (0x221), region = 44 }
  0x1e   : > { %v4623_v1 = vld [vmem:[%s6362_s1 + $0x40] sm:$0xff]   ;;  %v4627_v5 = vld [vmem:[%s6362_s1 + $0x48] sm:$0xff]   ;;  %v4631_v9 = vld [vmem:[%s6362_s1 + $0x50] sm:$0xff]  }
  0x1f   : > { %v4624_v2 = vld [vmem:[%s6362_s1 + $0xc0] sm:$0xff]   ;;  %4086 = vmatprep.subr.bf16.mxu0 %v4623_v1  ;;  %v4628_v6 = vld [vmem:[%s6362_s1 + $0xc8] sm:$0xff]   ;;  %v4632_v10 = vld [vmem:[%s6362_s1 + $0xd0] sm:$0xff]  }
  0x20   : > { %v4625_v3 = vld [vmem:[%s6362_s1] sm:$0xff]   ;;  %4150 = vmatprep.subr.bf16.mxu1 %v4624_v2  ;;  %v4629_v7 = vld [vmem:[%s6362_s1 + $0x8] sm:$0xff]   ;;  %v4633_v11 = vld [vmem:[%s6362_s1 + $0x10] sm:$0xff]  }
  0x21   : > { %v4626_v4 = vld [vmem:[%s6362_s1 + $0x80] sm:$0xff]   ;;  %4087 = vmatpush3.bf16.msra.mxu0 %v4625_v3  ;;  %v4630_v8 = vld [vmem:[%s6362_s1 + $0x88] sm:$0xff]   ;;  %v4634_v12 = vld [vmem:[%s6362_s1 + $0x90] sm:$0xff]  }
  0x22   : > { %4151 = vmatpush3.bf16.msra.mxu1 %v4626_v4  ;;  %4088 = vmatprep.subr.bf16.mxu0 %v4627_v5  ;;  %v4635_v13 = vld [vmem:[%s6362_s1 + $0x58] sm:$0xff]   ;;  %v4639_v17 = vld [vmem:[%s6362_s1 + $0x60] sm:$0xff]   ;;  %v4643_v21 = vld [vmem:[%s6362_s1 + $0x68] sm:$0xff]  }
  0x23   : > { %4152 = vmatprep.subr.bf16.mxu1 %v4628_v6  ;;  %v4636_v14 = vld [vmem:[%s6362_s1 + $0xd8] sm:$0xff]   ;;  %v4640_v18 = vld [vmem:[%s6362_s1 + $0xe0] sm:$0xff]   ;;  %v4644_v22 = vld [vmem:[%s6362_s1 + $0xe8] sm:$0xff]  }
  0x24   : > { %v4637_v15 = vld [vmem:[%s6362_s1 + $0x18] sm:$0xff]   ;;  %v4641_v19 = vld [vmem:[%s6362_s1 + $0x20] sm:$0xff]   ;;  %v4645_v23 = vld [vmem:[%s6362_s1 + $0x28] sm:$0xff]  }
  0x25   : > { %4089 = vmatpush3.bf16.msra.mxu0 %v4629_v7  ;;  %v4638_v16 = vld [vmem:[%s6362_s1 + $0x98] sm:$0xff]   ;;  %v4642_v20 = vld [vmem:[%s6362_s1 + $0xa0] sm:$0xff]   ;;  %v4646_v24 = vld [vmem:[%s6362_s1 + $0xa8] sm:$0xff]  }
  0x26   : > { %4153 = vmatpush3.bf16.msra.mxu1 %v4630_v8  ;;  %4090 = vmatprep.subr.bf16.mxu0 %v4631_v9  ;;  %v4647_v25 = vld [vmem:[%s6362_s1 + $0x70] sm:$0xff]   ;;  %v4651_v29 = vld [vmem:[%s6362_s1 + $0x78] sm:$0xff]   ;;  %v247_v33 = vld [vmem:[%s6361_s0] sm:$0xff] }
  0x27   : > { %4154 = vmatprep.subr.bf16.mxu1 %v4632_v10  ;;  %v4648_v26 = vld [vmem:[%s6362_s1 + $0xf0] sm:$0xff]   ;;  %v4652_v30 = vld [vmem:[%s6362_s1 + $0xf8] sm:$0xff]   ;;  %v248_v34 = vld [vmem:[%s6361_s0 + $0x8] sm:$0x11]  ;;  %v335_v36 = vrot.slane %v247_v33, 4 }
  0x28   : > { %v4649_v27 = vld [vmem:[%s6362_s1 + $0x30] sm:$0xff]   ;;  %v4653_v31 = vld [vmem:[%s6362_s1 + $0x38] sm:$0xff]   ;;  %v4977_v35 = vld [vmem:[%s6361_s0 + $0x20] sm:$0xff]  ;;  %v367_v38 = vrot.slane %v248_v34, 4  ;;  %v3673_v39 = vcombine.low %v247_v33, %v248_v34 }
  0x29   : > { %4091 = vmatpush3.bf16.msra.mxu0 %v4633_v11  ;;  %v4650_v28 = vld [vmem:[%s6362_s1 + $0xb0] sm:$0xff]   ;;  %v4654_v32 = vld [vmem:[%s6362_s1 + $0xb8] sm:$0xff]   ;;  %6437 = vst [vmem:[#allocation5_spill] sm:$0xff] %v4977_v35  ;;  %v4980_v37 = vrot.slane %v4977_v35, 4  ;;  %v252_v40 = vld [vmem:[%s6361_s0 + $0x28] sm:$0x11]  ;;  %v3745_v43 = vcombine.low %v247_v33, %v4977_v35 }
  0x2a   : > { %4155 = vmatpush3.bf16.msra.mxu1 %v4634_v12  ;;  %4092 = vmatprep.subr.bf16.mxu0 %v4635_v13  ;;  %v4657_v41 = vld [vmem:[%s6362_s1 + $0x140] sm:$0xff]   ;;  %v368_v42 = vrot.slane %v252_v40, 4  ;;  %v3674_v44 = vcombine.low %v4977_v35, %v252_v40  ;;  %v3689_v46 = vcombine.low %v335_v36, %v367_v38  ;;  %v512_v48 = vshrl.u32 %v3673_v39, 16  ;;  %v256_v0 = vld [vmem:[%s6361_s0 + $0x48] sm:$0x11] }
  0x2b   : > { %4156 = vmatprep.subr.bf16.mxu1 %v4636_v14  ;;  %6438 = vst [vmem:[#allocation6_spill] sm:$0xff] %v4980_v37  ;;  %v4658_v45 = vld [vmem:[%s6362_s1 + $0x100] sm:$0xff]   ;;  %v3746_v47 = vcombine.low %v335_v36, %v4980_v37  ;;  %v514_v49 = vshll.u32 %v3673_v39, 16  ;;  %v260_v5 = vld [vmem:[%s6361_s0 + $0x68] sm:$0x11]  ;;  %v369_v8 = vrot.slane %v256_v0, 4 }
  0x2c   : > { %v3690_v50 = vcombine.low %v4980_v37, %v368_v42  ;;  %v519_v51 = vshrl.u32 %v3674_v44, 16  ;;  %v521_v52 = vshll.u32 %v3674_v44, 16  ;;  %v672_v53 = vshrl.u32 %v3689_v46, 16  ;;  %v4659_v56 = vld [vmem:[%s6362_s1 + $0x1c0] sm:$0xff]   ;;  %v4663_v6 = vld [vmem:[%s6362_s1 + $0x148] sm:$0xff]   ;;  %v4669_v39 = vld [vmem:[%s6362_s1 + $0x150] sm:$0xff]  }
  0x2d   : > { %4093 = vmatpush3.bf16.msra.mxu0 %v4637_v15  ;;  %2567 = vmatprep.mubr.bf16.mxu0 %v3746_v47  ;;  %v674_v54 = vshll.u32 %v3689_v46, 16  ;;  %v516_v55 = vrot.slane %v514_v49, 1  ;;  %v5001_v62 = vld [vmem:[%s6361_s0 + $0x40] sm:$0xff]  ;;  %v370_v9 = vrot.slane %v260_v5, 4  ;;  %v4664_v15 = vld [vmem:[%s6362_s1 + $0x108] sm:$0xff]  }
  0x2e   : > { %4157 = vmatpush3.bf16.msra.mxu1 %v4638_v16  ;;  %4094 = vmatprep.subr.bf16.mxu0 %v4639_v17  ;;  %v679_v57 = vshrl.u32 %v3690_v50, 16  ;;  %v681_v58 = vshll.u32 %v3690_v50, 16  ;;  %v523_v59 = vrot.slane %v521_v52, 1  ;;  %6439 = vst [vmem:[#allocation7_spill] sm:$0xff] %v5001_v62  ;;  %v5006_v63 = vld [vmem:[%s6361_s0 + $0x60] sm:$0xff]  ;;  %v5014_v3 = vrot.slane %v5001_v62, 4 }
  0x2f   : > { %4158 = vmatprep.subr.bf16.mxu1 %v4640_v18  ;;  %v676_v60 = vrot.slane %v674_v54, 1  ;;  %v517_v61 = vor.u32 %v516_v55, %v512_v48  ;;  %6440 = vst [vmem:[#allocation8_spill] sm:$0xff] %v5006_v63  ;;  %v5017_v4 = vrot.slane %v5006_v63, 4  ;;  %v3761_v10 = vcombine.low %v5001_v62, %v5006_v63  ;;  %v4660_v16 = vld [vmem:[%s6362_s1 + $0x180] sm:$0xff]   ;;  %v4666_v34 = vld [vmem:[%s6362_s1 + $0x188] sm:$0xff]   ;;  %v4671_v55 = vld [vmem:[%s6362_s1 + $0x1d0] sm:$0xff]  }
  0x30   : > { %v683_v1 = vrot.slane %v681_v58, 1  ;;  %v5011_v2 = vor.u32 %v523_v59, %v519_v51  ;;  %6442 = vst [vmem:[#allocation10_spill] sm:$0xff] %v5014_v3  ;;  %v3675_v14 = vcombine.low %v5001_v62, %v256_v0  ;;  %v3691_v17 = vcombine.low %v5014_v3, %v369_v8  ;;  %v267_v36 = vld [vmem:[%s6361_s0 + $0xa0] sm:$0xff]  ;;  %v268_v48 = vld [vmem:[%s6361_s0 + $0xa8] sm:$0x11] }
  0x31   : > { %4095 = vmatpush3.bf16.msra.mxu0 %v4641_v19  ;;  %6443 = vst [vmem:[#allocation11_spill] sm:$0xff] %v5017_v4  ;;  %v677_v7 = vor.u32 %v676_v60, %v672_v53  ;;  %v3762_v13 = vcombine.low %v5014_v3, %v5017_v4  ;;  %v3692_v18 = vcombine.low %v5017_v4, %v370_v9  ;;  %v5067_v42 = vrot.slane %v267_v36, 4  ;;  %v4672_v9 = vld [vmem:[%s6362_s1 + $0x190] sm:$0xff]  }
  0x32   : > { %4159 = vmatpush3.bf16.msra.mxu1 %v4642_v20  ;;  %4096 = vmatprep.subr.bf16.mxu0 %v4643_v21  ;;  %6441 = vst [vmem:[#allocation9_spill] sm:$0xff] %v5011_v2  ;;  %v5027_v11 = vor.u32 %v683_v1, %v679_v57  ;;  %v3747_v12 = vcombine.low %v517_v61, %v5011_v2  ;;  %v372_v54 = vrot.slane %v268_v48, 4 }
  0x33   : > { %4160 = vmatprep.subr.bf16.mxu1 %v4644_v22  ;;  %v3676_v19 = vcombine.low %v5006_v63, %v260_v5  ;;  %v526_v22 = vshrl.u32 %v3675_v14, 16  ;;  %6447 = vst [vmem:[#allocation15_spill] sm:$0xff] %v5067_v42  ;;  %v3678_v59 = vcombine.low %v267_v36, %v268_v48  ;;  %v4677_v48 = vld [vmem:[%s6362_s1 + $0x1d8] sm:$0xff]  }
  0x34   : > { %6444 = vst [vmem:[#allocation12_spill] sm:$0xff] %v5027_v11  ;;  %v3748_v21 = vcombine.low %v677_v7, %v5027_v11  ;;  %v3694_v61 = vcombine.low %v5067_v42, %v372_v54 }
  0x35   : > { %4097 = vmatpush3.bf16.msra.mxu0 %v4645_v23  ;;  %v528_v23 = vshll.u32 %v3675_v14, 16  ;;  %v535_v33 = vshll.u32 %v3676_v19, 16  ;;  %v547_v8 = vshrl.u32 %v3678_v59, 16 }
  0x36   : > { %4161 = vmatpush3.bf16.msra.mxu1 %v4646_v24  ;;  %4098 = vmatprep.subr.bf16.mxu0 %v4647_v25  ;;  %v686_v25 = vshrl.u32 %v3691_v17, 16  ;;  %v709_v14 = vshll.u32 %v3694_v61, 16 }
  0x37   : > { %4162 = vmatprep.subr.bf16.mxu1 %v4648_v26  ;;  %v688_v26 = vshll.u32 %v3691_v17, 16  ;;  %2664 = vmatprep.mubr.bf16.mxu1 %v3748_v21  ;;  %v537_v47 = vrot.slane %v535_v33, 1  ;;  %v272_v17 = vld [vmem:[%s6361_s0 + $0xc8] sm:$0x11] }
  0x39   : > { %4099 = vmatpush3.bf16.msra.mxu0 %v4649_v27  ;;  %v693_v27 = vshrl.u32 %v3692_v18, 16  ;;  %v690_v40 = vrot.slane %v688_v26, 1 }
  0x3a   : > { %4163 = vmatpush3.bf16.msra.mxu1 %v4650_v28  ;;  %4100 = vmatprep.subr.bf16.mxu0 %v4651_v29  ;;  %v695_v28 = vshll.u32 %v3692_v18, 16  ;;  %v4665_v29 = vld [vmem:[%s6362_s1 + $0x1c8] sm:$0xff]  }
  0x3b   : > { %4164 = vmatprep.subr.bf16.mxu1 %v4652_v30  ;;  %v5053_v30 = vld [vmem:[%s6361_s0 + $0x80] sm:$0xff]  ;;  %v5082_v51 = vor.u32 %v690_v40, %v686_v25  ;;  %v711_v25 = vrot.slane %v709_v14, 1 }
  0x3c   : > { %6445 = vst [vmem:[#allocation13_spill] sm:$0xff] %v5053_v30  ;;  %v5062_v38 = vrot.slane %v5053_v30, 4  ;;  %v3777_v44 = vcombine.low %v5053_v30, %v267_v36 }
  0x3d   : > { %4101 = vmatpush3.bf16.msra.mxu0 %v4653_v31  ;;  %v530_v31 = vrot.slane %v528_v23, 1  ;;  %6449 = vst [vmem:[#allocation17_spill] sm:$0xff] %v5082_v51  ;;  %v373_v23 = vrot.slane %v272_v17, 4 }
  0x3e   : > { %4165 = vmatpush3.bf16.msra.mxu1 %v4654_v32  ;;  %4214 = vmatprep.subr.bf16.mxu0 %v4657_v41  ;;  %v533_v32 = vshrl.u32 %v3676_v19, 16  ;;  %6446 = vst [vmem:[#allocation14_spill] sm:$0xff] %v5062_v38  ;;  %v697_v41 = vrot.slane %v695_v28, 1  ;;  %v3778_v53 = vcombine.low %v5062_v38, %v5067_v42 }
  0x3f   : > { %4278 = vmatprep.subr.bf16.mxu1 %v4659_v56  ;;  %v5076_v46 = vor.u32 %v530_v31, %v526_v22  ;;  %v276_v22 = vld [vmem:[%s6361_s0 + $0xe8] sm:$0x11] }
  0x40   : > { %2568 = vmatmul.mubr.bf16.vlgmr.msra.gmra.mrb[0].mxu0 %v3745_v43  ;;  %v264_v43 = vld [vmem:[%s6361_s0 + $0x88] sm:$0x11]  ;;  %v5084_v52 = vor.u32 %v697_v41, %v693_v27  ;;  %v5091_v56 = vor.u32 %v537_v47, %v533_v32  ;;  %v374_v28 = vrot.slane %v276_v22, 4 }
  0x41   : > { %4215 = vmatpush3.bf16.msra.mxu0 %v4658_v45  ;;  %2575 = vmatprep.mubr.bf16.mxu0 %v3762_v13  ;;  %v4670_v45 = vld [vmem:[%s6362_s1 + $0x110] sm:$0xff]   ;;  %6448 = vst [vmem:[#allocation16_spill] sm:$0xff] %v5076_v46  ;;  %v371_v49 = vrot.slane %v264_v43, 4  ;;  %v3677_v50 = vcombine.low %v5053_v30, %v264_v43  ;;  %v707_v13 = vshrl.u32 %v3694_v61, 16  ;;  %v4676_v43 = vld [vmem:[%s6362_s1 + $0x118] sm:$0xff]  }
  0x42   : > { %4216 = vmatprep.subr.bf16.mxu0 %v4663_v6  ;;  %2665 = vmatmul.mubr.bf16.vlgmr.msra.gmra.mrb[0].mxu1 %v3747_v12  ;;  %6450 = vst [vmem:[#allocation18_spill] sm:$0xff] %v5084_v52  ;;  %6451 = vst [vmem:[#allocation19_spill] sm:$0xff] %v5091_v56  ;;  %v3764_v60 = vcombine.low %v5082_v51, %v5084_v52  ;;  %v3763_v5 = vcombine.low %v5076_v46, %v5091_v56  ;;  %v275_v12 = vld [vmem:[%s6361_s0 + $0xe0] sm:$0xff] }
  0x43   : > { %4279 = vmatpush3.bf16.msra.mxu1 %v4660_v16  ;;  %v3693_v58 = vcombine.low %v5062_v38, %v371_v49  ;;  %v540_v0 = vshrl.u32 %v3677_v50, 16  ;;  %v542_v1 = vshll.u32 %v3677_v50, 16  ;;  %v549_v16 = vshll.u32 %v3678_v59, 16  ;;  %v4678_v49 = vld [vmem:[%s6362_s1 + $0x198] sm:$0xff]   ;;  %v5153_v59 = vld [vmem:[%s6361_s0 + $0x120] sm:$0xff]  ;;  %v4742_v38 = vld [vmem:[%s6362_s1 + $0x230] sm:$0xff]  }
  0x44   : > { %4280 = vmatprep.subr.bf16.mxu1 %v4665_v29  ;;  %2672 = vmatprep.mubr.bf16.mxu1 %v3764_v60  ;;  %v5115_v21 = vrot.slane %v275_v12, 4  ;;  %v4675_v29 = vld [vmem:[%s6362_s1 + $0x158] sm:$0xff]   ;;  %v5130_v36 = vor.u32 %v711_v25, %v707_v13  ;;  %v3680_v47 = vcombine.low %v275_v12, %v276_v22  ;;  %v5158_v60 = vld [vmem:[%s6361_s0 + $0x140] sm:$0xff] }
  0x45   : > { %4217 = vmatpush3.bf16.msra.mxu0 %v4664_v15  ;;  %v700_v6 = vshrl.u32 %v3693_v58, 16  ;;  %v702_v7 = vshll.u32 %v3693_v58, 16  ;;  %v544_v15 = vrot.slane %v542_v1, 1  ;;  %v551_v27 = vrot.slane %v549_v16, 1 }
  0x46   : > { %4218 = vmatprep.subr.bf16.mxu0 %v4669_v39  ;;  %6453 = vst [vmem:[#allocation21_spill] sm:$0xff] %v5115_v21  ;;  %6456 = vst [vmem:[#allocation24_spill] sm:$0xff] %v5130_v36  ;;  %v3696_v40 = vcombine.low %v5115_v21, %v374_v28  ;;  %v3809_v25 = vcombine.low %v5153_v59, %v5158_v60 }
  0x47   : > { %4281 = vmatpush3.bf16.msra.mxu1 %v4666_v34  ;;  %v704_v18 = vrot.slane %v702_v7, 1  ;;  %v5120_v26 = vor.u32 %v544_v15, %v540_v0  ;;  %v5132_v39 = vor.u32 %v551_v27, %v547_v8  ;;  %v563_v8 = vshll.u32 %v3680_v47, 16  ;;  %v4682_v27 = vld [vmem:[%s6362_s1 + $0x120] sm:$0xff]  }
  0x48   : > { %2576 = vmatmul.mubr.bf16.gmra.mrb[4].mxu0 %v3761_v10  ;;  %v271_v10 = vld [vmem:[%s6361_s0 + $0xc0] sm:$0xff]  ;;  %4282 = vmatprep.subr.bf16.mxu1 %v4671_v55  ;;  %v721_v55 = vshrl.u32 %v3696_v40, 16  ;;  %v723_v58 = vshll.u32 %v3696_v40, 16 }
  0x49   : > { %4219 = vmatpush3.bf16.msra.mxu0 %v4670_v45  ;;  %2583 = vmatprep.mubr.bf16.mxu0 %v3778_v53  ;;  %v5113_v19 = vrot.slane %v271_v10, 4  ;;  %6454 = vst [vmem:[#allocation22_spill] sm:$0xff] %v5120_v26  ;;  %v5125_v31 = vor.u32 %v704_v18, %v700_v6  ;;  %v3793_v34 = vcombine.low %v271_v10, %v275_v12  ;;  %6457 = vst [vmem:[#allocation25_spill] sm:$0xff] %v5132_v39  ;;  %v284_v6 = vld [vmem:[%s6361_s0 + $0x128] sm:$0x11] }
  0x4a   : > { %2673 = vmatmul.mubr.bf16.gmra.mrb[4].mxu1 %v3763_v5  ;;  %v3679_v41 = vcombine.low %v271_v10, %v272_v17  ;;  %4220 = vmatprep.subr.bf16.mxu0 %v4675_v29  ;;  %v3779_v54 = vcombine.low %v5120_v26, %v5132_v39  ;;  %v561_v5 = vshrl.u32 %v3680_v47, 16  ;;  %v725_v7 = vrot.slane %v723_v58, 1  ;;  %v288_v12 = vld [vmem:[%s6361_s0 + $0x148] sm:$0x11]  ;;  %v4681_v17 = vld [vmem:[%s6362_s1 + $0x160] sm:$0xff]  }
  0x4b   : > { %6452 = vst [vmem:[#allocation20_spill] sm:$0xff] %v5113_v19  ;;  %6455 = vst [vmem:[#allocation23_spill] sm:$0xff] %v5125_v31  ;;  %4283 = vmatpush3.bf16.msra.mxu1 %v4672_v9  ;;  %v3794_v32 = vcombine.low %v5113_v19, %v5115_v21  ;;  %v3695_v33 = vcombine.low %v5113_v19, %v373_v23  ;;  %v3780_v53 = vcombine.low %v5125_v31, %v5130_v36  ;;  %v4729_v21 = vld [vmem:[%s6362_s1 + $0x260] sm:$0xff]  }
  0x4c   : > { %v554_v0 = vshrl.u32 %v3679_v41, 16  ;;  %v556_v1 = vshll.u32 %v3679_v41, 16  ;;  %4284 = vmatprep.subr.bf16.mxu1 %v4677_v48  ;;  %v343_v9 = vrot.slane %v5153_v59, 4  ;;  %v5165_v10 = vrot.slane %v5158_v60, 4 }
  0x4d   : > { %v716_v45 = vshll.u32 %v3695_v33, 16  ;;  %4221 = vmatpush3.bf16.msra.mxu0 %v4676_v43  ;;  %2680 = vmatprep.mubr.bf16.mxu1 %v3780_v53  ;;  %v375_v15 = vrot.slane %v284_v6, 4  ;;  %v376_v16 = vrot.slane %v288_v12, 4  ;;  %v5175_v18 = vor.u32 %v725_v7, %v721_v55  ;;  %v4683_v43 = vld [vmem:[%s6362_s1 + $0x1e0] sm:$0xff]   ;;  %v296_v7 = vld [vmem:[%s6361_s0 + $0x188] sm:$0x11] }
  0x4e   : > { %6458 = vst [vmem:[#allocation26_spill] sm:$0xff] %v5165_v10  ;;  %v558_v14 = vrot.slane %v556_v1, 1  ;;  %v565_v22 = vrot.slane %v563_v8, 1  ;;  %v3810_v23 = vcombine.low %v343_v9, %v5165_v10  ;;  %4222 = vmatprep.subr.bf16.mxu0 %v4681_v17  ;;  %v3682_v41 = vcombine.low %v5158_v60, %v288_v12  ;;  %v5201_v53 = vld [vmem:[%s6361_s0 + $0x160] sm:$0xff] }
  0x4f   : > { %v718_v61 = vrot.slane %v716_v45, 1  ;;  %4285 = vmatpush3.bf16.msra.mxu1 %v4678_v49  ;;  %6460 = vst [vmem:[#allocation28_spill] sm:$0xff] %v5175_v18  ;;  %v3697_v29 = vcombine.low %v343_v9, %v375_v15  ;;  %v4684_v49 = vld [vmem:[%s6362_s1 + $0x1a0] sm:$0xff]  }
  0x50   : > { %2584 = vmatmul.mubr.bf16.gmra.mrb[8].mxu0 %v3777_v44  ;;  %v714_v44 = vshrl.u32 %v3695_v33, 16  ;;  %v5183_v28 = vor.u32 %v558_v14, %v554_v0  ;;  %v3681_v33 = vcombine.low %v5153_v59, %v284_v6  ;;  %v5189_v40 = vor.u32 %v565_v22, %v561_v5  ;;  %4286 = vmatprep.subr.bf16.mxu1 %v4683_v43  ;;  %v295_v60 = vld [vmem:[%s6361_s0 + $0x180] sm:$0xff] }
  0x51   : > { %2591 = vmatprep.mubr.bf16.mxu0 %v3794_v32  ;;  %v3698_v32 = vcombine.low %v5165_v10, %v376_v16  ;;  %4223 = vmatpush3.bf16.msra.mxu0 %v4682_v27  ;;  %v730_v45 = vshll.u32 %v3697_v29, 16  ;;  %v575_v59 = vshrl.u32 %v3682_v41, 16  ;;  %v577_v5 = vshll.u32 %v3682_v41, 16 }
  0x52   : > { %v5170_v13 = vor.u32 %v718_v61, %v714_v44  ;;  %2681 = vmatmul.mubr.bf16.gmra.mrb[8].mxu1 %v3779_v54  ;;  %6461 = vst [vmem:[#allocation29_spill] sm:$0xff] %v5183_v28  ;;  %6462 = vst [vmem:[#allocation30_spill] sm:$0xff] %v5189_v40  ;;  %v728_v44 = vshrl.u32 %v3697_v29, 16  ;;  %v3795_v54 = vcombine.low %v5183_v28, %v5189_v40  ;;  %v568_v55 = vshrl.u32 %v3681_v33, 16  ;;  %v292_v61 = vld [vmem:[%s6361_s0 + $0x168] sm:$0x11] }
  0x53   : > { %v735_v47 = vshrl.u32 %v3698_v32, 16  ;;  %v737_v48 = vshll.u32 %v3698_v32, 16  ;;  %v570_v58 = vshll.u32 %v3681_v33, 16  ;;  %v732_v0 = vrot.slane %v730_v45, 1  ;;  %4287 = vmatpush3.bf16.msra.mxu1 %v4684_v49  ;;  %v4689_v45 = vld [vmem:[%s6362_s1 + $0x1e8] sm:$0xff]   ;;  %v4723_v40 = vld [vmem:[%s6362_s1 + $0x258] sm:$0xff]  }
  0x54   : > { %6459 = vst [vmem:[#allocation27_spill] sm:$0xff] %v5170_v13  ;;  %v5212_v6 = vrot.slane %v5201_v53, 4  ;;  %v5217_v9 = vrot.slane %v295_v60, 4  ;;  %v377_v12 = vrot.slane %v292_v61, 4  ;;  %v378_v14 = vrot.slane %v296_v7, 4  ;;  %4288 = vmatprep.subr.bf16.mxu1 %v4689_v45 }
  0x55   : > { %v739_v1 = vrot.slane %v737_v48, 1  ;;  %v572_v8 = vrot.slane %v570_v58, 1  ;;  %v733_v15 = vor.u32 %v732_v0, %v728_v44  ;;  %v579_v17 = vrot.slane %v577_v5, 1 }
  0x56   : > { %6463 = vst [vmem:[#allocation31_spill] sm:$0xff] %v5212_v6  ;;  %6464 = vst [vmem:[#allocation32_spill] sm:$0xff] %v5217_v9  ;;  %v3825_v22 = vcombine.low %v5201_v53, %v295_v60  ;;  %v3826_v29 = vcombine.low %v5212_v6, %v5217_v9  ;;  %v3699_v32 = vcombine.low %v5212_v6, %v377_v12  ;;  %v300_v12 = vld [vmem:[%s6361_s0 + $0x1a8] sm:$0x11] }
  0x57   : > { %v5219_v16 = vor.u32 %v739_v1, %v735_v47  ;;  %v573_v27 = vor.u32 %v572_v8, %v568_v55  ;;  %v3700_v33 = vcombine.low %v5217_v9, %v378_v14  ;;  %v5233_v41 = vor.u32 %v579_v17, %v575_v59  ;;  %v304_v17 = vld [vmem:[%s6361_s0 + $0x1c8] sm:$0x11] }
  0x58   : > { %2592 = vmatmul.mubr.bf16.gmra.mrb[12].mxu0 %v3793_v34  ;;  %v3796_v34 = vcombine.low %v5170_v13, %v5175_v18  ;;  %v3683_v43 = vcombine.low %v5201_v53, %v292_v61  ;;  %v3684_v44 = vcombine.low %v295_v60, %v296_v7  ;;  %v742_v47 = vshrl.u32 %v3699_v32, 16  ;;  %v4690_v53 = vld [vmem:[%s6362_s1 + $0x1a8] sm:$0xff]   ;;  %v5246_v60 = vld [vmem:[%s6361_s0 + $0x1a0] sm:$0xff]  ;;  %v4719_v18 = vld [vmem:[%s6362_s1 + $0x2d0] sm:$0xff]  }
  0x59   : > { %2599 = vmatprep.mubr.bf16.mxu0 %v3810_v23  ;;  %6465 = vst [vmem:[#allocation33_spill] sm:$0xff] %v5219_v16  ;;  %v4687_v23 = vld [vmem:[%s6362_s1 + $0x168] sm:$0xff]   ;;  %6466 = vst [vmem:[#allocation34_spill] sm:$0xff] %v5233_v41  ;;  %v744_v48 = vshll.u32 %v3699_v32, 16  ;;  %v749_v49 = vshrl.u32 %v3700_v33, 16  ;;  %v3811_v55 = vcombine.low %v573_v27, %v5233_v41  ;;  %v5251_v61 = vld [vmem:[%s6361_s0 + $0x1c0] sm:$0xff]  ;;  %4289 = vmatpush3.bf16.msra.mxu1 %v4690_v53 }
  0x5a   : > { %2688 = vmatprep.mubr.bf16.mxu1 %v3796_v34  ;;  %v3812_v34 = vcombine.low %v733_v15, %v5219_v16  ;;  %4224 = vmatprep.subr.bf16.mxu0 %v4687_v23  ;;  %v582_v58 = vshrl.u32 %v3683_v43, 16  ;;  %v584_v59 = vshll.u32 %v3683_v43, 16  ;;  %v589_v0 = vshrl.u32 %v3684_v44, 16  ;;  %v4693_v27 = vld [vmem:[%s6362_s1 + $0x170] sm:$0xff]  }
  0x5b   : > { %2689 = vmatmul.mubr.bf16.gmra.mrb[12].mxu1 %v3795_v54  ;;  %v751_v54 = vshll.u32 %v3700_v33, 16  ;;  %v746_v1 = vrot.slane %v744_v48, 1  ;;  %v591_v7 = vshll.u32 %v3684_v44, 16  ;;  %v5254_v8 = vrot.slane %v5246_v60, 4  ;;  %v4694_v48 = vld [vmem:[%s6362_s1 + $0x130] sm:$0xff]  }
  0x5c   : > { %2696 = vmatprep.mubr.bf16.mxu1 %v3812_v34  ;;  %v586_v14 = vrot.slane %v584_v59, 1  ;;  %v5260_v15 = vrot.slane %v5251_v61, 4  ;;  %v379_v23 = vrot.slane %v300_v12, 4  ;;  %v3685_v45 = vcombine.low %v5246_v60, %v300_v12 }
  0x5d   : > { %v753_v5 = vrot.slane %v751_v54, 1  ;;  %6467 = vst [vmem:[#allocation35_spill] sm:$0xff] %v5254_v8  ;;  %v593_v33 = vrot.slane %v591_v7, 1  ;;  %v3686_v54 = vcombine.low %v5251_v61, %v304_v17 }
  0x5e   : > { %6468 = vst [vmem:[#allocation36_spill] sm:$0xff] %v5260_v15  ;;  %v5272_v34 = vor.u32 %v586_v14, %v582_v58  ;;  %v3842_v43 = vcombine.low %v5254_v8, %v5260_v15  ;;  %v3701_v44 = vcombine.low %v5254_v8, %v379_v23  ;;  %v4695_v58 = vld [vmem:[%s6362_s1 + $0x1f0] sm:$0xff]   ;;  %v274_v8 = vld [vmem:[%s6361_s0 + $0xd8] sm:$0x11] }
  0x5f   : > { %v5270_v32 = vor.u32 %v753_v5, %v749_v49  ;;  %v5283_v49 = vor.u32 %v593_v33, %v589_v0  ;;  %v598_v5 = vshll.u32 %v3685_v45, 16  ;;  %v3841_v0 = vcombine.low %v5246_v60, %v5251_v61  ;;  %v4696_v14 = vld [vmem:[%s6362_s1 + $0x1b0] sm:$0xff]   ;;  %4290 = vmatprep.subr.bf16.mxu1 %v4695_v58  ;;  %v4699_v60 = vld [vmem:[%s6362_s1 + $0x178] sm:$0xff]  }
  0x60   : > { %2600 = vmatmul.mubr.bf16.gmra.mrb[16].mxu0 %v3809_v25  ;;  %v4688_v25 = vld [vmem:[%s6362_s1 + $0x128] sm:$0xff]   ;;  %6471 = vst [vmem:[#allocation39_spill] sm:$0xff] %v5272_v34  ;;  %v756_v59 = vshrl.u32 %v3701_v44, 16  ;;  %v758_v53 = vshll.u32 %v3701_v44, 16  ;;  %v603_v12 = vshrl.u32 %v3686_v54, 16  ;;  %v605_v33 = vshll.u32 %v3686_v54, 16  ;;  %4291 = vmatpush3.bf16.msra.mxu1 %v4696_v14 }
  0x61   : > { %2607 = vmatprep.mubr.bf16.mxu0 %v3826_v29  ;;  %4225 = vmatpush3.bf16.msra.mxu0 %v4688_v25  ;;  %v5268_v29 = vor.u32 %v746_v1, %v742_v47  ;;  %6470 = vst [vmem:[#allocation38_spill] sm:$0xff] %v5270_v32  ;;  %v380_v25 = vrot.slane %v304_v17, 4  ;;  %6472 = vst [vmem:[#allocation40_spill] sm:$0xff] %v5283_v49  ;;  %v596_v1 = vshrl.u32 %v3685_v45, 16  ;;  %v600_v23 = vrot.slane %v598_v5, 1 }
  0x62   : > { %4226 = vmatprep.subr.bf16.mxu0 %v4693_v27  ;;  %v760_v17 = vrot.slane %v758_v53, 1  ;;  %v5298_v27 = vld [vmem:[%s6361_s0 + $0x1e0] sm:$0xff]  ;;  %v607_v53 = vrot.slane %v605_v33, 1  ;;  %v312_v5 = vld [vmem:[%s6361_s0 + $0x208] sm:$0x11] }
  0x63   : > { %6469 = vst [vmem:[#allocation37_spill] sm:$0xff] %v5268_v29  ;;  %2697 = vmatmul.mubr.bf16.gmra.mrb[16].mxu1 %v3811_v55  ;;  %v3828_v47 = vcombine.low %v5268_v29, %v5270_v32  ;;  %v5313_v45 = vrot.slane %v5298_v27, 4  ;;  %v5326_v58 = vor.u32 %v600_v23, %v596_v1  ;;  %v382_v61 = vrot.slane %v312_v5, 4 }
  0x64   : > { %v5324_v54 = vor.u32 %v760_v17, %v756_v59  ;;  %v4701_v59 = vld [vmem:[%s6362_s1 + $0x1f8] sm:$0xff]   ;;  %v5339_v1 = vor.u32 %v607_v53, %v603_v12 }
  0x65   : > { %2704 = vmatprep.mubr.bf16.mxu1 %v3828_v47  ;;  %4227 = vmatpush3.bf16.msra.mxu0 %v4694_v48  ;;  %6473 = vst [vmem:[#allocation41_spill] sm:$0xff] %v5313_v45  ;;  %v308_v47 = vld [vmem:[%s6361_s0 + $0x1e8] sm:$0x11]  ;;  %6476 = vst [vmem:[#allocation44_spill] sm:$0xff] %v5326_v58 }
  0x66   : > { %6475 = vst [vmem:[#allocation43_spill] sm:$0xff] %v5324_v54  ;;  %4228 = vmatprep.subr.bf16.mxu0 %v4699_v60  ;;  %v3687_v50 = vcombine.low %v5298_v27, %v308_v47  ;;  %6478 = vst [vmem:[#allocation46_spill] sm:$0xff] %v5339_v1  ;;  %4292 = vmatprep.subr.bf16.mxu1 %v4701_v59 }
  0x68   : > { %2608 = vmatmul.mubr.bf16.gmra.mrb[20].mxu0 %v3825_v22  ;;  %v3702_v22 = vcombine.low %v5260_v15, %v380_v25  ;;  %v5303_v25 = vld [vmem:[%s6361_s0 + $0x200] sm:$0xff] }
  0x69   : > { %2615 = vmatprep.mubr.bf16.mxu0 %v3842_v43  ;;  %v3827_v43 = vcombine.low %v5272_v34, %v5283_v49  ;;  %v5316_v48 = vrot.slane %v5303_v25, 4  ;;  %v3688_v23 = vcombine.low %v5303_v25, %v312_v5  ;;  %v3857_v12 = vcombine.low %v5298_v27, %v5303_v25  ;;  %v4702_v5 = vld [vmem:[%s6362_s1 + $0x1b8] sm:$0xff]   ;;  %v4705_v49 = vld [vmem:[%s6362_s1 + $0x240] sm:$0xff]  }
  0x6a   : > { %v763_v55 = vshrl.u32 %v3702_v22, 16  ;;  %v765_v7 = vshll.u32 %v3702_v22, 16  ;;  %v4700_v22 = vld [vmem:[%s6362_s1 + $0x138] sm:$0xff]   ;;  %4293 = vmatpush3.bf16.msra.mxu1 %v4702_v5 }
  0x6b   : > { %6474 = vst [vmem:[#allocation42_spill] sm:$0xff] %v5316_v48  ;;  %v3858_v57 = vcombine.low %v5313_v45, %v5316_v48  ;;  %4229 = vmatpush3.bf16.msra.mxu0 %v4700_v22  ;;  %2705 = vmatmul.mubr.bf16.gmra.mrb[20].mxu1 %v3827_v43  ;;  %v3704_v60 = vcombine.low %v5316_v48, %v382_v61  ;;  %v617_v53 = vshrl.u32 %v3688_v23, 16  ;;  %v5356_v43 = vld [vmem:[%s6361_s0 + $0x10] sm:$0xff]  ;;  %v619_v25 = vshll.u32 %v3688_v23, 16 }
  0x6c   : > { %v767_v44 = vrot.slane %v765_v7, 1  ;;  %v381_v7 = vrot.slane %v308_v47, 4  ;;  %v612_v47 = vshll.u32 %v3687_v50, 16  ;;  %4342 = vmatprep.subr.bf16.mxu0 %v4705_v49 }
  0x6d   : > { %v779_v61 = vshll.u32 %v3704_v60, 16 }
  0x6e   : > { %v5331_v14 = vor.u32 %v767_v44, %v763_v55  ;;  %v3703_v17 = vcombine.low %v5313_v45, %v381_v7  ;;  %v610_v44 = vshrl.u32 %v3687_v50, 16  ;;  %v777_v50 = vshrl.u32 %v3704_v60, 16  ;;  %v250_v7 = vld [vmem:[%s6361_s0 + $0x18] sm:$0x11] }
  0x6f   : > { %v614_v27 = vrot.slane %v612_v47, 1  ;;  %v431_v24 = vrot.slane %v250_v7, 4  ;;  %v3843_v60 = vcombine.low %v5326_v58, %v5339_v1  ;;  %v781_v23 = vrot.slane %v779_v61, 1 }
  0x70   : > { %6477 = vst [vmem:[#allocation45_spill] sm:$0xff] %v5331_v14  ;;  %2616 = vmatmul.mubr.bf16.gmra.mrb[24].mxu0 %v3841_v0  ;;  %v3844_v33 = vcombine.low %v5324_v54, %v5331_v14  ;;  %v770_v22 = vshrl.u32 %v3703_v17, 16  ;;  %v772_v0 = vshll.u32 %v3703_v17, 16  ;;  %v399_v17 = vrot.slane %v5356_v43, 4 }
  0x71   : > { %2623 = vmatprep.mubr.bf16.mxu0 %v3858_v57  ;;  %v5361_v57 = vld [vmem:[%s6361_s0 + $0x30] sm:$0xff]  ;;  %v621_v47 = vrot.slane %v619_v25, 1  ;;  %v3705_v20 = vcombine.low %v5356_v43, %v250_v7  ;;  %v5384_v32 = vor.u32 %v781_v23, %v777_v50 }
  0x72   : > { %2712 = vmatprep.mubr.bf16.mxu1 %v3844_v33  ;;  %v774_v59 = vrot.slane %v772_v0, 1  ;;  %v5368_v55 = vrot.slane %v5361_v57, 4  ;;  %v254_v33 = vld [vmem:[%s6361_s0 + $0x38] sm:$0x11]  ;;  %v5378_v0 = vor.u32 %v614_v27, %v610_v44  ;;  %v3721_v5 = vcombine.low %v399_v17, %v431_v24 }
  0x73   : > { %6481 = vst [vmem:[#allocation49_spill] sm:$0xff] %v5384_v32  ;;  %v5386_v54 = vor.u32 %v621_v47, %v617_v53  ;;  %v832_v1 = vshrl.u32 %v3705_v20, 16  ;;  %v834_v61 = vshll.u32 %v3705_v20, 16  ;;  %v432_v44 = vrot.slane %v254_v33, 4  ;;  %2713 = vmatmul.mubr.bf16.gmra.mrb[24].mxu1 %v3843_v60  ;;  %v5399_v20 = vld [vmem:[%s6361_s0 + $0x50] sm:$0xff] }
  0x74   : > { %v5376_v14 = vor.u32 %v774_v59, %v770_v22  ;;  %6480 = vst [vmem:[#allocation48_spill] sm:$0xff] %v5378_v0  ;;  %v3750_v48 = vcombine.low %v399_v17, %v5368_v55  ;;  %v4707_v22 = vld [vmem:[%s6362_s1 + $0x2c0] sm:$0xff]   ;;  %v3706_v24 = vcombine.low %v5361_v57, %v254_v33  ;;  %v992_v27 = vshrl.u32 %v3721_v5, 16 }
  0x75   : > { %6482 = vst [vmem:[#allocation50_spill] sm:$0xff] %v5386_v54  ;;  %v994_v25 = vshll.u32 %v3721_v5, 16  ;;  %v836_v7 = vrot.slane %v834_v61, 1  ;;  %v3749_v53 = vcombine.low %v5356_v43, %v5361_v57  ;;  %v3859_v49 = vcombine.low %v5378_v0, %v5386_v54  ;;  %4406 = vmatprep.subr.bf16.mxu1 %v4707_v22  ;;  %v258_v43 = vld [vmem:[%s6361_s0 + $0x58] sm:$0x11] }
  0x76   : > { %6479 = vst [vmem:[#allocation47_spill] sm:$0xff] %v5376_v14  ;;  %v3860_v50 = vcombine.low %v5376_v14, %v5384_v32  ;;  %v841_v59 = vshll.u32 %v3706_v24, 16  ;;  %v3722_v17 = vcombine.low %v5368_v55, %v432_v44  ;;  %v839_v60 = vshrl.u32 %v3706_v24, 16  ;;  %v262_v5 = vld [vmem:[%s6361_s0 + $0x78] sm:$0x11]  ;;  %v4706_v24 = vld [vmem:[%s6362_s1 + $0x200] sm:$0xff]  }
  0x77   : > { %v996_v33 = vrot.slane %v994_v25, 1  ;;  %v5415_v23 = vrot.slane %v5399_v20, 4  ;;  %v433_v61 = vrot.slane %v258_v43, 4  ;;  %v5423_v25 = vor.u32 %v836_v7, %v832_v1 }
  0x78   : > { %2624 = vmatmul.mubr.bf16.gmra.mrb[28].mxu0 %v3857_v12  ;;  %2720 = vmatprep.mubr.bf16.mxu1 %v3860_v50  ;;  %v999_v22 = vshrl.u32 %v3722_v17, 16  ;;  %v1001_v44 = vshll.u32 %v3722_v17, 16  ;;  %v843_v12 = vrot.slane %v841_v59, 1  ;;  %v434_v32 = vrot.slane %v262_v5, 4 }
  0x79   : > { %2761 = vmatprep.mubr.bf16.mxu0 %v3750_v48  ;;  %v5409_v48 = vld [vmem:[%s6361_s0 + $0x70] sm:$0xff]  ;;  %v997_v54 = vor.u32 %v996_v33, %v992_v27  ;;  %v3723_v0 = vcombine.low %v5415_v23, %v433_v61  ;;  %v3707_v17 = vcombine.low %v5399_v20, %v258_v43  ;;  %v4711_v27 = vld [vmem:[%s6362_s1 + $0x248] sm:$0xff]  }
  0x7a   : > { %v5418_v47 = vrot.slane %v5409_v48, 4  ;;  %v1003_v14 = vrot.slane %v1001_v44, 1  ;;  %v3765_v58 = vcombine.low %v5399_v20, %v5409_v48  ;;  %v3708_v1 = vcombine.low %v5409_v48, %v262_v5  ;;  %v4712_v61 = vld [vmem:[%s6362_s1 + $0x208] sm:$0xff]  }
  0x7b   : > { %v1006_v59 = vshrl.u32 %v3723_v0, 16  ;;  %v1008_v33 = vshll.u32 %v3723_v0, 16  ;;  %v5446_v43 = vor.u32 %v843_v12, %v839_v60  ;;  %v846_v5 = vshrl.u32 %v3707_v17, 16  ;;  %v5456_v0 = vld [vmem:[%s6361_s0 + $0xb0] sm:$0xff]  ;;  %2721 = vmatmul.mubr.bf16.gmra.mrb[28].mxu1 %v3859_v49  ;;  %v266_v12 = vld [vmem:[%s6361_s0 + $0x98] sm:$0x11] }
  0x7c   : > { %v3766_v50 = vcombine.low %v5415_v23, %v5418_v47  ;;  %v3724_v7 = vcombine.low %v5418_v47, %v434_v32  ;;  %v5444_v15 = vor.u32 %v1003_v14, %v999_v22  ;;  %v848_v45 = vshll.u32 %v3707_v17, 16  ;;  %v5451_v32 = vld [vmem:[%s6361_s0 + $0x90] sm:$0xff]  ;;  %v270_v49 = vld [vmem:[%s6361_s0 + $0xb8] sm:$0x11] }
  0x7d   : > { %6483 = vst [vmem:[#allocation51_spill] sm:$0xff] %v5446_v43  ;;  %v1010_v44 = vrot.slane %v1008_v33, 1  ;;  %v855_v41 = vshll.u32 %v3708_v1, 16  ;;  %v5463_v34 = vrot.slane %v5451_v32, 4  ;;  %v436_v29 = vrot.slane %v270_v49, 4 }
  0x7e   : > { %v1013_v14 = vshrl.u32 %v3724_v7, 16  ;;  %v1015_v22 = vshll.u32 %v3724_v7, 16  ;;  %v3752_v60 = vcombine.low %v997_v54, %v5444_v15  ;;  %v850_v17 = vrot.slane %v848_v45, 1 }
  0x7f   : > { %v5471_v7 = vor.u32 %v1010_v44, %v1006_v59  ;;  %v5474_v54 = vrot.slane %v5456_v0, 4  ;;  %v435_v45 = vrot.slane %v266_v12, 4  ;;  %v857_v16 = vrot.slane %v855_v41, 1 }
  0x80   : > { %2762 = vmatmul.mubr.bf16.vlgmr.msra.gmra.mrb[32].mxu0 %v3749_v53  ;;  %v853_v53 = vshrl.u32 %v3708_v1, 16  ;;  %v1017_v33 = vrot.slane %v1015_v22, 1  ;;  %2858 = vmatprep.mubr.bf16.mxu1 %v3752_v60  ;;  %v4708_v1 = vld [vmem:[%s6362_s1 + $0x280] sm:$0xff]   ;;  %v3709_v22 = vcombine.low %v5451_v32, %v266_v12  ;;  %v4718_v12 = vld [vmem:[%s6362_s1 + $0x210] sm:$0xff]  }
  0x81   : > { %4343 = vmatpush3.bf16.msra.mxu0 %v4706_v24  ;;  %2769 = vmatprep.mubr.bf16.mxu0 %v3766_v50  ;;  %v4717_v24 = vld [vmem:[%s6362_s1 + $0x250] sm:$0xff]   ;;  %v3751_v50 = vcombine.low %v5423_v25, %v5446_v43  ;;  %v3782_v59 = vcombine.low %v5463_v34, %v5474_v54  ;;  %v3725_v44 = vcombine.low %v5463_v34, %v435_v45 }
  0x82   : > { %4344 = vmatprep.subr.bf16.mxu0 %v4711_v27  ;;  %v5481_v27 = vor.u32 %v850_v17, %v846_v5  ;;  %v5483_v9 = vor.u32 %v1017_v33, %v1013_v14  ;;  %v4713_v5 = vld [vmem:[%s6362_s1 + $0x2c8] sm:$0xff]   ;;  %v3726_v41 = vcombine.low %v5474_v54, %v436_v29  ;;  %v3710_v14 = vcombine.low %v5456_v0, %v270_v49  ;;  %v5504_v45 = vld [vmem:[%s6361_s0 + $0xd0] sm:$0xff] }
  0x83   : > { %v1020_v60 = vshrl.u32 %v3725_v44, 16  ;;  %v1022_v17 = vshll.u32 %v3725_v44, 16  ;;  %v860_v33 = vshrl.u32 %v3709_v22, 16  ;;  %v5509_v29 = vld [vmem:[%s6361_s0 + $0xf0] sm:$0xff]  ;;  %v5511_v49 = vor.u32 %v857_v16, %v853_v53  ;;  %2859 = vmatmul.mubr.bf16.vlgmr.msra.gmra.mrb[32].mxu1 %v3751_v50 }
  0x84   : > { %6484 = vst [vmem:[#allocation52_spill] sm:$0xff] %v5481_v27  ;;  %v1027_v44 = vshrl.u32 %v3726_v41, 16  ;;  %v1029_v25 = vshll.u32 %v3726_v41, 16  ;;  %v862_v43 = vshll.u32 %v3709_v22, 16  ;;  %v867_v16 = vshrl.u32 %v3710_v14, 16  ;;  %4407 = vmatpush3.bf16.msra.mxu1 %v4708_v1 }
  0x85   : > { %4345 = vmatpush3.bf16.msra.mxu0 %v4712_v61  ;;  %v3768_v61 = vcombine.low %v5471_v7, %v5483_v9  ;;  %v869_v53 = vshll.u32 %v3710_v14, 16  ;;  %v5526_v41 = vrot.slane %v5504_v45, 4  ;;  %v278_v22 = vld [vmem:[%s6361_s0 + $0xf8] sm:$0x11]  ;;  %v5532_v50 = vrot.slane %v5509_v29, 4  ;;  %4408 = vmatprep.subr.bf16.mxu1 %v4713_v5  ;;  %v4720_v5 = vld [vmem:[%s6362_s1 + $0x290] sm:$0xff]  }
  0x86   : > { %4346 = vmatprep.subr.bf16.mxu0 %v4717_v24  ;;  %v4714_v24 = vld [vmem:[%s6362_s1 + $0x288] sm:$0xff]   ;;  %v1031_v10 = vrot.slane %v1029_v25, 1  ;;  %v864_v6 = vrot.slane %v862_v43, 1  ;;  %v438_v39 = vrot.slane %v278_v22, 4  ;;  %v3767_v28 = vcombine.low %v5481_v27, %v5511_v49  ;;  %v4724_v25 = vld [vmem:[%s6362_s1 + $0x218] sm:$0xff]  }
  0x87   : > { %2866 = vmatprep.mubr.bf16.mxu1 %v3768_v61  ;;  %6485 = vst [vmem:[#allocation53_spill] sm:$0xff] %v5532_v50  ;;  %v3781_v1 = vcombine.low %v5451_v32, %v5456_v0  ;;  %v3798_v61 = vcombine.low %v5526_v41, %v5532_v50 }
  0x88   : > { %2770 = vmatmul.mubr.bf16.gmra.mrb[36].mxu0 %v3765_v58  ;;  %v1024_v58 = vrot.slane %v1022_v17, 1  ;;  %v871_v17 = vrot.slane %v869_v53, 1  ;;  %v5538_v26 = vor.u32 %v1031_v10, %v1027_v44  ;;  %v3728_v10 = vcombine.low %v5532_v50, %v438_v39  ;;  %4409 = vmatpush3.bf16.msra.mxu1 %v4714_v24  ;;  %v5564_v39 = vld [vmem:[%s6361_s0 + $0x130] sm:$0xff] }
  0x89   : > { %2777 = vmatprep.mubr.bf16.mxu0 %v3782_v59  ;;  %v437_v59 = vrot.slane %v274_v8, 4  ;;  %4347 = vmatpush3.bf16.msra.mxu0 %v4718_v12  ;;  %v3712_v12 = vcombine.low %v5509_v29, %v278_v22  ;;  %v5556_v44 = vor.u32 %v864_v6, %v860_v33  ;;  %v286_v6 = vld [vmem:[%s6361_s0 + $0x138] sm:$0x11]  ;;  %v5574_v33 = vld [vmem:[%s6361_s0 + $0x150] sm:$0xff] }
  0x8a   : > { %v5534_v14 = vor.u32 %v1024_v58, %v1020_v60  ;;  %4348 = vmatprep.subr.bf16.mxu0 %v4723_v40  ;;  %v3711_v60 = vcombine.low %v5504_v45, %v274_v8  ;;  %v5566_v8 = vor.u32 %v871_v17, %v867_v16  ;;  %4410 = vmatprep.subr.bf16.mxu1 %v4719_v18  ;;  %v1041_v24 = vshrl.u32 %v3728_v10, 16  ;;  %v4726_v18 = vld [vmem:[%s6362_s1 + $0x298] sm:$0xff]  }
  0x8b   : > { %v3727_v43 = vcombine.low %v5526_v41, %v437_v59  ;;  %v4725_v59 = vld [vmem:[%s6362_s1 + $0x2d8] sm:$0xff]   ;;  %v1043_v22 = vshll.u32 %v3728_v10, 16  ;;  %v881_v56 = vshrl.u32 %v3712_v12, 16  ;;  %v883_v16 = vshll.u32 %v3712_v12, 16  ;;  %2867 = vmatmul.mubr.bf16.gmra.mrb[36].mxu1 %v3767_v28 }
  0x8c   : > { %v3784_v40 = vcombine.low %v5534_v14, %v5538_v26  ;;  %v874_v50 = vshrl.u32 %v3711_v60, 16  ;;  %v876_v27 = vshll.u32 %v3711_v60, 16  ;;  %v290_v17 = vld [vmem:[%s6361_s0 + $0x158] sm:$0x11]  ;;  %v407_v10 = vrot.slane %v5564_v39, 4  ;;  %4411 = vmatpush3.bf16.msra.mxu1 %v4720_v5 }
  0x8d   : > { %v1034_v58 = vshrl.u32 %v3727_v43, 16  ;;  %v1036_v53 = vshll.u32 %v3727_v43, 16  ;;  %4349 = vmatpush3.bf16.msra.mxu0 %v4724_v25  ;;  %v1045_v25 = vrot.slane %v1043_v22, 1  ;;  %v5584_v36 = vrot.slane %v5574_v33, 4  ;;  %4412 = vmatprep.subr.bf16.mxu1 %v4725_v59 }
  0x8e   : > { %2874 = vmatprep.mubr.bf16.mxu1 %v3784_v40  ;;  %v878_v12 = vrot.slane %v876_v27, 1  ;;  %v440_v13 = vrot.slane %v290_v17, 4  ;;  %v3783_v28 = vcombine.low %v5556_v44, %v5566_v8  ;;  %v3797_v22 = vcombine.low %v5504_v45, %v5509_v29  ;;  %v4730_v27 = vld [vmem:[%s6362_s1 + $0x220] sm:$0xff]   ;;  %4350 = vmatprep.subr.bf16.mxu0 %v4729_v21 }
  0x8f   : > { %v1038_v43 = vrot.slane %v1036_v53, 1  ;;  %v885_v53 = vrot.slane %v883_v16, 1  ;;  %v3713_v16 = vcombine.low %v5564_v39, %v286_v6  ;;  %v4732_v21 = vld [vmem:[%s6362_s1 + $0x2a0] sm:$0xff]   ;;  %v3813_v2 = vcombine.low %v5564_v39, %v5574_v33 }
  0x90   : > { %2778 = vmatmul.mubr.bf16.gmra.mrb[40].mxu0 %v3781_v1  ;;  %v439_v1 = vrot.slane %v286_v6, 4  ;;  %v5600_v5 = vor.u32 %v878_v12, %v874_v50  ;;  %4413 = vmatpush3.bf16.msra.mxu1 %v4726_v18  ;;  %v5624_v6 = vld [vmem:[%s6361_s0 + $0x190] sm:$0xff] }
  0x91   : > { %2785 = vmatprep.mubr.bf16.mxu0 %v3798_v61  ;;  %v5586_v60 = vor.u32 %v1038_v43, %v1034_v58  ;;  %v5593_v61 = vor.u32 %v1045_v25, %v1041_v24  ;;  %v3814_v58 = vcombine.low %v407_v10, %v5584_v36  ;;  %v3730_v43 = vcombine.low %v5584_v36, %v440_v13  ;;  %v4731_v24 = vld [vmem:[%s6362_s1 + $0x2e0] sm:$0xff]  }
  0x92   : > { %v3729_v40 = vcombine.low %v407_v10, %v439_v1  ;;  %v5608_v29 = vor.u32 %v885_v53, %v881_v56  ;;  %v3714_v1 = vcombine.low %v5574_v33, %v290_v17  ;;  %4351 = vmatpush3.bf16.msra.mxu0 %v4730_v27  ;;  %v888_v12 = vshrl.u32 %v3713_v16, 16  ;;  %v5619_v56 = vld [vmem:[%s6361_s0 + $0x170] sm:$0xff]  ;;  %6488 = vst [vmem:[#allocation56_spill] sm:$0xff] %v5624_v6  ;;  %v294_v27 = vld [vmem:[%s6361_s0 + $0x178] sm:$0x11] }
  0x93   : > { %6486 = vst [vmem:[#allocation54_spill] sm:$0xff] %v5593_v61  ;;  %v3800_v50 = vcombine.low %v5586_v60, %v5593_v61  ;;  %v1055_v10 = vshrl.u32 %v3730_v43, 16  ;;  %v1057_v13 = vshll.u32 %v3730_v43, 16  ;;  %v890_v53 = vshll.u32 %v3713_v16, 16  ;;  %4414 = vmatprep.subr.bf16.mxu1 %v4731_v24  ;;  %2875 = vmatmul.mubr.bf16.gmra.mrb[40].mxu1 %v3783_v28 }
  0x94   : > { %6487 = vst [vmem:[#allocation55_spill] sm:$0xff] %v5608_v29  ;;  %v1048_v59 = vshrl.u32 %v3729_v40, 16  ;;  %v1050_v25 = vshll.u32 %v3729_v40, 16  ;;  %v895_v18 = vshrl.u32 %v3714_v1, 16  ;;  %v897_v40 = vshll.u32 %v3714_v1, 16  ;;  %4415 = vmatpush3.bf16.msra.mxu1 %v4732_v21 }
  0x95   : > { %v1059_v43 = vrot.slane %v1057_v13, 1  ;;  %v5630_v61 = vrot.slane %v5619_v56, 4  ;;  %v5633_v31 = vrot.slane %v5624_v6, 4  ;;  %v441_v16 = vrot.slane %v294_v27, 4  ;;  %2882 = vmatprep.mubr.bf16.mxu1 %v3800_v50  ;;  %v4736_v50 = vld [vmem:[%s6362_s1 + $0x228] sm:$0xff]  }
  0x96   : > { %v1052_v17 = vrot.slane %v1050_v25, 1  ;;  %v298_v25 = vld [vmem:[%s6361_s0 + $0x198] sm:$0x11]  ;;  %v892_v1 = vrot.slane %v890_v53, 1  ;;  %v899_v52 = vrot.slane %v897_v40, 1  ;;  %v3799_v28 = vcombine.low %v5600_v5, %v5608_v29  ;;  %v4738_v40 = vld [vmem:[%s6362_s1 + $0x2a8] sm:$0xff]  }
  0x97   : > { %v442_v46 = vrot.slane %v298_v25, 4  ;;  %v5641_v13 = vor.u32 %v1059_v43, %v1055_v10  ;;  %v3731_v30 = vcombine.low %v5630_v61, %v441_v16  ;;  %v3715_v53 = vcombine.low %v5619_v56, %v294_v27 }
  0x98   : > { %2786 = vmatmul.mubr.bf16.gmra.mrb[44].mxu0 %v3797_v22  ;;  %v1053_v24 = vor.u32 %v1052_v17, %v1048_v59  ;;  %v4735_v22 = vld [vmem:[%s6362_s1 + $0x268] sm:$0xff]   ;;  %v3830_v59 = vcombine.low %v5630_v61, %v5633_v31  ;;  %v5656_v10 = vor.u32 %v899_v52, %v895_v18  ;;  %v5675_v52 = vld [vmem:[%s6361_s0 + $0x1d0] sm:$0xff] }
  0x99   : > { %2793 = vmatprep.mubr.bf16.mxu0 %v3814_v58  ;;  %v5648_v58 = vor.u32 %v892_v1, %v888_v12  ;;  %v3732_v17 = vcombine.low %v5633_v31, %v442_v46  ;;  %4352 = vmatprep.subr.bf16.mxu0 %v4735_v22  ;;  %v1062_v39 = vshrl.u32 %v3731_v30, 16  ;;  %v1064_v21 = vshll.u32 %v3731_v30, 16  ;;  %v4737_v12 = vld [vmem:[%s6362_s1 + $0x2e8] sm:$0xff]   ;;  %v5670_v30 = vld [vmem:[%s6361_s0 + $0x1b0] sm:$0xff]  ;;  %6490 = vst [vmem:[#allocation58_spill] sm:$0xff] %v5675_v52 }
  0x9a   : > { %v3816_v46 = vcombine.low %v1053_v24, %v5641_v13  ;;  %v3716_v1 = vcombine.low %v5624_v6, %v298_v25  ;;  %4353 = vmatpush3.bf16.msra.mxu0 %v4736_v50  ;;  %6489 = vst [vmem:[#allocation57_spill] sm:$0xff] %v5670_v30  ;;  %v902_v27 = vshrl.u32 %v3715_v53, 16  ;;  %v904_v22 = vshll.u32 %v3715_v53, 16  ;;  %4416 = vmatprep.subr.bf16.mxu1 %v4737_v12  ;;  %v302_v25 = vld [vmem:[%s6361_s0 + $0x1b8] sm:$0x11] }
  0x9b   : > { %v1069_v43 = vshrl.u32 %v3732_v17, 16  ;;  %v1071_v16 = vshll.u32 %v3732_v17, 16  ;;  %v1066_v18 = vrot.slane %v1064_v21, 1  ;;  %v5678_v24 = vrot.slane %v5670_v30, 4  ;;  %4417 = vmatpush3.bf16.msra.mxu1 %v4738_v40  ;;  %v306_v21 = vld [vmem:[%s6361_s0 + $0x1d8] sm:$0x11] }
  0x9c   : > { %v909_v50 = vshrl.u32 %v3716_v1, 16  ;;  %v911_v29 = vshll.u32 %v3716_v1, 16  ;;  %v5684_v63 = vrot.slane %v5675_v52, 4  ;;  %v906_v12 = vrot.slane %v904_v22, 1  ;;  %2883 = vmatmul.mubr.bf16.gmra.mrb[44].mxu1 %v3799_v28 }
  0x9d   : > { %v1073_v17 = vrot.slane %v1071_v16, 1  ;;  %v5689_v53 = vor.u32 %v1066_v18, %v1062_v39  ;;  %v443_v42 = vrot.slane %v302_v25, 4  ;;  %v444_v19 = vrot.slane %v306_v21, 4  ;;  %v4741_v16 = vld [vmem:[%s6362_s1 + $0x270] sm:$0xff]   ;;  %2890 = vmatprep.mubr.bf16.mxu1 %v3816_v46 }
  0x9e   : > { %6491 = vst [vmem:[#allocation59_spill] sm:$0xff] %v5684_v63  ;;  %v913_v1 = vrot.slane %v911_v29, 1  ;;  %v5702_v18 = vcombine.low %v5670_v30, %v302_v25  ;;  %v3815_v22 = vcombine.low %v5648_v58, %v5656_v10  ;;  %v3829_v28 = vcombine.low %v5619_v56, %v5624_v6  ;;  %4354 = vmatprep.subr.bf16.mxu0 %v4741_v16  ;;  %v4744_v25 = vld [vmem:[%s6362_s1 + $0x2b0] sm:$0xff]  }
  0x9f   : > { %v5694_v40 = vor.u32 %v1073_v17, %v1069_v43  ;;  %v3734_v39 = vcombine.low %v5684_v63, %v444_v19  ;;  %v3846_v29 = vcombine.low %v5678_v24, %v5684_v63  ;;  %v5718_v46 = vor.u32 %v906_v12, %v902_v27  ;;  %4355 = vmatpush3.bf16.msra.mxu0 %v4742_v38  ;;  %v5726_v17 = vld [vmem:[%s6361_s0 + $0x1f0] sm:$0xff]  ;;  %v310_v27 = vld [vmem:[%s6361_s0 + $0x1f8] sm:$0x11] }
  0xa0   : > { %2794 = vmatmul.mubr.bf16.gmra.mrb[48].mxu0 %v3813_v2  ;;  %v3733_v2 = vcombine.low %v5678_v24, %v443_v42  ;;  %v4743_v42 = vld [vmem:[%s6362_s1 + $0x2f0] sm:$0xff]   ;;  %v918_v51 = vshll.u32 %v5702_v18, 16  ;;  %v3845_v3 = vcombine.low %v5670_v30, %v5675_v52 }
  0xa1   : > { %2801 = vmatprep.mubr.bf16.mxu0 %v3830_v59  ;;  %6492 = vst [vmem:[#allocation60_spill] sm:$0xff] %v5694_v40  ;;  %v5711_v59 = vcombine.low %v5675_v52, %v306_v21  ;;  %v3832_v19 = vcombine.low %v5689_v53, %v5694_v40  ;;  %v1085_v43 = vshll.u32 %v3734_v39, 16  ;;  %v5728_v21 = vor.u32 %v913_v1, %v909_v50  ;;  %v5734_v38 = vld [vmem:[%s6361_s0 + $0x210] sm:$0xff]  ;;  %v314_v1 = vld [vmem:[%s6361_s0 + $0x218] sm:$0x11] }
  0xa2   : > { %v1078_v58 = vshll.u32 %v3733_v2, 16  ;;  %v1076_v16 = vshrl.u32 %v3733_v2, 16  ;;  %v1083_v4 = vshrl.u32 %v3734_v39, 16  ;;  %4418 = vmatprep.subr.bf16.mxu1 %v4743_v42  ;;  %6494 = vst [vmem:[#allocation62_spill] sm:$0xff] %v5734_v38  ;;  %v5741_v50 = vrot.slane %v5726_v17, 4 }
  0xa3   : > { %6493 = vst [vmem:[#allocation61_spill] sm:$0xff] %v5728_v21  ;;  %v1087_v11 = vrot.slane %v1085_v43, 1  ;;  %v925_v62 = vshll.u32 %v5711_v59, 16  ;;  %4419 = vmatpush3.bf16.msra.mxu1 %v4744_v25  ;;  %v916_v2 = vshrl.u32 %v5702_v18, 16  ;;  %v5748_v39 = vrot.slane %v5734_v38, 4  ;;  %v4747_v43 = vld [vmem:[%s6362_s1 + $0x278] sm:$0xff]  }
  0xa4   : > { %v1080_v12 = vrot.slane %v1078_v58, 1  ;;  %v445_v42 = vrot.slane %v310_v27, 4  ;;  %v446_v35 = vrot.slane %v314_v1, 4  ;;  %v923_v58 = vshrl.u32 %v5711_v59, 16  ;;  %2891 = vmatmul.mubr.bf16.gmra.mrb[48].mxu1 %v3815_v22  ;;  %4356 = vmatprep.subr.bf16.mxu0 %v4747_v43 }
  0xa5   : > { %6495 = vst [vmem:[#allocation63_spill] sm:$0xff] %v5748_v39  ;;  %v920_v18 = vrot.slane %v918_v51, 1  ;;  %2898 = vmatprep.mubr.bf16.mxu1 %v3832_v19  ;;  %v5762_v59 = vor.u32 %v1087_v11, %v1083_v4  ;;  %v927_v63 = vrot.slane %v925_v62, 1  ;;  %v3719_v22 = vcombine.low %v5726_v17, %v310_v27  ;;  %v4750_v62 = vld [vmem:[%s6362_s1 + $0x2b8] sm:$0xff]  }
  0xa6   : > { %v5754_v25 = vor.u32 %v1080_v12, %v1076_v16  ;;  %v3735_v37 = vcombine.low %v5741_v50, %v445_v42  ;;  %v3736_v6 = vcombine.low %v5748_v39, %v446_v35  ;;  %v3831_v51 = vcombine.low %v5718_v46, %v5728_v21  ;;  %v4751_v35 = vld [vmem:[%s6362_s1 + $0x340] sm:$0xff]  }
  0xa7   : > { %6496 = vst [vmem:[#allocation64_spill] sm:$0xff] %v5762_v59  ;;  %v3720_v42 = vcombine.low %v5734_v38, %v314_v1  ;;  %v3862_v4 = vcombine.low %v5741_v50, %v5748_v39  ;;  %v930_v27 = vshrl.u32 %v3719_v22, 16  ;;  %v932_v52 = vshll.u32 %v3719_v22, 16  ;;  %v4753_v39 = vld [vmem:[%s6362_s1 + $0x3c0] sm:$0xff]  }
  0xa8   : > { %2802 = vmatmul.mubr.bf16.gmra.mrb[52].mxu0 %v3829_v28  ;;  %v4748_v28 = vld [vmem:[%s6362_s1 + $0x238] sm:$0xff]   ;;  %v1090_v16 = vshrl.u32 %v3735_v37, 16  ;;  %v1092_v12 = vshll.u32 %v3735_v37, 16  ;;  %v1097_v11 = vshrl.u32 %v3736_v6, 16  ;;  %v1099_v19 = vshll.u32 %v3736_v6, 16 }
  0xa9   : > { %2809 = vmatprep.mubr.bf16.mxu0 %v3846_v29  ;;  %v4749_v29 = vld [vmem:[%s6362_s1 + $0x2f8] sm:$0xff]   ;;  %4357 = vmatpush3.bf16.msra.mxu0 %v4748_v28  ;;  %v937_v1 = vshrl.u32 %v3720_v42, 16  ;;  %v939_v43 = vshll.u32 %v3720_v42, 16  ;;  %v3848_v21 = vcombine.low %v5754_v25, %v5762_v59  ;;  %v5782_v30 = vor.u32 %v920_v18, %v916_v2  ;;  %v6512_v42 = vld [vmem:[#allocation7_spill] sm:$0xff] }
  0xaa   : > { %4420 = vmatprep.subr.bf16.mxu1 %v4749_v29  ;;  %v1094_v37 = vrot.slane %v1092_v12, 1  ;;  %4470 = vmatprep.subr.bf16.mxu0 %v4751_v35  ;;  %v1101_v40 = vrot.slane %v1099_v19, 1  ;;  %v5787_v6 = vor.u32 %v927_v63, %v923_v58  ;;  %v934_v29 = vrot.slane %v932_v52, 1  ;;  %v6504_v35 = vld [vmem:[#allocation56_spill] sm:$0xff]  ;;  %v6505_v19 = vld [vmem:[#allocation61_spill] sm:$0xff] }
  0xab   : > { %4421 = vmatpush3.bf16.msra.mxu1 %v4750_v62  ;;  %v941_v22 = vrot.slane %v939_v43, 1  ;;  %v3861_v2 = vcombine.low %v5726_v17, %v5734_v38  ;;  %v6508_v62 = vld [vmem:[#allocation10_spill] sm:$0xff] }
  0xac   : > { %6497 = vst [vmem:[#allocation65_spill] sm:$0xff] %v5787_v6  ;;  %v5789_v28 = vor.u32 %v1094_v37, %v1090_v16  ;;  %v5791_v12 = vor.u32 %v1101_v40, %v1097_v11  ;;  %4534 = vmatprep.subr.bf16.mxu1 %v4753_v39  ;;  %2899 = vmatmul.mubr.bf16.gmra.mrb[52].mxu1 %v3831_v51  ;;  %v6503_v11 = vld [vmem:[#allocation57_spill] sm:$0xff]  ;;  %v6507_v37 = vld [vmem:[#allocation6_spill] sm:$0xff]  ;;  %v6514_v16 = vld [vmem:[#allocation12_spill] sm:$0xff] }
  0xad   : > { %2906 = vmatprep.mubr.bf16.mxu1 %v3848_v21  ;;  %v3847_v18 = vcombine.low %v5782_v30, %v5787_v6  ;;  %v5799_v58 = vor.u32 %v934_v29, %v930_v27  ;;  %v5801_v52 = vor.u32 %v941_v22, %v937_v1  ;;  %v6502_v29 = vld [vmem:[#allocation60_spill] sm:$0xff]  ;;  %v6506_v27 = vld [vmem:[#allocation59_spill] sm:$0xff]  ;;  %v6509_v1 = vcombine.low %v6507_v37, %v6508_v62  ;;  %v6510_v43 = vld [vmem:[#allocation58_spill] sm:$0xff] }
  0xae   : > { %6498 = vst [vmem:[#allocation66_spill] sm:$0xff] %v5789_v28  ;;  %6499 = vst [vmem:[#allocation67_spill] sm:$0xff] %v5791_v12  ;;  %v3864_v63 = vcombine.low %v5789_v28, %v5791_v12  ;;  %v4755_v62 = vld [vmem:[%s6362_s1 + $0x348] sm:$0xff]   ;;  %v5863_v37 = vld [vmem:[%s6361_s0 + $0x100] sm:$0xff] }
  0xaf   : > { %6500 = vst [vmem:[#allocation68_spill] sm:$0xff] %v5799_v58  ;;  %6501 = vst [vmem:[#allocation69_spill] sm:$0xff] %v5801_v52  ;;  %v4756_v22 = vld [vmem:[%s6362_s1 + $0x308] sm:$0xff]   ;;  %v4759_v51 = vld [vmem:[%s6362_s1 + $0x350] sm:$0xff]  }
  0xb0   : > { %2810 = vmatmul.mubr.bf16.gmra.mrb[56].mxu0 %v3845_v3  ;;  %v6515_v40 = vld [vmem:[#allocation17_spill] sm:$0xff]  ;;  %v6517_v21 = vld [vmem:[#allocation11_spill] sm:$0xff]  ;;  %v6518_v3 = vld [vmem:[#allocation14_spill] sm:$0xff] }
  0xb1   : > { %2817 = vmatprep.mubr.bf16.mxu0 %v3862_v4  ;;  %v4752_v4 = vld [vmem:[%s6362_s1 + $0x300] sm:$0xff]   ;;  %v6516_v39 = vcombine.low %v6514_v16, %v6515_v40  ;;  %v4757_v40 = vld [vmem:[%s6362_s1 + $0x3c8] sm:$0xff]  }
  0xb2   : > { %v4758_v12 = vld [vmem:[%s6362_s1 + $0x388] sm:$0xff]  }
  0xb4   : > { %2907 = vmatmul.mubr.bf16.gmra.mrb[56].mxu1 %v3847_v18  ;;  %v3863_v18 = vcombine.low %v5799_v58, %v5801_v52  ;;  %v6519_v52 = vcombine.low %v6517_v21, %v6518_v3  ;;  %v6522_v3 = vld [vmem:[#allocation8_spill] sm:$0xff]  ;;  %v6523_v21 = vld [vmem:[#allocation13_spill] sm:$0xff] }
  0xb5   : > { %2914 = vmatprep.mubr.bf16.mxu1 %v3864_v63  ;;  %v280_v63 = vld [vmem:[%s6361_s0 + $0x108] sm:$0x11]  ;;  %v6524_v16 = vcombine.low %v6522_v3, %v6523_v21  ;;  %v4761_v3 = vld [vmem:[%s6362_s1 + $0x3d0] sm:$0xff]  }
  0xb8   : > { %2818 = vmatmul.mubr.bf16.gmra.mrb[60].mxu0 %v3861_v2 }
  0xb9   : > { %2955 = vmatprep.mubr.bf16.mxu0 %v6509_v1  ;;  %v6511_v1 = vld [vmem:[#allocation5_spill] sm:$0xff] }
  0xba   : > { %v6513_v2 = vcombine.low %v6511_v1, %v6512_v42  ;;  %v449_v42 = vrot.slane %v5863_v37, 4  ;;  %v6521_v1 = vld [vmem:[#allocation15_spill] sm:$0xff] }
  0xbc   : > { %2915 = vmatmul.mubr.bf16.gmra.mrb[60].mxu1 %v3863_v18  ;;  %v6520_v18 = vld [vmem:[#allocation20_spill] sm:$0xff] }
  0xbd   : > { %3052 = vmatprep.mubr.bf16.mxu1 %v6516_v39  ;;  %v3786_v58 = vcombine.low %v6521_v1, %v6520_v18  ;;  %v6526_v18 = vld [vmem:[#allocation16_spill] sm:$0xff] }
  0xc0   : > { %2956 = vmatmul.mubr.bf16.vlgmr.msra.gmra.mrb[64].mxu0 %v6513_v2  ;;  %v453_v2 = vrot.slane %v280_v63, 4 }
  0xc1   : > { %4471 = vmatpush3.bf16.msra.mxu0 %v4752_v4  ;;  %2963 = vmatprep.mubr.bf16.mxu0 %v6519_v52  ;;  %v4754_v4 = vld [vmem:[%s6362_s1 + $0x380] sm:$0xff]   ;;  %v4760_v52 = vld [vmem:[%s6362_s1 + $0x310] sm:$0xff]  }
  0xc2   : > { %4472 = vmatprep.subr.bf16.mxu0 %v4755_v62  ;;  %v3739_v39 = vcombine.low %v449_v42, %v453_v2  ;;  %v6525_v62 = vld [vmem:[#allocation9_spill] sm:$0xff]  ;;  %v6529_v2 = vld [vmem:[#allocation23_spill] sm:$0xff] }
  0xc3   : > { %v6527_v1 = vcombine.low %v6525_v62, %v6526_v18 }
  0xc4   : > { %v1132_v21 = vshll.u32 %v3739_v39, 16  ;;  %v1130_v28 = vshrl.u32 %v3739_v39, 16 }
  0xc5   : > { %4473 = vmatpush3.bf16.msra.mxu0 %v4756_v22  ;;  %v4764_v22 = vld [vmem:[%s6362_s1 + $0x358] sm:$0xff]   ;;  %3053 = vmatmul.mubr.bf16.vlgmr.msra.gmra.mrb[64].mxu1 %v6527_v1  ;;  %v3737_v1 = vcombine.low %v5863_v37, %v280_v63  ;;  %v6534_v63 = vld [vmem:[#allocation19_spill] sm:$0xff] }
  0xc6   : > { %4474 = vmatprep.subr.bf16.mxu0 %v4759_v51  ;;  %4535 = vmatpush3.bf16.msra.mxu1 %v4754_v4  ;;  %v6528_v51 = vld [vmem:[#allocation18_spill] sm:$0xff]  ;;  %v4768_v4 = vld [vmem:[%s6362_s1 + $0x360] sm:$0xff]   ;;  %v1134_v59 = vrot.slane %v1132_v21, 1 }
  0xc7   : > { %v6530_v6 = vcombine.low %v6528_v51, %v6529_v2  ;;  %4536 = vmatprep.subr.bf16.mxu1 %v4757_v40  ;;  %v4762_v40 = vld [vmem:[%s6362_s1 + $0x390] sm:$0xff]   ;;  %v6532_v51 = vld [vmem:[#allocation27_spill] sm:$0xff]  ;;  %v6533_v2 = vld [vmem:[#allocation24_spill] sm:$0xff] }
  0xc8   : > { %2964 = vmatmul.mubr.bf16.gmra.mrb[68].mxu0 %v6524_v16  ;;  %v4788_v16 = vld [vmem:[%s6361_s0 + $0xc0] sm:$0xff]  ;;  %v3788_v38 = vcombine.low %v6533_v2, %v6532_v51  ;;  %v1135_v21 = vor.u32 %v1134_v59, %v1130_v28  ;;  %v4776_v28 = vld [vmem:[%s6362_s1 + $0x370] sm:$0xff]  }
  0xc9   : > { %2971 = vmatprep.mubr.bf16.mxu0 %v3786_v58  ;;  %3060 = vmatprep.mubr.bf16.mxu1 %v6530_v6  ;;  %v4765_v58 = vld [vmem:[%s6362_s1 + $0x318] sm:$0xff]   ;;  %v4787_v6 = vld [vmem:[%s6361_s0 + $0xa0] sm:$0xff] }
  0xca   : > { %4475 = vmatpush3.bf16.msra.mxu0 %v4760_v52  ;;  %v3785_v62 = vcombine.low %v4787_v6, %v4788_v16  ;;  %v6531_v52 = vld [vmem:[#allocation21_spill] sm:$0xff]  ;;  %4537 = vmatpush3.bf16.msra.mxu1 %v4758_v12  ;;  %v4769_v6 = vld [vmem:[%s6362_s1 + $0x320] sm:$0xff]   ;;  %v4772_v12 = vld [vmem:[%s6362_s1 + $0x368] sm:$0xff]  }
  0xcb   : > { %4476 = vmatprep.subr.bf16.mxu0 %v4764_v22  ;;  %v3802_v18 = vcombine.low %v6531_v52, %v449_v42  ;;  %4538 = vmatprep.subr.bf16.mxu1 %v4761_v3  ;;  %v4766_v22 = vld [vmem:[%s6362_s1 + $0x3d8] sm:$0xff]   ;;  %v1112_v3 = vshll.u32 %v3737_v1, 16  ;;  %v4773_v16 = vld [vmem:[%s6362_s1 + $0x328] sm:$0xff]   ;;  %v6539_v2 = vld [vmem:[#allocation31_spill] sm:$0xff] }
  0xcc   : > { %v6535_v42 = vld [vmem:[#allocation22_spill] sm:$0xff] }
  0xcd   : > { %v6536_v39 = vcombine.low %v6534_v63, %v6535_v42  ;;  %v1114_v51 = vrot.slane %v1112_v3, 1  ;;  %v6541_v63 = vld [vmem:[#allocation28_spill] sm:$0xff] }
  0xce   : > { %4477 = vmatpush3.bf16.msra.mxu0 %v4765_v58  ;;  %4539 = vmatpush3.bf16.msra.mxu1 %v4762_v40  ;;  %v4767_v58 = vld [vmem:[%s6362_s1 + $0x398] sm:$0xff]   ;;  %v6538_v40 = vld [vmem:[#allocation25_spill] sm:$0xff]  ;;  %v3804_v42 = vcombine.low %v6541_v63, %v1135_v21  ;;  %v4775_v21 = vld [vmem:[%s6362_s1 + $0x3a8] sm:$0xff]  }
  0xcf   : > { %4478 = vmatprep.subr.bf16.mxu0 %v4768_v4  ;;  %3061 = vmatmul.mubr.bf16.gmra.mrb[68].mxu1 %v6536_v39  ;;  %v4770_v4 = vld [vmem:[%s6362_s1 + $0x3e0] sm:$0xff]   ;;  %v4781_v39 = vld [vmem:[%s6362_s1 + $0x378] sm:$0xff]  }
  0xd0   : > { %2972 = vmatmul.mubr.bf16.gmra.mrb[72].mxu0 %v3785_v62  ;;  %3068 = vmatprep.mubr.bf16.mxu1 %v3788_v38  ;;  %v4789_v38 = vld [vmem:[%s6361_s0 + $0xe0] sm:$0xff]  ;;  %v6537_v62 = vld [vmem:[#allocation29_spill] sm:$0xff] }
  0xd1   : > { %2979 = vmatprep.mubr.bf16.mxu0 %v3802_v18  ;;  %4540 = vmatprep.subr.bf16.mxu1 %v4766_v22  ;;  %v3801_v59 = vcombine.low %v4789_v38, %v5863_v37  ;;  %v3787_v52 = vcombine.low %v6538_v40, %v6537_v62  ;;  %v1110_v18 = vshrl.u32 %v3737_v1, 16  ;;  %v6540_v22 = vld [vmem:[#allocation26_spill] sm:$0xff]  ;;  %v4771_v37 = vld [vmem:[%s6362_s1 + $0x3a0] sm:$0xff]   ;;  %v4777_v1 = vld [vmem:[%s6362_s1 + $0x330] sm:$0xff]  }
  0xd2   : > { %4479 = vmatpush3.bf16.msra.mxu0 %v4769_v6  ;;  %v3818_v6 = vcombine.low %v6540_v22, %v6539_v2  ;;  %4541 = vmatpush3.bf16.msra.mxu1 %v4767_v58  ;;  %v4778_v58 = vld [vmem:[%s6362_s1 + $0x3f0] sm:$0xff]   ;;  %v4791_v38 = vld [vmem:[%s6361_s0 + $0x160] sm:$0xff] }
  0xd3   : > { %4480 = vmatprep.subr.bf16.mxu0 %v4772_v12  ;;  %4542 = vmatprep.subr.bf16.mxu1 %v4770_v4  ;;  %v4774_v12 = vld [vmem:[%s6362_s1 + $0x3e8] sm:$0xff]   ;;  %v1115_v3 = vor.u32 %v1114_v51, %v1110_v18  ;;  %v4782_v4 = vld [vmem:[%s6362_s1 + $0x338] sm:$0xff]   ;;  %v6543_v40 = vld [vmem:[#allocation35_spill] sm:$0xff] }
  0xd4   : > { %v6545_v51 = vld [vmem:[#allocation37_spill] sm:$0xff]  ;;  %v315_v63 = vld [vmem:[%s6361_s0 + $0x220] sm:$0xff] }
  0xd5   : > { %v6546_v2 = vld [vmem:[#allocation33_spill] sm:$0xff] }
  0xd6   : > { %4481 = vmatpush3.bf16.msra.mxu0 %v4773_v16  ;;  %4543 = vmatpush3.bf16.msra.mxu1 %v4771_v37  ;;  %v4790_v16 = vld [vmem:[%s6361_s0 + $0x140] sm:$0xff]  ;;  %v3820_v22 = vcombine.low %v6546_v2, %v6545_v51  ;;  %v4783_v37 = vld [vmem:[%s6362_s1 + $0x3f8] sm:$0xff]  }
  0xd7   : > { %4482 = vmatprep.subr.bf16.mxu0 %v4776_v28  ;;  %3069 = vmatmul.mubr.bf16.gmra.mrb[72].mxu1 %v3787_v52  ;;  %v6542_v28 = vld [vmem:[#allocation30_spill] sm:$0xff]  ;;  %v6544_v52 = vld [vmem:[#allocation32_spill] sm:$0xff] }
  0xd8   : > { %2980 = vmatmul.mubr.bf16.gmra.mrb[76].mxu0 %v3801_v59  ;;  %3076 = vmatprep.mubr.bf16.mxu1 %v3804_v42  ;;  %v3817_v59 = vcombine.low %v4790_v16, %v4791_v38  ;;  %v3803_v62 = vcombine.low %v6542_v28, %v1115_v3  ;;  %v3834_v18 = vcombine.low %v6544_v52, %v6543_v40  ;;  %v316_v42 = vld [vmem:[%s6361_s0 + $0x228] sm:$0x11]  ;;  %v4792_v3 = vld [vmem:[%s6361_s0 + $0x180] sm:$0xff]  ;;  %v6548_v16 = vld [vmem:[#allocation34_spill] sm:$0xff] }
  0xd9   : > { %2987 = vmatprep.mubr.bf16.mxu0 %v3818_v6  ;;  %4544 = vmatprep.subr.bf16.mxu1 %v4774_v12  ;;  %v4779_v6 = vld [vmem:[%s6362_s1 + $0x3b0] sm:$0xff]   ;;  %v450_v12 = vrot.slane %v315_v63, 4  ;;  %v6550_v28 = vld [vmem:[#allocation36_spill] sm:$0xff]  ;;  %v6551_v40 = vld [vmem:[#allocation43_spill] sm:$0xff] }
  0xda   : > { %4483 = vmatpush3.bf16.msra.mxu0 %v4777_v1  ;;  %4545 = vmatpush3.bf16.msra.mxu1 %v4775_v21  ;;  %v454_v1 = vrot.slane %v316_v42, 4  ;;  %v4793_v21 = vld [vmem:[%s6361_s0 + $0x1a0] sm:$0xff]  ;;  %v6552_v52 = vld [vmem:[#allocation38_spill] sm:$0xff] }
  0xdb   : > { %4484 = vmatprep.subr.bf16.mxu0 %v4781_v39  ;;  %4546 = vmatprep.subr.bf16.mxu1 %v4778_v58  ;;  %v4784_v39 = vld [vmem:[%s6362_s1 + $0x3b8] sm:$0xff]   ;;  %v3833_v58 = vcombine.low %v4792_v3, %v4793_v21  ;;  %v6553_v3 = vld [vmem:[#allocation44_spill] sm:$0xff] }
  0xdc   : > { %v3740_v51 = vcombine.low %v450_v12, %v454_v1  ;;  %v6554_v21 = vld [vmem:[#allocation40_spill] sm:$0xff] }
  0xde   : > { %4485 = vmatpush3.bf16.msra.mxu0 %v4782_v4  ;;  %4547 = vmatpush3.bf16.msra.mxu1 %v4779_v6  ;;  %v6547_v4 = vld [vmem:[#allocation39_spill] sm:$0xff]  ;;  %v1139_v2 = vshll.u32 %v3740_v51, 16 }
  0xdf   : > { %3077 = vmatmul.mubr.bf16.gmra.mrb[76].mxu1 %v3803_v62  ;;  %4548 = vmatprep.subr.bf16.mxu1 %v4783_v37  ;;  %v3819_v38 = vcombine.low %v6548_v16, %v6547_v4  ;;  %v4795_v6 = vld [vmem:[%s6361_s0 + $0x1e0] sm:$0xff]  ;;  %v3835_v4 = vcombine.low %v6554_v21, %v6553_v3  ;;  %v6555_v16 = vld [vmem:[#allocation42_spill] sm:$0xff] }
  0xe0   : > { %2988 = vmatmul.mubr.bf16.gmra.mrb[80].mxu0 %v3817_v59  ;;  %3084 = vmatprep.mubr.bf16.mxu1 %v3820_v22  ;;  %v6549_v59 = vld [vmem:[#allocation41_spill] sm:$0xff]  ;;  %v4794_v22 = vld [vmem:[%s6361_s0 + $0x1c0] sm:$0xff]  ;;  %v3866_v1 = vcombine.low %v6555_v16, %v450_v12  ;;  %v6559_v3 = vld [vmem:[#allocation46_spill] sm:$0xff] }
  0xe1   : > { %2995 = vmatprep.mubr.bf16.mxu0 %v3834_v18  ;;  %v3850_v62 = vcombine.low %v6550_v28, %v6549_v59  ;;  %v3836_v18 = vcombine.low %v6552_v52, %v6551_v40  ;;  %v3849_v37 = vcombine.low %v4794_v22, %v4795_v6  ;;  %v1137_v28 = vshrl.u32 %v3740_v51, 16  ;;  %v6558_v6 = vld [vmem:[#allocation48_spill] sm:$0xff]  ;;  %v6560_v16 = vld [vmem:[#allocation49_spill] sm:$0xff] }
  0xe2   : > { %4549 = vmatpush3.bf16.msra.mxu1 %v4784_v39  ;;  %v3738_v39 = vcombine.low %v315_v63, %v316_v42  ;;  %v3851_v12 = vcombine.low %v6559_v3, %v6558_v6 }
  0xe4   : > { %v1119_v40 = vshll.u32 %v3738_v39, 16  ;;  %v1117_v42 = vshrl.u32 %v3738_v39, 16  ;;  %v6563_v39 = vcombine.low %v5361_v57, %v5399_v20  ;;  %v6570_v20 = vcombine.low %v5474_v54, %v5526_v41 }
  0xe6   : > { %v1121_v21 = vrot.slane %v1119_v40, 1  ;;  %v6567_v40 = vld [vmem:[#allocation51_spill] sm:$0xff] }
  0xe7   : > { %3085 = vmatmul.mubr.bf16.gmra.mrb[80].mxu1 %v3819_v38  ;;  %v6557_v38 = vld [vmem:[#allocation45_spill] sm:$0xff] }
  0xe8   : > { %2996 = vmatmul.mubr.bf16.gmra.mrb[84].mxu0 %v3833_v58  ;;  %3092 = vmatprep.mubr.bf16.mxu1 %v3836_v18  ;;  %v6556_v58 = vld [vmem:[#allocation47_spill] sm:$0xff]  ;;  %v1122_v51 = vor.u32 %v1121_v21, %v1117_v42 }
  0xe9   : > { %3003 = vmatprep.mubr.bf16.mxu0 %v3850_v62  ;;  %v3852_v59 = vcombine.low %v6557_v38, %v6556_v58  ;;  %v1141_v62 = vrot.slane %v1139_v2, 1  ;;  %v4796_v18 = vld [vmem:[%s6361_s0 + $0x200] sm:$0xff]  ;;  %v6561_v2 = vcombine.low %v5368_v55, %v5415_v23  ;;  %v6564_v55 = vcombine.low %v5418_v47, %v5463_v34  ;;  %v6572_v47 = vld [vmem:[#allocation53_spill] sm:$0xff] }
  0xea   : > { %v3865_v22 = vcombine.low %v4796_v18, %v315_v63  ;;  %v281_v63 = vld [vmem:[%s6361_s0 + $0x110] sm:$0xff]  ;;  %v6565_v23 = vcombine.low %v5444_v15, %v5471_v7  ;;  %v6571_v34 = vcombine.low %v5483_v9, %v5534_v14  ;;  %v6575_v9 = vcombine.low %v5538_v26, %v5586_v60 }
  0xeb   : > { %v1142_v52 = vor.u32 %v1141_v62, %v1137_v28  ;;  %v457_v38 = vrot.slane %v281_v63, 4  ;;  %v6566_v62 = vcombine.low %v5409_v48, %v5451_v32  ;;  %v6573_v48 = vcombine.low %v5456_v0, %v5504_v45 }
  0xec   : > { %v6574_v32 = vcombine.low %v5511_v49, %v5556_v44  ;;  %v6576_v44 = vld [vmem:[#allocation54_spill] sm:$0xff]  ;;  %v6577_v26 = vcombine.low %v5566_v8, %v5600_v5  ;;  %v6096_v5 = vld [vmem:[%s6361_s0 + $0x230] sm:$0xff] }
  0xed   : > { %v3868_v58 = vcombine.low %v6560_v16, %v1142_v52  ;;  %v6568_v52 = vld [vmem:[#allocation52_spill] sm:$0xff]  ;;  %v3806_v7 = vcombine.low %v6572_v47, %v457_v38  ;;  %v458_v47 = vrot.slane %v6096_v5, 4 }
  0xee   : > { %v6569_v57 = vcombine.low %v6567_v40, %v6568_v52 }
  0xef   : > { %3093 = vmatmul.mubr.bf16.gmra.mrb[84].mxu1 %v3835_v4 }
  0xf0   : > { %3004 = vmatmul.mubr.bf16.gmra.mrb[88].mxu0 %v3849_v37  ;;  %3100 = vmatprep.mubr.bf16.mxu1 %v3852_v59  ;;  %v6562_v37 = vld [vmem:[#allocation50_spill] sm:$0xff] }
  0xf1   : > { %3011 = vmatprep.mubr.bf16.mxu0 %v3866_v1  ;;  %v3867_v4 = vcombine.low %v6562_v37, %v1122_v51  ;;  %v282_v1 = vld [vmem:[%s6361_s0 + $0x118] sm:$0x11] }
  0xf2   : > { %v461_v59 = vrot.slane %v282_v1, 4  ;;  %v3741_v18 = vcombine.low %v281_v63, %v282_v1 }
  0xf4   : > { %v3743_v28 = vcombine.low %v457_v38, %v461_v59  ;;  %v1152_v54 = vshll.u32 %v3741_v18, 16  ;;  %v1150_v21 = vshrl.u32 %v3741_v18, 16 }
  0xf6   : > { %v1172_v15 = vshll.u32 %v3743_v28, 16  ;;  %v1154_v16 = vrot.slane %v1152_v54, 1 }
  0xf7   : > { %3101 = vmatmul.mubr.bf16.gmra.mrb[88].mxu1 %v3851_v12  ;;  %v4797_v12 = vld [vmem:[%s6361_s0 + $0xf0] sm:$0xff] }
  0xf8   : > { %3012 = vmatmul.mubr.bf16.gmra.mrb[92].mxu0 %v3865_v22  ;;  %3108 = vmatprep.mubr.bf16.mxu1 %v3868_v58  ;;  %v1170_v22 = vshrl.u32 %v3743_v28, 16  ;;  %v1174_v6 = vrot.slane %v1172_v15, 1  ;;  %v3805_v42 = vcombine.low %v4797_v12, %v281_v63  ;;  %v1155_v60 = vor.u32 %v1154_v16, %v1150_v21 }
  0xf9   : > { %3149 = vmatprep.mubr.bf16.mxu0 %v6561_v2  ;;  %v6578_v2 = vcombine.low %v5584_v36, %v5630_v61  ;;  %v318_v36 = vld [vmem:[%s6361_s0 + $0x238] sm:$0x11]  ;;  %v6582_v15 = vcombine.low %v5641_v13, %v5689_v53  ;;  %v6583_v13 = vcombine.low %v6504_v35, %v6503_v11  ;;  %v6584_v53 = vcombine.low %v5656_v10, %v5718_v46 }
  0xfa   : > { %v1175_v41 = vor.u32 %v1174_v6, %v1170_v22  ;;  %v6585_v12 = vcombine.low %v6506_v27, %v5741_v50  ;;  %v3742_v46 = vcombine.low %v6096_v5, %v318_v36 }
  0xfc   : > { %v3808_v58 = vcombine.low %v6576_v44, %v1175_v41 }
  0xff   : > { %3109 = vmatmul.mubr.bf16.gmra.mrb[92].mxu1 %v3867_v4 }
 0x100   : > { %3150 = vmatmul.mubr.bf16.vlgmr.msra.gmra.mrb[96].mxu0 %v6563_v39  ;;  %3246 = vmatprep.mubr.bf16.mxu1 %v6565_v23  ;;  %v6579_v39 = vld [vmem:[#allocation55_spill] sm:$0xff] }
 0x101   : > { %3157 = vmatprep.mubr.bf16.mxu0 %v6564_v55  ;;  %v3807_v55 = vcombine.low %v6579_v39, %v1155_v60 }
 0x107   : > { %3247 = vmatmul.mubr.bf16.vlgmr.msra.gmra.mrb[96].mxu1 %v6569_v57  ;;  %v6580_v57 = vcombine.low %v5574_v33, %v5619_v56 }
 0x108   : > { %3158 = vmatmul.mubr.bf16.gmra.mrb[100].mxu0 %v6566_v62  ;;  %3254 = vmatprep.mubr.bf16.mxu1 %v6571_v34 }
 0x109   : > { %3165 = vmatprep.mubr.bf16.mxu0 %v6570_v20  ;;  %v6581_v20 = vcombine.low %v5633_v31, %v5678_v24 }
 0x10f   : > { %3255 = vmatmul.mubr.bf16.gmra.mrb[100].mxu1 %v6574_v32 }
 0x110   : > { %3166 = vmatmul.mubr.bf16.gmra.mrb[104].mxu0 %v6573_v48  ;;  %3262 = vmatprep.mubr.bf16.mxu1 %v6575_v9 }
 0x111   : > { %3173 = vmatprep.mubr.bf16.mxu0 %v3806_v7  ;;  %v462_v7 = vrot.slane %v318_v36, 4 }
 0x113   : > { %v4102_v14 = vpop.f32.mrb[0].mxu0  ;;  %v3744_v31 = vcombine.low %v458_v47, %v462_v7 }
 0x114   : > { %v4103_v3 = vpop.f32.mrb[1].mxu0 }
 0x115   : > { %v4104_v0 = vadd.f32 %v4103_v3, %v4102_v14  ;;  %v4105_v45 = vpop.f32.mrb[2].mxu0  ;;  %v4166_v4 = vpop.f32.mrb[0].mxu1 }
 0x116   : > { %v4106_v49 = vpop.f32.mrb[3].mxu0  ;;  %v4167_v1 = vpop.f32.mrb[1].mxu1 }
 0x117   : > { %v4107_v51 = vadd.f32 %v4106_v49, %v4105_v45  ;;  %3263 = vmatmul.mubr.bf16.gmra.mrb[104].mxu1 %v6577_v26  ;;  %v4168_v59 = vadd.f32 %v4167_v1, %v4166_v4  ;;  %v4169_v28 = vpop.f32.mrb[2].mxu1  ;;  %v1179_v45 = vshll.u32 %v3744_v31, 16  ;;  %v1177_v26 = vshrl.u32 %v3744_v31, 16 }
 0x118   : > { %3174 = vmatmul.mubr.bf16.gmra.mrb[108].mxu0 %v3805_v42  ;;  %3270 = vmatprep.mubr.bf16.mxu1 %v3808_v58  ;;  %v4170_v40 = vpop.f32.mrb[3].mxu1  ;;  %v6587_v58 = vld [vmem:[#allocation63_spill] sm:$0xff]  ;;  %v6588_v4 = vcombine.low %v6510_v43, %v5726_v17  ;;  %v1159_v1 = vshll.u32 %v3742_v46, 16 }
 0x119   : > { %3181 = vmatprep.mubr.bf16.mxu0 %v6578_v2  ;;  %v6101_v61 = vadd.f32 %v4168_v59, %v4104_v0  ;;  %v4171_v52 = vadd.f32 %v4170_v40, %v4169_v28  ;;  %v6586_v0 = vcombine.low %v6502_v29, %v5754_v25  ;;  %v3870_v10 = vcombine.low %v6587_v58, %v458_v47  ;;  %v6594_v47 = vld [vmem:[#allocation67_spill] sm:$0xff] }
 0x11a   : > { %v1181_v60 = vrot.slane %v1179_v45, 1 }
 0x11b   : > { %v4108_v37 = vpop.f32.mrb[4].mxu0  ;;  %v6109_v34 = vadd.f32 %v4171_v52, %v4107_v51 }
 0x11c   : > { %v4109_v63 = vpop.f32.mrb[5].mxu0  ;;  %v1182_v59 = vor.u32 %v1181_v60, %v1177_v26 }
 0x11d   : > { %v4110_v23 = vadd.f32 %v4109_v63, %v4108_v37  ;;  %v4111_v38 = vpop.f32.mrb[6].mxu0  ;;  %v4172_v22 = vpop.f32.mrb[4].mxu1  ;;  %v6589_v63 = vcombine.low %v6505_v19, %v5782_v30  ;;  %v1157_v30 = vshrl.u32 %v3742_v46, 16  ;;  %v1161_v19 = vrot.slane %v1159_v1, 1 }
 0x11e   : > { %v4112_v62 = vpop.f32.mrb[7].mxu0  ;;  %v4173_v48 = vpop.f32.mrb[5].mxu1  ;;  %v3872_v7 = vcombine.low %v6594_v47, %v1182_v59 }
 0x11f   : > { %v4113_v8 = vadd.f32 %v4112_v62, %v4111_v38  ;;  %3271 = vmatmul.mubr.bf16.gmra.mrb[108].mxu1 %v3807_v55  ;;  %v4174_v32 = vadd.f32 %v4173_v48, %v4172_v22  ;;  %v4175_v54 = vpop.f32.mrb[6].mxu1  ;;  %v6590_v55 = vld [vmem:[#allocation64_spill] sm:$0xff] }
 0x120   : > { %3182 = vmatmul.mubr.bf16.gmra.mrb[112].mxu0 %v6580_v57  ;;  %3278 = vmatprep.mubr.bf16.mxu1 %v6582_v15  ;;  %v4176_v24 = vpop.f32.mrb[7].mxu1 }
 0x121   : > { %3189 = vmatprep.mubr.bf16.mxu0 %v6581_v20  ;;  %v6115_v14 = vadd.f32 %v4174_v32, %v4110_v23  ;;  %v4177_v3 = vadd.f32 %v4176_v24, %v4175_v54  ;;  %v6591_v23 = vld [vmem:[#allocation66_spill] sm:$0xff] }
 0x122   : > { %v6592_v38 = vcombine.low %v6590_v55, %v6591_v23 }
 0x123   : > { %v4114_v18 = vpop.f32.mrb[8].mxu0  ;;  %v6126_v42 = vadd.f32 %v4177_v3, %v4113_v8  ;;  %v6593_v8 = vld [vmem:[#allocation62_spill] sm:$0xff]  ;;  %v6598_v3 = vld [vmem:[#allocation69_spill] sm:$0xff] }
 0x124   : > { %v4115_v6 = vpop.f32.mrb[9].mxu0  ;;  %v3869_v17 = vcombine.low %v6593_v8, %v6096_v5  ;;  %v1162_v5 = vor.u32 %v1161_v19, %v1157_v30 }
 0x125   : > { %v4116_v33 = vadd.f32 %v4115_v6, %v4114_v18  ;;  %v4117_v56 = vpop.f32.mrb[10].mxu0  ;;  %v4178_v16 = vpop.f32.mrb[8].mxu1 }
 0x126   : > { %v4118_v9 = vpop.f32.mrb[11].mxu0  ;;  %v4179_v35 = vpop.f32.mrb[9].mxu1 }
 0x127   : > { %v4119_v41 = vadd.f32 %v4118_v9, %v4117_v56  ;;  %3279 = vmatmul.mubr.bf16.gmra.mrb[112].mxu1 %v6584_v53  ;;  %v4180_v51 = vadd.f32 %v4179_v35, %v4178_v16  ;;  %v4181_v50 = vpop.f32.mrb[10].mxu1  ;;  %v6596_v56 = vld [vmem:[#allocation68_spill] sm:$0xff] }
 0x128   : > { %3190 = vmatmul.mubr.bf16.gmra.mrb[116].mxu0 %v6583_v13  ;;  %3286 = vmatprep.mubr.bf16.mxu1 %v6586_v0  ;;  %v4182_v2 = vpop.f32.mrb[11].mxu1  ;;  %v3871_v13 = vcombine.low %v6598_v3, %v1162_v5 }
 0x129   : > { %3197 = vmatprep.mubr.bf16.mxu0 %v6585_v12  ;;  %v6133_v25 = vadd.f32 %v4180_v51, %v4116_v33  ;;  %v4183_v29 = vadd.f32 %v4182_v2, %v4181_v50  ;;  %v6595_v33 = vld [vmem:[#allocation65_spill] sm:$0xff] }
 0x12a   : > { %v6597_v32 = vcombine.low %v6595_v33, %v6596_v56 }
 0x12b   : > { %v4120_v21 = vpop.f32.mrb[12].mxu0  ;;  %v6141_v39 = vadd.f32 %v4183_v29, %v4119_v41 }
 0x12c   : > { %v4121_v49 = vpop.f32.mrb[13].mxu0 }
 0x12d   : > { %v4122_v11 = vadd.f32 %v4121_v49, %v4120_v21  ;;  %v4123_v44 = vpop.f32.mrb[14].mxu0 }
 0x12e   : > { %v4124_v27 = vpop.f32.mrb[15].mxu0  ;;  %v4184_v62 = vpop.f32.mrb[12].mxu1 }
 0x12f   : > { %v4125_v37 = vadd.f32 %v4124_v27, %v4123_v44  ;;  %3287 = vmatmul.mubr.bf16.gmra.mrb[116].mxu1 %v6589_v63  ;;  %v4185_v43 = vpop.f32.mrb[13].mxu1 }
 0x130   : > { %3198 = vmatmul.mubr.bf16.gmra.mrb[120].mxu0 %v6588_v4  ;;  %3294 = vmatprep.mubr.bf16.mxu1 %v6592_v38  ;;  %v4186_v57 = vadd.f32 %v4185_v43, %v4184_v62  ;;  %v4187_v20 = vpop.f32.mrb[14].mxu1 }
 0x131   : > { %3205 = vmatprep.mubr.bf16.mxu0 %v3870_v10  ;;  %v4188_v18 = vpop.f32.mrb[15].mxu1 }
 0x132   : > { %v6149_v6 = vadd.f32 %v4186_v57, %v4122_v11  ;;  %v4189_v48 = vadd.f32 %v4188_v18, %v4187_v20 }
 0x133   : > { %v4126_v28 = vpop.f32.mrb[16].mxu0 }
 0x134   : > { %v4127_v40 = vpop.f32.mrb[17].mxu0  ;;  %v6154_v54 = vadd.f32 %v4189_v48, %v4125_v37 }
 0x135   : > { %v4128_v36 = vadd.f32 %v4127_v40, %v4126_v28  ;;  %v4129_v52 = vpop.f32.mrb[18].mxu0 }
 0x136   : > { %v4130_v15 = vpop.f32.mrb[19].mxu0  ;;  %v4190_v31 = vpop.f32.mrb[16].mxu1 }
 0x137   : > { %v4131_v22 = vadd.f32 %v4130_v15, %v4129_v52  ;;  %3295 = vmatmul.mubr.bf16.gmra.mrb[120].mxu1 %v6597_v32  ;;  %v4191_v41 = vpop.f32.mrb[17].mxu1 }
 0x138   : > { %3206 = vmatmul.mubr.bf16.gmra.mrb[124].mxu0 %v3869_v17  ;;  %3302 = vmatprep.mubr.bf16.mxu1 %v3872_v7  ;;  %v4192_v0 = vadd.f32 %v4191_v41, %v4190_v31  ;;  %v4193_v45 = vpop.f32.mrb[18].mxu1 }
 0x139   : > { %v4194_v16 = vpop.f32.mrb[19].mxu1 }
 0x13a   : > { %v6157_v35 = vadd.f32 %v4192_v0, %v4128_v36  ;;  %v4195_v11 = vadd.f32 %v4194_v16, %v4193_v45 }
 0x13b   : > { %v4132_v9 = vpop.f32.mrb[20].mxu0 }
 0x13c   : > { %v4133_v24 = vpop.f32.mrb[21].mxu0  ;;  %v6159_v44 = vadd.f32 %v4195_v11, %v4131_v22 }
 0x13d   : > { %v4134_v53 = vadd.f32 %v4133_v24, %v4132_v9  ;;  %v4135_v12 = vpop.f32.mrb[22].mxu0 }
 0x13e   : > { %v4136_v21 = vpop.f32.mrb[23].mxu0  ;;  %v4196_v10 = vpop.f32.mrb[20].mxu1 }
 0x13f   : > { %v4137_v49 = vadd.f32 %v4136_v21, %v4135_v12  ;;  %3303 = vmatmul.mubr.bf16.gmra.mrb[124].mxu1 %v3871_v13  ;;  %v4197_v51 = vpop.f32.mrb[21].mxu1 }
 0x140   : > { %v4198_v26 = vadd.f32 %v4197_v51, %v4196_v10  ;;  %v4199_v60 = vpop.f32.mrb[22].mxu1 }
 0x141   : > { %v4200_v37 = vpop.f32.mrb[23].mxu1 }
 0x142   : > { %v6161_v4 = vadd.f32 %v4198_v26, %v4134_v53  ;;  %v4201_v63 = vadd.f32 %v4200_v37, %v4199_v60 }
 0x143   : > { %v4138_v58 = vpop.f32.mrb[24].mxu0 }
 0x144   : > { %v4139_v46 = vpop.f32.mrb[25].mxu0  ;;  %v6163_v1 = vadd.f32 %v4201_v63, %v4137_v49 }
 0x145   : > { %v4140_v50 = vadd.f32 %v4139_v46, %v4138_v58  ;;  %v4141_v27 = vpop.f32.mrb[26].mxu0 }
 0x146   : > { %v4142_v2 = vpop.f32.mrb[27].mxu0  ;;  %v4202_v23 = vpop.f32.mrb[24].mxu1 }
 0x147   : > { %v4143_v29 = vadd.f32 %v4142_v2, %v4141_v27  ;;  %v4203_v59 = vpop.f32.mrb[25].mxu1 }
 0x148   : > { %v4204_v40 = vadd.f32 %v4203_v59, %v4202_v23  ;;  %v4205_v8 = vpop.f32.mrb[26].mxu1 }
 0x149   : > { %v4206_v43 = vpop.f32.mrb[27].mxu1 }
 0x14a   : > { %v6165_v52 = vadd.f32 %v4204_v40, %v4140_v50  ;;  %v4207_v30 = vadd.f32 %v4206_v43, %v4205_v8 }
 0x14b   : > { %v4144_v55 = vpop.f32.mrb[28].mxu0 }
 0x14c   : > { %v4145_v38 = vpop.f32.mrb[29].mxu0  ;;  %v6167_v19 = vadd.f32 %v4207_v30, %v4143_v29 }
 0x14d   : > { %v4146_v28 = vadd.f32 %v4145_v38, %v4144_v55  ;;  %v4147_v62 = vpop.f32.mrb[30].mxu0 }
 0x14e   : > { %v4148_v17 = vpop.f32.mrb[31].mxu0  ;;  %v4208_v20 = vpop.f32.mrb[28].mxu1 }
 0x14f   : > { %v4149_v36 = vadd.f32 %v4148_v17, %v4147_v62  ;;  %v4209_v47 = vpop.f32.mrb[29].mxu1 }
 0x150   : > { %v4210_v22 = vadd.f32 %v4209_v47, %v4208_v20  ;;  %v4211_v48 = vpop.f32.mrb[30].mxu1 }
 0x151   : > { %v4212_v56 = vpop.f32.mrb[31].mxu1 }
 0x152   : > { %v6170_v9 = vadd.f32 %v4210_v22, %v4146_v28  ;;  %v4213_v31 = vadd.f32 %v4212_v56, %v4211_v48 }
 0x153   : > { %v4230_v57 = vpop.f32.mrb[32].mxu0 }
 0x154   : > { %v4231_v15 = vpop.f32.mrb[33].mxu0  ;;  %v6173_v41 = vadd.f32 %v4213_v31, %v4149_v36 }
 0x155   : > { %v4232_v7 = vadd.f32 %v4231_v15, %v4230_v57  ;;  %v4233_v18 = vpop.f32.mrb[34].mxu0 }
 0x156   : > { %v4234_v33 = vpop.f32.mrb[35].mxu0  ;;  %v4294_v13 = vpop.f32.mrb[32].mxu1 }
 0x157   : > { %v2764_v32 = vadd.f32 %v4232_v7, %v6101_v61  ;;  %v4235_v5 = vadd.f32 %v4234_v33, %v4233_v18  ;;  %v4295_v12 = vpop.f32.mrb[33].mxu1 }
 0x158   : > { %v4296_v21 = vadd.f32 %v4295_v12, %v4294_v13  ;;  %v4297_v16 = vpop.f32.mrb[34].mxu1 }
 0x159   : > { %v2767_v24 = vadd.f32 %v4235_v5, %v6109_v34  ;;  %v4298_v11 = vpop.f32.mrb[35].mxu1 }
 0x15a   : > { %v6176_v10 = vadd.f32 %v4296_v21, %v2764_v32  ;;  %v4299_v46 = vadd.f32 %v4298_v11, %v4297_v16 }
 0x15b   : > { %v4236_v3 = vpop.f32.mrb[36].mxu0 }
 0x15c   : > { %v4237_v53 = vpop.f32.mrb[37].mxu0  ;;  %v6179_v51 = vadd.f32 %v4299_v46, %v2767_v24 }
 0x15d   : > { %v4238_v0 = vadd.f32 %v4237_v53, %v4236_v3  ;;  %v4239_v45 = vpop.f32.mrb[38].mxu0 }
 0x15e   : > { %v4240_v49 = vpop.f32.mrb[39].mxu0  ;;  %v4300_v27 = vpop.f32.mrb[36].mxu1 }
 0x15f   : > { %v2772_v61 = vadd.f32 %v4238_v0, %v6115_v14  ;;  %v4241_v58 = vadd.f32 %v4240_v49, %v4239_v45  ;;  %v4301_v60 = vpop.f32.mrb[37].mxu1 }
 0x160   : > { %v4302_v29 = vadd.f32 %v4301_v60, %v4300_v27  ;;  %v4303_v63 = vpop.f32.mrb[38].mxu1 }
 0x161   : > { %v2775_v34 = vadd.f32 %v4241_v58, %v6126_v42  ;;  %v4304_v23 = vpop.f32.mrb[39].mxu1 }
 0x162   : > { %v6182_v59 = vadd.f32 %v4302_v29, %v2772_v61  ;;  %v4305_v28 = vadd.f32 %v4304_v23, %v4303_v63 }
 0x163   : > { %v4242_v50 = vpop.f32.mrb[40].mxu0 }
 0x164   : > { %v4243_v26 = vpop.f32.mrb[41].mxu0  ;;  %v6185_v62 = vadd.f32 %v4305_v28, %v2775_v34 }
 0x165   : > { %v4244_v2 = vadd.f32 %v4243_v26, %v4242_v50  ;;  %v4245_v37 = vpop.f32.mrb[42].mxu0 }
 0x166   : > { %v4246_v55 = vpop.f32.mrb[43].mxu0  ;;  %v4306_v8 = vpop.f32.mrb[40].mxu1 }
 0x167   : > { %v2780_v14 = vadd.f32 %v4244_v2, %v6133_v25  ;;  %v4247_v38 = vadd.f32 %v4246_v55, %v4245_v37  ;;  %v4307_v43 = vpop.f32.mrb[41].mxu1 }
 0x168   : > { %v4308_v57 = vadd.f32 %v4307_v43, %v4306_v8  ;;  %v4309_v20 = vpop.f32.mrb[42].mxu1 }
 0x169   : > { %v2783_v42 = vadd.f32 %v4247_v38, %v6141_v39  ;;  %v4310_v47 = vpop.f32.mrb[43].mxu1 }
 0x16a   : > { %v6188_v18 = vadd.f32 %v4308_v57, %v2780_v14  ;;  %v4311_v22 = vadd.f32 %v4310_v47, %v4309_v20 }
 0x16b   : > { %v4248_v40 = vpop.f32.mrb[44].mxu0 }
 0x16c   : > { %v4249_v17 = vpop.f32.mrb[45].mxu0  ;;  %v6191_v48 = vadd.f32 %v4311_v22, %v2783_v42 }
 0x16d   : > { %v4250_v36 = vadd.f32 %v4249_v17, %v4248_v40  ;;  %v4251_v30 = vpop.f32.mrb[46].mxu0 }
 0x16e   : > { %v4252_v15 = vpop.f32.mrb[47].mxu0 }
 0x16f   : > { %v2788_v25 = vadd.f32 %v4250_v36, %v6149_v6  ;;  %v4253_v7 = vadd.f32 %v4252_v15, %v4251_v30  ;;  %v4312_v56 = vpop.f32.mrb[44].mxu1 }
 0x170   : > { %v4313_v5 = vpop.f32.mrb[45].mxu1 }
 0x171   : > { %v2791_v39 = vadd.f32 %v4253_v7, %v6154_v54  ;;  %v4314_v3 = vadd.f32 %v4313_v5, %v4312_v56  ;;  %v4315_v13 = vpop.f32.mrb[46].mxu1 }
 0x172   : > { %v4316_v12 = vpop.f32.mrb[47].mxu1 }
 0x173   : > { %v4254_v33 = vpop.f32.mrb[48].mxu0  ;;  %v6194_v45 = vadd.f32 %v4314_v3, %v2788_v25  ;;  %v4317_v21 = vadd.f32 %v4316_v12, %v4315_v13 }
 0x174   : > { %v4255_v32 = vpop.f32.mrb[49].mxu0 }
 0x175   : > { %v4256_v31 = vadd.f32 %v4255_v32, %v4254_v33  ;;  %v4257_v24 = vpop.f32.mrb[50].mxu0  ;;  %v6197_v16 = vadd.f32 %v4317_v21, %v2791_v39 }
 0x176   : > { %v4258_v53 = vpop.f32.mrb[51].mxu0 }
 0x177   : > { %v2796_v6 = vadd.f32 %v4256_v31, %v6157_v35  ;;  %v4259_v0 = vadd.f32 %v4258_v53, %v4257_v24  ;;  %v4318_v11 = vpop.f32.mrb[48].mxu1 }
 0x178   : > { %v4319_v58 = vpop.f32.mrb[49].mxu1 }
 0x179   : > { %v2799_v54 = vadd.f32 %v4259_v0, %v6159_v44  ;;  %v4320_v50 = vadd.f32 %v4319_v58, %v4318_v11  ;;  %v4321_v27 = vpop.f32.mrb[50].mxu1 }
 0x17a   : > { %v4322_v60 = vpop.f32.mrb[51].mxu1 }
 0x17b   : > { %v4260_v49 = vpop.f32.mrb[52].mxu0  ;;  %v6200_v37 = vadd.f32 %v4320_v50, %v2796_v6  ;;  %v4323_v29 = vadd.f32 %v4322_v60, %v4321_v27 }
 0x17c   : > { %v4261_v61 = vpop.f32.mrb[53].mxu0 }
 0x17d   : > { %v4262_v46 = vadd.f32 %v4261_v61, %v4260_v49  ;;  %v4263_v34 = vpop.f32.mrb[54].mxu0  ;;  %v6203_v63 = vadd.f32 %v4323_v29, %v2799_v54 }
 0x17e   : > { %v4264_v26 = vpop.f32.mrb[55].mxu0 }
 0x17f   : > { %v2804_v35 = vadd.f32 %v4262_v46, %v6161_v4  ;;  %v4265_v2 = vadd.f32 %v4264_v26, %v4263_v34  ;;  %v4324_v23 = vpop.f32.mrb[52].mxu1 }
 0x180   : > { %v4325_v38 = vpop.f32.mrb[53].mxu1 }
 0x181   : > { %v2807_v44 = vadd.f32 %v4265_v2, %v6163_v1  ;;  %v4326_v40 = vadd.f32 %v4325_v38, %v4324_v23  ;;  %v4327_v8 = vpop.f32.mrb[54].mxu1 }
 0x182   : > { %v4328_v43 = vpop.f32.mrb[55].mxu1 }
 0x183   : > { %v4266_v55 = vpop.f32.mrb[56].mxu0  ;;  %v6206_v30 = vadd.f32 %v4326_v40, %v2804_v35  ;;  %v4329_v57 = vadd.f32 %v4328_v43, %v4327_v8 }
 0x184   : > { %v4267_v14 = vpop.f32.mrb[57].mxu0 }
 0x185   : > { %v4268_v28 = vadd.f32 %v4267_v14, %v4266_v55  ;;  %v4269_v42 = vpop.f32.mrb[58].mxu0  ;;  %v6209_v20 = vadd.f32 %v4329_v57, %v2807_v44 }
 0x186   : > { %v4270_v17 = vpop.f32.mrb[59].mxu0 }
 0x187   : > { %v2812_v4 = vadd.f32 %v4268_v28, %v6165_v52  ;;  %v4271_v36 = vadd.f32 %v4270_v17, %v4269_v42  ;;  %v4330_v47 = vpop.f32.mrb[56].mxu1 }
 0x188   : > { %v4331_v7 = vpop.f32.mrb[57].mxu1 }
 0x189   : > { %v2815_v1 = vadd.f32 %v4271_v36, %v6167_v19  ;;  %v4332_v33 = vadd.f32 %v4331_v7, %v4330_v47  ;;  %v4333_v56 = vpop.f32.mrb[58].mxu1 }
 0x18a   : > { %v4334_v5 = vpop.f32.mrb[59].mxu1 }
 0x18b   : > { %v4272_v15 = vpop.f32.mrb[60].mxu0  ;;  %v6212_v24 = vadd.f32 %v4332_v33, %v2812_v4  ;;  %v4335_v3 = vadd.f32 %v4334_v5, %v4333_v56 }
 0x18c   : > { %v4273_v25 = vpop.f32.mrb[61].mxu0 }
 0x18d   : > { %v4274_v22 = vadd.f32 %v4273_v25, %v4272_v15  ;;  %v4275_v39 = vpop.f32.mrb[62].mxu0  ;;  %v6215_v13 = vadd.f32 %v4335_v3, %v2815_v1 }
 0x18e   : > { %v4276_v32 = vpop.f32.mrb[63].mxu0 }
 0x18f   : > { %v2820_v52 = vadd.f32 %v4274_v22, %v6170_v9  ;;  %v4277_v31 = vadd.f32 %v4276_v32, %v4275_v39  ;;  %v4336_v12 = vpop.f32.mrb[60].mxu1 }
 0x190   : > { %v4337_v0 = vpop.f32.mrb[61].mxu1 }
 0x191   : > { %v2823_v19 = vadd.f32 %v4277_v31, %v6173_v41  ;;  %v4338_v49 = vadd.f32 %v4337_v0, %v4336_v12  ;;  %v4339_v11 = vpop.f32.mrb[62].mxu1 }
 0x192   : > { %v4340_v58 = vpop.f32.mrb[63].mxu1 }
 0x193   : > { %v4358_v53 = vpop.f32.mrb[64].mxu0  ;;  %v6218_v34 = vadd.f32 %v4338_v49, %v2820_v52  ;;  %v4341_v50 = vadd.f32 %v4340_v58, %v4339_v11 }
 0x194   : > { %v4359_v6 = vpop.f32.mrb[65].mxu0 }
 0x195   : > { %v4360_v21 = vadd.f32 %v4359_v6, %v4358_v53  ;;  %v4361_v54 = vpop.f32.mrb[66].mxu0  ;;  %v6221_v27 = vadd.f32 %v4341_v50, %v2823_v19 }
 0x196   : > { %v4362_v61 = vpop.f32.mrb[67].mxu0 }
 0x197   : > { %v2958_v9 = vadd.f32 %v4360_v21, %v6176_v10  ;;  %v4363_v46 = vadd.f32 %v4362_v61, %v4361_v54 }
 0x198   : > { %v4422_v60 = vpop.f32.mrb[64].mxu1 }
 0x199   : > { %v2961_v41 = vadd.f32 %v4363_v46, %v6179_v51  ;;  %v4423_v2 = vpop.f32.mrb[65].mxu1 }
 0x19a   : > { %v4424_v55 = vadd.f32 %v4423_v2, %v4422_v60  ;;  %v4425_v23 = vpop.f32.mrb[66].mxu1 }
 0x19b   : > { %v4364_v26 = vpop.f32.mrb[68].mxu0  ;;  %v4426_v38 = vpop.f32.mrb[67].mxu1 }
 0x19c   : > { %v4365_v35 = vpop.f32.mrb[69].mxu0  ;;  %v6224_v42 = vadd.f32 %v4424_v55, %v2958_v9  ;;  %v4427_v40 = vadd.f32 %v4426_v38, %v4425_v23 }
 0x19d   : > { %v4366_v29 = vadd.f32 %v4365_v35, %v4364_v26  ;;  %v4367_v44 = vpop.f32.mrb[70].mxu0 }
 0x19e   : > { %v4368_v14 = vpop.f32.mrb[71].mxu0  ;;  %v6227_v8 = vadd.f32 %v4427_v40, %v2961_v41 }
 0x19f   : > { %v2966_v10 = vadd.f32 %v4366_v29, %v6182_v59  ;;  %v4369_v28 = vadd.f32 %v4368_v14, %v4367_v44 }
 0x1a1   : > { %v2969_v51 = vadd.f32 %v4369_v28, %v6185_v62 }
 0x1a2   : > { %v4428_v43 = vpop.f32.mrb[68].mxu1 }
 0x1a3   : > { %v4370_v17 = vpop.f32.mrb[72].mxu0  ;;  %v4429_v36 = vpop.f32.mrb[69].mxu1 }
 0x1a4   : > { %v4371_v4 = vpop.f32.mrb[73].mxu0  ;;  %v4430_v15 = vadd.f32 %v4429_v36, %v4428_v43  ;;  %v4431_v47 = vpop.f32.mrb[70].mxu1 }
 0x1a5   : > { %v4372_v57 = vadd.f32 %v4371_v4, %v4370_v17  ;;  %v4373_v1 = vpop.f32.mrb[74].mxu0  ;;  %v4432_v7 = vpop.f32.mrb[71].mxu1 }
 0x1a6   : > { %v4374_v25 = vpop.f32.mrb[75].mxu0  ;;  %v6230_v39 = vadd.f32 %v4430_v15, %v2966_v10  ;;  %v4433_v33 = vadd.f32 %v4432_v7, %v4431_v47 }
 0x1a7   : > { %v2974_v59 = vadd.f32 %v4372_v57, %v6188_v18  ;;  %v4375_v22 = vadd.f32 %v4374_v25, %v4373_v1 }
 0x1a8   : > { %v6233_v56 = vadd.f32 %v4433_v33, %v2969_v51 }
 0x1a9   : > { %v2977_v62 = vadd.f32 %v4375_v22, %v6191_v48 }
 0x1aa   : > { %v4434_v5 = vpop.f32.mrb[72].mxu1 }
 0x1ab   : > { %v4376_v32 = vpop.f32.mrb[76].mxu0  ;;  %v4435_v31 = vpop.f32.mrb[73].mxu1 }
 0x1ac   : > { %v4377_v52 = vpop.f32.mrb[77].mxu0  ;;  %v4436_v53 = vadd.f32 %v4435_v31, %v4434_v5  ;;  %v4437_v12 = vpop.f32.mrb[74].mxu1 }
 0x1ad   : > { %v4378_v3 = vadd.f32 %v4377_v52, %v4376_v32  ;;  %v4379_v19 = vpop.f32.mrb[78].mxu0  ;;  %v4438_v0 = vpop.f32.mrb[75].mxu1 }
 0x1ae   : > { %v4380_v6 = vpop.f32.mrb[79].mxu0  ;;  %v6236_v54 = vadd.f32 %v4436_v53, %v2974_v59  ;;  %v4439_v49 = vadd.f32 %v4438_v0, %v4437_v12 }
 0x1af   : > { %v2982_v18 = vadd.f32 %v4378_v3, %v6194_v45  ;;  %v4381_v21 = vadd.f32 %v4380_v6, %v4379_v19 }
 0x1b0   : > { %v6239_v11 = vadd.f32 %v4439_v49, %v2977_v62 }
 0x1b1   : > { %v2985_v48 = vadd.f32 %v4381_v21, %v6197_v16 }
 0x1b2   : > { %v4440_v58 = vpop.f32.mrb[76].mxu1 }
 0x1b3   : > { %v4382_v61 = vpop.f32.mrb[80].mxu0  ;;  %v4441_v46 = vpop.f32.mrb[77].mxu1 }
 0x1b4   : > { %v4383_v9 = vpop.f32.mrb[81].mxu0  ;;  %v4442_v26 = vadd.f32 %v4441_v46, %v4440_v58  ;;  %v4443_v60 = vpop.f32.mrb[78].mxu1 }
 0x1b5   : > { %v4384_v50 = vadd.f32 %v4383_v9, %v4382_v61  ;;  %v4385_v41 = vpop.f32.mrb[82].mxu0  ;;  %v4444_v2 = vpop.f32.mrb[79].mxu1 }
 0x1b6   : > { %v4386_v35 = vpop.f32.mrb[83].mxu0  ;;  %v6242_v44 = vadd.f32 %v4442_v26, %v2982_v18  ;;  %v4445_v55 = vadd.f32 %v4444_v2, %v4443_v60 }
 0x1b7   : > { %v2990_v45 = vadd.f32 %v4384_v50, %v6200_v37  ;;  %v4387_v29 = vadd.f32 %v4386_v35, %v4385_v41 }
 0x1b8   : > { %v6245_v23 = vadd.f32 %v4445_v55, %v2985_v48 }
 0x1b9   : > { %v2993_v16 = vadd.f32 %v4387_v29, %v6203_v63 }
 0x1ba   : > { %v4446_v38 = vpop.f32.mrb[80].mxu1 }
 0x1bb   : > { %v4388_v14 = vpop.f32.mrb[84].mxu0  ;;  %v4447_v28 = vpop.f32.mrb[81].mxu1 }
 0x1bc   : > { %v4389_v10 = vpop.f32.mrb[85].mxu0  ;;  %v4448_v17 = vadd.f32 %v4447_v28, %v4446_v38  ;;  %v4449_v43 = vpop.f32.mrb[82].mxu1 }
 0x1bd   : > { %v4390_v40 = vadd.f32 %v4389_v10, %v4388_v14  ;;  %v4391_v51 = vpop.f32.mrb[86].mxu0  ;;  %v4450_v36 = vpop.f32.mrb[83].mxu1 }
 0x1be   : > { %v4392_v4 = vpop.f32.mrb[87].mxu0  ;;  %v6248_v1 = vadd.f32 %v4448_v17, %v2990_v45  ;;  %v4451_v15 = vadd.f32 %v4450_v36, %v4449_v43 }
 0x1bf   : > { %v2998_v37 = vadd.f32 %v4390_v40, %v6206_v30  ;;  %v4393_v57 = vadd.f32 %v4392_v4, %v4391_v51 }
 0x1c0   : > { %v6251_v47 = vadd.f32 %v4451_v15, %v2993_v16 }
 0x1c1   : > { %v3001_v63 = vadd.f32 %v4393_v57, %v6209_v20 }
 0x1c2   : > { %v4452_v7 = vpop.f32.mrb[84].mxu1 }
 0x1c3   : > { %v4394_v25 = vpop.f32.mrb[88].mxu0  ;;  %v4453_v22 = vpop.f32.mrb[85].mxu1 }
 0x1c4   : > { %v4395_v59 = vpop.f32.mrb[89].mxu0  ;;  %v4454_v32 = vadd.f32 %v4453_v22, %v4452_v7  ;;  %v4455_v5 = vpop.f32.mrb[86].mxu1 }
 0x1c5   : > { %v4396_v33 = vadd.f32 %v4395_v59, %v4394_v25  ;;  %v4397_v62 = vpop.f32.mrb[90].mxu0  ;;  %v4456_v31 = vpop.f32.mrb[87].mxu1 }
 0x1c6   : > { %v4398_v52 = vpop.f32.mrb[91].mxu0  ;;  %v6254_v19 = vadd.f32 %v4454_v32, %v2998_v37  ;;  %v4457_v53 = vadd.f32 %v4456_v31, %v4455_v5 }
 0x1c7   : > { %v3006_v30 = vadd.f32 %v4396_v33, %v6212_v24  ;;  %v4399_v3 = vadd.f32 %v4398_v52, %v4397_v62 }
 0x1c8   : > { %v6257_v12 = vadd.f32 %v4457_v53, %v3001_v63 }
 0x1c9   : > { %v3009_v20 = vadd.f32 %v4399_v3, %v6215_v13 }
 0x1ca   : > { %v4458_v0 = vpop.f32.mrb[88].mxu1 }
 0x1cb   : > { %v4400_v6 = vpop.f32.mrb[92].mxu0  ;;  %v4459_v21 = vpop.f32.mrb[89].mxu1 }
 0x1cc   : > { %v4401_v18 = vpop.f32.mrb[93].mxu0  ;;  %v4460_v61 = vadd.f32 %v4459_v21, %v4458_v0  ;;  %v4461_v58 = vpop.f32.mrb[90].mxu1 }
 0x1cd   : > { %v4402_v49 = vadd.f32 %v4401_v18, %v4400_v6  ;;  %v4403_v48 = vpop.f32.mrb[94].mxu0  ;;  %v4462_v46 = vpop.f32.mrb[91].mxu1 }
 0x1ce   : > { %v4404_v9 = vpop.f32.mrb[95].mxu0  ;;  %v6260_v41 = vadd.f32 %v4460_v61, %v3006_v30  ;;  %v4463_v26 = vadd.f32 %v4462_v46, %v4461_v58 }
 0x1cf   : > { %v3014_v24 = vadd.f32 %v4402_v49, %v6218_v34  ;;  %v4405_v50 = vadd.f32 %v4404_v9, %v4403_v48 }
 0x1d0   : > { %v6263_v60 = vadd.f32 %v4463_v26, %v3009_v20 }
 0x1d1   : > { %v3017_v13 = vadd.f32 %v4405_v50, %v6221_v27 }
 0x1d2   : > { %v4464_v2 = vpop.f32.mrb[92].mxu1 }
 0x1d3   : > { %v4486_v35 = vpop.f32.mrb[96].mxu0  ;;  %v4465_v29 = vpop.f32.mrb[93].mxu1 }
 0x1d4   : > { %v4487_v45 = vpop.f32.mrb[97].mxu0  ;;  %v4466_v14 = vadd.f32 %v4465_v29, %v4464_v2  ;;  %v4467_v38 = vpop.f32.mrb[94].mxu1 }
 0x1d5   : > { %v4488_v55 = vadd.f32 %v4487_v45, %v4486_v35  ;;  %v4489_v16 = vpop.f32.mrb[98].mxu0  ;;  %v4468_v28 = vpop.f32.mrb[95].mxu1 }
 0x1d6   : > { %v4490_v10 = vpop.f32.mrb[99].mxu0  ;;  %v6266_v51 = vadd.f32 %v4466_v14, %v3014_v24  ;;  %v4469_v17 = vadd.f32 %v4468_v28, %v4467_v38 }
 0x1d7   : > { %v3152_v34 = vadd.f32 %v4488_v55, %v6224_v42  ;;  %v4491_v40 = vadd.f32 %v4490_v10, %v4489_v16 }
 0x1d8   : > { %v6269_v43 = vadd.f32 %v4469_v17, %v3017_v13 }
 0x1d9   : > { %v3155_v27 = vadd.f32 %v4491_v40, %v6227_v8 }
 0x1da   : > { %v4550_v36 = vpop.f32.mrb[96].mxu1 }
 0x1db   : > { %v4492_v4 = vpop.f32.mrb[100].mxu0  ;;  %v4551_v57 = vpop.f32.mrb[97].mxu1 }
 0x1dc   : > { %v4493_v37 = vpop.f32.mrb[101].mxu0  ;;  %v4552_v25 = vadd.f32 %v4551_v57, %v4550_v36  ;;  %v4553_v7 = vpop.f32.mrb[98].mxu1 }
 0x1dd   : > { %v4494_v15 = vadd.f32 %v4493_v37, %v4492_v4  ;;  %v4495_v63 = vpop.f32.mrb[102].mxu0  ;;  %v4554_v22 = vpop.f32.mrb[99].mxu1 }
 0x1de   : > { %v4496_v59 = vpop.f32.mrb[103].mxu0  ;;  %v3249_v62 = vadd.f32 %v4552_v25, %v3152_v34  ;;  %v4555_v32 = vadd.f32 %v4554_v22, %v4553_v7 }
 0x1df   : > { %v3160_v42 = vadd.f32 %v4494_v15, %v6230_v39  ;;  %v4497_v33 = vadd.f32 %v4496_v59, %v4495_v63 }
 0x1e0   : > { %3311 = vst [vmem:[#allocation2] sm:$0xff] %v3249_v62  ;;  %v3252_v8 = vadd.f32 %v4555_v32, %v3155_v27  ;;  %v3346_v31 = vmul.f32 %v3249_v62, %v3249_v62 }
 0x1e1   : > { %v3163_v5 = vadd.f32 %v4497_v33, %v6233_v56 }
 0x1e2   : > { %3312 = vst [vmem:[#allocation2 + $0x8] sm:$0xff] %v3252_v8  ;;  %v3328_v30 = vadd.f32 %v3252_v8, %v3249_v62  ;;  %v3347_v3 = vmul.f32 %v3252_v8, %v3252_v8  ;;  %v4556_v53 = vpop.f32.mrb[100].mxu1 }
 0x1e3   : > { %v4498_v52 = vpop.f32.mrb[104].mxu0  ;;  %v4557_v6 = vpop.f32.mrb[101].mxu1 }
 0x1e4   : > { %v4499_v20 = vpop.f32.mrb[105].mxu0  ;;  %v3362_v21 = vadd.f32 %v3347_v3, %v3346_v31  ;;  %v4558_v49 = vadd.f32 %v4557_v6, %v4556_v53  ;;  %v4559_v39 = vpop.f32.mrb[102].mxu1 }
 0x1e5   : > { %v4500_v0 = vadd.f32 %v4499_v20, %v4498_v52  ;;  %v4501_v18 = vpop.f32.mrb[106].mxu0  ;;  %v4560_v61 = vpop.f32.mrb[103].mxu1 }
 0x1e6   : > { %v4502_v48 = vpop.f32.mrb[107].mxu0  ;;  %v3257_v9 = vadd.f32 %v4558_v49, %v3160_v42  ;;  %v4561_v46 = vadd.f32 %v4560_v61, %v4559_v39 }
 0x1e7   : > { %v3168_v58 = vadd.f32 %v4500_v0, %v6236_v54  ;;  %v4503_v56 = vadd.f32 %v4502_v48, %v4501_v18 }
 0x1e8   : > { %3313 = vst [vmem:[#allocation2 + $0x10] sm:$0xff] %v3257_v9  ;;  %v3329_v50 = vadd.f32 %v3328_v30, %v3257_v9  ;;  %v3348_v26 = vmul.f32 %v3257_v9, %v3257_v9  ;;  %v3260_v13 = vadd.f32 %v4561_v46, %v3163_v5 }
 0x1e9   : > { %v3171_v24 = vadd.f32 %v4503_v56, %v6239_v11 }
 0x1ea   : > { %v3363_v2 = vadd.f32 %v3362_v21, %v3348_v26  ;;  %3314 = vst [vmem:[#allocation2 + $0x18] sm:$0xff] %v3260_v13  ;;  %v3330_v45 = vadd.f32 %v3329_v50, %v3260_v13  ;;  %v3349_v29 = vmul.f32 %v3260_v13, %v3260_v13  ;;  %v4562_v55 = vpop.f32.mrb[104].mxu1 }
 0x1eb   : > { %v4504_v35 = vpop.f32.mrb[108].mxu0  ;;  %v4563_v14 = vpop.f32.mrb[105].mxu1 }
 0x1ec   : > { %v4505_v16 = vpop.f32.mrb[109].mxu0  ;;  %v3364_v54 = vadd.f32 %v3363_v2, %v3349_v29  ;;  %v4564_v28 = vadd.f32 %v4563_v14, %v4562_v55  ;;  %v4565_v34 = vpop.f32.mrb[106].mxu1 }
 0x1ed   : > { %v4506_v38 = vadd.f32 %v4505_v16, %v4504_v35  ;;  %v4507_v10 = vpop.f32.mrb[110].mxu0  ;;  %v4566_v17 = vpop.f32.mrb[107].mxu1 }
 0x1ee   : > { %v4508_v40 = vpop.f32.mrb[111].mxu0  ;;  %v3265_v4 = vadd.f32 %v4564_v28, %v3168_v58  ;;  %v4567_v36 = vadd.f32 %v4566_v17, %v4565_v34 }
 0x1ef   : > { %v3176_v11 = vadd.f32 %v4506_v38, %v6242_v44  ;;  %v4509_v27 = vadd.f32 %v4508_v40, %v4507_v10 }
 0x1f0   : > { %3315 = vst [vmem:[#allocation2 + $0x20] sm:$0xff] %v3265_v4  ;;  %v3331_v57 = vadd.f32 %v3330_v45, %v3265_v4  ;;  %v3350_v15 = vmul.f32 %v3265_v4, %v3265_v4  ;;  %v3268_v63 = vadd.f32 %v4567_v36, %v3171_v24 }
 0x1f1   : > { %v3179_v37 = vadd.f32 %v4509_v27, %v6245_v23 }
 0x1f2   : > { %v3365_v7 = vadd.f32 %v3364_v54, %v3350_v15  ;;  %3316 = vst [vmem:[#allocation2 + $0x28] sm:$0xff] %v3268_v63  ;;  %v3332_v59 = vadd.f32 %v3331_v57, %v3268_v63  ;;  %v3351_v22 = vmul.f32 %v3268_v63, %v3268_v63  ;;  %v4568_v42 = vpop.f32.mrb[108].mxu1 }
 0x1f3   : > { %v4510_v25 = vpop.f32.mrb[112].mxu0  ;;  %v4569_v62 = vpop.f32.mrb[109].mxu1 }
 0x1f4   : > { %v4511_v33 = vpop.f32.mrb[113].mxu0  ;;  %v3366_v44 = vadd.f32 %v3365_v7, %v3351_v22  ;;  %v4570_v8 = vadd.f32 %v4569_v62, %v4568_v42  ;;  %v4571_v52 = vpop.f32.mrb[110].mxu1 }
 0x1f5   : > { %v4512_v32 = vadd.f32 %v4511_v33, %v4510_v25  ;;  %v4513_v5 = vpop.f32.mrb[114].mxu0  ;;  %v4572_v30 = vpop.f32.mrb[111].mxu1 }
 0x1f6   : > { %v4514_v31 = vpop.f32.mrb[115].mxu0  ;;  %v3273_v53 = vadd.f32 %v4570_v8, %v3176_v11  ;;  %v4573_v20 = vadd.f32 %v4572_v30, %v4571_v52 }
 0x1f7   : > { %v3184_v23 = vadd.f32 %v4512_v32, %v6248_v1  ;;  %v4515_v3 = vadd.f32 %v4514_v31, %v4513_v5 }
 0x1f8   : > { %3317 = vst [vmem:[#allocation2 + $0x30] sm:$0xff] %v3273_v53  ;;  %v3333_v0 = vadd.f32 %v3332_v59, %v3273_v53  ;;  %v3352_v18 = vmul.f32 %v3273_v53, %v3273_v53  ;;  %v3276_v21 = vadd.f32 %v4573_v20, %v3179_v37 }
 0x1f9   : > { %v3187_v6 = vadd.f32 %v4515_v3, %v6251_v47 }
 0x1fa   : > { %v3367_v39 = vadd.f32 %v3366_v44, %v3352_v18  ;;  %3318 = vst [vmem:[#allocation2 + $0x38] sm:$0xff] %v3276_v21  ;;  %v3334_v48 = vadd.f32 %v3333_v0, %v3276_v21  ;;  %v3353_v61 = vmul.f32 %v3276_v21, %v3276_v21  ;;  %v4574_v58 = vpop.f32.mrb[112].mxu1 }
 0x1fb   : > { %v4516_v49 = vpop.f32.mrb[116].mxu0  ;;  %v4575_v9 = vpop.f32.mrb[113].mxu1 }
 0x1fc   : > { %v4517_v56 = vpop.f32.mrb[117].mxu0  ;;  %v3368_v1 = vadd.f32 %v3367_v39, %v3353_v61  ;;  %v4576_v50 = vadd.f32 %v4575_v9, %v4574_v58  ;;  %v4577_v26 = vpop.f32.mrb[114].mxu1 }
 0x1fd   : > { %v4518_v46 = vadd.f32 %v4517_v56, %v4516_v49  ;;  %v4519_v24 = vpop.f32.mrb[118].mxu0  ;;  %v4578_v35 = vpop.f32.mrb[115].mxu1 }
 0x1fe   : > { %v4520_v13 = vpop.f32.mrb[119].mxu0  ;;  %v3281_v45 = vadd.f32 %v4576_v50, %v3184_v23  ;;  %v4579_v29 = vadd.f32 %v4578_v35, %v4577_v26 }
 0x1ff   : > { %v3192_v47 = vadd.f32 %v4518_v46, %v6254_v19  ;;  %v4521_v2 = vadd.f32 %v4520_v13, %v4519_v24 }
 0x200   : > { %3319 = vst [vmem:[#allocation2 + $0x40] sm:$0xff] %v3281_v45  ;;  %v3335_v16 = vadd.f32 %v3334_v48, %v3281_v45  ;;  %v3354_v14 = vmul.f32 %v3281_v45, %v3281_v45  ;;  %v3284_v38 = vadd.f32 %v4579_v29, %v3187_v6  ;;  %v3327_v45 = vld [vmem:[#allocation3] sm:$0xff] }
 0x201   : > { %v3195_v55 = vadd.f32 %v4521_v2, %v6257_v12 }
 0x202   : > { %v3369_v54 = vadd.f32 %v3368_v1, %v3354_v14  ;;  %3320 = vst [vmem:[#allocation2 + $0x48] sm:$0xff] %v3284_v38  ;;  %v3336_v28 = vadd.f32 %v3335_v16, %v3284_v38  ;;  %v3355_v34 = vmul.f32 %v3284_v38, %v3284_v38  ;;  %v4580_v40 = vpop.f32.mrb[116].mxu1  ;;  %v3345_v14 = vld [vmem:[#allocation4] sm:$0xff] }
 0x203   : > { %v4522_v10 = vpop.f32.mrb[120].mxu0  ;;  %v4581_v11 = vpop.f32.mrb[117].mxu1 }
 0x204   : > { %v4523_v17 = vpop.f32.mrb[121].mxu0  ;;  %v3370_v19 = vadd.f32 %v3369_v54, %v3355_v34  ;;  %v4582_v36 = vadd.f32 %v4581_v11, %v4580_v40  ;;  %v4583_v37 = vpop.f32.mrb[118].mxu1 }
 0x205   : > { %v4524_v27 = vadd.f32 %v4523_v17, %v4522_v10  ;;  %v4525_v4 = vpop.f32.mrb[122].mxu0  ;;  %v4584_v15 = vpop.f32.mrb[119].mxu1 }
 0x206   : > { %v4526_v57 = vpop.f32.mrb[123].mxu0  ;;  %v3289_v25 = vadd.f32 %v4582_v36, %v3192_v47  ;;  %v4585_v7 = vadd.f32 %v4584_v15, %v4583_v37 }
 0x207   : > { %v3200_v12 = vadd.f32 %v4524_v27, %v6260_v41  ;;  %v4527_v63 = vadd.f32 %v4526_v57, %v4525_v4 }
 0x208   : > { %3321 = vst [vmem:[#allocation2 + $0x50] sm:$0xff] %v3289_v25  ;;  %v3337_v22 = vadd.f32 %v3336_v28, %v3289_v25  ;;  %v3356_v42 = vmul.f32 %v3289_v25, %v3289_v25  ;;  %v3292_v33 = vadd.f32 %v4585_v7, %v3195_v55 }
 0x209   : > { %v3203_v59 = vadd.f32 %v4527_v63, %v6263_v60 }
 0x20a   : > { %v3371_v32 = vadd.f32 %v3370_v19, %v3356_v42  ;;  %3322 = vst [vmem:[#allocation2 + $0x58] sm:$0xff] %v3292_v33  ;;  %v3338_v5 = vadd.f32 %v3337_v22, %v3292_v33  ;;  %v3357_v44 = vmul.f32 %v3292_v33, %v3292_v33  ;;  %v4586_v8 = vpop.f32.mrb[120].mxu1 }
 0x20b   : > { %v4528_v62 = vpop.f32.mrb[124].mxu0  ;;  %v4587_v31 = vpop.f32.mrb[121].mxu1 }
 0x20c   : > { %v4529_v52 = vpop.f32.mrb[125].mxu0  ;;  %v3372_v41 = vadd.f32 %v3371_v32, %v3357_v44  ;;  %v4588_v3 = vadd.f32 %v4587_v31, %v4586_v8  ;;  %v4589_v53 = vpop.f32.mrb[122].mxu1 }
 0x20d   : > { %v4530_v30 = vadd.f32 %v4529_v52, %v4528_v62  ;;  %v4531_v23 = vpop.f32.mrb[126].mxu0  ;;  %v4590_v6 = vpop.f32.mrb[123].mxu1 }
 0x20e   : > { %v4532_v20 = vpop.f32.mrb[127].mxu0  ;;  %v3297_v18 = vadd.f32 %v4588_v3, %v3200_v12  ;;  %v4591_v21 = vadd.f32 %v4590_v6, %v4589_v53 }
 0x20f   : > { %v3208_v60 = vadd.f32 %v4530_v30, %v6266_v51  ;;  %v4533_v0 = vadd.f32 %v4532_v20, %v4531_v23 }
 0x210   : > { %3323 = vst [vmem:[#allocation2 + $0x60] sm:$0xff] %v3297_v18  ;;  %v3339_v39 = vadd.f32 %v3338_v5, %v3297_v18  ;;  %v3358_v48 = vmul.f32 %v3297_v18, %v3297_v18  ;;  %v3300_v61 = vadd.f32 %v4591_v21, %v3203_v59 }
 0x211   : > { %v3211_v49 = vadd.f32 %v4533_v0, %v6269_v43 }
 0x212   : > { %v3373_v58 = vadd.f32 %v3372_v41, %v3358_v48  ;;  %3324 = vst [vmem:[#allocation2 + $0x68] sm:$0xff] %v3300_v61  ;;  %v3340_v56 = vadd.f32 %v3339_v39, %v3300_v61  ;;  %v3359_v9 = vmul.f32 %v3300_v61, %v3300_v61  ;;  %v4592_v46 = vpop.f32.mrb[124].mxu1 }
 0x213   : > { %v4593_v24 = vpop.f32.mrb[125].mxu1 }
 0x214   : > { %v3374_v1 = vadd.f32 %v3373_v58, %v3359_v9  ;;  %v4594_v50 = vadd.f32 %v4593_v24, %v4592_v46  ;;  %v4595_v26 = vpop.f32.mrb[126].mxu1 }
 0x215   : > { %v4596_v13 = vpop.f32.mrb[127].mxu1 }
 0x216   : > { %v3305_v51 = vadd.f32 %v4594_v50, %v3208_v60  ;;  %v4597_v35 = vadd.f32 %v4596_v13, %v4595_v26 }
 0x218   : > { %3325 = vst [vmem:[#allocation2 + $0x70] sm:$0xff] %v3305_v51  ;;  %v3341_v47 = vadd.f32 %v3340_v56, %v3305_v51  ;;  %v3360_v2 = vmul.f32 %v3305_v51, %v3305_v51  ;;  %v3308_v43 = vadd.f32 %v4597_v35, %v3211_v49 }
 0x21a   : > { %v3375_v29 = vadd.f32 %v3374_v1, %v3360_v2  ;;  %3326 = vst [vmem:[#allocation2 + $0x78] sm:$0xff] %v3308_v43  ;;  %v3342_v55 = vadd.f32 %v3341_v47, %v3308_v43  ;;  %v3361_v16 = vmul.f32 %v3308_v43, %v3308_v43 }
 0x21c   : > { %v3343_v38 = vadd.f32 %v3342_v55, %v3327_v45  ;;  %v3376_v10 = vadd.f32 %v3375_v29, %v3361_v16 }
 0x21e   : > { %3344 = vst [vmem:[#allocation3] sm:$0xff] %v3343_v38  ;;  %v3377_v54 = vadd.f32 %v3376_v10, %v3345_v14 }
 0x220   : > { %3378 = vst [vmem:[#allocation4] sm:$0xff] %v3377_v54 }
 0x221 PF: > { %p4001_p6 = scmp.ne.s32.totalorder %s4814_s15, 1 }
 0x222   : > { %v3426_v62 = vlaneseq (!%p4001_p6)  ;;  %v3402_v5 = vld [vmem:[%s6363_s2] sm:$0x1] (!%p4001_p6)  ;;  %v3410_v23 = vld [vmem:[#allocation2 + $0x8] sm:$0xff] (!%p4001_p6)  ;;  %v3411_v41 = vld [vmem:[#allocation2 + $0x10] sm:$0xff] (!%p4001_p6) }
 0x223   : > { %3382 = sbr.rel (%p4001_p6) target bundleno = 616 (0x268), region = 48  ;;  %v3406_v31 = vld [vmem:[%s6364_s3] sm:$0x1] (!%p4001_p6)  ;;  %v3412_v3 = vld [vmem:[#allocation2 + $0x18] sm:$0xff] (!%p4001_p6)  ;;  %v3414_v60 = vld [vmem:[#allocation2 + $0x28] sm:$0xff] (!%p4001_p6) }
 0x224   : > { %v3427_v32 = vshrl.u32 (!%p4001_p6), %v3426_v62, 7  ;;  %v3409_v30 = vld [vmem:[#allocation2] sm:$0xff] (!%p4001_p6)  ;;  %v3415_v0 = vld [vmem:[#allocation2 + $0x30] sm:$0xff] (!%p4001_p6)  ;;  %v3416_v18 = vld [vmem:[#allocation2 + $0x38] sm:$0xff] (!%p4001_p6) }
 0x225   : > { %v3383_v28 = vld [vmem:[#allocation3] sm:$0xff] (!%p4001_p6)  ;;  %v3418_v49 = vld [vmem:[#allocation2 + $0x48] sm:$0xff] (!%p4001_p6)  ;;  %v3419_v39 = vld [vmem:[#allocation2 + $0x50] sm:$0xff] (!%p4001_p6) }
 0x226   : > { %v3384_v40 = vrot.slane (!%p4001_p6), %v3383_v28, 4  ;;  %v3428_v44 = vsub.s32 (!%p4001_p6), 0, %v3427_v32  ;;  %v3413_v53 = vld [vmem:[#allocation2 + $0x20] sm:$0xff] (!%p4001_p6)  ;;  %v3420_v9 = vld [vmem:[#allocation2 + $0x58] sm:$0xff] (!%p4001_p6)  ;;  %v3422_v24 = vld [vmem:[#allocation2 + $0x68] sm:$0xff] (!%p4001_p6) }
 0x227   : > { %v3390_v34 = vld [vmem:[#allocation4] sm:$0xff] (!%p4001_p6)  ;;  %v3417_v21 = vld [vmem:[#allocation2 + $0x40] sm:$0xff] (!%p4001_p6) }
 0x228   : > { %v3391_v17 = vrot.slane (!%p4001_p6), %v3390_v34, 4  ;;  %v3385_v11 = vadd.f32 (!%p4001_p6), %v3384_v40, %v3383_v28  ;;  %v3421_v46 = vld [vmem:[#allocation2 + $0x60] sm:$0xff] (!%p4001_p6) }
 0x22a   : > { %v3392_v27 = vadd.f32 %v3391_v17, %v3390_v34  ;;  %v3386_v4 = vrot.slane %v3385_v11, 2 }
 0x22c   : > { %v3393_v19 = vrot.slane %v3392_v27, 2  ;;  %v3387_v36 = vadd.f32 %v3386_v4, %v3385_v11 }
 0x22e   : > { %v3394_v37 = vadd.f32 %v3393_v19, %v3392_v27  ;;  %v3388_v57 = vrot.slane %v3387_v36, 1 }
 0x230   : > { %v3395_v15 = vrot.slane %v3394_v37, 1  ;;  %v3389_v12 = vadd.f32 %v3388_v57, %v3387_v36 }
 0x232   : > { %v3396_v63 = vadd.f32 %v3395_v15, %v3394_v37  ;;  %v3397_v25 = vmul.f32 0.0078125, %v3389_v12 }
 0x234   : > { %v3398_v7 = vmul.f32 0.0078125, %v3396_v63  ;;  %v3399_v59 = vmul.f32 %v3397_v25, %v3397_v25 }
 0x236   : > { %v3400_v22 = vsub.f32 %v3398_v7, %v3399_v59 }
 0x238   : > { %v3401_v42 = vmax.f32 %v3400_v22, 0.0 }
 0x23a   : > { %v3403_v33 = vadd.f32 1e-05, %v3401_v42 }
 0x23c   : > { %4798 = vrsqrt.f32 %v3403_v33 }
 0x246   : > { %v4799_v8 = vpop.eup %4798 }
 0x247   : > { %v3405_v52 = vmul.f32 %v4799_v8, %v3402_v5 }
 0x249   : > { %v3407_v20 = vmul.f32 %v3405_v52, %v3397_v25  ;;  %v6292_v6 = vrot.slane %v3405_v52, %v3428_v44 }
 0x24b   : > { %v3408_v48 = vsub.f32 %v3406_v31, %v3407_v20  ;;  %v3431_v61 = vmul.f32 %v6292_v6, %v3409_v30  ;;  %v3432_v58 = vmul.f32 %v6292_v6, %v3410_v23  ;;  %v3433_v56 = vmul.f32 %v6292_v6, %v3411_v41  ;;  %v3423_v41 = vld [vmem:[#allocation2 + $0x70] sm:$0xff] }
 0x24c   : > { %v3434_v1 = vmul.f32 %v6292_v6, %v3412_v3  ;;  %v3435_v50 = vmul.f32 %v6292_v6, %v3413_v53  ;;  %v3436_v26 = vmul.f32 %v6292_v6, %v3414_v60  ;;  %v3437_v13 = vmul.f32 %v6292_v6, %v3415_v0 }
 0x24d   : > { %v6301_v51 = vrot.slane %v3408_v48, %v3428_v44  ;;  %v3438_v35 = vmul.f32 %v6292_v6, %v3416_v18  ;;  %v3439_v47 = vmul.f32 %v6292_v6, %v3417_v21  ;;  %v3440_v2 = vmul.f32 %v6292_v6, %v3418_v49  ;;  %v3424_v21 = vld [vmem:[#allocation2 + $0x78] sm:$0xff] }
 0x24e   : > { %v3441_v43 = vmul.f32 %v6292_v6, %v3419_v39  ;;  %v3442_v45 = vmul.f32 %v6292_v6, %v3420_v9  ;;  %v3443_v29 = vmul.f32 %v6292_v6, %v3421_v46  ;;  %v3444_v55 = vmul.f32 %v6292_v6, %v3422_v24 }
 0x24f   : > { %v3453_v16 = vadd.f32 %v6301_v51, %v3431_v61  ;;  %v3454_v14 = vadd.f32 %v6301_v51, %v3432_v58  ;;  %v3455_v38 = vadd.f32 %v6301_v51, %v3433_v56  ;;  %v3456_v10 = vadd.f32 %v6301_v51, %v3434_v1 }
 0x250   : > { %v3457_v54 = vadd.f32 %v6301_v51, %v3435_v50  ;;  %v3458_v28 = vadd.f32 %v6301_v51, %v3436_v26  ;;  %v3459_v34 = vadd.f32 %v6301_v51, %v3437_v13  ;;  %v3460_v40 = vadd.f32 %v6301_v51, %v3438_v35 }
 0x251   : > { %vm3469_vm0 = vcmp.ge.f32.partialorder %v3453_v16, 0.0  ;;  %vm3470_vm1 = vcmp.ge.f32.partialorder %v3454_v14, 0.0  ;;  %v3485_v17 = vmul.f32 0.2, %v3453_v16  ;;  %v3486_v11 = vmul.f32 0.2, %v3454_v14 }
 0x252   : > { %vm3471_vm2 = vcmp.ge.f32.partialorder %v3455_v38, 0.0  ;;  %vm3472_vm3 = vcmp.ge.f32.partialorder %v3456_v10, 0.0  ;;  %v3487_v27 = vmul.f32 0.2, %v3455_v38  ;;  %v3488_v4 = vmul.f32 0.2, %v3456_v10 }
 0x253   : > { %v3501_v19 = vsel %vm3469_vm0, %v3453_v16, %v3485_v17  ;;  %v3502_v36 = vsel %vm3470_vm1, %v3454_v14, %v3486_v11  ;;  %vm3473_vm4 = vcmp.ge.f32.partialorder %v3457_v54, 0.0  ;;  %vm3474_vm5 = vcmp.ge.f32.partialorder %v3458_v28, 0.0 }
 0x254   : > { %v4042_v37 = vpack.c.bf16 %v3502_v36, %v3501_v19  ;;  %v3503_v57 = vsel %vm3471_vm2, %v3455_v38, %v3487_v27  ;;  %v3504_v15 = vsel %vm3472_vm3, %v3456_v10, %v3488_v4  ;;  %v3489_v12 = vmul.f32 0.2, %v3457_v54 }
 0x255   : > { %v4047_v63 = vpack.c.bf16 %v3504_v15, %v3503_v57  ;;  %v3490_v25 = vmul.f32 0.2, %v3458_v28  ;;  %vm3475_vm6 = vcmp.ge.f32.partialorder %v3459_v34, 0.0  ;;  %vm3476_vm7 = vcmp.ge.f32.partialorder %v3460_v40, 0.0 }
 0x256   : > { %4043 = vst [vmem:[%s6365_s4] sm:$0xff] %v4042_v37   ;;  %v3505_v7 = vsel %vm3473_vm4, %v3457_v54, %v3489_v12  ;;  %v3491_v59 = vmul.f32 0.2, %v3459_v34  ;;  %v3492_v22 = vmul.f32 0.2, %v3460_v40  ;;  %v3461_v42 = vadd.f32 %v6301_v51, %v3439_v47 }
 0x257   : > { %4079 = vst [vmem:[%s6365_s4 + $0x8] sm:$0xff] %v4047_v63   ;;  %v3506_v33 = vsel %vm3474_vm5, %v3458_v28, %v3490_v25  ;;  %v3462_v62 = vadd.f32 %v6301_v51, %v3440_v2  ;;  %v3463_v32 = vadd.f32 %v6301_v51, %v3441_v43  ;;  %v3464_v5 = vadd.f32 %v6301_v51, %v3442_v45 }
 0x258   : > { %v4052_v44 = vpack.c.bf16 %v3506_v33, %v3505_v7  ;;  %v3507_v8 = vsel %vm3475_vm6, %v3459_v34, %v3491_v59  ;;  %v3508_v52 = vsel %vm3476_vm7, %v3460_v40, %v3492_v22  ;;  %vm3477_vm8 = vcmp.ge.f32.partialorder %v3461_v42, 0.0 }
 0x259   : > { %v4057_v31 = vpack.c.bf16 %v3508_v52, %v3507_v8  ;;  %vm3478_vm9 = vcmp.ge.f32.partialorder %v3462_v62, 0.0  ;;  %v3493_v30 = vmul.f32 0.2, %v3461_v42  ;;  %v3494_v23 = vmul.f32 0.2, %v3462_v62 }
 0x25a   : > { %4080 = vst [vmem:[%s6365_s4 + $0x10] sm:$0xff] %v4052_v44   ;;  %vm3479_vm10 = vcmp.ge.f32.partialorder %v3463_v32, 0.0  ;;  %vm3480_vm11 = vcmp.ge.f32.partialorder %v3464_v5, 0.0  ;;  %v3495_v3 = vmul.f32 0.2, %v3463_v32  ;;  %v3465_v0 = vadd.f32 %v6301_v51, %v3443_v29 }
 0x25b   : > { %v3496_v53 = vmul.f32 0.2, %v3464_v5  ;;  %4081 = vst [vmem:[%s6365_s4 + $0x18] sm:$0xff] %v4057_v31   ;;  %v3509_v20 = vsel %vm3477_vm8, %v3461_v42, %v3493_v30  ;;  %v3510_v60 = vsel %vm3478_vm9, %v3462_v62, %v3494_v23  ;;  %v3466_v18 = vadd.f32 %v6301_v51, %v3444_v55 }
 0x25c   : > { %v4062_v49 = vpack.c.bf16 %v3510_v60, %v3509_v20  ;;  %v3511_v39 = vsel %vm3479_vm10, %v3463_v32, %v3495_v3  ;;  %v3445_v61 = vmul.f32 %v6292_v6, %v3423_v41  ;;  %vm3481_vm12 = vcmp.ge.f32.partialorder %v3465_v0, 0.0 }
 0x25d   : > { %v3512_v48 = vsel %vm3480_vm11, %v3464_v5, %v3496_v53  ;;  %vm3482_vm13 = vcmp.ge.f32.partialorder %v3466_v18, 0.0  ;;  %v3497_v56 = vmul.f32 0.2, %v3465_v0  ;;  %v3498_v9 = vmul.f32 0.2, %v3466_v18 }
 0x25e   : > { %v4067_v58 = vpack.c.bf16 %v3512_v48, %v3511_v39  ;;  %4082 = vst [vmem:[%s6365_s4 + $0x20] sm:$0xff] %v4062_v49   ;;  %v3446_v46 = vmul.f32 %v6292_v6, %v3424_v21  ;;  %v3467_v24 = vadd.f32 %v6301_v51, %v3445_v61 }
 0x25f   : > { %v3513_v1 = vsel %vm3481_vm12, %v3465_v0, %v3497_v56  ;;  %v3514_v50 = vsel %vm3482_vm13, %v3466_v18, %v3498_v9 }
 0x260   : > { %4083 = vst [vmem:[%s6365_s4 + $0x28] sm:$0xff] %v4067_v58   ;;  %v3468_v26 = vadd.f32 %v6301_v51, %v3446_v46  ;;  %vm3483_vm14 = vcmp.ge.f32.partialorder %v3467_v24, 0.0  ;;  %v3499_v13 = vmul.f32 0.2, %v3467_v24  ;;  %v4072_v35 = vpack.c.bf16 %v3514_v50, %v3513_v1 }
 0x262   : > { %vm3484_vm15 = vcmp.ge.f32.partialorder %v3468_v26, 0.0  ;;  %v3500_v47 = vmul.f32 0.2, %v3468_v26  ;;  %v3515_v2 = vsel %vm3483_vm14, %v3467_v24, %v3499_v13  ;;  %4084 = vst [vmem:[%s6365_s4 + $0x30] sm:$0xff] %v4072_v35  }
 0x264   : > { %v3516_v6 = vsel %vm3484_vm15, %v3468_v26, %v3500_v47 }
 0x265   : > { %v4077_v43 = vpack.c.bf16 %v3516_v6, %v3515_v2 }
 0x267   : > { %4085 = vst [vmem:[%s6365_s4 + $0x38] sm:$0xff] %v4077_v43  }
 0x268 PF: > { %s14_s17 = sadd.s32 1, %s4822_s17   ;;  %s6599_s15 = smov %s4818_s16 }
 0x269   : > { %p11_p7 = scmp.ge.s32.totalorder %s14_s17, 4   ;;  %s6600_s16 = smov %s6602_s18 }
 0x26b   :  { %13 = sbr.rel (!%p11_p7) target bundleno = 2 (0x2), region = 78 }

</bundles_post_ra>
